<compile_context>
chip_gen: v5e
topology: v5e:2x2
jax: 0.10.0
libtpu: 0.0.40
codegen_flags: <defaults>
</compile_context>

<pallas_src>
import jax
import jax.numpy as jnp
import numpy as np
from jax.experimental import pallas as pl
from jax.experimental.pallas import tpu as pltpu

# ---- scaled-down config (analog of the original module sizes) --------------
T = 3            # sequence length   (inputVariable.size(0))
B = 2            # batch             (inputVariable.size(1))
C_IN = 16        # channels fed to the synthetic backbone
NC = 64          # feature_conv channels       (512 in the original)
MEM = 32         # mem_size                    (512 in the original)
C_CAM = 16       # backbone fc / CAM classes   (1000 in the original)
NUM_CLASSES = 8  # classifier classes          (51 in the original)
H = W = 7
S = H * W        # 49

PAD = 8                                                     # max |row offset| of a 3x3 tap
OFFS = [(k // 3 - 1) * 7 + (k % 3 - 1) for k in range(9)]   # dy*7 + dx per tap


# ================= pass 1: non-recurrent backbone + CAM (all T frames) ======

def _backbone_cam_kernel(x_ref, pool_ref, bcast_ref, mask_ref,
                         w_proj_ref, b_proj_ref,
                         w_cam_ref, b_cam_ref, w_cam_t_ref,
                         feat_ref, cam9_ref,
                         cam_ext):
    # TODO(synk): resNetNew.resnet34 source is not provided; a 1x1-conv
    # feature extractor + avgpool/fc stands in for (logit, feature_conv, x).
    f32 = jnp.float32
    rows = feat_ref.shape[0]                                          # T * m_pad

    feature = jnp.dot(x_ref[...].astype(jnp.bfloat16), w_proj_ref[...],
                      preferred_element_type=f32) + b_proj_ref[...]   # (rows, NC)
    feat_ref[...] = feature

    pooled = jnp.dot(pool_ref[...], feature, preferred_element_type=f32)   # (T*B, NC)
    logit = jnp.dot(pooled, w_cam_ref[...],
                    preferred_element_type=f32) + b_cam_ref[...]           # (T*B, C_CAM)

    # top-1 class pick (== logit.sort(1, True) -> idxs[:, 0]) done in-kernel
    ids = jax.lax.broadcasted_iota(jnp.int32, logit.shape, 1).astype(f32)
    mx = jnp.max(logit, axis=1, keepdims=True)
    idx = jnp.min(jnp.where(logit == mx, ids, jnp.float32(logit.shape[1])),
                  axis=1, keepdims=True)
    onehot = (ids == idx).astype(f32)                                       # (T*B, C_CAM)
    w_sel = jnp.dot(onehot, w_cam_t_ref[...], preferred_element_type=f32)   # (T*B, NC)
    w_sel_big = jnp.dot(bcast_ref[...], w_sel, preferred_element_type=f32)  # (rows, NC)
    cam = jnp.sum(feature * w_sel_big, axis=1, keepdims=True)               # (rows, 1)

    # 9 spatially-shifted, boundary-masked CAM copies, hoisted out of the
    # recurrence.  Shift = static sublane-offset slice of a zero-padded
    # scratch; the mask zeros 7x7-border wrap, cross-batch rows and pad rows.
    cam_ext[...] = jnp.zeros_like(cam_ext)
    cam_ext[pl.ds(PAD, rows), :] = cam
    cols = [cam_ext[pl.ds(PAD + off, rows), :] for off in OFFS]
    cam9_ref[...] = jnp.concatenate(cols, axis=1) * mask_ref[...]           # (rows, 9)


# ================= pass 2: serialized Conv-LSTA recurrence over T ===========

def _lsta_recurrent_kernel(feat_ref, cam9_ref, mask_ref, pool_ref,
                           w_att_c_ref, w_att_a_ref, b_att_ref,
                           w_x9_ref, w_h9_ref, b_inp_ref,
                           w_fc_ref, b_fc_ref,
                           logits_ref, feats_ref,
                           a_ext, ca_scr, h_ext, ci_scr, xatt_ext):
    # TODO(synk): MyConvLSTACell source is not provided; a representative
    # Conv-LSTA (attention ConvLSTM on the CAM + gated ConvLSTM on attended
    # features) with matching state shapes is implemented instead.
    f32 = jnp.float32
    bf16 = jnp.bfloat16
    t = pl.program_id(0)
    rows = feat_ref.shape[0]                                # m_pad

    @pl.when(t == 0)
    def _init_state():
        a_ext[...] = jnp.zeros_like(a_ext)
        ca_scr[...] = jnp.zeros_like(ca_scr)
        h_ext[...] = jnp.zeros_like(h_ext)
        ci_scr[...] = jnp.zeros_like(ci_scr)
        xatt_ext[...] = jnp.zeros_like(xatt_ext)

    mask9 = mask_ref[...]                                   # (rows, 9)

    # ---- attention Conv-LSTA cell: 9 taps folded into (rows,9) @ (9,4) -----
    a_cols = [a_ext[pl.ds(PAD + off, rows), :] for off in OFFS]
    a9 = jnp.concatenate(a_cols, axis=1) * mask9            # (rows, 9)
    g_att = (jnp.dot(cam9_ref[...], w_att_c_ref[...], preferred_element_type=f32)
             + jnp.dot(a9, w_att_a_ref[...], preferred_element_type=f32)
             + b_att_ref[...])                              # (rows, 4)
    i_a = jax.nn.sigmoid(g_att[:, 0:1])
    f_a = jax.nn.sigmoid(g_att[:, 1:2])
    o_a = jax.nn.sigmoid(g_att[:, 2:3])
    g_a = jnp.tanh(g_att[:, 3:4])
    ca_new = f_a * ca_scr[...] + i_a * g_a
    a_new = o_a * jnp.tanh(ca_new)
    att = jax.nn.sigmoid(a_new)                             # (rows, 1)
    ca_scr[...] = ca_new
    a_ext[pl.ds(PAD, rows), :] = a_new

    # ---- mem_size-channel Conv-LSTA cell: shift inputs, fold taps into K ---
    x_att = feat_ref[...] * att                             # (rows, NC)  f32
    xatt_ext[pl.ds(PAD, rows), :] = x_att
    x_cols, h_cols = [], []
    for tap, off in enumerate(OFFS):
        m_col = mask9[:, tap:tap + 1]                       # (rows, 1)
        x_cols.append(xatt_ext[pl.ds(PAD + off, rows), :] * m_col)
        h_cols.append(h_ext[pl.ds(PAD + off, rows), :] * m_col)
    x9 = jnp.concatenate(x_cols, axis=1).astype(bf16)       # (rows, 9*NC)
    h9 = jnp.concatenate(h_cols, axis=1).astype(bf16)       # (rows, 9*MEM)
    g_inp = (jnp.dot(x9, w_x9_ref[...], preferred_element_type=f32)
             + jnp.dot(h9, w_h9_ref[...], preferred_element_type=f32)
             + b_inp_ref[...])                              # (rows, 4*MEM)
    m = MEM
    i_i = jax.nn.sigmoid(g_inp[:, 0 * m:1 * m])
    f_i = jax.nn.sigmoid(g_inp[:, 1 * m:2 * m])
    o_i = jax.nn.sigmoid(g_inp[:, 2 * m:3 * m])
    g_i = jnp.tanh(g_inp[:, 3 * m:4 * m])
    ci_new = f_i * ci_scr[...] + i_i * g_i
    h_new = o_i * jnp.tanh(ci_new)
    ci_scr[...] = ci_new
    h_ext[pl.ds(PAD, rows), :] = h_new

    # ---- classifier head after the last frame -------------------------------
    # TODO(synk): nn.Dropout(0.7) is identity at inference time.
    @pl.when(t == pl.num_programs(0) - 1)
    def _head():
        feats = jnp.dot(pool_ref[...], h_new, preferred_element_type=f32)   # (B, MEM)
        feats_ref[...] = feats
        logits_ref[...] = jnp.dot(feats, w_fc_ref[...],
                                  preferred_element_type=f32) + b_fc_ref[...]


# ============================== host-side glue ===============================

def _build_const_mats(bn, tn, m_pad):
    """Per-frame 3x3 tap validity mask + avg-pool / broadcast matrices."""
    mask = np.zeros((m_pad, 9), np.float32)
    for tap in range(9):
        dy, dx = tap // 3 - 1, tap % 3 - 1
        for b in range(bn):
            for y in range(H):
                for x in range(W):
                    if 0 <= y + dy < H and 0 <= x + dx < W:
                        mask[b * S + y * W + x, tap] = 1.0
    pool = np.zeros((bn, m_pad), np.float32)
    for b in range(bn):
        pool[b, b * S:(b + 1) * S] = 1.0 / S
    tm = tn * m_pad
    pool_all = np.zeros((tn * bn, tm), np.float32)
    bcast_all = np.zeros((tm, tn * bn), np.float32)
    for t_ in range(tn):
        for b in range(bn):
            r0 = t_ * m_pad + b * S
            pool_all[t_ * bn + b, r0:r0 + S] = 1.0 / S
            bcast_all[r0:r0 + S, t_ * bn + b] = 1.0
    mask_all = np.tile(mask, (tn, 1))
    return (jnp.asarray(mask), jnp.asarray(mask_all), jnp.asarray(pool),
            jnp.asarray(pool_all), jnp.asarray(bcast_all))


def init_params(key):
    ks = jax.random.split(key, 8)

    def n(k, shape, scale, dtype=jnp.float32):
        return (scale * jax.random.normal(k, shape, dtype=jnp.float32)).astype(dtype)

    return dict(
        # synthetic backbone (stand-in for resnet34): 1x1 conv + fc
        w_proj=n(ks[0], (C_IN, NC), 0.1, jnp.bfloat16),
        b_proj=jnp.zeros((1, NC), jnp.float32),
        w_fc_cam=n(ks[1], (NC, C_CAM), 0.1),
        b_fc_cam=jnp.zeros((1, C_CAM), jnp.float32),
        # attention (1-channel) Conv-LSTA branch: per-tap (cam, a) -> 4 gates
        w_att_cam=n(ks[2], (9, 4), 0.2),
        w_att_a=n(ks[3], (9, 4), 0.2),
        b_att=jnp.zeros((1, 4), jnp.float32),
        # input-memory Conv-LSTA branch: per-tap gate matmuls (bf16 for MXU)
        w_x=n(ks[4], (9, NC, 4 * MEM), 0.05, jnp.bfloat16),
        w_h=n(ks[5], (9, MEM, 4 * MEM), 0.05, jnp.bfloat16),
        b_inp=jnp.zeros((1, 4 * MEM), jnp.float32),
        # classifier head
        w_fc=n(ks[6], (MEM, NUM_CLASSES), 0.1),
        b_fc=jnp.zeros((1, NUM_CLASSES), jnp.float32),
    )


def forward(inputVariable, params):
    # inputVariable: (T, B, C_IN, 7, 7) -- NCHW per frame, like the torch module.
    tn, bn = inputVariable.shape[0], inputVariable.shape[1]
    m = bn * S
    m_pad = ((m + 7) // 8) * 8                     # sublane-aligned rows per frame
    tm = tn * m_pad

    # single NCHW -> channels-last transpose, hoisted out of the time loop
    x_seq = jnp.transpose(inputVariable, (0, 1, 3, 4, 2)).reshape(tn, m, C_IN)
    x_seq = jnp.pad(x_seq, ((0, 0), (0, m_pad - m), (0, 0))).reshape(tm, C_IN)

    mask9, mask_all, pool, pool_all, bcast_all = _build_const_mats(bn, tn, m_pad)
    w_cam_t = params['w_fc_cam'].T                       # (C_CAM, NC) for onehot gather
    w_x9 = params['w_x'].reshape(9 * NC, 4 * MEM)        # taps folded into contraction
    w_h9 = params['w_h'].reshape(9 * MEM, 4 * MEM)

    def full2(arr):
        return pl.BlockSpec(arr.shape, lambda *_: (0, 0))

    # ---- pass 1: backbone + CAM for all T frames in one batched call -------
    feat_all, cam9_all = pl.pallas_call(
        _backbone_cam_kernel,
        out_shape=(jax.ShapeDtypeStruct((tm, NC), jnp.float32),
                   jax.ShapeDtypeStruct((tm, 9), jnp.float32)),
        grid_spec=pltpu.PrefetchScalarGridSpec(
            num_scalar_prefetch=0,
            grid=(1,),
            in_specs=[full2(x_seq), full2(pool_all), full2(bcast_all), full2(mask_all),
                      full2(params['w_proj']), full2(params['b_proj']),
                      full2(params['w_fc_cam']), full2(params['b_fc_cam']),
                      full2(w_cam_t)],
            out_specs=(pl.BlockSpec((tm, NC), lambda i: (0, 0)),
                       pl.BlockSpec((tm, 9), lambda i: (0, 0))),
            scratch_shapes=[pltpu.VMEM((tm + 2 * PAD, 1), jnp.float32)],
        ),
        compiler_params=pltpu.CompilerParams(dimension_semantics=("arbitrary",)),
    )(x_seq, pool_all, bcast_all, mask_all,
      params['w_proj'], params['b_proj'],
      params['w_fc_cam'], params['b_fc_cam'], w_cam_t)

    # ---- pass 2: Conv-LSTA recurrence (state persistent in VMEM scratch) ---
    logits, feats = pl.pallas_call(
        _lsta_recurrent_kernel,
        out_shape=(jax.ShapeDtypeStruct((bn, NUM_CLASSES), jnp.float32),
                   jax.ShapeDtypeStruct((bn, MEM), jnp.float32)),
        grid_spec=pltpu.PrefetchScalarGridSpec(
            num_scalar_prefetch=0,
            grid=(tn,),
            in_specs=[
                pl.BlockSpec((m_pad, NC), lambda t: (t, 0)),   # feature of frame t
                pl.BlockSpec((m_pad, 9), lambda t: (t, 0)),    # shifted CAM of frame t
                full2(mask9), full2(pool),
                full2(params['w_att_cam']), full2(params['w_att_a']), full2(params['b_att']),
                full2(w_x9), full2(w_h9), full2(params['b_inp']),
                full2(params['w_fc']), full2(params['b_fc']),
            ],
            out_specs=(pl.BlockSpec((bn, NUM_CLASSES), lambda t: (0, 0)),
                       pl.BlockSpec((bn, MEM), lambda t: (0, 0))),
            scratch_shapes=[
                pltpu.VMEM((m_pad + 2 * PAD, 1), jnp.float32),    # a   (attention state)
                pltpu.VMEM((m_pad, 1), jnp.float32),              # c_a
                pltpu.VMEM((m_pad + 2 * PAD, MEM), jnp.float32),  # h   (memory state)
                pltpu.VMEM((m_pad, MEM), jnp.float32),            # c_i
                pltpu.VMEM((m_pad + 2 * PAD, NC), jnp.float32),   # x*att shift scratch
            ],
        ),
        compiler_params=pltpu.CompilerParams(
            dimension_semantics=("arbitrary",),          # T is a recurrence
            # explicit VMEM budget; at the real sizes (NC=MEM=512) the ~38 MiB
            # of bf16 gate weights must be streamed / fp8-quantized on v7x.
            vmem_limit_bytes=32 * 1024 * 1024,
        ),
    )(feat_all, cam9_all, mask9, pool,
      params['w_att_cam'], params['w_att_a'], params['b_att'],
      w_x9, w_h9, params['b_inp'],
      params['w_fc'], params['b_fc'])
    return logits, feats


if __name__ == "__main__":
    key = jax.random.PRNGKey(0)
    kp, kx = jax.random.split(key)
    params = init_params(kp)
    inputVariable = jax.random.normal(kx, (T, B, C_IN, H, W), dtype=jnp.float32)

    logits, feats = jax.jit(forward)(inputVariable, params)
    jax.block_until_ready((logits, feats))

    assert logits.shape == (B, NUM_CLASSES)
    assert feats.shape == (B, MEM)
    assert bool(jnp.all(jnp.isfinite(logits))) and bool(jnp.all(jnp.isfinite(feats)))
    print("KERNEL_OK")
</pallas_src>

<mosaic_0001>
module attributes {stable_mosaic.version = 11 : i64} {
  func.func @_backbone_cam_kernel(%arg0: i32, %arg1: memref<312x16xf32, #tpu.memory_space<vmem>>, %arg2: memref<6x312xf32, #tpu.memory_space<vmem>>, %arg3: memref<312x6xf32, #tpu.memory_space<vmem>>, %arg4: memref<312x9xf32, #tpu.memory_space<vmem>>, %arg5: memref<16x64xbf16, #tpu.memory_space<vmem>>, %arg6: memref<1x64xf32, #tpu.memory_space<vmem>>, %arg7: memref<64x16xf32, #tpu.memory_space<vmem>>, %arg8: memref<1x16xf32, #tpu.memory_space<vmem>>, %arg9: memref<16x64xf32, #tpu.memory_space<vmem>>, %arg10: memref<312x64xf32, #tpu.memory_space<vmem>>, %arg11: memref<312x9xf32, #tpu.memory_space<vmem>>, %arg12: memref<328x1xf32, #tpu.memory_space<vmem>>) attributes {dimension_semantics = [#tpu.dimension_semantics<arbitrary>], iteration_bounds = array<i64: 1>, scalar_prefetch = 0 : i64, scratch_operands = 1 : i64, tpu.core_type = #tpu.core_type<tc>, window_params = [{pipeline_mode = #tpu.pipeline_mode<synchronous>, transform_indices = @transform_0, window_bounds = array<i64: 312, 16>}, {pipeline_mode = #tpu.pipeline_mode<synchronous>, transform_indices = @transform_1, window_bounds = array<i64: 6, 312>}, {pipeline_mode = #tpu.pipeline_mode<synchronous>, transform_indices = @transform_2, window_bounds = array<i64: 312, 6>}, {pipeline_mode = #tpu.pipeline_mode<synchronous>, transform_indices = @transform_3, window_bounds = array<i64: 312, 9>}, {pipeline_mode = #tpu.pipeline_mode<synchronous>, transform_indices = @transform_4, window_bounds = array<i64: 16, 64>}, {pipeline_mode = #tpu.pipeline_mode<synchronous>, transform_indices = @transform_5, window_bounds = array<i64: 1, 64>}, {pipeline_mode = #tpu.pipeline_mode<synchronous>, transform_indices = @transform_6, window_bounds = array<i64: 64, 16>}, {pipeline_mode = #tpu.pipeline_mode<synchronous>, transform_indices = @transform_7, window_bounds = array<i64: 1, 16>}, {pipeline_mode = #tpu.pipeline_mode<synchronous>, transform_indices = @transform_8, window_bounds = array<i64: 16, 64>}, {pipeline_mode = #tpu.pipeline_mode<synchronous>, transform_indices = @transform_9, window_bounds = array<i64: 312, 64>}, {pipeline_mode = #tpu.pipeline_mode<synchronous>, transform_indices = @transform_10, window_bounds = array<i64: 312, 9>}]} {
    %c0 = arith.constant 0 : index
    %c0_0 = arith.constant 0 : index
    %0 = vector.load %arg1[%c0, %c0_0] : memref<312x16xf32, #tpu.memory_space<vmem>>, vector<312x16xf32>
    %1 = arith.truncf %0 : vector<312x16xf32> to vector<312x16xbf16>
    %c0_1 = arith.constant 0 : index
    %c0_2 = arith.constant 0 : index
    %2 = vector.load %arg5[%c0_1, %c0_2] : memref<16x64xbf16, #tpu.memory_space<vmem>>, vector<16x64xbf16>
    %cst = arith.constant dense<0.000000e+00> : vector<312x64xf32>
    %3 = tpu.matmul %1, %2, %cst {dimension_numbers = #tpu.dot_dimension_numbers<[1], [0], [0], [1], [0, 0, 1, 1], [], []>} : vector<312x16xbf16>, vector<16x64xbf16>, vector<312x64xf32> -> vector<312x64xf32>
    %c0_3 = arith.constant 0 : index
    %c0_4 = arith.constant 0 : index
    %4 = vector.load %arg6[%c0_3, %c0_4] : memref<1x64xf32, #tpu.memory_space<vmem>>, vector<1x64xf32>
    %5 = vector.broadcast %4 : vector<1x64xf32> to vector<312x64xf32>
    %6 = arith.addf %3, %5 : vector<312x64xf32>
    %c0_5 = arith.constant 0 : index
    %c0_6 = arith.constant 0 : index
    %7 = vector.load %arg10[%c0_5, %c0_6] : memref<312x64xf32, #tpu.memory_space<vmem>>, vector<312x64xf32>
    tpu.vector_store %arg10[%c0_5, %c0_6], %6 {strides = array<i32>} : memref<312x64xf32, #tpu.memory_space<vmem>>, vector<312x64xf32>,
    %c0_7 = arith.constant 0 : index
    %c0_8 = arith.constant 0 : index
    %8 = vector.load %arg2[%c0_7, %c0_8] : memref<6x312xf32, #tpu.memory_space<vmem>>, vector<6x312xf32>
    %cst_9 = arith.constant dense<0.000000e+00> : vector<6x64xf32>
    %9 = tpu.matmul %8, %6, %cst_9 {dimension_numbers = #tpu.dot_dimension_numbers<[1], [0], [0], [1], [0, 0, 1, 1], [], []>} : vector<6x312xf32>, vector<312x64xf32>, vector<6x64xf32> -> vector<6x64xf32>
    %c0_10 = arith.constant 0 : index
    %c0_11 = arith.constant 0 : index
    %10 = vector.load %arg7[%c0_10, %c0_11] : memref<64x16xf32, #tpu.memory_space<vmem>>, vector<64x16xf32>
    %cst_12 = arith.constant dense<0.000000e+00> : vector<6x16xf32>
    %11 = tpu.matmul %9, %10, %cst_12 {dimension_numbers = #tpu.dot_dimension_numbers<[1], [0], [0], [1], [0, 0, 1, 1], [], []>} : vector<6x64xf32>, vector<64x16xf32>, vector<6x16xf32> -> vector<6x16xf32>
    %c0_13 = arith.constant 0 : index
    %c0_14 = arith.constant 0 : index
    %12 = vector.load %arg8[%c0_13, %c0_14] : memref<1x16xf32, #tpu.memory_space<vmem>>, vector<1x16xf32>
    %13 = vector.broadcast %12 : vector<1x16xf32> to vector<6x16xf32>
    %14 = arith.addf %11, %13 : vector<6x16xf32>
    %15 = tpu.iota {dimensions = array<i32: 1>} : vector<6x16xi32>
    %16 = arith.sitofp %15 : vector<6x16xi32> to vector<6x16xf32>
    %cst_15 = arith.constant dense<0xFF800000> : vector<6xf32>
    %17 = vector.multi_reduction <maximumf>, %14, %cst_15 [1] : vector<6x16xf32> to vector<6xf32>
    %18 = vector.shape_cast %17 : vector<6xf32> to vector<6x1xf32>
    %19 = vector.broadcast %18 : vector<6x1xf32> to vector<6x16xf32>
    %20 = arith.cmpf oeq, %14, %19 : vector<6x16xf32>
    %cst_16 = arith.constant 1.600000e+01 : f32
    %21 = vector.broadcast %cst_16 : f32 to vector<6x16xf32>
    %22 = arith.select %20, %16, %21 : vector<6x16xi1>, vector<6x16xf32>
    %cst_17 = arith.constant dense<0x7F800000> : vector<6xf32>
    %23 = vector.multi_reduction <minimumf>, %22, %cst_17 [1] : vector<6x16xf32> to vector<6xf32>
    %24 = vector.shape_cast %23 : vector<6xf32> to vector<6x1xf32>
    %25 = vector.broadcast %24 : vector<6x1xf32> to vector<6x16xf32>
    %26 = arith.cmpf oeq, %16, %25 : vector<6x16xf32>
    %27 = arith.extui %26 : vector<6x16xi1> to vector<6x16xi32>
    %28 = arith.sitofp %27 : vector<6x16xi32> to vector<6x16xf32>
    %c0_18 = arith.constant 0 : index
    %c0_19 = arith.constant 0 : index
    %29 = vector.load %arg9[%c0_18, %c0_19] : memref<16x64xf32, #tpu.memory_space<vmem>>, vector<16x64xf32>
    %cst_20 = arith.constant dense<0.000000e+00> : vector<6x64xf32>
    %30 = tpu.matmul %28, %29, %cst_20 {dimension_numbers = #tpu.dot_dimension_numbers<[1], [0], [0], [1], [0, 0, 1, 1], [], []>} : vector<6x16xf32>, vector<16x64xf32>, vector<6x64xf32> -> vector<6x64xf32>
    %c0_21 = arith.constant 0 : index
    %c0_22 = arith.constant 0 : index
    %31 = vector.load %arg3[%c0_21, %c0_22] : memref<312x6xf32, #tpu.memory_space<vmem>>, vector<312x6xf32>
    %cst_23 = arith.constant dense<0.000000e+00> : vector<312x64xf32>
    %32 = tpu.matmul %31, %30, %cst_23 {dimension_numbers = #tpu.dot_dimension_numbers<[1], [0], [0], [1], [0, 0, 1, 1], [], []>} : vector<312x6xf32>, vector<6x64xf32>, vector<312x64xf32> -> vector<312x64xf32>
    %33 = arith.mulf %6, %32 : vector<312x64xf32>
    %cst_24 = arith.constant dense<0.000000e+00> : vector<312xf32>
    %34 = vector.multi_reduction <add>, %33, %cst_24 [1] : vector<312x64xf32> to vector<312xf32>
    %35 = vector.shape_cast %34 : vector<312xf32> to vector<312x1xf32>
    %cst_25 = arith.constant 0.000000e+00 : f32
    %36 = vector.broadcast %cst_25 : f32 to vector<328x1xf32>
    %c0_26 = arith.constant 0 : index
    %c0_27 = arith.constant 0 : index
    %37 = vector.load %arg12[%c0_26, %c0_27] : memref<328x1xf32, #tpu.memory_space<vmem>>, vector<328x1xf32>
    tpu.vector_store %arg12[%c0_26, %c0_27], %36 {strides = array<i32>} : memref<328x1xf32, #tpu.memory_space<vmem>>, vector<328x1xf32>,
    %c8 = arith.constant 8 : index
    %c0_28 = arith.constant 0 : index
    %38 = vector.load %arg12[%c8, %c0_28] : memref<328x1xf32, #tpu.memory_space<vmem>>, vector<312x1xf32>
    tpu.vector_store %arg12[%c8, %c0_28], %35 {strides = array<i32>} : memref<328x1xf32, #tpu.memory_space<vmem>>, vector<312x1xf32>,
    %c0_29 = arith.constant 0 : index
    %c0_30 = arith.constant 0 : index
    %39 = vector.load %arg12[%c0_29, %c0_30] : memref<328x1xf32, #tpu.memory_space<vmem>>, vector<312x1xf32>
    %c1 = arith.constant 1 : index
    %c0_31 = arith.constant 0 : index
    %40 = vector.load %arg12[%c1, %c0_31] : memref<328x1xf32, #tpu.memory_space<vmem>>, vector<312x1xf32>
    %c2 = arith.constant 2 : index
    %c0_32 = arith.constant 0 : index
    %41 = vector.load %arg12[%c2, %c0_32] : memref<328x1xf32, #tpu.memory_space<vmem>>, vector<312x1xf32>
    %c7 = arith.constant 7 : index
    %c0_33 = arith.constant 0 : index
    %42 = vector.load %arg12[%c7, %c0_33] : memref<328x1xf32, #tpu.memory_space<vmem>>, vector<312x1xf32>
    %c8_34 = arith.constant 8 : index
    %c0_35 = arith.constant 0 : index
    %43 = vector.load %arg12[%c8_34, %c0_35] : memref<328x1xf32, #tpu.memory_space<vmem>>, vector<312x1xf32>
    %c9 = arith.constant 9 : index
    %c0_36 = arith.constant 0 : index
    %44 = vector.load %arg12[%c9, %c0_36] : memref<328x1xf32, #tpu.memory_space<vmem>>, vector<312x1xf32>
    %c14 = arith.constant 14 : index
    %c0_37 = arith.constant 0 : index
    %45 = vector.load %arg12[%c14, %c0_37] : memref<328x1xf32, #tpu.memory_space<vmem>>, vector<312x1xf32>
    %c15 = arith.constant 15 : index
    %c0_38 = arith.constant 0 : index
    %46 = vector.load %arg12[%c15, %c0_38] : memref<328x1xf32, #tpu.memory_space<vmem>>, vector<312x1xf32>
    %c16 = arith.constant 16 : index
    %c0_39 = arith.constant 0 : index
    %47 = vector.load %arg12[%c16, %c0_39] : memref<328x1xf32, #tpu.memory_space<vmem>>, vector<312x1xf32>
    %48 = tpu.concatenate %39, %40, %41, %42, %43, %44, %45, %46, %47 in 1 : vector<312x1xf32>, vector<312x1xf32>, vector<312x1xf32>, vector<312x1xf32>, vector<312x1xf32>, vector<312x1xf32>, vector<312x1xf32>, vector<312x1xf32>, vector<312x1xf32> -> vector<312x9xf32>
    %c0_40 = arith.constant 0 : index
    %c0_41 = arith.constant 0 : index
    %49 = vector.load %arg4[%c0_40, %c0_41] : memref<312x9xf32, #tpu.memory_space<vmem>>, vector<312x9xf32>
    %50 = arith.mulf %48, %49 : vector<312x9xf32>
    %c0_42 = arith.constant 0 : index
    %c0_43 = arith.constant 0 : index
    %51 = vector.load %arg11[%c0_42, %c0_43] : memref<312x9xf32, #tpu.memory_space<vmem>>, vector<312x9xf32>
    tpu.vector_store %arg11[%c0_42, %c0_43], %50 {strides = array<i32>} : memref<312x9xf32, #tpu.memory_space<vmem>>, vector<312x9xf32>,
    return
  }
  func.func @transform_0(%arg0: i32) -> (i32, i32) {
    %c0_i32 = arith.constant 0 : i32
    %c0_i32_0 = arith.constant 0 : i32
    %c0_i32_1 = arith.constant 0 : i32
    return %c0_i32, %c0_i32_0 : i32, i32
  }
  func.func @transform_1(%arg0: i32) -> (i32, i32) {
    %c0_i32 = arith.constant 0 : i32
    %c0_i32_0 = arith.constant 0 : i32
    %c0_i32_1 = arith.constant 0 : i32
    return %c0_i32, %c0_i32_0 : i32, i32
  }
  func.func @transform_2(%arg0: i32) -> (i32, i32) {
    %c0_i32 = arith.constant 0 : i32
    %c0_i32_0 = arith.constant 0 : i32
    %c0_i32_1 = arith.constant 0 : i32
    return %c0_i32, %c0_i32_0 : i32, i32
  }
  func.func @transform_3(%arg0: i32) -> (i32, i32) {
    %c0_i32 = arith.constant 0 : i32
    %c0_i32_0 = arith.constant 0 : i32
    %c0_i32_1 = arith.constant 0 : i32
    return %c0_i32, %c0_i32_0 : i32, i32
  }
  func.func @transform_4(%arg0: i32) -> (i32, i32) {
    %c0_i32 = arith.constant 0 : i32
    %c0_i32_0 = arith.constant 0 : i32
    %c0_i32_1 = arith.constant 0 : i32
    return %c0_i32, %c0_i32_0 : i32, i32
  }
  func.func @transform_5(%arg0: i32) -> (i32, i32) {
    %c0_i32 = arith.constant 0 : i32
    %c0_i32_0 = arith.constant 0 : i32
    %c0_i32_1 = arith.constant 0 : i32
    return %c0_i32, %c0_i32_0 : i32, i32
  }
  func.func @transform_6(%arg0: i32) -> (i32, i32) {
    %c0_i32 = arith.constant 0 : i32
    %c0_i32_0 = arith.constant 0 : i32
    %c0_i32_1 = arith.constant 0 : i32
    return %c0_i32, %c0_i32_0 : i32, i32
  }
  func.func @transform_7(%arg0: i32) -> (i32, i32) {
    %c0_i32 = arith.constant 0 : i32
    %c0_i32_0 = arith.constant 0 : i32
    %c0_i32_1 = arith.constant 0 : i32
    return %c0_i32, %c0_i32_0 : i32, i32
  }
  func.func @transform_8(%arg0: i32) -> (i32, i32) {
    %c0_i32 = arith.constant 0 : i32
    %c0_i32_0 = arith.constant 0 : i32
    %c0_i32_1 = arith.constant 0 : i32
    return %c0_i32, %c0_i32_0 : i32, i32
  }
  func.func @transform_9(%arg0: i32) -> (i32, i32) {
    %c0_i32 = arith.constant 0 : i32
    %c0_i32_0 = arith.constant 0 : i32
    %c0_i32_1 = arith.constant 0 : i32
    return %c0_i32, %c0_i32_0 : i32, i32
  }
  func.func @transform_10(%arg0: i32) -> (i32, i32) {
    %c0_i32 = arith.constant 0 : i32
    %c0_i32_0 = arith.constant 0 : i32
    %c0_i32_1 = arith.constant 0 : i32
    return %c0_i32, %c0_i32_0 : i32, i32
  }
}

module attributes {stable_mosaic.version = 11 : i64} {
  func.func @_lsta_recurrent_kernel(%arg0: i32, %arg1: memref<104x64xf32, #tpu.memory_space<vmem>>, %arg2: memref<104x9xf32, #tpu.memory_space<vmem>>, %arg3: memref<104x9xf32, #tpu.memory_space<vmem>>, %arg4: memref<2x104xf32, #tpu.memory_space<vmem>>, %arg5: memref<9x4xf32, #tpu.memory_space<vmem>>, %arg6: memref<9x4xf32, #tpu.memory_space<vmem>>, %arg7: memref<1x4xf32, #tpu.memory_space<vmem>>, %arg8: memref<576x128xbf16, #tpu.memory_space<vmem>>, %arg9: memref<288x128xbf16, #tpu.memory_space<vmem>>, %arg10: memref<1x128xf32, #tpu.memory_space<vmem>>, %arg11: memref<32x8xf32, #tpu.memory_space<vmem>>, %arg12: memref<1x8xf32, #tpu.memory_space<vmem>>, %arg13: memref<2x8xf32, #tpu.memory_space<vmem>>, %arg14: memref<2x32xf32, #tpu.memory_space<vmem>>, %arg15: memref<120x1xf32, #tpu.memory_space<vmem>>, %arg16: memref<104x1xf32, #tpu.memory_space<vmem>>, %arg17: memref<120x32xf32, #tpu.memory_space<vmem>>, %arg18: memref<104x32xf32, #tpu.memory_space<vmem>>, %arg19: memref<120x64xf32, #tpu.memory_space<vmem>>) attributes {dimension_semantics = [#tpu.dimension_semantics<arbitrary>], iteration_bounds = array<i64: 3>, scalar_prefetch = 0 : i64, scratch_operands = 5 : i64, tpu.core_type = #tpu.core_type<tc>, window_params = [{transform_indices = @transform_0, window_bounds = array<i64: 104, 64>}, {transform_indices = @transform_1, window_bounds = array<i64: 104, 9>}, {pipeline_mode = #tpu.pipeline_mode<synchronous>, transform_indices = @transform_2, window_bounds = array<i64: 104, 9>}, {pipeline_mode = #tpu.pipeline_mode<synchronous>, transform_indices = @transform_3, window_bounds = array<i64: 2, 104>}, {pipeline_mode = #tpu.pipeline_mode<synchronous>, transform_indices = @transform_4, window_bounds = array<i64: 9, 4>}, {pipeline_mode = #tpu.pipeline_mode<synchronous>, transform_indices = @transform_5, window_bounds = array<i64: 9, 4>}, {pipeline_mode = #tpu.pipeline_mode<synchronous>, transform_indices = @transform_6, window_bounds = array<i64: 1, 4>}, {pipeline_mode = #tpu.pipeline_mode<synchronous>, transform_indices = @transform_7, window_bounds = array<i64: 576, 128>}, {pipeline_mode = #tpu.pipeline_mode<synchronous>, transform_indices = @transform_8, window_bounds = array<i64: 288, 128>}, {pipeline_mode = #tpu.pipeline_mode<synchronous>, transform_indices = @transform_9, window_bounds = array<i64: 1, 128>}, {pipeline_mode = #tpu.pipeline_mode<synchronous>, transform_indices = @transform_10, window_bounds = array<i64: 32, 8>}, {pipeline_mode = #tpu.pipeline_mode<synchronous>, transform_indices = @transform_11, window_bounds = array<i64: 1, 8>}, {pipeline_mode = #tpu.pipeline_mode<synchronous>, transform_indices = @transform_12, window_bounds = array<i64: 2, 8>}, {pipeline_mode = #tpu.pipeline_mode<synchronous>, transform_indices = @transform_13, window_bounds = array<i64: 2, 32>}]} {
    %c0_i32 = arith.constant 0 : i32
    %0 = arith.cmpi eq, %arg0, %c0_i32 : i32
    %1 = arith.extui %0 : i1 to i32
    %c0_i32_0 = arith.constant 0 : i32
    %2 = arith.cmpi ne, %1, %c0_i32_0 : i32
    scf.if %2 {
      %cst_89 = arith.constant 0.000000e+00 : f32
      %167 = vector.broadcast %cst_89 : f32 to vector<120x1xf32>
      %c0_90 = arith.constant 0 : index
      %c0_91 = arith.constant 0 : index
      %168 = vector.load %arg15[%c0_90, %c0_91] : memref<120x1xf32, #tpu.memory_space<vmem>>, vector<120x1xf32>
      tpu.vector_store %arg15[%c0_90, %c0_91], %167 {strides = array<i32>} : memref<120x1xf32, #tpu.memory_space<vmem>>, vector<120x1xf32>,
      %cst_92 = arith.constant 0.000000e+00 : f32
      %169 = vector.broadcast %cst_92 : f32 to vector<104x1xf32>
      %c0_93 = arith.constant 0 : index
      %c0_94 = arith.constant 0 : index
      %170 = vector.load %arg16[%c0_93, %c0_94] : memref<104x1xf32, #tpu.memory_space<vmem>>, vector<104x1xf32>
      tpu.vector_store %arg16[%c0_93, %c0_94], %169 {strides = array<i32>} : memref<104x1xf32, #tpu.memory_space<vmem>>, vector<104x1xf32>,
      %cst_95 = arith.constant 0.000000e+00 : f32
      %171 = vector.broadcast %cst_95 : f32 to vector<120x32xf32>
      %c0_96 = arith.constant 0 : index
      %c0_97 = arith.constant 0 : index
      %172 = vector.load %arg17[%c0_96, %c0_97] : memref<120x32xf32, #tpu.memory_space<vmem>>, vector<120x32xf32>
      tpu.vector_store %arg17[%c0_96, %c0_97], %171 {strides = array<i32>} : memref<120x32xf32, #tpu.memory_space<vmem>>, vector<120x32xf32>,
      %cst_98 = arith.constant 0.000000e+00 : f32
      %173 = vector.broadcast %cst_98 : f32 to vector<104x32xf32>
      %c0_99 = arith.constant 0 : index
      %c0_100 = arith.constant 0 : index
      %174 = vector.load %arg18[%c0_99, %c0_100] : memref<104x32xf32, #tpu.memory_space<vmem>>, vector<104x32xf32>
      tpu.vector_store %arg18[%c0_99, %c0_100], %173 {strides = array<i32>} : memref<104x32xf32, #tpu.memory_space<vmem>>, vector<104x32xf32>,
      %cst_101 = arith.constant 0.000000e+00 : f32
      %175 = vector.broadcast %cst_101 : f32 to vector<120x64xf32>
      %c0_102 = arith.constant 0 : index
      %c0_103 = arith.constant 0 : index
      %176 = vector.load %arg19[%c0_102, %c0_103] : memref<120x64xf32, #tpu.memory_space<vmem>>, vector<120x64xf32>
      tpu.vector_store %arg19[%c0_102, %c0_103], %175 {strides = array<i32>} : memref<120x64xf32, #tpu.memory_space<vmem>>, vector<120x64xf32>,
    } else {
    }
    %c0 = arith.constant 0 : index
    %c0_1 = arith.constant 0 : index
    %3 = vector.load %arg3[%c0, %c0_1] : memref<104x9xf32, #tpu.memory_space<vmem>>, vector<104x9xf32>
    %c0_2 = arith.constant 0 : index
    %c0_3 = arith.constant 0 : index
    %4 = vector.load %arg15[%c0_2, %c0_3] : memref<120x1xf32, #tpu.memory_space<vmem>>, vector<104x1xf32>
    %c1 = arith.constant 1 : index
    %c0_4 = arith.constant 0 : index
    %5 = vector.load %arg15[%c1, %c0_4] : memref<120x1xf32, #tpu.memory_space<vmem>>, vector<104x1xf32>
    %c2 = arith.constant 2 : index
    %c0_5 = arith.constant 0 : index
    %6 = vector.load %arg15[%c2, %c0_5] : memref<120x1xf32, #tpu.memory_space<vmem>>, vector<104x1xf32>
    %c7 = arith.constant 7 : index
    %c0_6 = arith.constant 0 : index
    %7 = vector.load %arg15[%c7, %c0_6] : memref<120x1xf32, #tpu.memory_space<vmem>>, vector<104x1xf32>
    %c8 = arith.constant 8 : index
    %c0_7 = arith.constant 0 : index
    %8 = vector.load %arg15[%c8, %c0_7] : memref<120x1xf32, #tpu.memory_space<vmem>>, vector<104x1xf32>
    %c9 = arith.constant 9 : index
    %c0_8 = arith.constant 0 : index
    %9 = vector.load %arg15[%c9, %c0_8] : memref<120x1xf32, #tpu.memory_space<vmem>>, vector<104x1xf32>
    %c14 = arith.constant 14 : index
    %c0_9 = arith.constant 0 : index
    %10 = vector.load %arg15[%c14, %c0_9] : memref<120x1xf32, #tpu.memory_space<vmem>>, vector<104x1xf32>
    %c15 = arith.constant 15 : index
    %c0_10 = arith.constant 0 : index
    %11 = vector.load %arg15[%c15, %c0_10] : memref<120x1xf32, #tpu.memory_space<vmem>>, vector<104x1xf32>
    %c16 = arith.constant 16 : index
    %c0_11 = arith.constant 0 : index
    %12 = vector.load %arg15[%c16, %c0_11] : memref<120x1xf32, #tpu.memory_space<vmem>>, vector<104x1xf32>
    %13 = tpu.concatenate %4, %5, %6, %7, %8, %9, %10, %11, %12 in 1 : vector<104x1xf32>, vector<104x1xf32>, vector<104x1xf32>, vector<104x1xf32>, vector<104x1xf32>, vector<104x1xf32>, vector<104x1xf32>, vector<104x1xf32>, vector<104x1xf32> -> vector<104x9xf32>
    %14 = arith.mulf %13, %3 : vector<104x9xf32>
    %c0_12 = arith.constant 0 : index
    %c0_13 = arith.constant 0 : index
    %15 = vector.load %arg2[%c0_12, %c0_13] : memref<104x9xf32, #tpu.memory_space<vmem>>, vector<104x9xf32>
    %c0_14 = arith.constant 0 : index
    %c0_15 = arith.constant 0 : index
    %16 = vector.load %arg5[%c0_14, %c0_15] : memref<9x4xf32, #tpu.memory_space<vmem>>, vector<9x4xf32>
    %cst = arith.constant dense<0.000000e+00> : vector<104x4xf32>
    %17 = tpu.matmul %15, %16, %cst {dimension_numbers = #tpu.dot_dimension_numbers<[1], [0], [0], [1], [0, 0, 1, 1], [], []>} : vector<104x9xf32>, vector<9x4xf32>, vector<104x4xf32> -> vector<104x4xf32>
    %c0_16 = arith.constant 0 : index
    %c0_17 = arith.constant 0 : index
    %18 = vector.load %arg6[%c0_16, %c0_17] : memref<9x4xf32, #tpu.memory_space<vmem>>, vector<9x4xf32>
    %cst_18 = arith.constant dense<0.000000e+00> : vector<104x4xf32>
    %19 = tpu.matmul %14, %18, %cst_18 {dimension_numbers = #tpu.dot_dimension_numbers<[1], [0], [0], [1], [0, 0, 1, 1], [], []>} : vector<104x9xf32>, vector<9x4xf32>, vector<104x4xf32> -> vector<104x4xf32>
    %20 = arith.addf %17, %19 : vector<104x4xf32>
    %c0_19 = arith.constant 0 : index
    %c0_20 = arith.constant 0 : index
    %21 = vector.load %arg7[%c0_19, %c0_20] : memref<1x4xf32, #tpu.memory_space<vmem>>, vector<1x4xf32>
    %22 = vector.broadcast %21 : vector<1x4xf32> to vector<104x4xf32>
    %23 = arith.addf %20, %22 : vector<104x4xf32>
    %24 = vector.extract_strided_slice %23 {offsets = [0, 0], sizes = [104, 1], strides = [1, 1]} : vector<104x4xf32> to vector<104x1xf32>
    %25 = arith.negf %24 : vector<104x1xf32>
    %26 = math.exp %25 : vector<104x1xf32>
    %cst_21 = arith.constant 1.000000e+00 : f32
    %27 = vector.broadcast %cst_21 : f32 to vector<104x1xf32>
    %28 = arith.addf %27, %26 : vector<104x1xf32>
    %29 = arith.divf %27, %28 : vector<104x1xf32>
    %30 = vector.extract_strided_slice %23 {offsets = [0, 1], sizes = [104, 1], strides = [1, 1]} : vector<104x4xf32> to vector<104x1xf32>
    %31 = arith.negf %30 : vector<104x1xf32>
    %32 = math.exp %31 : vector<104x1xf32>
    %cst_22 = arith.constant 1.000000e+00 : f32
    %33 = vector.broadcast %cst_22 : f32 to vector<104x1xf32>
    %34 = arith.addf %33, %32 : vector<104x1xf32>
    %35 = arith.divf %33, %34 : vector<104x1xf32>
    %36 = vector.extract_strided_slice %23 {offsets = [0, 2], sizes = [104, 1], strides = [1, 1]} : vector<104x4xf32> to vector<104x1xf32>
    %37 = arith.negf %36 : vector<104x1xf32>
    %38 = math.exp %37 : vector<104x1xf32>
    %cst_23 = arith.constant 1.000000e+00 : f32
    %39 = vector.broadcast %cst_23 : f32 to vector<104x1xf32>
    %40 = arith.addf %39, %38 : vector<104x1xf32>
    %41 = arith.divf %39, %40 : vector<104x1xf32>
    %42 = vector.extract_strided_slice %23 {offsets = [0, 3], sizes = [104, 1], strides = [1, 1]} : vector<104x4xf32> to vector<104x1xf32>
    %43 = math.tanh %42 : vector<104x1xf32>
    %c0_24 = arith.constant 0 : index
    %c0_25 = arith.constant 0 : index
    %44 = vector.load %arg16[%c0_24, %c0_25] : memref<104x1xf32, #tpu.memory_space<vmem>>, vector<104x1xf32>
    %45 = arith.mulf %35, %44 : vector<104x1xf32>
    %46 = arith.mulf %29, %43 : vector<104x1xf32>
    %47 = arith.addf %45, %46 : vector<104x1xf32>
    %48 = math.tanh %47 : vector<104x1xf32>
    %49 = arith.mulf %41, %48 : vector<104x1xf32>
    %50 = arith.negf %49 : vector<104x1xf32>
    %51 = math.exp %50 : vector<104x1xf32>
    %cst_26 = arith.constant 1.000000e+00 : f32
    %52 = vector.broadcast %cst_26 : f32 to vector<104x1xf32>
    %53 = arith.addf %52, %51 : vector<104x1xf32>
    %54 = arith.divf %52, %53 : vector<104x1xf32>
    %c0_27 = arith.constant 0 : index
    %c0_28 = arith.constant 0 : index
    %55 = vector.load %arg16[%c0_27, %c0_28] : memref<104x1xf32, #tpu.memory_space<vmem>>, vector<104x1xf32>
    tpu.vector_store %arg16[%c0_27, %c0_28], %47 {strides = array<i32>} : memref<104x1xf32, #tpu.memory_space<vmem>>, vector<104x1xf32>,
    %c8_29 = arith.constant 8 : index
    %c0_30 = arith.constant 0 : index
    %56 = vector.load %arg15[%c8_29, %c0_30] : memref<120x1xf32, #tpu.memory_space<vmem>>, vector<104x1xf32>
    tpu.vector_store %arg15[%c8_29, %c0_30], %49 {strides = array<i32>} : memref<120x1xf32, #tpu.memory_space<vmem>>, vector<104x1xf32>,
    %c0_31 = arith.constant 0 : index
    %c0_32 = arith.constant 0 : index
    %57 = vector.load %arg1[%c0_31, %c0_32] : memref<104x64xf32, #tpu.memory_space<vmem>>, vector<104x64xf32>
    %58 = vector.broadcast %54 : vector<104x1xf32> to vector<104x64xf32>
    %59 = arith.mulf %57, %58 : vector<104x64xf32>
    %c8_33 = arith.constant 8 : index
    %c0_34 = arith.constant 0 : index
    %60 = vector.load %arg19[%c8_33, %c0_34] : memref<120x64xf32, #tpu.memory_space<vmem>>, vector<104x64xf32>
    tpu.vector_store %arg19[%c8_33, %c0_34], %59 {strides = array<i32>} : memref<120x64xf32, #tpu.memory_space<vmem>>, vector<104x64xf32>,
    %61 = vector.extract_strided_slice %3 {offsets = [0, 0], sizes = [104, 1], strides = [1, 1]} : vector<104x9xf32> to vector<104x1xf32>
    %c0_35 = arith.constant 0 : index
    %c0_36 = arith.constant 0 : index
    %62 = vector.load %arg19[%c0_35, %c0_36] : memref<120x64xf32, #tpu.memory_space<vmem>>, vector<104x64xf32>
    %63 = vector.broadcast %61 : vector<104x1xf32> to vector<104x64xf32>
    %64 = arith.mulf %62, %63 : vector<104x64xf32>
    %c0_37 = arith.constant 0 : index
    %c0_38 = arith.constant 0 : index
    %65 = vector.load %arg17[%c0_37, %c0_38] : memref<120x32xf32, #tpu.memory_space<vmem>>, vector<104x32xf32>
    %66 = vector.broadcast %61 : vector<104x1xf32> to vector<104x32xf32>
    %67 = arith.mulf %65, %66 : vector<104x32xf32>
    %68 = vector.extract_strided_slice %3 {offsets = [0, 1], sizes = [104, 1], strides = [1, 1]} : vector<104x9xf32> to vector<104x1xf32>
    %c1_39 = arith.constant 1 : index
    %c0_40 = arith.constant 0 : index
    %69 = vector.load %arg19[%c1_39, %c0_40] : memref<120x64xf32, #tpu.memory_space<vmem>>, vector<104x64xf32>
    %70 = vector.broadcast %68 : vector<104x1xf32> to vector<104x64xf32>
    %71 = arith.mulf %69, %70 : vector<104x64xf32>
    %c1_41 = arith.constant 1 : index
    %c0_42 = arith.constant 0 : index
    %72 = vector.load %arg17[%c1_41, %c0_42] : memref<120x32xf32, #tpu.memory_space<vmem>>, vector<104x32xf32>
    %73 = vector.broadcast %68 : vector<104x1xf32> to vector<104x32xf32>
    %74 = arith.mulf %72, %73 : vector<104x32xf32>
    %75 = vector.extract_strided_slice %3 {offsets = [0, 2], sizes = [104, 1], strides = [1, 1]} : vector<104x9xf32> to vector<104x1xf32>
    %c2_43 = arith.constant 2 : index
    %c0_44 = arith.constant 0 : index
    %76 = vector.load %arg19[%c2_43, %c0_44] : memref<120x64xf32, #tpu.memory_space<vmem>>, vector<104x64xf32>
    %77 = vector.broadcast %75 : vector<104x1xf32> to vector<104x64xf32>
    %78 = arith.mulf %76, %77 : vector<104x64xf32>
    %c2_45 = arith.constant 2 : index
    %c0_46 = arith.constant 0 : index
    %79 = vector.load %arg17[%c2_45, %c0_46] : memref<120x32xf32, #tpu.memory_space<vmem>>, vector<104x32xf32>
    %80 = vector.broadcast %75 : vector<104x1xf32> to vector<104x32xf32>
    %81 = arith.mulf %79, %80 : vector<104x32xf32>
    %82 = vector.extract_strided_slice %3 {offsets = [0, 3], sizes = [104, 1], strides = [1, 1]} : vector<104x9xf32> to vector<104x1xf32>
    %c7_47 = arith.constant 7 : index
    %c0_48 = arith.constant 0 : index
    %83 = vector.load %arg19[%c7_47, %c0_48] : memref<120x64xf32, #tpu.memory_space<vmem>>, vector<104x64xf32>
    %84 = vector.broadcast %82 : vector<104x1xf32> to vector<104x64xf32>
    %85 = arith.mulf %83, %84 : vector<104x64xf32>
    %c7_49 = arith.constant 7 : index
    %c0_50 = arith.constant 0 : index
    %86 = vector.load %arg17[%c7_49, %c0_50] : memref<120x32xf32, #tpu.memory_space<vmem>>, vector<104x32xf32>
    %87 = vector.broadcast %82 : vector<104x1xf32> to vector<104x32xf32>
    %88 = arith.mulf %86, %87 : vector<104x32xf32>
    %89 = vector.extract_strided_slice %3 {offsets = [0, 4], sizes = [104, 1], strides = [1, 1]} : vector<104x9xf32> to vector<104x1xf32>
    %c8_51 = arith.constant 8 : index
    %c0_52 = arith.constant 0 : index
    %90 = vector.load %arg19[%c8_51, %c0_52] : memref<120x64xf32, #tpu.memory_space<vmem>>, vector<104x64xf32>
    %91 = vector.broadcast %89 : vector<104x1xf32> to vector<104x64xf32>
    %92 = arith.mulf %90, %91 : vector<104x64xf32>
    %c8_53 = arith.constant 8 : index
    %c0_54 = arith.constant 0 : index
    %93 = vector.load %arg17[%c8_53, %c0_54] : memref<120x32xf32, #tpu.memory_space<vmem>>, vector<104x32xf32>
    %94 = vector.broadcast %89 : vector<104x1xf32> to vector<104x32xf32>
    %95 = arith.mulf %93, %94 : vector<104x32xf32>
    %96 = vector.extract_strided_slice %3 {offsets = [0, 5], sizes = [104, 1], strides = [1, 1]} : vector<104x9xf32> to vector<104x1xf32>
    %c9_55 = arith.constant 9 : index
    %c0_56 = arith.constant 0 : index
    %97 = vector.load %arg19[%c9_55, %c0_56] : memref<120x64xf32, #tpu.memory_space<vmem>>, vector<104x64xf32>
    %98 = vector.broadcast %96 : vector<104x1xf32> to vector<104x64xf32>
    %99 = arith.mulf %97, %98 : vector<104x64xf32>
    %c9_57 = arith.constant 9 : index
    %c0_58 = arith.constant 0 : index
    %100 = vector.load %arg17[%c9_57, %c0_58] : memref<120x32xf32, #tpu.memory_space<vmem>>, vector<104x32xf32>
    %101 = vector.broadcast %96 : vector<104x1xf32> to vector<104x32xf32>
    %102 = arith.mulf %100, %101 : vector<104x32xf32>
    %103 = vector.extract_strided_slice %3 {offsets = [0, 6], sizes = [104, 1], strides = [1, 1]} : vector<104x9xf32> to vector<104x1xf32>
    %c14_59 = arith.constant 14 : index
    %c0_60 = arith.constant 0 : index
    %104 = vector.load %arg19[%c14_59, %c0_60] : memref<120x64xf32, #tpu.memory_space<vmem>>, vector<104x64xf32>
    %105 = vector.broadcast %103 : vector<104x1xf32> to vector<104x64xf32>
    %106 = arith.mulf %104, %105 : vector<104x64xf32>
    %c14_61 = arith.constant 14 : index
    %c0_62 = arith.constant 0 : index
    %107 = vector.load %arg17[%c14_61, %c0_62] : memref<120x32xf32, #tpu.memory_space<vmem>>, vector<104x32xf32>
    %108 = vector.broadcast %103 : vector<104x1xf32> to vector<104x32xf32>
    %109 = arith.mulf %107, %108 : vector<104x32xf32>
    %110 = vector.extract_strided_slice %3 {offsets = [0, 7], sizes = [104, 1], strides = [1, 1]} : vector<104x9xf32> to vector<104x1xf32>
    %c15_63 = arith.constant 15 : index
    %c0_64 = arith.constant 0 : index
    %111 = vector.load %arg19[%c15_63, %c0_64] : memref<120x64xf32, #tpu.memory_space<vmem>>, vector<104x64xf32>
    %112 = vector.broadcast %110 : vector<104x1xf32> to vector<104x64xf32>
    %113 = arith.mulf %111, %112 : vector<104x64xf32>
    %c15_65 = arith.constant 15 : index
    %c0_66 = arith.constant 0 : index
    %114 = vector.load %arg17[%c15_65, %c0_66] : memref<120x32xf32, #tpu.memory_space<vmem>>, vector<104x32xf32>
    %115 = vector.broadcast %110 : vector<104x1xf32> to vector<104x32xf32>
    %116 = arith.mulf %114, %115 : vector<104x32xf32>
    %117 = vector.extract_strided_slice %3 {offsets = [0, 8], sizes = [104, 1], strides = [1, 1]} : vector<104x9xf32> to vector<104x1xf32>
    %c16_67 = arith.constant 16 : index
    %c0_68 = arith.constant 0 : index
    %118 = vector.load %arg19[%c16_67, %c0_68] : memref<120x64xf32, #tpu.memory_space<vmem>>, vector<104x64xf32>
    %119 = vector.broadcast %117 : vector<104x1xf32> to vector<104x64xf32>
    %120 = arith.mulf %118, %119 : vector<104x64xf32>
    %c16_69 = arith.constant 16 : index
    %c0_70 = arith.constant 0 : index
    %121 = vector.load %arg17[%c16_69, %c0_70] : memref<120x32xf32, #tpu.memory_space<vmem>>, vector<104x32xf32>
    %122 = vector.broadcast %117 : vector<104x1xf32> to vector<104x32xf32>
    %123 = arith.mulf %121, %122 : vector<104x32xf32>
    %124 = tpu.concatenate %64, %71, %78, %85, %92, %99, %106, %113, %120 in 1 : vector<104x64xf32>, vector<104x64xf32>, vector<104x64xf32>, vector<104x64xf32>, vector<104x64xf32>, vector<104x64xf32>, vector<104x64xf32>, vector<104x64xf32>, vector<104x64xf32> -> vector<104x576xf32>
    %125 = arith.truncf %124 : vector<104x576xf32> to vector<104x576xbf16>
    %126 = tpu.concatenate %67, %74, %81, %88, %95, %102, %109, %116, %123 in 1 : vector<104x32xf32>, vector<104x32xf32>, vector<104x32xf32>, vector<104x32xf32>, vector<104x32xf32>, vector<104x32xf32>, vector<104x32xf32>, vector<104x32xf32>, vector<104x32xf32> -> vector<104x288xf32>
    %127 = arith.truncf %126 : vector<104x288xf32> to vector<104x288xbf16>
    %c0_71 = arith.constant 0 : index
    %c0_72 = arith.constant 0 : index
    %128 = vector.load %arg8[%c0_71, %c0_72] : memref<576x128xbf16, #tpu.memory_space<vmem>>, vector<576x128xbf16>
    %cst_73 = arith.constant dense<0.000000e+00> : vector<104x128xf32>
    %129 = tpu.matmul %125, %128, %cst_73 {dimension_numbers = #tpu.dot_dimension_numbers<[1], [0], [0], [1], [0, 0, 1, 1], [], []>} : vector<104x576xbf16>, vector<576x128xbf16>, vector<104x128xf32> -> vector<104x128xf32>
    %c0_74 = arith.constant 0 : index
    %c0_75 = arith.constant 0 : index
    %130 = vector.load %arg9[%c0_74, %c0_75] : memref<288x128xbf16, #tpu.memory_space<vmem>>, vector<288x128xbf16>
    %cst_76 = arith.constant dense<0.000000e+00> : vector<104x128xf32>
    %131 = tpu.matmul %127, %130, %cst_76 {dimension_numbers = #tpu.dot_dimension_numbers<[1], [0], [0], [1], [0, 0, 1, 1], [], []>} : vector<104x288xbf16>, vector<288x128xbf16>, vector<104x128xf32> -> vector<104x128xf32>
    %132 = arith.addf %129, %131 : vector<104x128xf32>
    %c0_77 = arith.constant 0 : index
    %c0_78 = arith.constant 0 : index
    %133 = vector.load %arg10[%c0_77, %c0_78] : memref<1x128xf32, #tpu.memory_space<vmem>>, vector<1x128xf32>
    %134 = vector.broadcast %133 : vector<1x128xf32> to vector<104x128xf32>
    %135 = arith.addf %132, %134 : vector<104x128xf32>
    %136 = vector.extract_strided_slice %135 {offsets = [0, 0], sizes = [104, 32], strides = [1, 1]} : vector<104x128xf32> to vector<104x32xf32>
    %137 = arith.negf %136 : vector<104x32xf32>
    %138 = math.exp %137 : vector<104x32xf32>
    %cst_79 = arith.constant 1.000000e+00 : f32
    %139 = vector.broadcast %cst_79 : f32 to vector<104x32xf32>
    %140 = arith.addf %139, %138 : vector<104x32xf32>
    %141 = arith.divf %139, %140 : vector<104x32xf32>
    %142 = vector.extract_strided_slice %135 {offsets = [0, 32], sizes = [104, 32], strides = [1, 1]} : vector<104x128xf32> to vector<104x32xf32>
    %143 = arith.negf %142 : vector<104x32xf32>
    %144 = math.exp %143 : vector<104x32xf32>
    %cst_80 = arith.constant 1.000000e+00 : f32
    %145 = vector.broadcast %cst_80 : f32 to vector<104x32xf32>
    %146 = arith.addf %145, %144 : vector<104x32xf32>
    %147 = arith.divf %145, %146 : vector<104x32xf32>
    %148 = vector.extract_strided_slice %135 {offsets = [0, 64], sizes = [104, 32], strides = [1, 1]} : vector<104x128xf32> to vector<104x32xf32>
    %149 = arith.negf %148 : vector<104x32xf32>
    %150 = math.exp %149 : vector<104x32xf32>
    %cst_81 = arith.constant 1.000000e+00 : f32
    %151 = vector.broadcast %cst_81 : f32 to vector<104x32xf32>
    %152 = arith.addf %151, %150 : vector<104x32xf32>
    %153 = arith.divf %151, %152 : vector<104x32xf32>
    %154 = vector.extract_strided_slice %135 {offsets = [0, 96], sizes = [104, 32], strides = [1, 1]} : vector<104x128xf32> to vector<104x32xf32>
    %155 = math.tanh %154 : vector<104x32xf32>
    %c0_82 = arith.constant 0 : index
    %c0_83 = arith.constant 0 : index
    %156 = vector.load %arg18[%c0_82, %c0_83] : memref<104x32xf32, #tpu.memory_space<vmem>>, vector<104x32xf32>
    %157 = arith.mulf %147, %156 : vector<104x32xf32>
    %158 = arith.mulf %141, %155 : vector<104x32xf32>
    %159 = arith.addf %157, %158 : vector<104x32xf32>
    %160 = math.tanh %159 : vector<104x32xf32>
    %161 = arith.mulf %153, %160 : vector<104x32xf32>
    %c0_84 = arith.constant 0 : index
    %c0_85 = arith.constant 0 : index
    %162 = vector.load %arg18[%c0_84, %c0_85] : memref<104x32xf32, #tpu.memory_space<vmem>>, vector<104x32xf32>
    tpu.vector_store %arg18[%c0_84, %c0_85], %159 {strides = array<i32>} : memref<104x32xf32, #tpu.memory_space<vmem>>, vector<104x32xf32>,
    %c8_86 = arith.constant 8 : index
    %c0_87 = arith.constant 0 : index
    %163 = vector.load %arg17[%c8_86, %c0_87] : memref<120x32xf32, #tpu.memory_space<vmem>>, vector<104x32xf32>
    tpu.vector_store %arg17[%c8_86, %c0_87], %161 {strides = array<i32>} : memref<120x32xf32, #tpu.memory_space<vmem>>, vector<104x32xf32>,
    %c2_i32 = arith.constant 2 : i32
    %164 = arith.cmpi eq, %arg0, %c2_i32 : i32
    %165 = arith.extui %164 : i1 to i32
    %c0_i32_88 = arith.constant 0 : i32
    %166 = arith.cmpi ne, %165, %c0_i32_88 : i32
    scf.if %166 {
      %c0_89 = arith.constant 0 : index
      %c0_90 = arith.constant 0 : index
      %167 = vector.load %arg4[%c0_89, %c0_90] : memref<2x104xf32, #tpu.memory_space<vmem>>, vector<2x104xf32>
      %cst_91 = arith.constant dense<0.000000e+00> : vector<2x32xf32>
      %168 = tpu.matmul %167, %161, %cst_91 {dimension_numbers = #tpu.dot_dimension_numbers<[1], [0], [0], [1], [0, 0, 1, 1], [], []>} : vector<2x104xf32>, vector<104x32xf32>, vector<2x32xf32> -> vector<2x32xf32>
      %c0_92 = arith.constant 0 : index
      %c0_93 = arith.constant 0 : index
      %169 = vector.load %arg14[%c0_92, %c0_93] : memref<2x32xf32, #tpu.memory_space<vmem>>, vector<2x32xf32>
      tpu.vector_store %arg14[%c0_92, %c0_93], %168 {strides = array<i32>} : memref<2x32xf32, #tpu.memory_space<vmem>>, vector<2x32xf32>,
      %c0_94 = arith.constant 0 : index
      %c0_95 = arith.constant 0 : index
      %170 = vector.load %arg11[%c0_94, %c0_95] : memref<32x8xf32, #tpu.memory_space<vmem>>, vector<32x8xf32>
      %cst_96 = arith.constant dense<0.000000e+00> : vector<2x8xf32>
      %171 = tpu.matmul %168, %170, %cst_96 {dimension_numbers = #tpu.dot_dimension_numbers<[1], [0], [0], [1], [0, 0, 1, 1], [], []>} : vector<2x32xf32>, vector<32x8xf32>, vector<2x8xf32> -> vector<2x8xf32>
      %c0_97 = arith.constant 0 : index
      %c0_98 = arith.constant 0 : index
      %172 = vector.load %arg12[%c0_97, %c0_98] : memref<1x8xf32, #tpu.memory_space<vmem>>, vector<1x8xf32>
      %173 = vector.broadcast %172 : vector<1x8xf32> to vector<2x8xf32>
      %174 = arith.addf %171, %173 : vector<2x8xf32>
      %c0_99 = arith.constant 0 : index
      %c0_100 = arith.constant 0 : index
      %175 = vector.load %arg13[%c0_99, %c0_100] : memref<2x8xf32, #tpu.memory_space<vmem>>, vector<2x8xf32>
      tpu.vector_store %arg13[%c0_99, %c0_100], %174 {strides = array<i32>} : memref<2x8xf32, #tpu.memory_space<vmem>>, vector<2x8xf32>,
    } else {
    }
    return
  }
  func.func @transform_0(%arg0: i32) -> (i32, i32) {
    %c0_i32 = arith.constant 0 : i32
    %c0_i32_0 = arith.constant 0 : i32
    return %arg0, %c0_i32 : i32, i32
  }
  func.func @transform_1(%arg0: i32) -> (i32, i32) {
    %c0_i32 = arith.constant 0 : i32
    %c0_i32_0 = arith.constant 0 : i32
    return %arg0, %c0_i32 : i32, i32
  }
  func.func @transform_2(%arg0: i32) -> (i32, i32) {
    %c0_i32 = arith.constant 0 : i32
    %c0_i32_0 = arith.constant 0 : i32
    %c0_i32_1 = arith.constant 0 : i32
    return %c0_i32, %c0_i32_0 : i32, i32
  }
  func.func @transform_3(%arg0: i32) -> (i32, i32) {
    %c0_i32 = arith.constant 0 : i32
    %c0_i32_0 = arith.constant 0 : i32
    %c0_i32_1 = arith.constant 0 : i32
    return %c0_i32, %c0_i32_0 : i32, i32
  }
  func.func @transform_4(%arg0: i32) -> (i32, i32) {
    %c0_i32 = arith.constant 0 : i32
    %c0_i32_0 = arith.constant 0 : i32
    %c0_i32_1 = arith.constant 0 : i32
    return %c0_i32, %c0_i32_0 : i32, i32
  }
  func.func @transform_5(%arg0: i32) -> (i32, i32) {
    %c0_i32 = arith.constant 0 : i32
    %c0_i32_0 = arith.constant 0 : i32
    %c0_i32_1 = arith.constant 0 : i32
    return %c0_i32, %c0_i32_0 : i32, i32
  }
  func.func @transform_6(%arg0: i32) -> (i32, i32) {
    %c0_i32 = arith.constant 0 : i32
    %c0_i32_0 = arith.constant 0 : i32
    %c0_i32_1 = arith.constant 0 : i32
    return %c0_i32, %c0_i32_0 : i32, i32
  }
  func.func @transform_7(%arg0: i32) -> (i32, i32) {
    %c0_i32 = arith.constant 0 : i32
    %c0_i32_0 = arith.constant 0 : i32
    %c0_i32_1 = arith.constant 0 : i32
    return %c0_i32, %c0_i32_0 : i32, i32
  }
  func.func @transform_8(%arg0: i32) -> (i32, i32) {
    %c0_i32 = arith.constant 0 : i32
    %c0_i32_0 = arith.constant 0 : i32
    %c0_i32_1 = arith.constant 0 : i32
    return %c0_i32, %c0_i32_0 : i32, i32
  }
  func.func @transform_9(%arg0: i32) -> (i32, i32) {
    %c0_i32 = arith.constant 0 : i32
    %c0_i32_0 = arith.constant 0 : i32
    %c0_i32_1 = arith.constant 0 : i32
    return %c0_i32, %c0_i32_0 : i32, i32
  }
  func.func @transform_10(%arg0: i32) -> (i32, i32) {
    %c0_i32 = arith.constant 0 : i32
    %c0_i32_0 = arith.constant 0 : i32
    %c0_i32_1 = arith.constant 0 : i32
    return %c0_i32, %c0_i32_0 : i32, i32
  }
  func.func @transform_11(%arg0: i32) -> (i32, i32) {
    %c0_i32 = arith.constant 0 : i32
    %c0_i32_0 = arith.constant 0 : i32
    %c0_i32_1 = arith.constant 0 : i32
    return %c0_i32, %c0_i32_0 : i32, i32
  }
  func.func @transform_12(%arg0: i32) -> (i32, i32) {
    %c0_i32 = arith.constant 0 : i32
    %c0_i32_0 = arith.constant 0 : i32
    %c0_i32_1 = arith.constant 0 : i32
    return %c0_i32, %c0_i32_0 : i32, i32
  }
  func.func @transform_13(%arg0: i32) -> (i32, i32) {
    %c0_i32 = arith.constant 0 : i32
    %c0_i32_0 = arith.constant 0 : i32
    %c0_i32_1 = arith.constant 0 : i32
    return %c0_i32, %c0_i32_0 : i32, i32
  }
}

</mosaic_0001>

<bundles_post_ra>
// kernel: forward.2
= control target key start
LH: loop header
LB: loop body
LE: loop exit
PB: predicated region body
PF: predicated region fallthrough
CT: control target
= control target key end

     0   :  { %vm106_vm0 = vcmask 130048   ;;  %vm275_vm1 = vcmask 523264   ;;  %vm318_vm2 = vcmask 457728   ;;  %vm420_vm3 = vcmask 128000   ;;  %s2851_s16 = smov 3   ;;  %s2852_s17 = smov 4   ;;  %s5345_s4 = inlined_call_operand.vmem [shape: bf16[16,64], index: 4, kind: input, shape index: {}]   ;;  %s5346_s0 = inlined_call_operand.vmem [shape: f32[312,16], index: 0, kind: input, shape index: {}]   ;;  %s5347_s5 = inlined_call_operand.vmem [shape: f32[1,64], index: 5, kind: input, shape index: {}]   ;;  %s5348_s9 = inlined_call_operand.vmem [shape: f32[312,64], index: 9, kind: output, shape index: {0}]   ;;  %s5349_s1 = inlined_call_operand.vmem [shape: f32[6,312], index: 1, kind: input, shape index: {}]   ;;  %s5350_s6 = inlined_call_operand.vmem [shape: f32[64,16], index: 6, kind: input, shape index: {}]   ;;  %s5351_s7 = inlined_call_operand.vmem [shape: f32[1,16], index: 7, kind: input, shape index: {}]   ;;  %s5352_s8 = inlined_call_operand.vmem [shape: f32[16,64], index: 8, kind: input, shape index: {}]   ;;  %s5353_s2 = inlined_call_operand.vmem [shape: f32[312,6], index: 2, kind: input, shape index: {}]   ;;  %s5354_s3 = inlined_call_operand.vmem [shape: f32[312,9], index: 3, kind: input, shape index: {}]   ;;  %s5355_s10 = inlined_call_operand.vmem [shape: f32[312,9], index: 10, kind: output, shape index: {1}]  }
   0x1   :  { %v2834_v0 = vld [vmem:[%s5345_s4] sm:$0xff]  ;;  %v36_v2 = vld [vmem:[%s5346_s0 + $0x8] sm:$0xff]  ;;  %v37_v7 = vld [vmem:[%s5346_s0 + $0x10] sm:$0xff]  ;;  %vm614_vm6 = vcmask 1045504   ;;  %vm496_vm7 = vcmask 48128   ;;  %vm908_vm8 = vcmask 7168  }
   0x2   :  { %v35_v1 = vld [vmem:[%s5346_s0] sm:$0xff]  ;;  %v60_v5 = vld [vmem:[%s5346_s0 + $0xc8] sm:$0xff]  ;;  %174 = vmatpush.bf16.msra.mxu0 %v2834_v0  ;;  %2835 = vmatpush.bf16.msra.mxu3 %v2834_v0  ;;  %v38_v8 = vld [vmem:[%s5346_s0 + $0x18] sm:$0xff]  ;;  %s2853_s18 = smov 8   ;;  %s2856_s19 = smov 7   ;;  %vm2361_vm9 = vcmask 15360  }
   0x3   :  { %v74_v3 = vpack.c.bf16 %v36_v2, %v35_v1  ;;  %v59_v4 = vld [vmem:[%s5346_s0 + $0xc0] sm:$0xff]  ;;  %v61_v9 = vld [vmem:[%s5346_s0 + $0xd0] sm:$0xff]  ;;  %v62_v10 = vld [vmem:[%s5346_s0 + $0xd8] sm:$0xff]  ;;  %v75_v11 = vpack.c.bf16 %v38_v8, %v37_v7  ;;  %vm2401_vm10 = vcmask 23552   ;;  %vm2441_vm11 = vcmask 31744  }
   0x4   :  { %v86_v6 = vpack.c.bf16 %v60_v5, %v59_v4  ;;  %v87_v12 = vpack.c.bf16 %v62_v10, %v61_v9  ;;  %v39_v13 = vld [vmem:[%s5346_s0 + $0x20] sm:$0xff]  ;;  %v40_v14 = vld [vmem:[%s5346_s0 + $0x28] sm:$0xff]  ;;  %v41_v19 = vld [vmem:[%s5346_s0 + $0x30] sm:$0xff]  ;;  %vm2481_vm12 = vcmask 39936   ;;  %vm2560_vm13 = vcmask 56320  }
   0x5   :  { %2770 = vmatmul.msk.bf16.vlgmr.msra.gmra.mxu0 %vm106_vm0, %v74_v3  ;;  %v63_v15 = vld [vmem:[%s5346_s0 + $0xe0] sm:$0xff]  ;;  %v64_v16 = vld [vmem:[%s5346_s0 + $0xe8] sm:$0xff]  ;;  %v76_v17 = vpack.c.bf16 %v40_v14, %v39_v13  ;;  %v42_v20 = vld [vmem:[%s5346_s0 + $0x38] sm:$0xff]  ;;  %vm2600_vm14 = vcmask 64512   ;;  %vm2718_vm15 = vcmask 72704  }
   0x6   :  { %2782 = vmatmul.msk.bf16.vlgmr.msra.gmra.mxu3 %vm106_vm0, %v86_v6  ;;  %v88_v18 = vpack.c.bf16 %v64_v16, %v63_v15  ;;  %v65_v21 = vld [vmem:[%s5346_s0 + $0xf0] sm:$0xff]  ;;  %v66_v22 = vld [vmem:[%s5346_s0 + $0xf8] sm:$0xff]  ;;  %v77_v23 = vpack.c.bf16 %v42_v20, %v41_v19  ;;  %v43_v25 = vld [vmem:[%s5346_s0 + $0x40] sm:$0xff] }
   0x7   :  { %v89_v24 = vpack.c.bf16 %v66_v22, %v65_v21  ;;  %v44_v26 = vld [vmem:[%s5346_s0 + $0x48] sm:$0xff]  ;;  %v45_v28 = vld [vmem:[%s5346_s0 + $0x50] sm:$0xff]  ;;  %v46_v29 = vld [vmem:[%s5346_s0 + $0x58] sm:$0xff] }
   0x8   :  { %v78_v27 = vpack.c.bf16 %v44_v26, %v43_v25  ;;  %v79_v30 = vpack.c.bf16 %v46_v29, %v45_v28  ;;  %v47_v31 = vld [vmem:[%s5346_s0 + $0x60] sm:$0xff]  ;;  %v48_v32 = vld [vmem:[%s5346_s0 + $0x68] sm:$0xff]  ;;  %v49_v37 = vld [vmem:[%s5346_s0 + $0x70] sm:$0xff] }
   0x9   :  { %v80_v33 = vpack.c.bf16 %v48_v32, %v47_v31  ;;  %v67_v34 = vld [vmem:[%s5346_s0 + $0x100] sm:$0xff]  ;;  %v68_v35 = vld [vmem:[%s5346_s0 + $0x108] sm:$0xff]  ;;  %v50_v38 = vld [vmem:[%s5346_s0 + $0x78] sm:$0xff] }
   0xa   :  { %v90_v36 = vpack.c.bf16 %v68_v35, %v67_v34  ;;  %v81_v39 = vpack.c.bf16 %v50_v38, %v49_v37  ;;  %v69_v40 = vld [vmem:[%s5346_s0 + $0x110] sm:$0xff]  ;;  %v70_v41 = vld [vmem:[%s5346_s0 + $0x118] sm:$0xff]  ;;  %v51_v43 = vld [vmem:[%s5346_s0 + $0x80] sm:$0xff] }
   0xb   :  { %v91_v42 = vpack.c.bf16 %v70_v41, %v69_v40  ;;  %v52_v44 = vld [vmem:[%s5346_s0 + $0x88] sm:$0xff]  ;;  %v3022_v45 = vld [vmem:[%s5347_s5] ss:$0 sm:$0xff]  ;;  %v53_v56 = vld [vmem:[%s5346_s0 + $0x90] sm:$0xff]  ;;  %s2850_s5 = smov 1  }
   0xc   :  { %v82_v46 = vpack.c.bf16 %v52_v44, %v51_v43  ;;  %v71_v53 = vld [vmem:[%s5346_s0 + $0x120] sm:$0xff]  ;;  %v72_v54 = vld [vmem:[%s5346_s0 + $0x128] sm:$0xff]  ;;  %v54_v57 = vld [vmem:[%s5346_s0 + $0x98] sm:$0xff] }
   0xd   :  { %v92_v55 = vpack.c.bf16 %v72_v54, %v71_v53  ;;  %v83_v60 = vpack.c.bf16 %v54_v57, %v53_v56  ;;  %v73_v3 = vld [vmem:[%s5346_s0 + $0x130] sm:$0xff]  ;;  %v55_v5 = vld [vmem:[%s5346_s0 + $0xa0] sm:$0xff]  ;;  %v56_v6 = vld [vmem:[%s5346_s0 + $0xa8] sm:$0xff] }
   0xe   :  { %v93_v4 = vpack.c.bf16 %v73_v3, %v73_v3  ;;  %v84_v9 = vpack.c.bf16 %v56_v6, %v55_v5  ;;  %v57_v16 = vld [vmem:[%s5346_s0 + $0xb0] sm:$0xff] }
  0x15   :  { %2771 = vmatmul.msk.bf16.gmra.mxu0 %vm106_vm0, %v75_v11 }
  0x16   :  { %2783 = vmatmul.msk.bf16.gmra.mxu3 %vm106_vm0, %v87_v12 }
  0x25   :  { %2772 = vmatmul.msk.bf16.gmra.mxu0 %vm106_vm0, %v76_v17  ;;  %v58_v17 = vld [vmem:[%s5346_s0 + $0xb8] sm:$0xff] }
  0x26   :  { %2784 = vmatmul.msk.bf16.gmra.mxu3 %vm106_vm0, %v88_v18  ;;  %v85_v20 = vpack.c.bf16 %v58_v17, %v57_v16 }
  0x35   :  { %2773 = vmatmul.msk.bf16.gmra.mxu0 %vm106_vm0, %v77_v23 }
  0x36   :  { %2785 = vmatmul.msk.bf16.gmra.mxu3 %vm106_vm0, %v89_v24 }
  0x45   :  { %2774 = vmatmul.msk.bf16.gmra.mxu0 %vm106_vm0, %v78_v27 }
  0x46   :  { %2786 = vmatmul.msk.bf16.gmra.mxu3 %vm106_vm0, %v90_v36 }
  0x55   :  { %2775 = vmatmul.msk.bf16.gmra.mxu0 %vm106_vm0, %v79_v30 }
  0x56   :  { %2787 = vmatmul.msk.bf16.gmra.mxu3 %vm106_vm0, %v91_v42 }
  0x65   :  { %2776 = vmatmul.msk.bf16.gmra.mxu0 %vm106_vm0, %v80_v33 }
  0x66   :  { %2788 = vmatmul.msk.bf16.gmra.mxu3 %vm106_vm0, %v92_v55 }
  0x75   :  { %2777 = vmatmul.msk.bf16.gmra.mxu0 %vm106_vm0, %v81_v39 }
  0x76   :  { %2789 = vmatmul.msk.bf16.gmra.mxu3 %vm106_vm0, %v93_v4 }
  0x82   :  { %v176_v47 = vpop.f32.mrf.mxu0 }
  0x83   :  { %v3025_v48 = vadd.f32 %v3022_v45, %v176_v47 }
  0x85   :  { %276 = vst.msk [vmem:[%s5348_s9] sm:$0xff] %vm275_vm1, %v3025_v48  ;;  %2778 = vmatmul.msk.bf16.gmra.mxu0 %vm106_vm0, %v82_v46 }
  0x89   :  { %v236_v49 = vpop.f32.mrf.mxu3 }
  0x8a   :  { %v3034_v50 = vadd.f32 %v3022_v45, %v236_v49  ;;  %v178_v51 = vpop.f32.mrf.mxu0 }
  0x8b   :  { %v3042_v52 = vadd.f32 %v3022_v45, %v178_v51 }
  0x8c   :  { %300 = vst.msk [vmem:[%s5348_s9 + $0xc0] sm:$0xff] %vm275_vm1, %v3034_v50 }
  0x8d   :  { %277 = vst.msk [vmem:[%s5348_s9 + $0x8] sm:$0xff] %vm275_vm1, %v3042_v52 }
  0x91   :  { %v238_v58 = vpop.f32.mrf.mxu3 }
  0x92   :  { %v3063_v59 = vadd.f32 %v3022_v45, %v238_v58  ;;  %v181_v61 = vpop.f32.mrf.mxu0 }
  0x93   :  { %v3071_v62 = vadd.f32 %v3022_v45, %v181_v61 }
  0x94   :  { %301 = vst.msk [vmem:[%s5348_s9 + $0xc8] sm:$0xff] %vm275_vm1, %v3063_v59 }
  0x95   :  { %278 = vst.msk [vmem:[%s5348_s9 + $0x10] sm:$0xff] %vm275_vm1, %v3071_v62  ;;  %2779 = vmatmul.msk.bf16.gmra.mxu0 %vm106_vm0, %v83_v60 }
  0x99   :  { %v241_v63 = vpop.f32.mrf.mxu3 }
  0x9a   :  { %v3080_v0 = vadd.f32 %v3022_v45, %v241_v63  ;;  %v183_v1 = vpop.f32.mrf.mxu0 }
  0x9b   :  { %v3088_v2 = vadd.f32 %v3022_v45, %v183_v1 }
  0x9c   :  { %302 = vst.msk [vmem:[%s5348_s9 + $0xd0] sm:$0xff] %vm275_vm1, %v3080_v0 }
  0x9d   :  { %279 = vst.msk [vmem:[%s5348_s9 + $0x18] sm:$0xff] %vm275_vm1, %v3088_v2 }
  0xa1   :  { %v243_v7 = vpop.f32.mrf.mxu3 }
  0xa2   :  { %v3106_v8 = vadd.f32 %v3022_v45, %v243_v7  ;;  %v186_v10 = vpop.f32.mrf.mxu0 }
  0xa3   :  { %v3114_v11 = vadd.f32 %v3022_v45, %v186_v10 }
  0xa4   :  { %303 = vst.msk [vmem:[%s5348_s9 + $0xd8] sm:$0xff] %vm275_vm1, %v3106_v8 }
  0xa5   :  { %280 = vst.msk [vmem:[%s5348_s9 + $0x20] sm:$0xff] %vm275_vm1, %v3114_v11  ;;  %2780 = vmatmul.msk.bf16.gmra.mxu0 %vm106_vm0, %v84_v9 }
  0xa9   :  { %v246_v12 = vpop.f32.mrf.mxu3 }
  0xaa   :  { %v3123_v13 = vadd.f32 %v3022_v45, %v246_v12  ;;  %v188_v14 = vpop.f32.mrf.mxu0 }
  0xab   :  { %v3131_v15 = vadd.f32 %v3022_v45, %v188_v14 }
  0xac   :  { %304 = vst.msk [vmem:[%s5348_s9 + $0xe0] sm:$0xff] %vm275_vm1, %v3123_v13 }
  0xad   :  { %281 = vst.msk [vmem:[%s5348_s9 + $0x28] sm:$0xff] %vm275_vm1, %v3131_v15 }
  0xb1   :  { %v248_v18 = vpop.f32.mrf.mxu3 }
  0xb2   :  { %v3145_v19 = vadd.f32 %v3022_v45, %v248_v18  ;;  %v191_v21 = vpop.f32.mrf.mxu0 }
  0xb3   :  { %v3153_v22 = vadd.f32 %v3022_v45, %v191_v21 }
  0xb4   :  { %305 = vst.msk [vmem:[%s5348_s9 + $0xe8] sm:$0xff] %vm275_vm1, %v3145_v19 }
  0xb5   :  { %282 = vst.msk [vmem:[%s5348_s9 + $0x30] sm:$0xff] %vm275_vm1, %v3153_v22  ;;  %2781 = vmatmul.msk.bf16.gmra.mxu0 %vm106_vm0, %v85_v20 }
  0xb9   :  { %v251_v23 = vpop.f32.mrf.mxu3 }
  0xba   :  { %v3162_v24 = vadd.f32 %v3022_v45, %v251_v23  ;;  %v193_v25 = vpop.f32.mrf.mxu0 }
  0xbb   :  { %v3170_v26 = vadd.f32 %v3022_v45, %v193_v25  ;;  %v315_v25 = vld [vmem:[%s5349_s1] sm:$0x3f] }
  0xbc   :  { %306 = vst.msk [vmem:[%s5348_s9 + $0xf0] sm:$0xff] %vm275_vm1, %v3162_v24 }
  0xbd   :  { %283 = vst.msk [vmem:[%s5348_s9 + $0x38] sm:$0xff] %vm275_vm1, %v3170_v26 }
  0xc1   :  { %v253_v27 = vpop.f32.mrf.mxu3 }
  0xc2   :  { %v3178_v28 = vadd.f32 %v3022_v45, %v253_v27  ;;  %v196_v29 = vpop.f32.mrf.mxu0 }
  0xc3   :  { %v3186_v30 = vadd.f32 %v3022_v45, %v196_v29 }
  0xc4   :  { %307 = vst.msk [vmem:[%s5348_s9 + $0xf8] sm:$0xff] %vm275_vm1, %v3178_v28  ;;  %342 = vmatpush.msrb.mxu3 %v3178_v28 }
  0xc5   :  { %284 = vst.msk [vmem:[%s5348_s9 + $0x40] sm:$0xff] %vm275_vm1, %v3186_v30 }
  0xc6   :  { %343 = vmatpush.msrb.mxu3 %v3162_v24 }
  0xc8   :  { %344 = vmatpush.msrb.mxu3 %v3145_v19 }
  0xc9   :  { %v256_v41 = vpop.f32.mrf.mxu3 }
  0xca   :  { %345 = vmatpush.msrb.mxu3 %v3123_v13  ;;  %v198_v31 = vpop.f32.mrf.mxu0  ;;  %v3250_v44 = vadd.f32 %v3022_v45, %v256_v41  ;;  %v385_v41 = vld [vmem:[%s5350_s6 + $0x18] sm:$0xff] }
  0xcb   :  { %v3198_v32 = vadd.f32 %v3022_v45, %v198_v31  ;;  %v317_v31 = vld [vmem:[%s5349_s1 + $0x10] sm:$0x3f] }
  0xcc   :  { %346 = vmatpush.msrb.mxu3 %v3106_v8  ;;  %308 = vst.msk [vmem:[%s5348_s9 + $0x100] sm:$0xff] %vm275_vm1, %v3250_v44 }
  0xcd   :  { %285 = vst.msk [vmem:[%s5348_s9 + $0x48] sm:$0xff] %vm275_vm1, %v3198_v32 }
  0xce   :  { %347 = vmatpush.msrb.mxu3 %v3080_v0 }
  0xd0   :  { %348 = vmatpush.msrb.mxu3 %v3063_v59 }
  0xd1   :  { %v258_v46 = vpop.f32.mrf.mxu3 }
  0xd2   :  { %349 = vmatpush.msrb.mxu3 %v3034_v50  ;;  %v201_v33 = vpop.f32.mrf.mxu0  ;;  %v3258_v49 = vadd.f32 %v3022_v45, %v258_v46  ;;  %v383_v46 = vld [vmem:[%s5350_s6 + $0x8] sm:$0xff] }
  0xd3   :  { %v3210_v34 = vadd.f32 %v3022_v45, %v201_v33  ;;  %v389_v33 = vld [vmem:[%s5350_s6 + $0x38] sm:$0xff] }
  0xd4   :  { %309 = vst.msk [vmem:[%s5348_s9 + $0x108] sm:$0xff] %vm275_vm1, %v3258_v49 }
  0xd5   :  { %286 = vst.msk [vmem:[%s5348_s9 + $0x50] sm:$0xff] %vm275_vm1, %v3210_v34 }
  0xd9   :  { %v261_v53 = vpop.f32.mrf.mxu3 }
  0xda   :  { %v203_v35 = vpop.f32.mrf.mxu0  ;;  %v3287_v56 = vadd.f32 %v3022_v45, %v261_v53 }
  0xdb   :  { %v3218_v36 = vadd.f32 %v3022_v45, %v203_v35  ;;  %v388_v35 = vld [vmem:[%s5350_s6 + $0x30] sm:$0xff] }
  0xdc   :  { %310 = vst.msk [vmem:[%s5348_s9 + $0x110] sm:$0xff] %vm275_vm1, %v3287_v56 }
  0xdd   :  { %287 = vst.msk [vmem:[%s5348_s9 + $0x58] sm:$0xff] %vm275_vm1, %v3218_v36 }
  0xe1   :  { %v263_v57 = vpop.f32.mrf.mxu3 }
  0xe2   :  { %v206_v37 = vpop.f32.mrf.mxu0  ;;  %v3297_v60 = vadd.f32 %v3022_v45, %v263_v57 }
  0xe3   :  { %v3226_v38 = vadd.f32 %v3022_v45, %v206_v37  ;;  %v387_v37 = vld [vmem:[%s5350_s6 + $0x28] sm:$0xff] }
  0xe4   :  { %311 = vst.msk [vmem:[%s5348_s9 + $0x118] sm:$0xff] %vm275_vm1, %v3297_v60 }
  0xe5   :  { %288 = vst.msk [vmem:[%s5348_s9 + $0x60] sm:$0xff] %vm275_vm1, %v3226_v38 }
  0xe9   :  { %v266_v63 = vpop.f32.mrf.mxu3 }
  0xea   :  { %v208_v39 = vpop.f32.mrf.mxu0  ;;  %v3327_v4 = vadd.f32 %v3022_v45, %v266_v63 }
  0xeb   :  { %v3234_v40 = vadd.f32 %v3022_v45, %v208_v39  ;;  %v386_v39 = vld [vmem:[%s5350_s6 + $0x20] sm:$0xff] }
  0xec   :  { %312 = vst.msk [vmem:[%s5348_s9 + $0x120] sm:$0xff] %vm275_vm1, %v3327_v4 }
  0xed   :  { %289 = vst.msk [vmem:[%s5348_s9 + $0x68] sm:$0xff] %vm275_vm1, %v3234_v40 }
  0xf1   :  { %v268_v5 = vpop.f32.mrf.mxu3 }
  0xf2   :  { %v211_v42 = vpop.f32.mrf.mxu0  ;;  %v3337_v7 = vadd.f32 %v3022_v45, %v268_v5 }
  0xf3   :  { %v3242_v43 = vadd.f32 %v3022_v45, %v211_v42  ;;  %v384_v42 = vld [vmem:[%s5350_s6 + $0x10] sm:$0xff] }
  0xf4   :  { %313 = vst.msk [vmem:[%s5348_s9 + $0x128] sm:$0xff] %vm275_vm1, %v3337_v7 }
  0xf5   :  { %290 = vst.msk [vmem:[%s5348_s9 + $0x70] sm:$0xff] %vm275_vm1, %v3242_v43 }
  0xf9   :  { %v271_v10 = vpop.f32.mrf.mxu3 }
  0xfa   :  { %v213_v47 = vpop.f32.mrf.mxu0  ;;  %v3362_v16 = vadd.f32 %v3022_v45, %v271_v10 }
  0xfb   :  { %v3261_v51 = vadd.f32 %v3022_v45, %v213_v47  ;;  %v382_v47 = vld [vmem:[%s5350_s6] sm:$0xff]  ;;  %s2854_s6 = smov 5  }
  0xfc   :  { %314 = vst.msk [vmem:[%s5348_s9 + $0x130] sm:$0xff] %vm275_vm1, %v3362_v16 }
  0xfd   :  { %291 = vst.msk [vmem:[%s5348_s9 + $0x78] sm:$0xff] %vm275_vm1, %v3261_v51  ;;  %322 = vmatpush.msra.mxu1 %v3261_v51 }
  0xff   :  { %323 = vmatpush.msra.mxu1 %v3242_v43 }
 0x101   :  { %324 = vmatpush.msra.mxu1 %v3234_v40  ;;  %v273_v17 = vpop.f32.mrf.mxu3 }
 0x102   :  { %v216_v54 = vpop.f32.mrf.mxu0  ;;  %v417_v17 = vlaneseq }
 0x103   :  { %v3277_v55 = vadd.f32 %v3022_v45, %v216_v54  ;;  %325 = vmatpush.msra.mxu1 %v3226_v38 }
 0x105   :  { %292 = vst.msk [vmem:[%s5348_s9 + $0x80] sm:$0xff] %vm275_vm1, %v3277_v55  ;;  %326 = vmatpush.msra.mxu1 %v3218_v36 }
 0x107   :  { %327 = vmatpush.msra.mxu1 %v3210_v34 }
 0x109   :  { %328 = vmatpush.msra.mxu1 %v3198_v32 }
 0x10a   :  { %v218_v58 = vpop.f32.mrf.mxu0 }
 0x10b   :  { %v3300_v61 = vadd.f32 %v3022_v45, %v218_v58  ;;  %329 = vmatpush.msra.mxu1 %v3186_v30 }
 0x10d   :  { %293 = vst.msk [vmem:[%s5348_s9 + $0x88] sm:$0xff] %vm275_vm1, %v3300_v61  ;;  %330 = vmatpush.msra.mxu1 %v3170_v26 }
 0x10f   :  { %331 = vmatpush.msra.mxu1 %v3153_v22 }
 0x111   :  { %332 = vmatpush.msra.mxu1 %v3131_v15 }
 0x112   :  { %v221_v1 = vpop.f32.mrf.mxu0 }
 0x113   :  { %v3317_v3 = vadd.f32 %v3022_v45, %v221_v1  ;;  %333 = vmatpush.msra.mxu1 %v3114_v11  ;;  %v2847_v1 = vld [vmem:[%s5351_s7] ss:$0 sm:$0xff]  ;;  %s2855_s7 = smov 6  }
 0x115   :  { %294 = vst.msk [vmem:[%s5348_s9 + $0x90] sm:$0xff] %vm275_vm1, %v3317_v3  ;;  %334 = vmatpush.msra.mxu1 %v3088_v2 }
 0x117   :  { %335 = vmatpush.msra.mxu1 %v3071_v62 }
 0x119   :  { %336 = vmatpush.msra.mxu1 %v3042_v52 }
 0x11a   :  { %v223_v6 = vpop.f32.mrf.mxu0 }
 0x11b   :  { %v3340_v9 = vadd.f32 %v3022_v45, %v223_v6  ;;  %337 = vmatpush.msra.mxu1 %v3025_v48 }
 0x11c   :  { %338 = vmatmul.f32.vlgmr.msra.gmra.mxu1 %v315_v25 }
 0x11d   :  { %295 = vst.msk [vmem:[%s5348_s9 + $0x98] sm:$0xff] %vm275_vm1, %v3340_v9 }
 0x122   :  { %v226_v12 = vpop.f32.mrf.mxu0 }
 0x123   :  { %v3354_v14 = vadd.f32 %v3022_v45, %v226_v12  ;;  %v433_v12 = vld [vmem:[%s5352_s8 + $0x8] sm:$0xff] }
 0x125   :  { %296 = vst.msk [vmem:[%s5348_s9 + $0xa0] sm:$0xff] %vm275_vm1, %v3354_v14 }
 0x12a   :  { %v228_v18 = vpop.f32.mrf.mxu0 }
 0x12b   :  { %v3370_v20 = vadd.f32 %v3022_v45, %v228_v18  ;;  %v418_v18 = vand.u32 127, %v417_v17  ;;  %v464_v17 = vld [vmem:[%s5353_s2 + $0x38] sm:$0xff] }
 0x12d   :  { %297 = vst.msk [vmem:[%s5348_s9 + $0xa8] sm:$0xff] %vm275_vm1, %v3370_v20 }
 0x132   :  { %v231_v21 = vpop.f32.mrf.mxu0 }
 0x133   :  { %v3378_v23 = vadd.f32 %v3022_v45, %v231_v21  ;;  %v419_v21 = vcvt.s32.f32 %v418_v18  ;;  %v483_v18 = vld [vmem:[%s5353_s2 + $0xd0] sm:$0xff] }
 0x135   :  { %298 = vst.msk [vmem:[%s5348_s9 + $0xb0] sm:$0xff] %vm275_vm1, %v3378_v23 }
 0x13a   :  { %v233_v27 = vpop.f32.mrf.mxu0 }
 0x13b   :  { %v3389_v29 = vadd.f32 %v3022_v45, %v233_v27  ;;  %v316_v45 = vld [vmem:[%s5349_s1 + $0x8] sm:$0x3f] }
 0x13d   :  { %299 = vst.msk [vmem:[%s5348_s9 + $0xb8] sm:$0xff] %vm275_vm1, %v3389_v29  ;;  %350 = vmatpush.msrb.mxu3 %v3389_v29 }
 0x13f   :  { %351 = vmatpush.msrb.mxu3 %v3378_v23 }
 0x141   :  { %352 = vmatpush.msrb.mxu3 %v3370_v20 }
 0x143   :  { %353 = vmatpush.msrb.mxu3 %v3354_v14 }
 0x145   :  { %354 = vmatpush.msrb.mxu3 %v3340_v9 }
 0x147   :  { %355 = vmatpush.msrb.mxu3 %v3317_v3 }
 0x149   :  { %356 = vmatpush.msrb.mxu3 %v3300_v61 }
 0x14b   :  { %357 = vmatpush.msrb.mxu3 %v3277_v55 }
 0x14c   :  { %358 = vmatmul.f32.vlgmr.msrb.gmra.mxu3 %v316_v45 }
 0x14d   :  { %371 = vmatpush.msra.mxu3 %v3362_v16 }
 0x14f   :  { %372 = vmatpush.msra.mxu3 %v3337_v7 }
 0x151   :  { %373 = vmatpush.msra.mxu3 %v3327_v4 }
 0x153   :  { %374 = vmatpush.msra.mxu3 %v3297_v60 }
 0x155   :  { %375 = vmatpush.msra.mxu3 %v3287_v56 }
 0x157   :  { %376 = vmatpush.msra.mxu3 %v3258_v49 }
 0x159   :  { %377 = vmatpush.msra.mxu3 %v3250_v44 }
 0x15a   :  { %2790 = vmatmul.msk.f32.vlgmr.msra.gmra.mxu3 %vm318_vm2, %v317_v31  ;;  %v432_v31 = vld [vmem:[%s5352_s8] sm:$0xff] }
 0x15b   :  { %405 = vmatpush.msrb.mxu3 %v389_v33 }
 0x15d   :  { %406 = vmatpush.msrb.mxu3 %v388_v35  ;;  %v2848_v35 = vmov 0.0  }
 0x15e   :  { %910 = vst.msk [vmem:[#allocation2 + $0x8] sm:$0xff] %vm908_vm8, %v2848_v35 }
 0x15f   :  { %407 = vmatpush.msrb.mxu3 %v387_v37  ;;  %909 = vst.msk [vmem:[#allocation2] sm:$0xff] %vm908_vm8, %v2848_v35 }
 0x160   :  { %911 = vst.msk [vmem:[#allocation2 + $0x10] sm:$0xff] %vm908_vm8, %v2848_v35 }
 0x161   :  { %408 = vmatpush.msrb.mxu3 %v386_v39  ;;  %v457_v39 = vld [vmem:[%s5353_s2] sm:$0xff]  ;;  %912 = vst.msk [vmem:[#allocation2 + $0x18] sm:$0xff] %vm908_vm8, %v2848_v35 }
 0x162   :  { %913 = vst.msk [vmem:[#allocation2 + $0x20] sm:$0xff] %vm908_vm8, %v2848_v35 }
 0x163   :  { %409 = vmatpush.msrb.mxu3 %v385_v41  ;;  %v476_v41 = vld [vmem:[%s5353_s2 + $0x98] sm:$0xff]  ;;  %914 = vst.msk [vmem:[#allocation2 + $0x28] sm:$0xff] %vm908_vm8, %v2848_v35 }
 0x164   :  { %915 = vst.msk [vmem:[#allocation2 + $0x30] sm:$0xff] %vm908_vm8, %v2848_v35 }
 0x165   :  { %410 = vmatpush.msrb.mxu3 %v384_v42  ;;  %916 = vst.msk [vmem:[#allocation2 + $0x38] sm:$0xff] %vm908_vm8, %v2848_v35 }
 0x166   :  { %917 = vst.msk [vmem:[#allocation2 + $0x40] sm:$0xff] %vm908_vm8, %v2848_v35 }
 0x167   :  { %411 = vmatpush.msrb.mxu3 %v383_v46  ;;  %v458_v46 = vld [vmem:[%s5353_s2 + $0x8] sm:$0xff]  ;;  %918 = vst.msk [vmem:[#allocation2 + $0x48] sm:$0xff] %vm908_vm8, %v2848_v35 }
 0x168   :  { %919 = vst.msk [vmem:[#allocation2 + $0x50] sm:$0xff] %vm908_vm8, %v2848_v35 }
 0x169   :  { %412 = vmatpush.msrb.mxu3 %v382_v47  ;;  %v477_v47 = vld [vmem:[%s5353_s2 + $0xa0] sm:$0xff]  ;;  %920 = vst.msk [vmem:[#allocation2 + $0x58] sm:$0xff] %vm908_vm8, %v2848_v35 }
 0x16a   :  { %921 = vst.msk [vmem:[#allocation2 + $0x60] sm:$0xff] %vm908_vm8, %v2848_v35 }
 0x16b   :  { %451 = vmatpush.msra.mxu3 %v433_v12  ;;  %v482_v12 = vld [vmem:[%s5353_s2 + $0xc8] sm:$0xff]  ;;  %922 = vst.msk [vmem:[#allocation2 + $0x68] sm:$0xff] %vm908_vm8, %v2848_v35 }
 0x16c   :  { %923 = vst.msk [vmem:[#allocation2 + $0x70] sm:$0xff] %vm908_vm8, %v2848_v35 }
 0x16d   :  { %452 = vmatpush.msra.mxu3 %v432_v31  ;;  %v467_v31 = vld [vmem:[%s5353_s2 + $0x50] sm:$0xff]  ;;  %924 = vst.msk [vmem:[#allocation2 + $0x78] sm:$0xff] %vm908_vm8, %v2848_v35 }
 0x16e   :  { %925 = vst.msk [vmem:[#allocation2 + $0x80] sm:$0xff] %vm908_vm8, %v2848_v35 }
 0x16f   :  { %926 = vst.msk [vmem:[#allocation2 + $0x88] sm:$0xff] %vm908_vm8, %v2848_v35 }
 0x170   :  { %927 = vst.msk [vmem:[#allocation2 + $0x90] sm:$0xff] %vm908_vm8, %v2848_v35 }
 0x171   :  { %928 = vst.msk [vmem:[#allocation2 + $0x98] sm:$0xff] %vm908_vm8, %v2848_v35 }
 0x172   :  { %929 = vst.msk [vmem:[#allocation2 + $0xa0] sm:$0xff] %vm908_vm8, %v2848_v35 }
 0x173   :  { %930 = vst.msk [vmem:[#allocation2 + $0xa8] sm:$0xff] %vm908_vm8, %v2848_v35 }
 0x174   :  { %931 = vst.msk [vmem:[#allocation2 + $0xb0] sm:$0xff] %vm908_vm8, %v2848_v35 }
 0x175   :  { %932 = vst.msk [vmem:[#allocation2 + $0xb8] sm:$0xff] %vm908_vm8, %v2848_v35 }
 0x176   :  { %933 = vst.msk [vmem:[#allocation2 + $0xc0] sm:$0xff] %vm908_vm8, %v2848_v35 }
 0x177   :  { %934 = vst.msk [vmem:[#allocation2 + $0xc8] sm:$0xff] %vm908_vm8, %v2848_v35 }
 0x178   :  { %935 = vst.msk [vmem:[#allocation2 + $0xd0] sm:$0xff] %vm908_vm8, %v2848_v35 }
 0x179   :  { %936 = vst.msk [vmem:[#allocation2 + $0xd8] sm:$0xff] %vm908_vm8, %v2848_v35 }
 0x17a   :  { %937 = vst.msk [vmem:[#allocation2 + $0xe0] sm:$0xff] %vm908_vm8, %v2848_v35 }
 0x17b   :  { %938 = vst.msk [vmem:[#allocation2 + $0xe8] sm:$0xff] %vm908_vm8, %v2848_v35 }
 0x17c   :  { %939 = vst.msk [vmem:[#allocation2 + $0xf0] sm:$0xff] %vm908_vm8, %v2848_v35 }
 0x17d   :  { %940 = vst.msk [vmem:[#allocation2 + $0xf8] sm:$0xff] %vm908_vm8, %v2848_v35 }
 0x17e   :  { %941 = vst.msk [vmem:[#allocation2 + $0x100] sm:$0xff] %vm908_vm8, %v2848_v35 }
 0x17f   :  { %942 = vst.msk [vmem:[#allocation2 + $0x108] sm:$0xff] %vm908_vm8, %v2848_v35 }
 0x180   :  { %943 = vst.msk [vmem:[#allocation2 + $0x110] sm:$0xff] %vm908_vm8, %v2848_v35 }
 0x181   :  { %944 = vst.msk [vmem:[#allocation2 + $0x118] sm:$0xff] %vm908_vm8, %v2848_v35 }
 0x182   :  { %945 = vst.msk [vmem:[#allocation2 + $0x120] sm:$0xff] %vm908_vm8, %v2848_v35 }
 0x183   :  { %946 = vst.msk [vmem:[#allocation2 + $0x128] sm:$0xff] %vm908_vm8, %v2848_v35 }
 0x184   :  { %947 = vst.msk [vmem:[#allocation2 + $0x130] sm:$0xff] %vm908_vm8, %v2848_v35 }
 0x185   :  { %948 = vst.msk [vmem:[#allocation2 + $0x138] sm:$0xff] %vm908_vm8, %v2848_v35 }
 0x186   :  { %949 = vst.msk [vmem:[#allocation2 + $0x140] sm:$0xff] %vm908_vm8, %v2848_v35 }
 0x199   :  { %v339_v54 = vpop.f32.mrf.mxu1 }
 0x1cf   :  { %v359_v53 = vpop.f32.mrf.mxu3 }
 0x1d0   :  { %v360_v57 = vadd.f32 %v359_v53, %v339_v54  ;;  %v459_v53 = vld [vmem:[%s5353_s2 + $0x10] sm:$0xff]  ;;  %v478_v54 = vld [vmem:[%s5353_s2 + $0xa8] sm:$0xff] }
 0x1dd   :  { %v379_v58 = vpop.f32.mrf.mxu3 }
 0x1de   :  { %v380_v63 = vadd.f32 %v379_v58, %v360_v57  ;;  %v460_v57 = vld [vmem:[%s5353_s2 + $0x18] sm:$0xff]  ;;  %v479_v58 = vld [vmem:[%s5353_s2 + $0xb0] sm:$0xff] }
 0x1e0   :  { %2791 = vmatmul.msk.f32.vlgmr.msrb.gmra.mxu3 %vm275_vm1, %v380_v63  ;;  %v461_v63 = vld [vmem:[%s5353_s2 + $0x20] sm:$0xff] }
 0x263   :  { %v414_v5 = vpop.f32.mrf.mxu3 }
 0x264   :  { %v415_v6 = vadd.f32 %v2847_v1, %v414_v5  ;;  %v480_v1 = vld [vmem:[%s5353_s2 + $0xb8] sm:$0xff]  ;;  %v462_v5 = vld [vmem:[%s5353_s2 + $0x28] sm:$0xff] }
 0x266   :  { %v421_v10 = vsel %vm420_vm3, %v415_v6, -inf }
 0x267   :  { %422 = vmax.xlane.f32.xlu0 %v421_v10  ;;  %v463_v10 = vld [vmem:[%s5353_s2 + $0x30] sm:$0xff] }
 0x2da   :  { %v423_v25 = vpop.xlane.xlu0 %422 }
 0x2db   :  { %vm424_vm4 = vcmp.eq.f32.partialorder %v415_v6, %v423_v25  ;;  %v481_v6 = vld [vmem:[%s5353_s2 + $0xc0] sm:$0xff]  ;;  %v484_v25 = vld [vmem:[%s5353_s2 + $0xd8] sm:$0xff] }
 0x2dc   :  { %v425_v27 = vsel %vm424_vm4, %v419_v21, 16.0 }
 0x2dd   :  { %v426_v45 = vsel %vm420_vm3, %v425_v27, inf  ;;  %v466_v27 = vld [vmem:[%s5353_s2 + $0x48] sm:$0xff] }
 0x2de   :  { %427 = vmin.xlane.f32.xlu0 %v426_v45  ;;  %v485_v45 = vld [vmem:[%s5353_s2 + $0xe0] sm:$0xff] }
 0x351   :  { %v428_v33 = vpop.xlane.xlu0 %427 }
 0x352   :  { %vm429_vm5 = vcmp.eq.f32.partialorder %v419_v21, %v428_v33  ;;  %v465_v21 = vld [vmem:[%s5353_s2 + $0x40] sm:$0xff]  ;;  %v486_v33 = vld [vmem:[%s5353_s2 + $0xe8] sm:$0xff] }
 0x353   :  { %v2792_v37 = vsel %vm429_vm5, 1.0, %v2848_v35 }
 0x354   :  { %2793 = vmatmul.msk.f32.vlgmr.msra.gmra.mxu3 %vm106_vm0, %v2792_v37  ;;  %v468_v37 = vld [vmem:[%s5353_s2 + $0x58] sm:$0xff] }
 0x3d7   :  { %v454_v42 = vpop.f32.mrf.mxu3 }
 0x3d8   :  { %2794 = vmatpush.msk.msrb.mxu1 %vm614_vm6, %v454_v42  ;;  %2836 = vmatpush.msk.msra.mxu2 %vm614_vm6, %v454_v42  ;;  %v488_v42 = vld [vmem:[%s5353_s2 + $0xf8] sm:$0xff] }
 0x3d9   :  { %2795 = vmatmul.msk.f32.vlgmr.msrb.gmra.mxu1 %vm496_vm7, %v457_v39  ;;  %2814 = vmatmul.msk.f32.vlgmr.msra.gmra.mxu2 %vm496_vm7, %v476_v41  ;;  %v487_v39 = vld [vmem:[%s5353_s2 + $0xf0] sm:$0xff]  ;;  %v469_v41 = vld [vmem:[%s5353_s2 + $0x60] sm:$0xff] }
 0x3e1   :  { %2796 = vmatmul.msk.f32.gmra.mxu1 %vm496_vm7, %v458_v46  ;;  %2815 = vmatmul.msk.f32.gmra.mxu2 %vm496_vm7, %v477_v47  ;;  %v470_v46 = vld [vmem:[%s5353_s2 + $0x68] sm:$0xff]  ;;  %v489_v47 = vld [vmem:[%s5353_s2 + $0x100] sm:$0xff] }
 0x3e9   :  { %2797 = vmatmul.msk.f32.gmra.mxu1 %vm496_vm7, %v459_v53  ;;  %2816 = vmatmul.msk.f32.gmra.mxu2 %vm496_vm7, %v478_v54  ;;  %v471_v53 = vld [vmem:[%s5353_s2 + $0x70] sm:$0xff]  ;;  %v490_v54 = vld [vmem:[%s5353_s2 + $0x108] sm:$0xff] }
 0x3f1   :  { %2798 = vmatmul.msk.f32.gmra.mxu1 %vm496_vm7, %v460_v57  ;;  %2817 = vmatmul.msk.f32.gmra.mxu2 %vm496_vm7, %v479_v58  ;;  %v472_v57 = vld [vmem:[%s5353_s2 + $0x78] sm:$0xff]  ;;  %v491_v58 = vld [vmem:[%s5353_s2 + $0x110] sm:$0xff] }
 0x3f9   :  { %2799 = vmatmul.msk.f32.gmra.mxu1 %vm496_vm7, %v461_v63  ;;  %2818 = vmatmul.msk.f32.gmra.mxu2 %vm496_vm7, %v480_v1  ;;  %v473_v1 = vld [vmem:[%s5353_s2 + $0x80] sm:$0xff] }
 0x401   :  { %2800 = vmatmul.msk.f32.gmra.mxu1 %vm496_vm7, %v462_v5  ;;  %2819 = vmatmul.msk.f32.gmra.mxu2 %vm496_vm7, %v481_v6  ;;  %v492_v5 = vld [vmem:[%s5353_s2 + $0x118] sm:$0xff] }
 0x409   :  { %2801 = vmatmul.msk.f32.gmra.mxu1 %vm496_vm7, %v463_v10  ;;  %2820 = vmatmul.msk.f32.gmra.mxu2 %vm496_vm7, %v482_v12 }
 0x411   :  { %2802 = vmatmul.msk.f32.gmra.mxu1 %vm496_vm7, %v464_v17  ;;  %2821 = vmatmul.msk.f32.gmra.mxu2 %vm496_vm7, %v483_v18 }
 0x419   :  { %2803 = vmatmul.msk.f32.gmra.mxu1 %vm496_vm7, %v465_v21  ;;  %2822 = vmatmul.msk.f32.gmra.mxu2 %vm496_vm7, %v484_v25  ;;  %v474_v21 = vld [vmem:[%s5353_s2 + $0x88] sm:$0xff]  ;;  %v493_v25 = vld [vmem:[%s5353_s2 + $0x120] sm:$0xff] }
 0x421   :  { %2804 = vmatmul.msk.f32.gmra.mxu1 %vm496_vm7, %v466_v27  ;;  %2823 = vmatmul.msk.f32.gmra.mxu2 %vm496_vm7, %v485_v45 }
 0x429   :  { %2805 = vmatmul.msk.f32.gmra.mxu1 %vm496_vm7, %v467_v31  ;;  %2824 = vmatmul.msk.f32.gmra.mxu2 %vm496_vm7, %v486_v33 }
 0x431   :  { %2806 = vmatmul.msk.f32.gmra.mxu1 %vm496_vm7, %v468_v37  ;;  %2825 = vmatmul.msk.f32.gmra.mxu2 %vm496_vm7, %v487_v39  ;;  %v475_v37 = vld [vmem:[%s5353_s2 + $0x90] sm:$0xff] }
 0x439   :  { %2807 = vmatmul.msk.f32.gmra.mxu1 %vm496_vm7, %v469_v41  ;;  %2826 = vmatmul.msk.f32.gmra.mxu2 %vm496_vm7, %v488_v42 }
 0x441   :  { %2808 = vmatmul.msk.f32.gmra.mxu1 %vm496_vm7, %v470_v46  ;;  %2827 = vmatmul.msk.f32.gmra.mxu2 %vm496_vm7, %v489_v47 }
 0x449   :  { %2809 = vmatmul.msk.f32.gmra.mxu1 %vm496_vm7, %v471_v53  ;;  %2828 = vmatmul.msk.f32.gmra.mxu2 %vm496_vm7, %v490_v54  ;;  %v495_v53 = vld [vmem:[%s5353_s2 + $0x130] sm:$0xff] }
 0x451   :  { %2810 = vmatmul.msk.f32.gmra.mxu1 %vm496_vm7, %v472_v57  ;;  %2829 = vmatmul.msk.f32.gmra.mxu2 %vm496_vm7, %v491_v58 }
 0x456   :  { %v635_v63 = vpop.f32.mrf.mxu1 }
 0x457   :  { %v752_v6 = vmul.f32 %v635_v63, %v3025_v48 }
 0x459   :  { %2811 = vmatmul.msk.f32.gmra.mxu1 %vm496_vm7, %v473_v1  ;;  %2830 = vmatmul.msk.f32.gmra.mxu2 %vm496_vm7, %v492_v5  ;;  %v791_v10 = vsel %vm275_vm1, %v752_v6, 0.0 }
 0x45a   :  { %792 = vadd.xlane.f32.xlu1 %v791_v10 }
 0x45c   :  { %v692_v12 = vpop.f32.mrf.mxu2 }
 0x45d   :  { %v771_v17 = vmul.f32 %v692_v12, %v3340_v9 }
 0x45e   :  { %v638_v18 = vpop.f32.mrf.mxu1 }
 0x45f   :  { %v753_v48 = vmul.f32 %v638_v18, %v3042_v52  ;;  %v848_v27 = vsel %vm275_vm1, %v771_v17, 0.0  ;;  %v494_v52 = vld [vmem:[%s5353_s2 + $0x128] sm:$0xff]  ;;  %s2849_s2 = smov 2  }
 0x460   :  { %849 = vadd.xlane.f32.xlu0 %v848_v27 }
 0x461   :  { %2812 = vmatmul.msk.f32.gmra.mxu1 %vm496_vm7, %v474_v21  ;;  %2831 = vmatmul.msk.f32.gmra.mxu2 %vm496_vm7, %v493_v25  ;;  %v794_v9 = vsel %vm275_vm1, %v753_v48, 0.0 }
 0x462   :  { %795 = vadd.xlane.f32.xlu1 %v794_v9 }
 0x464   :  { %v695_v45 = vpop.f32.mrf.mxu2 }
 0x465   :  { %v772_v31 = vmul.f32 %v695_v45, %v3354_v14 }
 0x466   :  { %v641_v33 = vpop.f32.mrf.mxu1 }
 0x467   :  { %v754_v39 = vmul.f32 %v641_v33, %v3071_v62  ;;  %v851_v41 = vsel %vm275_vm1, %v772_v31, 0.0 }
 0x469   :  { %2813 = vmatmul.msk.f32.gmra.mxu1 %vm496_vm7, %v475_v37  ;;  %2832 = vmatmul.msk.f32.gmra.mxu2 %vm496_vm7, %v494_v52  ;;  %v797_v42 = vsel %vm275_vm1, %v754_v39, 0.0 }
 0x46a   :  { %852 = vadd.xlane.f32.xlu1 %v851_v41  ;;  %798 = vadd.xlane.f32.xlu2 %v797_v42 }
 0x46c   :  { %v698_v14 = vpop.f32.mrf.mxu2 }
 0x46d   :  { %v773_v46 = vmul.f32 %v698_v14, %v3370_v20 }
 0x46e   :  { %v644_v47 = vpop.f32.mrf.mxu1 }
 0x46f   :  { %v854_v62 = vsel %vm275_vm1, %v773_v46, 0.0  ;;  %v755_v57 = vmul.f32 %v644_v47, %v3088_v2 }
 0x471   :  { %2833 = vmatmul.msk.f32.gmra.mxu2 %vm496_vm7, %v495_v53  ;;  %v800_v20 = vsel %vm275_vm1, %v755_v57, 0.0 }
 0x472   :  { %855 = vadd.xlane.f32.xlu2 %v854_v62 }
 0x474   :  { %v701_v54 = vpop.f32.mrf.mxu2 }
 0x475   :  { %v774_v58 = vmul.f32 %v701_v54, %v3378_v23 }
 0x476   :  { %v647_v63 = vpop.f32.mrf.mxu1 }
 0x477   :  { %v857_v1 = vsel %vm275_vm1, %v774_v58, 0.0  ;;  %v756_v5 = vmul.f32 %v647_v63, %v3114_v11 }
 0x478   :  { %858 = vadd.xlane.f32.xlu0 %v857_v1 }
 0x479   :  { %v803_v18 = vsel %vm275_vm1, %v756_v5, 0.0 }
 0x47a   :  { %801 = vadd.xlane.f32.xlu2 %v800_v20 }
 0x47c   :  { %v704_v6 = vpop.f32.mrf.mxu2 }
 0x47d   :  { %v775_v10 = vmul.f32 %v704_v6, %v3389_v29 }
 0x47e   :  { %v650_v12 = vpop.f32.mrf.mxu1 }
 0x47f   :  { %v860_v17 = vsel %vm275_vm1, %v775_v10, 0.0  ;;  %v757_v2 = vmul.f32 %v650_v12, %v3131_v15 }
 0x480   :  { %861 = vadd.xlane.f32.xlu1 %v860_v17  ;;  %804 = vadd.xlane.f32.xlu0 %v803_v18 }
 0x481   :  { %v806_v11 = vsel %vm275_vm1, %v757_v2, 0.0 }
 0x484   :  { %v707_v23 = vpop.f32.mrf.mxu2 }
 0x485   :  { %v776_v21 = vmul.f32 %v707_v23, %v3034_v50 }
 0x486   :  { %v653_v25 = vpop.f32.mrf.mxu1 }
 0x487   :  { %v863_v48 = vsel %vm275_vm1, %v776_v21, 0.0  ;;  %v758_v29 = vmul.f32 %v653_v25, %v3153_v22 }
 0x488   :  { %864 = vadd.xlane.f32.xlu2 %v863_v48  ;;  %807 = vadd.xlane.f32.xlu1 %v806_v11 }
 0x489   :  { %v809_v15 = vsel %vm275_vm1, %v758_v29, 0.0 }
 0x48c   :  { %v710_v27 = vpop.f32.mrf.mxu2 }
 0x48d   :  { %v777_v9 = vmul.f32 %v710_v27, %v3063_v59 }
 0x48e   :  { %v656_v45 = vpop.f32.mrf.mxu1 }
 0x48f   :  { %v866_v31 = vsel %vm275_vm1, %v777_v9, 0.0  ;;  %v759_v50 = vmul.f32 %v656_v45, %v3170_v26 }
 0x490   :  { %867 = vadd.xlane.f32.xlu0 %v866_v31  ;;  %810 = vadd.xlane.f32.xlu2 %v809_v15 }
 0x491   :  { %v812_v22 = vsel %vm275_vm1, %v759_v50, 0.0 }
 0x494   :  { %v713_v33 = vpop.f32.mrf.mxu2 }
 0x495   :  { %v778_v37 = vmul.f32 %v713_v33, %v3080_v0 }
 0x496   :  { %v659_v52 = vpop.f32.mrf.mxu1 }
 0x497   :  { %v869_v39 = vsel %vm275_vm1, %v778_v37, 0.0  ;;  %v760_v59 = vmul.f32 %v659_v52, %v3186_v30 }
 0x498   :  { %870 = vadd.xlane.f32.xlu1 %v869_v39  ;;  %813 = vadd.xlane.f32.xlu0 %v812_v22 }
 0x499   :  { %v815_v26 = vsel %vm275_vm1, %v760_v59, 0.0 }
 0x49c   :  { %v716_v41 = vpop.f32.mrf.mxu2 }
 0x49d   :  { %v779_v42 = vmul.f32 %v716_v41, %v3106_v8 }
 0x49e   :  { %v662_v14 = vpop.f32.mrf.mxu1 }
 0x49f   :  { %v872_v46 = vsel %vm275_vm1, %v779_v42, 0.0  ;;  %v761_v0 = vmul.f32 %v662_v14, %v3198_v32 }
 0x4a0   :  { %873 = vadd.xlane.f32.xlu2 %v872_v46  ;;  %816 = vadd.xlane.f32.xlu1 %v815_v26 }
 0x4a1   :  { %v818_v30 = vsel %vm275_vm1, %v761_v0, 0.0 }
 0x4a4   :  { %v719_v47 = vpop.f32.mrf.mxu2 }
 0x4a5   :  { %v780_v53 = vmul.f32 %v719_v47, %v3123_v13 }
 0x4a6   :  { %v665_v62 = vpop.f32.mrf.mxu1 }
 0x4a7   :  { %v875_v54 = vsel %vm275_vm1, %v780_v53, 0.0  ;;  %v762_v8 = vmul.f32 %v665_v62, %v3210_v34 }
 0x4a8   :  { %876 = vadd.xlane.f32.xlu0 %v875_v54  ;;  %819 = vadd.xlane.f32.xlu2 %v818_v30 }
 0x4a9   :  { %v821_v63 = vsel %vm275_vm1, %v762_v8, 0.0 }
 0x4ac   :  { %v722_v57 = vpop.f32.mrf.mxu2 }
 0x4ad   :  { %v781_v58 = vmul.f32 %v722_v57, %v3145_v19 }
 0x4ae   :  { %v668_v32 = vpop.f32.mrf.mxu1 }
 0x4af   :  { %v878_v13 = vsel %vm275_vm1, %v781_v58, 0.0  ;;  %v763_v19 = vmul.f32 %v668_v32, %v3218_v36 }
 0x4b0   :  { %879 = vadd.xlane.f32.xlu1 %v878_v13  ;;  %822 = vadd.xlane.f32.xlu0 %v821_v63 }
 0x4b1   :  { %v824_v36 = vsel %vm275_vm1, %v763_v19, 0.0 }
 0x4b4   :  { %v725_v34 = vpop.f32.mrf.mxu2 }
 0x4b5   :  { %v782_v1 = vmul.f32 %v725_v34, %v3162_v24 }
 0x4b6   :  { %v671_v20 = vpop.f32.mrf.mxu1 }
 0x4b7   :  { %v881_v5 = vsel %vm275_vm1, %v782_v1, 0.0  ;;  %v764_v24 = vmul.f32 %v671_v20, %v3226_v38 }
 0x4b8   :  { %882 = vadd.xlane.f32.xlu2 %v881_v5  ;;  %825 = vadd.xlane.f32.xlu1 %v824_v36 }
 0x4b9   :  { %v827_v38 = vsel %vm275_vm1, %v764_v24, 0.0 }
 0x4bc   :  { %v728_v6 = vpop.f32.mrf.mxu2 }
 0x4bd   :  { %v783_v10 = vmul.f32 %v728_v6, %v3178_v28 }
 0x4be   :  { %v674_v12 = vpop.f32.mrf.mxu1 }
 0x4bf   :  { %v884_v17 = vsel %vm275_vm1, %v783_v10, 0.0  ;;  %v765_v28 = vmul.f32 %v674_v12, %v3234_v40 }
 0x4c0   :  { %885 = vadd.xlane.f32.xlu0 %v884_v17  ;;  %828 = vadd.xlane.f32.xlu2 %v827_v38 }
 0x4c1   :  { %v830_v40 = vsel %vm275_vm1, %v765_v28, 0.0 }
 0x4c4   :  { %v731_v18 = vpop.f32.mrf.mxu2 }
 0x4c5   :  { %v784_v2 = vmul.f32 %v731_v18, %v3250_v44 }
 0x4c6   :  { %v677_v23 = vpop.f32.mrf.mxu1 }
 0x4c7   :  { %v887_v21 = vsel %vm275_vm1, %v784_v2, 0.0  ;;  %v766_v44 = vmul.f32 %v677_v23, %v3242_v43 }
 0x4c8   :  { %888 = vadd.xlane.f32.xlu1 %v887_v21  ;;  %831 = vadd.xlane.f32.xlu0 %v830_v40 }
 0x4c9   :  { %v833_v27 = vsel %vm275_vm1, %v766_v44, 0.0 }
 0x4cc   :  { %v734_v25 = vpop.f32.mrf.mxu2 }
 0x4cd   :  { %v785_v48 = vmul.f32 %v734_v25, %v3258_v49  ;;  %v793_v11 = vpop.xlane.xlu1 %792 }
 0x4ce   :  { %950 = vst.msk [vmem:[#allocation2 + $0x8] sm:$0xff] %vm908_vm8, %v793_v11  ;;  %v680_v29 = vpop.f32.mrf.mxu1 }
 0x4cf   :  { %v890_v43 = vsel %vm275_vm1, %v785_v48, 0.0  ;;  %v767_v49 = vmul.f32 %v680_v29, %v3261_v51 }
 0x4d0   :  { %891 = vadd.xlane.f32.xlu2 %v890_v43  ;;  %834 = vadd.xlane.f32.xlu1 %v833_v27 }
 0x4d1   :  { %v836_v51 = vsel %vm275_vm1, %v767_v49, 0.0 }
 0x4d3   :  { %v850_v9 = vpop.xlane.xlu0 %849 }
 0x4d4   :  { %v737_v45 = vpop.f32.mrf.mxu2  ;;  %969 = vst.msk [vmem:[#allocation2 + $0xa0] sm:$0xff] %vm908_vm8, %v850_v9 }
 0x4d5   :  { %v786_v31 = vmul.f32 %v737_v45, %v3287_v56  ;;  %v796_v15 = vpop.xlane.xlu1 %795  ;;  %v1067_v22 = vld [vmem:[#allocation2 + $0x2] sm:$0xff] }
 0x4d6   :  { %951 = vst.msk [vmem:[#allocation2 + $0x10] sm:$0xff] %vm908_vm8, %v796_v15  ;;  %v683_v33 = vpop.f32.mrf.mxu1  ;;  %v1028_v41 = vld [vmem:[#allocation2 + $0x1] sm:$0xff] }
 0x4d7   :  { %v893_v50 = vsel %vm275_vm1, %v786_v31, 0.0  ;;  %v768_v37 = vmul.f32 %v683_v33, %v3277_v55  ;;  %v1106_v42 = vld [vmem:[#allocation2 + $0x7] sm:$0xff] }
 0x4d8   :  { %894 = vadd.xlane.f32.xlu0 %v893_v50  ;;  %837 = vadd.xlane.f32.xlu2 %v836_v51  ;;  %v3775_v47 = vld [vmem:[#allocation2 + $0x8] sm:$0xff] }
 0x4d9   :  { %v839_v56 = vsel %vm275_vm1, %v768_v37, 0.0 }
 0x4db   :  { %v3768_v26 = vld [vmem:[#allocation2 + $0xa0] sm:$0xff] }
 0x4dc   :  { %v740_v11 = vpop.f32.mrf.mxu2 }
 0x4dd   :  { %v853_v52 = vpop.xlane.xlu1 %852  ;;  %v799_v39 = vpop.xlane.xlu2 %798  ;;  %v1029_v54 = vld [vmem:[#allocation2 + $0x9] sm:$0xff]  ;;  %v787_v49 = vmul.f32 %v740_v11, %v3297_v60 }
 0x4de   :  { %970 = vst.msk [vmem:[#allocation2 + $0xa8] sm:$0xff] %vm908_vm8, %v853_v52  ;;  %v1068_v58 = vld [vmem:[#allocation2 + $0xa] sm:$0xff]  ;;  %v686_v9 = vpop.f32.mrf.mxu1 }
 0x4df   :  { %952 = vst.msk [vmem:[#allocation2 + $0x18] sm:$0xff] %vm908_vm8, %v799_v39  ;;  %v1107_v19 = vld [vmem:[#allocation2 + $0xf] sm:$0xff]  ;;  %v896_v31 = vsel %vm275_vm1, %v787_v49, 0.0  ;;  %v769_v33 = vmul.f32 %v686_v9, %v3300_v61 }
 0x4e0   :  { %840 = vadd.xlane.f32.xlu0 %v839_v56  ;;  %v1147_v1 = vld [vmem:[#allocation2 + $0xe] sm:$0xff] }
 0x4e1   :  { %v3798_v36 = vld [vmem:[#allocation2 + $0x10] sm:$0xff]  ;;  %v842_v52 = vsel %vm275_vm1, %v769_v33, 0.0 }
 0x4e4   :  { %v743_v45 = vpop.f32.mrf.mxu2 }
 0x4e5   :  { %v856_v35 = vpop.xlane.xlu2 %855  ;;  %v1048_v0 = vld [vmem:[#allocation2 + $0xa1] sm:$0xff]  ;;  %v788_v51 = vmul.f32 %v743_v45, %v3327_v4 }
 0x4e6   :  { %971 = vst.msk [vmem:[#allocation2 + $0xb0] sm:$0xff] %vm908_vm8, %v856_v35  ;;  %v1087_v30 = vld [vmem:[#allocation2 + $0xa2] sm:$0xff]  ;;  %v1069_v24 = vld [vmem:[#allocation2 + $0x12] sm:$0xff]  ;;  %v689_v60 = vpop.f32.mrf.mxu1 }
 0x4e7   :  { %v1126_v32 = vld [vmem:[#allocation2 + $0xa7] sm:$0xff]  ;;  %v1108_v12 = vld [vmem:[#allocation2 + $0x17] sm:$0xff]  ;;  %v899_v37 = vsel %vm275_vm1, %v788_v51, 0.0  ;;  %v770_v56 = vmul.f32 %v689_v60, %v3317_v3 }
 0x4e8   :  { %v3793_v34 = vld [vmem:[#allocation2 + $0xa8] sm:$0xff]  ;;  %v3815_v18 = vld [vmem:[#allocation2 + $0x18] sm:$0xff] }
 0x4e9   :  { %1383 = vrot.lane.b32.xlu1 %v1067_v22, %s2849_s2  ;;  %v1166_v28 = vld [vmem:[#allocation2 + $0xa6] sm:$0xff]  ;;  %v1030_v48 = vld [vmem:[#allocation2 + $0x11] sm:$0xff]  ;;  %v845_v4 = vsel %vm275_vm1, %v770_v56, 0.0 }
 0x4ea   :  { %v1148_v27 = vld [vmem:[#allocation2 + $0x16] sm:$0xff] }
 0x4eb   :  { %v859_v59 = vpop.xlane.xlu0 %858 }
 0x4ec   :  { %972 = vst.msk [vmem:[#allocation2 + $0xb8] sm:$0xff] %vm908_vm8, %v859_v59 }
 0x4ed   :  { %v802_v55 = vpop.xlane.xlu2 %801 }
 0x4ee   :  { %953 = vst.msk [vmem:[#allocation2 + $0x20] sm:$0xff] %vm908_vm8, %v802_v55 }
 0x4f0   :  { %1227 = vrot.lane.b32.xlu2 %v1028_v41, %s2850_s5  ;;  %v1049_v41 = vld [vmem:[#allocation2 + $0xa9] sm:$0xff] }
 0x4f1   :  { %1539 = vrot.lane.b32.xlu1 %v1106_v42, %s2851_s16  ;;  %v746_v42 = vpop.f32.mrf.mxu2 }
 0x4f3   :  { %v862_v14 = vpop.xlane.xlu1 %861  ;;  %v805_v46 = vpop.xlane.xlu0 %804  ;;  %v1128_v45 = vld [vmem:[#allocation2 + $0xb7] sm:$0xff] }
 0x4f4   :  { %973 = vst.msk [vmem:[#allocation2 + $0xc0] sm:$0xff] %vm908_vm8, %v862_v14  ;;  %1733 = vrot.lane.b32.xlu0 %v3768_v26, %s2852_s17  ;;  %v3919_v51 = vld [vmem:[#allocation2 + $0xb8] sm:$0xff] }
 0x4f5   :  { %954 = vst.msk [vmem:[#allocation2 + $0x28] sm:$0xff] %vm908_vm8, %v805_v46  ;;  %v1149_v9 = vld [vmem:[#allocation2 + $0x1e] sm:$0xff] }
 0x4f8   :  { %1267 = vrot.lane.b32.xlu2 %v1048_v0, %s2850_s5 }
 0x4f9   :  { %1695 = vrot.lane.b32.xlu1 %v3775_v47, %s2852_s17 }
 0x4fb   :  { %v865_v53 = vpop.xlane.xlu2 %864  ;;  %v808_v62 = vpop.xlane.xlu1 %807  ;;  %v1051_v56 = vld [vmem:[#allocation2 + $0xb9] sm:$0xff] }
 0x4fc   :  { %974 = vst.msk [vmem:[#allocation2 + $0xc8] sm:$0xff] %vm908_vm8, %v865_v53  ;;  %1229 = vrot.lane.b32.xlu0 %v1029_v54, %s2850_s5  ;;  %v789_v53 = vmul.f32 %v746_v42, %v3337_v7  ;;  %v1090_v42 = vld [vmem:[#allocation2 + $0xba] sm:$0xff] }
 0x4fd   :  { %955 = vst.msk [vmem:[#allocation2 + $0x30] sm:$0xff] %vm908_vm8, %v808_v62 }
 0x500   :  { %1423 = vrot.lane.b32.xlu2 %v1087_v30, %s2849_s2  ;;  %v902_v30 = vsel %vm275_vm1, %v789_v53, 0.0 }
 0x501   :  { %2241 = vrot.lane.b32.xlu1 %v3768_v26, %s2853_s18 }
 0x503   :  { %v868_v8 = vpop.xlane.xlu0 %867  ;;  %v811_v57 = vpop.xlane.xlu2 %810 }
 0x504   :  { %975 = vst.msk [vmem:[#allocation2 + $0xd0] sm:$0xff] %vm908_vm8, %v868_v8  ;;  %1385 = vrot.lane.b32.xlu0 %v1068_v58, %s2849_s2  ;;  %v1127_v58 = vld [vmem:[#allocation2 + $0xaf] sm:$0xff] }
 0x505   :  { %956 = vst.msk [vmem:[#allocation2 + $0x38] sm:$0xff] %vm908_vm8, %v811_v57 }
 0x508   :  { %1579 = vrot.lane.b32.xlu2 %v1126_v32, %s2851_s16 }
 0x509   :  { %1813 = vrot.lane.b32.xlu1 %v1029_v54, %s2854_s6  ;;  %v1088_v54 = vld [vmem:[#allocation2 + $0xaa] sm:$0xff] }
 0x50b   :  { %v871_v13 = vpop.xlane.xlu1 %870  ;;  %v814_v63 = vpop.xlane.xlu0 %813 }
 0x50c   :  { %976 = vst.msk [vmem:[#allocation2 + $0xd8] sm:$0xff] %vm908_vm8, %v871_v13  ;;  %1541 = vrot.lane.b32.xlu0 %v1107_v19, %s2851_s16  ;;  %v3869_v13 = vld [vmem:[#allocation2 + $0xb0] sm:$0xff] }
 0x50d   :  { %957 = vst.msk [vmem:[#allocation2 + $0x40] sm:$0xff] %vm908_vm8, %v814_v63  ;;  %v989_v63 = vld [vmem:[#allocation2] sm:$0xff] }
 0x510   :  { %1735 = vrot.lane.b32.xlu2 %v3793_v34, %s2852_s17 }
 0x511   :  { %1969 = vrot.lane.b32.xlu1 %v1147_v1, %s2855_s7 }
 0x513   :  { %v874_v20 = vpop.xlane.xlu2 %873  ;;  %v817_v5 = vpop.xlane.xlu1 %816 }
 0x514   :  { %977 = vst.msk [vmem:[#allocation2 + $0xe0] sm:$0xff] %vm908_vm8, %v874_v20  ;;  %1697 = vrot.lane.b32.xlu0 %v3798_v36, %s2852_s17 }
 0x515   :  { %958 = vst.msk [vmem:[#allocation2 + $0x48] sm:$0xff] %vm908_vm8, %v817_v5 }
 0x518   :  { %1387 = vrot.lane.b32.xlu2 %v1069_v24, %s2849_s2 }
 0x519   :  { %2087 = vrot.lane.b32.xlu1 %v1107_v19, %s2856_s19 }
 0x51b   :  { %v877_v6 = vpop.xlane.xlu0 %876  ;;  %v820_v10 = vpop.xlane.xlu2 %819 }
 0x51c   :  { %978 = vst.msk [vmem:[#allocation2 + $0xe8] sm:$0xff] %vm908_vm8, %v877_v6  ;;  %1851 = vrot.lane.b32.xlu0 %v1048_v0, %s2854_s6  ;;  %v1167_v0 = vld [vmem:[#allocation2 + $0xae] sm:$0xff] }
 0x51d   :  { %959 = vst.msk [vmem:[#allocation2 + $0x50] sm:$0xff] %vm908_vm8, %v820_v10 }
 0x520   :  { %1543 = vrot.lane.b32.xlu2 %v1108_v12, %s2851_s16 }
 0x521   :  { %2205 = vrot.lane.b32.xlu1 %v3798_v36, %s2853_s18 }
 0x523   :  { %v880_v17 = vpop.xlane.xlu1 %879  ;;  %v823_v38 = vpop.xlane.xlu0 %822 }
 0x524   :  { %979 = vst.msk [vmem:[#allocation2 + $0xf0] sm:$0xff] %vm908_vm8, %v880_v17  ;;  %2007 = vrot.lane.b32.xlu0 %v1166_v28, %s2855_s7 }
 0x525   :  { %960 = vst.msk [vmem:[#allocation2 + $0x58] sm:$0xff] %vm908_vm8, %v823_v38  ;;  %v1050_v38 = vld [vmem:[#allocation2 + $0xb1] sm:$0xff] }
 0x528   :  { %1699 = vrot.lane.b32.xlu2 %v3815_v18, %s2852_s17 }
 0x52b   :  { %v883_v2 = vpop.xlane.xlu2 %882  ;;  %v826_v23 = vpop.xlane.xlu1 %825 }
 0x52c   :  { %980 = vst.msk [vmem:[#allocation2 + $0xf8] sm:$0xff] %vm908_vm8, %v883_v2  ;;  %2125 = vrot.lane.b32.xlu0 %v1126_v32, %s2856_s19  ;;  %v2640_v2 = vld [vmem:[%s5354_s3] sm:$0xff] }
 0x52d   :  { %961 = vst.msk [vmem:[#allocation2 + $0x60] sm:$0xff] %vm908_vm8, %v826_v23 }
 0x533   :  { %v886_v21 = vpop.xlane.xlu0 %885  ;;  %v829_v40 = vpop.xlane.xlu2 %828 }
 0x534   :  { %981 = vst.msk [vmem:[#allocation2 + $0x100] sm:$0xff] %vm908_vm8, %v886_v21  ;;  %2243 = vrot.lane.b32.xlu0 %v3793_v34, %s2853_s18 }
 0x535   :  { %962 = vst.msk [vmem:[#allocation2 + $0x68] sm:$0xff] %vm908_vm8, %v829_v40  ;;  %v1070_v40 = vld [vmem:[#allocation2 + $0x1a] sm:$0xff] }
 0x53b   :  { %v889_v44 = vpop.xlane.xlu1 %888  ;;  %v832_v25 = vpop.xlane.xlu0 %831 }
 0x53c   :  { %982 = vst.msk [vmem:[#allocation2 + $0x108] sm:$0xff] %vm908_vm8, %v889_v44  ;;  %1815 = vrot.lane.b32.xlu0 %v1030_v48, %s2854_s6 }
 0x53d   :  { %963 = vst.msk [vmem:[#allocation2 + $0x70] sm:$0xff] %vm908_vm8, %v832_v25 }
 0x543   :  { %v892_v29 = vpop.xlane.xlu2 %891  ;;  %v835_v43 = vpop.xlane.xlu1 %834 }
 0x544   :  { %983 = vst.msk [vmem:[#allocation2 + $0x110] sm:$0xff] %vm908_vm8, %v892_v29  ;;  %1971 = vrot.lane.b32.xlu0 %v1148_v27, %s2855_s7  ;;  %v1089_v29 = vld [vmem:[#allocation2 + $0xb2] sm:$0xff] }
 0x545   :  { %964 = vst.msk [vmem:[#allocation2 + $0x78] sm:$0xff] %vm908_vm8, %v835_v43  ;;  %v1109_v43 = vld [vmem:[#allocation2 + $0x1f] sm:$0xff] }
 0x54b   :  { %v895_v15 = vpop.xlane.xlu0 %894  ;;  %897 = vadd.xlane.f32.xlu1 %v896_v31  ;;  %v838_v50 = vpop.xlane.xlu2 %837  ;;  %v3910_v31 = vld [vmem:[#allocation2 + $0x20] sm:$0xff] }
 0x54c   :  { %984 = vst.msk [vmem:[#allocation2 + $0x118] sm:$0xff] %vm908_vm8, %v895_v15  ;;  %2089 = vrot.lane.b32.xlu0 %v1108_v12, %s2856_s19  ;;  %v1031_v12 = vld [vmem:[#allocation2 + $0x19] sm:$0xff] }
 0x54d   :  { %965 = vst.msk [vmem:[#allocation2 + $0x80] sm:$0xff] %vm908_vm8, %v838_v50 }
 0x551   :  { %900 = vadd.xlane.f32.xlu2 %v899_v37  ;;  %v1032_v37 = vld [vmem:[#allocation2 + $0x21] sm:$0xff] }
 0x553   :  { %v841_v39 = vpop.xlane.xlu0 %840  ;;  %843 = vadd.xlane.f32.xlu1 %v842_v52  ;;  %v1228_v14 = vpop.permute.xlu2 %1227  ;;  %v1168_v52 = vld [vmem:[#allocation2 + $0xb6] sm:$0xff] }
 0x554   :  { %966 = vst.msk [vmem:[#allocation2 + $0x88] sm:$0xff] %vm908_vm8, %v841_v39  ;;  %2207 = vrot.lane.b32.xlu0 %v3815_v18, %s2853_s18  ;;  %v2322_v20 = vsel %vm908_vm8, %v989_v63, %v1228_v14  ;;  %v1129_v63 = vld [vmem:[#allocation2 + $0xbf] sm:$0xff] }
 0x559   :  { %846 = vadd.xlane.f32.xlu2 %v845_v4  ;;  %v1071_v4 = vld [vmem:[#allocation2 + $0x22] sm:$0xff] }
 0x55b   :  { %v1384_v35 = vpop.permute.xlu1 %1383  ;;  %v3863_v57 = vpop.permute.xlu2 %1267 }
 0x55c   :  { %v2362_v5 = vsel %vm2361_vm9, %v2322_v20, %v1384_v35 }
 0x563   :  { %v1540_v61 = vpop.permute.xlu1 %1539  ;;  %v3873_v19 = vpop.permute.xlu2 %1423 }
 0x564   :  { %v2402_v6 = vsel %vm2401_vm10, %v2362_v5, %v1540_v61  ;;  %v3969_v5 = vld [vmem:[#allocation2 + $0xc0] sm:$0xff] }
 0x566   :  { %v3846_v22 = vpop.permute.xlu0 %1733 }
 0x56b   :  { %v1696_v59 = vpop.permute.xlu1 %1695  ;;  %v3891_v44 = vpop.permute.xlu2 %1579 }
 0x56c   :  { %1231 = vrot.lane.b32.xlu1 %v1030_v48, %s2850_s5  ;;  %v2442_v10 = vsel %vm2441_vm11, %v2402_v6, %v1696_v59  ;;  %v1150_v6 = vld [vmem:[#allocation2 + $0x26] sm:$0xff] }
 0x56e   :  { %v3849_v55 = vpop.permute.xlu0 %1229 }
 0x571   :  { %1853 = vrot.lane.b32.xlu2 %v1049_v41, %s2854_s6 }
 0x573   :  { %v3852_v3 = vpop.permute.xlu1 %2241  ;;  %v3904_v27 = vpop.permute.xlu2 %1735 }
 0x574   :  { %1269 = vrot.lane.b32.xlu1 %v1049_v41, %s2850_s5  ;;  %v2323_v41 = vsel %vm908_vm8, %v3775_v47, %v3849_v55  ;;  %v2641_v55 = vld [vmem:[%s5354_s3 + $0x8] sm:$0xff] }
 0x576   :  { %v3855_v46 = vpop.permute.xlu0 %1385 }
 0x577   :  { %v2363_v14 = vsel %vm2361_vm9, %v2323_v41, %v3855_v46 }
 0x579   :  { %2009 = vrot.lane.b32.xlu2 %v1167_v0, %s2855_s7  ;;  %v1110_v0 = vld [vmem:[#allocation2 + $0x27] sm:$0xff] }
 0x57b   :  { %v1814_v62 = vpop.permute.xlu1 %1813  ;;  %v3916_v50 = vpop.permute.xlu2 %1387 }
 0x57c   :  { %1425 = vrot.lane.b32.xlu1 %v1088_v54, %s2849_s2  ;;  %v2482_v17 = vsel %vm2481_vm12, %v2442_v10, %v1814_v62 }
 0x57e   :  { %903 = vadd.xlane.f32.xlu0 %v902_v30  ;;  %v3861_v8 = vpop.permute.xlu0 %1541 }
 0x57f   :  { %v2403_v53 = vsel %vm2401_vm10, %v2363_v14, %v3861_v8 }
 0x581   :  { %2127 = vrot.lane.b32.xlu2 %v1127_v58, %s2856_s19 }
 0x583   :  { %v1970_v32 = vpop.permute.xlu1 %1969  ;;  %v3926_v60 = vpop.permute.xlu2 %1543 }
 0x584   :  { %1581 = vrot.lane.b32.xlu1 %v1127_v58, %s2851_s16  ;;  %v2521_v28 = vsel %vm496_vm7, %v2482_v17, %v1970_v32  ;;  %v1169_v17 = vld [vmem:[#allocation2 + $0xbe] sm:$0xff] }
 0x586   :  { %v3867_v7 = vpop.permute.xlu0 %1697 }
 0x587   :  { %v2443_v62 = vsel %vm2441_vm11, %v2403_v53, %v3867_v7  ;;  %v749_v53 = vpop.f32.mrf.mxu2 }
 0x589   :  { %2245 = vrot.lane.b32.xlu2 %v3869_v13, %s2853_s18 }
 0x58b   :  { %v2088_v1 = vpop.permute.xlu1 %2087  ;;  %v3932_v35 = vpop.permute.xlu2 %1699 }
 0x58c   :  { %1737 = vrot.lane.b32.xlu1 %v3869_v13, %s2852_s17  ;;  %v2561_v23 = vsel %vm2560_vm13, %v2521_v28, %v2088_v1  ;;  %v3959_v1 = vld [vmem:[#allocation2 + $0x28] sm:$0xff] }
 0x58e   :  { %v3879_v24 = vpop.permute.xlu0 %1851 }
 0x591   :  { %1233 = vrot.lane.b32.xlu2 %v1031_v12, %s2850_s5 }
 0x592   :  { %1271 = vrot.lane.b32.xlu0 %v1050_v38, %s2850_s5 }
 0x593   :  { %v2206_v21 = vpop.permute.xlu1 %2205 }
 0x594   :  { %v2601_v25 = vsel %vm2600_vm14, %v2561_v23, %v2206_v21  ;;  %1389 = vrot.lane.b32.xlu1 %v1070_v40, %s2849_s2  ;;  %v2342_v21 = vsel %vm908_vm8, %v3768_v26, %v3863_v57  ;;  %v2660_v57 = vld [vmem:[%s5354_s3 + $0xa0] sm:$0xff] }
 0x595   :  { %v2679_v48 = vmul.f32 %v2640_v2, %v2601_v25  ;;  %v1072_v2 = vld [vmem:[#allocation2 + $0x2a] sm:$0xff]  ;;  %v2382_v25 = vsel %vm2361_vm9, %v2342_v21, %v3873_v19 }
 0x596   :  { %v3895_v11 = vpop.permute.xlu0 %2007 }
 0x597   :  { %2719 = vst.msk [vmem:[%s5355_s10] sm:$0xff] %vm2718_vm15, %v2679_v48  ;;  %v2422_v48 = vsel %vm2401_vm10, %v2382_v25, %v3891_v44 }
 0x599   :  { %1817 = vrot.lane.b32.xlu2 %v1031_v12, %s2854_s6  ;;  %v1033_v12 = vld [vmem:[#allocation2 + $0x29] sm:$0xff] }
 0x59a   :  { %1427 = vrot.lane.b32.xlu0 %v1089_v29, %s2849_s2  ;;  %v1111_v29 = vld [vmem:[#allocation2 + $0x2f] sm:$0xff] }
 0x59c   :  { %1545 = vrot.lane.b32.xlu1 %v1109_v43, %s2851_s16 }
 0x59e   :  { %v3906_v49 = vpop.permute.xlu0 %2125 }
 0x5a1   :  { %1973 = vrot.lane.b32.xlu2 %v1149_v9, %s2855_s7 }
 0x5a2   :  { %1583 = vrot.lane.b32.xlu0 %v1128_v45, %s2851_s16 }
 0x5a4   :  { %1701 = vrot.lane.b32.xlu1 %v3910_v31, %s2852_s17 }
 0x5a6   :  { %v3914_v15 = vpop.permute.xlu0 %2243 }
 0x5a9   :  { %2091 = vrot.lane.b32.xlu2 %v1109_v43, %s2856_s19  ;;  %v2462_v43 = vsel %vm2441_vm11, %v2422_v48, %v3904_v27  ;;  %v1152_v48 = vld [vmem:[#allocation2 + $0x36] sm:$0xff] }
 0x5aa   :  { %1739 = vrot.lane.b32.xlu0 %v3919_v51, %s2852_s17 }
 0x5ac   :  { %1855 = vrot.lane.b32.xlu1 %v1050_v38, %s2854_s6 }
 0x5ae   :  { %v1816_v33 = vpop.permute.xlu0 %1815 }
 0x5af   :  { %v2483_v54 = vsel %vm2481_vm12, %v2443_v62, %v1816_v33 }
 0x5b1   :  { %2209 = vrot.lane.b32.xlu2 %v3910_v31, %s2853_s18 }
 0x5b2   :  { %1235 = vrot.lane.b32.xlu0 %v1032_v37, %s2850_s5 }
 0x5b4   :  { %2011 = vrot.lane.b32.xlu1 %v1168_v52, %s2855_s7 }
 0x5b6   :  { %v1972_v39 = vpop.permute.xlu0 %1971 }
 0x5b7   :  { %v2522_v47 = vsel %vm496_vm7, %v2483_v54, %v1972_v39 }
 0x5b9   :  { %1273 = vrot.lane.b32.xlu2 %v1051_v56, %s2850_s5 }
 0x5ba   :  { %1391 = vrot.lane.b32.xlu0 %v1071_v4, %s2849_s2  ;;  %v1052_v4 = vld [vmem:[#allocation2 + $0xc1] sm:$0xff] }
 0x5bc   :  { %2129 = vrot.lane.b32.xlu1 %v1128_v45, %s2856_s19 }
 0x5be   :  { %v898_v61 = vpop.xlane.xlu1 %897  ;;  %v2090_v59 = vpop.permute.xlu0 %2089 }
 0x5bf   :  { %985 = vst.msk [vmem:[#allocation2 + $0x120] sm:$0xff] %vm908_vm8, %v898_v61  ;;  %v2562_v46 = vsel %vm2560_vm13, %v2522_v47, %v2090_v59  ;;  %v1151_v61 = vld [vmem:[#allocation2 + $0x2e] sm:$0xff]  ;;  %v790_v47 = vmul.f32 %v749_v53, %v3362_v16 }
 0x5c0   :  { %v4047_v16 = vld [vmem:[#allocation2 + $0xc8] sm:$0xff] }
 0x5c1   :  { %1429 = vrot.lane.b32.xlu2 %v1090_v42, %s2849_s2  ;;  %v1170_v42 = vld [vmem:[#allocation2 + $0xc6] sm:$0xff] }
 0x5c2   :  { %1547 = vrot.lane.b32.xlu0 %v1110_v0, %s2851_s16 }
 0x5c4   :  { %v901_v30 = vpop.xlane.xlu2 %900  ;;  %2247 = vrot.lane.b32.xlu1 %v3919_v51, %s2853_s18 }
 0x5c5   :  { %986 = vst.msk [vmem:[#allocation2 + $0x128] sm:$0xff] %vm908_vm8, %v901_v30  ;;  %v4031_v30 = vld [vmem:[#allocation2 + $0xc7] sm:$0xff] }
 0x5c6   :  { %v2208_v8 = vpop.permute.xlu0 %2207  ;;  %v844_v58 = vpop.xlane.xlu1 %843 }
 0x5c7   :  { %v2602_v32 = vsel %vm2600_vm14, %v2562_v46, %v2208_v8  ;;  %967 = vst.msk [vmem:[#allocation2 + $0x90] sm:$0xff] %vm908_vm8, %v844_v58  ;;  %v905_v58 = vsel %vm275_vm1, %v790_v47, 0.0  ;;  %v2661_v47 = vld [vmem:[%s5354_s3 + $0xa8] sm:$0xff] }
 0x5c8   :  { %v2680_v7 = vmul.f32 %v2641_v55, %v2602_v32 }
 0x5c9   :  { %1585 = vrot.lane.b32.xlu2 %v1129_v63, %s2851_s16 }
 0x5ca   :  { %2720 = vst.msk [vmem:[%s5355_s10 + $0x8] sm:$0xff] %vm2718_vm15, %v2680_v7  ;;  %1703 = vrot.lane.b32.xlu0 %v3959_v1, %s2852_s17 }
 0x5cc   :  { %1819 = vrot.lane.b32.xlu1 %v1032_v37, %s2854_s6  ;;  %v847_v20 = vpop.xlane.xlu2 %846  ;;  %v4009_v37 = vld [vmem:[#allocation2 + $0x30] sm:$0xff] }
 0x5cd   :  { %968 = vst.msk [vmem:[#allocation2 + $0x98] sm:$0xff] %vm908_vm8, %v847_v20  ;;  %v2642_v20 = vld [vmem:[%s5354_s3 + $0x10] sm:$0xff] }
 0x5d1   :  { %1741 = vrot.lane.b32.xlu2 %v3969_v5, %s2852_s17 }
 0x5d2   :  { %1857 = vrot.lane.b32.xlu0 %v1051_v56, %s2854_s6 }
 0x5d4   :  { %1975 = vrot.lane.b32.xlu1 %v1150_v6, %s2855_s7  ;;  %v1854_v10 = vpop.permute.xlu2 %1853 }
 0x5d5   :  { %v2502_v9 = vsel %vm2481_vm12, %v2462_v43, %v1854_v10 }
 0x5d9   :  { %1237 = vrot.lane.b32.xlu2 %v1033_v12, %s2850_s5 }
 0x5da   :  { %2013 = vrot.lane.b32.xlu0 %v1169_v17, %s2855_s7 }
 0x5dc   :  { %2093 = vrot.lane.b32.xlu1 %v1110_v0, %s2856_s19  ;;  %v2010_v38 = vpop.permute.xlu2 %2009 }
 0x5dd   :  { %v2541_v26 = vsel %vm496_vm7, %v2502_v9, %v2010_v38 }
 0x5de   :  { %v1232_v28 = vpop.permute.xlu1 %1231 }
 0x5df   :  { %v2324_v54 = vsel %vm908_vm8, %v3798_v36, %v1232_v28  ;;  %v1034_v28 = vld [vmem:[#allocation2 + $0x31] sm:$0xff] }
 0x5e0   :  { %v2364_v55 = vsel %vm2361_vm9, %v2324_v54, %v3916_v50  ;;  %v4053_v50 = vld [vmem:[#allocation2 + $0xc9] sm:$0xff] }
 0x5e1   :  { %1393 = vrot.lane.b32.xlu2 %v1072_v2, %s2849_s2  ;;  %v2404_v36 = vsel %vm2401_vm10, %v2364_v55, %v3926_v60  ;;  %v1092_v2 = vld [vmem:[#allocation2 + $0xca] sm:$0xff] }
 0x5e2   :  { %2131 = vrot.lane.b32.xlu0 %v1129_v63, %s2856_s19  ;;  %v2444_v7 = vsel %vm2441_vm11, %v2404_v36, %v3932_v35  ;;  %v1074_v36 = vld [vmem:[#allocation2 + $0x3a] sm:$0xff] }
 0x5e4   :  { %2211 = vrot.lane.b32.xlu1 %v3959_v1, %s2853_s18  ;;  %v2128_v23 = vpop.permute.xlu2 %2127 }
 0x5e5   :  { %v2581_v19 = vsel %vm2560_vm13, %v2541_v26, %v2128_v23 }
 0x5e6   :  { %v3985_v40 = vpop.permute.xlu1 %1269 }
 0x5e9   :  { %1549 = vrot.lane.b32.xlu2 %v1111_v29, %s2851_s16 }
 0x5ea   :  { %2249 = vrot.lane.b32.xlu0 %v3969_v5, %s2853_s18 }
 0x5ec   :  { %v2246_v44 = vpop.permute.xlu2 %2245 }
 0x5ed   :  { %v2621_v45 = vsel %vm2600_vm14, %v2581_v19, %v2246_v44  ;;  %v4092_v19 = vld [vmem:[#allocation2 + $0xd0] sm:$0xff] }
 0x5ee   :  { %v2699_v33 = vmul.f32 %v2660_v57, %v2621_v45  ;;  %v4003_v27 = vpop.permute.xlu1 %1425  ;;  %v4088_v57 = vld [vmem:[#allocation2 + $0x37] sm:$0xff] }
 0x5f0   :  { %2739 = vst.msk [vmem:[%s5355_s10 + $0xa0] sm:$0xff] %vm2718_vm15, %v2699_v33 }
 0x5f1   :  { %v904_v52 = vpop.xlane.xlu0 %903  ;;  %1705 = vrot.lane.b32.xlu2 %v4009_v37, %s2852_s17 }
 0x5f2   :  { %987 = vst.msk [vmem:[#allocation2 + $0x130] sm:$0xff] %vm908_vm8, %v904_v52  ;;  %1821 = vrot.lane.b32.xlu0 %v1033_v12, %s2854_s6  ;;  %v1091_v52 = vld [vmem:[#allocation2 + $0xc2] sm:$0xff] }
 0x5f4   :  { %v4015_v39 = vpop.permute.xlu2 %1233 }
 0x5f6   :  { %v4017_v56 = vpop.permute.xlu1 %1581 }
 0x5f9   :  { %1859 = vrot.lane.b32.xlu2 %v1052_v4, %s2854_s6 }
 0x5fa   :  { %1977 = vrot.lane.b32.xlu0 %v1151_v61, %s2855_s7  ;;  %v4104_v61 = vld [vmem:[#allocation2 + $0x38] sm:$0xff] }
 0x5fc   :  { %v1818_v59 = vpop.permute.xlu2 %1817 }
 0x5fd   :  { %v2484_v63 = vsel %vm2481_vm12, %v2444_v7, %v1818_v59 }
 0x5fe   :  { %v4021_v41 = vpop.permute.xlu1 %1737 }
 0x601   :  { %2015 = vrot.lane.b32.xlu2 %v1170_v42, %s2855_s7  ;;  %v4110_v42 = vld [vmem:[#allocation2 + $0x39] sm:$0xff] }
 0x602   :  { %2095 = vrot.lane.b32.xlu0 %v1111_v29, %s2856_s19  ;;  %v4079_v29 = vld [vmem:[#allocation2 + $0xcf] sm:$0xff] }
 0x604   :  { %v4025_v14 = vpop.permute.xlu0 %1271  ;;  %v1974_v0 = vpop.permute.xlu2 %1973 }
 0x605   :  { %v2523_v60 = vsel %vm496_vm7, %v2484_v63, %v1974_v0 }
 0x606   :  { %v4027_v62 = vpop.permute.xlu1 %1389 }
 0x609   :  { %2133 = vrot.lane.b32.xlu2 %v4031_v30, %s2856_s19 }
 0x60a   :  { %2213 = vrot.lane.b32.xlu0 %v4009_v37, %s2853_s18 }
 0x60c   :  { %v4040_v46 = vpop.permute.xlu0 %1427  ;;  %v2092_v8 = vpop.permute.xlu2 %2091 }
 0x60d   :  { %v2563_v6 = vsel %vm2560_vm13, %v2523_v60, %v2092_v8 }
 0x60e   :  { %906 = vadd.xlane.f32.xlu1 %v905_v58  ;;  %v4045_v32 = vpop.permute.xlu1 %1545  ;;  %v1054_v58 = vld [vmem:[#allocation2 + $0xd1] sm:$0xff] }
 0x611   :  { %2251 = vrot.lane.b32.xlu2 %v4047_v16, %s2853_s18 }
 0x612   :  { %1277 = vrot.lane.b32.xlu0 %v4053_v50, %s2850_s5 }
 0x614   :  { %v4063_v10 = vpop.permute.xlu0 %1583  ;;  %v2210_v35 = vpop.permute.xlu2 %2209 }
 0x615   :  { %v2603_v12 = vsel %vm2600_vm14, %v2563_v6, %v2210_v35 }
 0x616   :  { %v2681_v17 = vmul.f32 %v2642_v20, %v2603_v12  ;;  %v4066_v38 = vpop.permute.xlu1 %1701  ;;  %v4144_v20 = vld [vmem:[#allocation2 + $0x3f] sm:$0xff] }
 0x618   :  { %2721 = vst.msk [vmem:[%s5355_s10 + $0x10] sm:$0xff] %vm2718_vm15, %v2681_v17  ;;  %v1132_v17 = vld [vmem:[#allocation2 + $0xd7] sm:$0xff] }
 0x619   :  { %1823 = vrot.lane.b32.xlu2 %v1034_v28, %s2854_s6 }
 0x61a   :  { %1433 = vrot.lane.b32.xlu0 %v1092_v2, %s2849_s2  ;;  %v4152_v2 = vld [vmem:[#allocation2 + $0x40] sm:$0xff] }
 0x61c   :  { %v4074_v23 = vpop.permute.xlu0 %1739  ;;  %v4076_v21 = vpop.permute.xlu2 %1273 }
 0x61e   :  { %v1856_v25 = vpop.permute.xlu1 %1855 }
 0x621   :  { %1979 = vrot.lane.b32.xlu2 %v1152_v48, %s2855_s7 }
 0x622   :  { %1589 = vrot.lane.b32.xlu0 %v4079_v29, %s2851_s16 }
 0x624   :  { %v4083_v43 = vpop.permute.xlu0 %1235  ;;  %v4085_v9 = vpop.permute.xlu2 %1429 }
 0x626   :  { %v2012_v26 = vpop.permute.xlu1 %2011 }
 0x627   :  { %1275 = vrot.lane.b32.xlu1 %v1052_v4, %s2850_s5  ;;  %v2343_v4 = vsel %vm908_vm8, %v3793_v34, %v3985_v40 }
 0x628   :  { %v2383_v59 = vsel %vm2361_vm9, %v2343_v4, %v4003_v27 }
 0x629   :  { %2097 = vrot.lane.b32.xlu2 %v4088_v57, %s2856_s19  ;;  %v2423_v0 = vsel %vm2401_vm10, %v2383_v59, %v4017_v56 }
 0x62a   :  { %1745 = vrot.lane.b32.xlu0 %v4092_v19, %s2852_s17  ;;  %v2463_v53 = vsel %vm2441_vm11, %v2423_v0, %v4021_v41 }
 0x62b   :  { %v2503_v34 = vsel %vm2481_vm12, %v2463_v53, %v1856_v25 }
 0x62c   :  { %v4096_v44 = vpop.permute.xlu0 %1391  ;;  %v4098_v45 = vpop.permute.xlu2 %1585  ;;  %v2542_v27 = vsel %vm496_vm7, %v2503_v34, %v2012_v26 }
 0x62e   :  { %v2130_v33 = vpop.permute.xlu1 %2129 }
 0x62f   :  { %1431 = vrot.lane.b32.xlu1 %v1091_v52, %s2849_s2  ;;  %v2582_v56 = vsel %vm2560_vm13, %v2542_v27, %v2130_v33  ;;  %v1073_v33 = vld [vmem:[#allocation2 + $0x32] sm:$0xff]  ;;  %v2325_v52 = vsel %vm908_vm8, %v3815_v18, %v4015_v39 }
 0x630   :  { %v2365_v4 = vsel %vm2361_vm9, %v2325_v52, %v4027_v62  ;;  %v2643_v62 = vld [vmem:[%s5354_s3 + $0x18] sm:$0xff] }
 0x631   :  { %2215 = vrot.lane.b32.xlu2 %v4104_v61, %s2853_s18  ;;  %v2405_v59 = vsel %vm2401_vm10, %v2365_v4, %v4045_v32  ;;  %v2344_v32 = vsel %vm908_vm8, %v3869_v13, %v4025_v14  ;;  %v1172_v13 = vld [vmem:[#allocation2 + $0xd6] sm:$0xff]  ;;  %v2345_v4 = vsel %vm908_vm8, %v3919_v51, %v4076_v21 }
 0x632   :  { %1241 = vrot.lane.b32.xlu0 %v4110_v42, %s2850_s5  ;;  %v2445_v0 = vsel %vm2441_vm11, %v2405_v59, %v4066_v38  ;;  %v2384_v38 = vsel %vm2361_vm9, %v2344_v32, %v4040_v46  ;;  %v1171_v59 = vld [vmem:[#allocation2 + $0xce] sm:$0xff]  ;;  %v2663_v21 = vld [vmem:[%s5354_s3 + $0xb8] sm:$0xff] }
 0x634   :  { %v4119_v40 = vpop.permute.xlu0 %1547  ;;  %v4121_v54 = vpop.permute.xlu2 %1741 }
 0x636   :  { %v2248_v55 = vpop.permute.xlu1 %2247 }
 0x637   :  { %v2622_v8 = vsel %vm2600_vm14, %v2582_v56, %v2248_v55  ;;  %1587 = vrot.lane.b32.xlu1 %v4031_v30, %s2851_s16  ;;  %v1093_v30 = vld [vmem:[#allocation2 + $0xd2] sm:$0xff]  ;;  %v2424_v55 = vsel %vm2401_vm10, %v2384_v38, %v4063_v10 }
 0x638   :  { %v2700_v41 = vmul.f32 %v2661_v47, %v2622_v8  ;;  %v2662_v10 = vld [vmem:[%s5354_s3 + $0xb0] sm:$0xff]  ;;  %v1055_v38 = vld [vmem:[#allocation2 + $0xd9] sm:$0xff] }
 0x639   :  { %1279 = vrot.lane.b32.xlu2 %v1054_v58, %s2850_s5 }
 0x63a   :  { %2740 = vst.msk [vmem:[%s5355_s10 + $0xa8] sm:$0xff] %vm2718_vm15, %v2700_v41  ;;  %1397 = vrot.lane.b32.xlu0 %v1074_v36, %s2849_s2  ;;  %v1036_v41 = vld [vmem:[#allocation2 + $0x41] sm:$0xff] }
 0x63c   :  { %v4137_v7 = vpop.permute.xlu0 %1703  ;;  %v4139_v63 = vpop.permute.xlu2 %1237 }
 0x63e   :  { %v1820_v60 = vpop.permute.xlu1 %1819 }
 0x63f   :  { %1743 = vrot.lane.b32.xlu1 %v4047_v16, %s2852_s17  ;;  %v2485_v53 = vsel %vm2481_vm12, %v2445_v0, %v1820_v60  ;;  %v4227_v0 = vld [vmem:[#allocation2 + $0x48] sm:$0xff] }
 0x641   :  { %1435 = vrot.lane.b32.xlu2 %v1093_v30, %s2849_s2 }
 0x642   :  { %1553 = vrot.lane.b32.xlu0 %v4144_v20, %s2851_s16 }
 0x644   :  { %v1858_v6 = vpop.permute.xlu0 %1857  ;;  %v4148_v35 = vpop.permute.xlu2 %1393 }
 0x646   :  { %v1976_v12 = vpop.permute.xlu1 %1975 }
 0x647   :  { %1239 = vrot.lane.b32.xlu1 %v1034_v28, %s2850_s5  ;;  %v4162_v28 = vld [vmem:[#allocation2 + $0xd8] sm:$0xff]  ;;  %v2524_v39 = vsel %vm496_vm7, %v2485_v53, %v1976_v12 }
 0x649   :  { %1591 = vrot.lane.b32.xlu2 %v1132_v17, %s2851_s16 }
 0x64a   :  { %1709 = vrot.lane.b32.xlu0 %v4152_v2, %s2852_s17 }
 0x64c   :  { %v2014_v25 = vpop.permute.xlu0 %2013  ;;  %v4156_v48 = vpop.permute.xlu2 %1549 }
 0x64e   :  { %v2094_v26 = vpop.permute.xlu1 %2093 }
 0x64f   :  { %1395 = vrot.lane.b32.xlu1 %v1073_v33, %s2849_s2  ;;  %v2564_v27 = vsel %vm2560_vm13, %v2524_v39, %v2094_v26  ;;  %v1114_v26 = vld [vmem:[#allocation2 + $0x47] sm:$0xff] }
 0x651   :  { %1747 = vrot.lane.b32.xlu2 %v4162_v28, %s2852_s17 }
 0x652   :  { %1863 = vrot.lane.b32.xlu0 %v1054_v58, %s2854_s6  ;;  %v2464_v58 = vsel %vm2441_vm11, %v2424_v55, %v4074_v23 }
 0x653   :  { %v2504_v14 = vsel %vm2481_vm12, %v2464_v58, %v1858_v6  ;;  %v1075_v6 = vld [vmem:[#allocation2 + $0x42] sm:$0xff] }
 0x654   :  { %v2132_v34 = vpop.permute.xlu0 %2131  ;;  %v4174_v18 = vpop.permute.xlu2 %1705  ;;  %v2543_v46 = vsel %vm496_vm7, %v2504_v14, %v2014_v25  ;;  %v1173_v58 = vld [vmem:[#allocation2 + $0xde] sm:$0xff] }
 0x655   :  { %v2583_v23 = vsel %vm2560_vm13, %v2543_v46, %v2132_v34 }
 0x656   :  { %v2212_v47 = vpop.permute.xlu1 %2211 }
 0x657   :  { %v2604_v56 = vsel %vm2600_vm14, %v2564_v27, %v2212_v47  ;;  %1551 = vrot.lane.b32.xlu1 %v4088_v57, %s2851_s16 }
 0x658   :  { %v2682_v8 = vmul.f32 %v2643_v62, %v2604_v56 }
 0x659   :  { %1243 = vrot.lane.b32.xlu2 %v1036_v41, %s2850_s5 }
 0x65a   :  { %2722 = vst.msk [vmem:[%s5355_s10 + $0x18] sm:$0xff] %vm2718_vm15, %v2682_v8  ;;  %2019 = vrot.lane.b32.xlu0 %v1172_v13, %s2855_s7 }
 0x65c   :  { %v2250_v57 = vpop.permute.xlu0 %2249  ;;  %v1860_v36 = vpop.permute.xlu2 %1859 }
 0x65d   :  { %v2623_v60 = vsel %vm2600_vm14, %v2583_v23, %v2250_v57 }
 0x65e   :  { %v2701_v30 = vmul.f32 %v2662_v10, %v2623_v60  ;;  %v1133_v10 = vld [vmem:[#allocation2 + $0xdf] sm:$0xff] }
 0x65f   :  { %1707 = vrot.lane.b32.xlu1 %v4104_v61, %s2852_s17  ;;  %v1153_v60 = vld [vmem:[#allocation2 + $0x3e] sm:$0xff] }
 0x660   :  { %2741 = vst.msk [vmem:[%s5355_s10 + $0xb0] sm:$0xff] %vm2718_vm15, %v2701_v30 }
 0x661   :  { %1399 = vrot.lane.b32.xlu2 %v1075_v6, %s2849_s2  ;;  %v4291_v6 = vld [vmem:[#allocation2 + $0xe0] sm:$0xff] }
 0x662   :  { %2137 = vrot.lane.b32.xlu0 %v1132_v17, %s2856_s19  ;;  %v2385_v17 = vsel %vm2361_vm9, %v2345_v4, %v4085_v9  ;;  %v1037_v4 = vld [vmem:[#allocation2 + $0x49] sm:$0xff] }
 0x664   :  { %v1822_v12 = vpop.permute.xlu0 %1821  ;;  %v2016_v25 = vpop.permute.xlu2 %2015 }
 0x667   :  { %1861 = vrot.lane.b32.xlu1 %v4053_v50, %s2854_s6  ;;  %v2425_v50 = vsel %vm2401_vm10, %v2385_v17, %v4098_v45  ;;  %v1095_v17 = vld [vmem:[#allocation2 + $0xe2] sm:$0xff] }
 0x668   :  { %v2465_v53 = vsel %vm2441_vm11, %v2425_v50, %v4121_v54  ;;  %v2326_v54 = vsel %vm908_vm8, %v3910_v31, %v4083_v43  ;;  %v1154_v31 = vld [vmem:[#allocation2 + $0x46] sm:$0xff] }
 0x669   :  { %1555 = vrot.lane.b32.xlu2 %v1114_v26, %s2851_s16  ;;  %v2505_v34 = vsel %vm2481_vm12, %v2465_v53, %v1860_v36  ;;  %v2366_v27 = vsel %vm2361_vm9, %v2326_v54, %v4096_v44  ;;  %v2644_v44 = vld [vmem:[%s5354_s3 + $0x20] sm:$0xff]  ;;  %v2327_v36 = vsel %vm908_vm8, %v3959_v1, %v4139_v63 }
 0x66a   :  { %2255 = vrot.lane.b32.xlu0 %v4162_v28, %s2853_s18  ;;  %v2544_v51 = vsel %vm496_vm7, %v2505_v34, %v2016_v25  ;;  %v2406_v47 = vsel %vm2401_vm10, %v2366_v27, %v4119_v40  ;;  %v2367_v30 = vsel %vm2361_vm9, %v2327_v36, %v4148_v35  ;;  %v4297_v25 = vld [vmem:[#allocation2 + $0xe1] sm:$0xff]  ;;  %v4388_v36 = vld [vmem:[#allocation2 + $0x58] sm:$0xff] }
 0x66b   :  { %v2446_v56 = vsel %vm2441_vm11, %v2406_v47, %v4137_v7  ;;  %v2645_v35 = vld [vmem:[%s5354_s3 + $0x28] sm:$0xff]  ;;  %v1094_v27 = vld [vmem:[#allocation2 + $0xda] sm:$0xff]  ;;  %v4350_v47 = vld [vmem:[#allocation2 + $0x50] sm:$0xff] }
 0x66c   :  { %v1978_v33 = vpop.permute.xlu0 %1977  ;;  %v2134_v52 = vpop.permute.xlu2 %2133  ;;  %v2486_v43 = vsel %vm2481_vm12, %v2446_v56, %v1822_v12  ;;  %v4356_v56 = vld [vmem:[#allocation2 + $0x51] sm:$0xff] }
 0x66d   :  { %v2584_v9 = vsel %vm2560_vm13, %v2544_v51, %v2134_v52  ;;  %v4329_v51 = vld [vmem:[#allocation2 + $0xe7] sm:$0xff] }
 0x66f   :  { %2017 = vrot.lane.b32.xlu1 %v1171_v59, %s2855_s7 }
 0x671   :  { %1711 = vrot.lane.b32.xlu2 %v4227_v0, %s2852_s17 }
 0x672   :  { %1827 = vrot.lane.b32.xlu0 %v1036_v41, %s2854_s6 }
 0x674   :  { %v2096_v45 = vpop.permute.xlu0 %2095  ;;  %v2252_v39 = vpop.permute.xlu2 %2251 }
 0x675   :  { %v2624_v62 = vsel %vm2600_vm14, %v2584_v9, %v2252_v39 }
 0x676   :  { %v2702_v32 = vmul.f32 %v2663_v21, %v2624_v62  ;;  %v4341_v62 = vld [vmem:[#allocation2 + $0xe8] sm:$0xff] }
 0x677   :  { %2135 = vrot.lane.b32.xlu1 %v4079_v29, %s2856_s19  ;;  %v2525_v29 = vsel %vm496_vm7, %v2486_v43, %v1978_v33 }
 0x678   :  { %2742 = vst.msk [vmem:[%s5355_s10 + $0xb8] sm:$0xff] %vm2718_vm15, %v2702_v32  ;;  %v2565_v40 = vsel %vm2560_vm13, %v2525_v29, %v2096_v45  ;;  %v1115_v45 = vld [vmem:[#allocation2 + $0x4f] sm:$0xff] }
 0x679   :  { %1865 = vrot.lane.b32.xlu2 %v1055_v38, %s2854_s6  ;;  %v1057_v29 = vld [vmem:[#allocation2 + $0xe9] sm:$0xff] }
 0x67a   :  { %1983 = vrot.lane.b32.xlu0 %v1154_v31, %s2855_s7 }
 0x67c   :  { %v2214_v55 = vpop.permute.xlu0 %2213  ;;  %v1824_v8 = vpop.permute.xlu2 %1823 }
 0x67d   :  { %v2605_v41 = vsel %vm2600_vm14, %v2565_v40, %v2214_v55  ;;  %v1077_v40 = vld [vmem:[#allocation2 + $0x52] sm:$0xff] }
 0x67e   :  { %v2683_v7 = vmul.f32 %v2644_v44, %v2605_v41  ;;  %v1096_v41 = vld [vmem:[#allocation2 + $0xea] sm:$0xff] }
 0x67f   :  { %2253 = vrot.lane.b32.xlu1 %v4092_v19, %s2853_s18 }
 0x680   :  { %2723 = vst.msk [vmem:[%s5355_s10 + $0x20] sm:$0xff] %vm2718_vm15, %v2683_v7 }
 0x681   :  { %v907_v13 = vpop.xlane.xlu1 %906  ;;  %2021 = vrot.lane.b32.xlu2 %v1173_v58, %s2855_s7  ;;  %v4378_v58 = vld [vmem:[#allocation2 + $0x57] sm:$0xff] }
 0x682   :  { %988 = vst.msk [vmem:[#allocation2 + $0x138] sm:$0xff] %vm908_vm8, %v907_v13  ;;  %2101 = vrot.lane.b32.xlu0 %v1114_v26, %s2856_s19 }
 0x684   :  { %v4274_v14 = vpop.permute.xlu0 %1277  ;;  %v1980_v46 = vpop.permute.xlu2 %1979 }
 0x687   :  { %1825 = vrot.lane.b32.xlu1 %v4110_v42, %s2854_s6  ;;  %v2407_v42 = vsel %vm2401_vm10, %v2367_v30, %v4156_v48 }
 0x688   :  { %v2447_v12 = vsel %vm2441_vm11, %v2407_v42, %v4174_v18  ;;  %v1076_v42 = vld [vmem:[#allocation2 + $0x4a] sm:$0xff] }
 0x689   :  { %2139 = vrot.lane.b32.xlu2 %v1133_v10, %s2856_s19  ;;  %v2487_v1 = vsel %vm2481_vm12, %v2447_v12, %v1824_v8  ;;  %v4395_v12 = vld [vmem:[#allocation2 + $0xf0] sm:$0xff] }
 0x68a   :  { %2219 = vrot.lane.b32.xlu0 %v4227_v0, %s2853_s18  ;;  %v2526_v63 = vsel %vm496_vm7, %v2487_v1, %v1980_v46 }
 0x68c   :  { %v4281_v23 = vpop.permute.xlu0 %1433  ;;  %v2098_v57 = vpop.permute.xlu2 %2097 }
 0x68d   :  { %v2566_v48 = vsel %vm2560_vm13, %v2526_v63, %v2098_v57 }
 0x68f   :  { %1981 = vrot.lane.b32.xlu1 %v1153_v60, %s2855_s7 }
 0x691   :  { %2257 = vrot.lane.b32.xlu2 %v4291_v6, %s2853_s18 }
 0x692   :  { %1283 = vrot.lane.b32.xlu0 %v4297_v25, %s2850_s5 }
 0x694   :  { %v4307_v26 = vpop.permute.xlu0 %1589  ;;  %v2216_v18 = vpop.permute.xlu2 %2215 }
 0x695   :  { %v2606_v33 = vsel %vm2600_vm14, %v2566_v48, %v2216_v18  ;;  %v2347_v48 = vsel %vm908_vm8, %v4047_v16, %v4274_v14  ;;  %v2665_v14 = vld [vmem:[%s5354_s3 + $0xc8] sm:$0xff] }
 0x696   :  { %v2684_v52 = vmul.f32 %v2645_v35, %v2606_v33  ;;  %v2387_v18 = vsel %vm2361_vm9, %v2347_v48, %v4281_v23 }
 0x697   :  { %2099 = vrot.lane.b32.xlu1 %v4144_v20, %s2856_s19  ;;  %v1155_v20 = vld [vmem:[#allocation2 + $0x4e] sm:$0xff]  ;;  %v2427_v33 = vsel %vm2401_vm10, %v2387_v18, %v4307_v26 }
 0x698   :  { %2724 = vst.msk [vmem:[%s5355_s10 + $0x28] sm:$0xff] %vm2718_vm15, %v2684_v52  ;;  %v1039_v52 = vld [vmem:[#allocation2 + $0x59] sm:$0xff] }
 0x699   :  { %v4316_v59 = vpop.permute.xlu1 %1275  ;;  %1829 = vrot.lane.b32.xlu2 %v1037_v4, %s2854_s6 }
 0x69a   :  { %1439 = vrot.lane.b32.xlu0 %v1095_v17, %s2849_s2  ;;  %v2346_v48 = vsel %vm908_vm8, %v3969_v5, %v4316_v59 }
 0x69c   :  { %v4320_v50 = vpop.permute.xlu0 %1745  ;;  %v4322_v53 = vpop.permute.xlu2 %1279 }
 0x69f   :  { %2217 = vrot.lane.b32.xlu1 %v4152_v2, %s2853_s18 }
 0x6a1   :  { %v4326_v34 = vpop.permute.xlu1 %1431  ;;  %1985 = vrot.lane.b32.xlu2 %v1155_v20, %s2855_s7  ;;  %v1175_v20 = vld [vmem:[#allocation2 + $0xee] sm:$0xff] }
 0x6a2   :  { %1595 = vrot.lane.b32.xlu0 %v4329_v51, %s2851_s16  ;;  %v2386_v18 = vsel %vm2361_vm9, %v2346_v48, %v4326_v34  ;;  %v2647_v48 = vld [vmem:[%s5354_s3 + $0x38] sm:$0xff] }
 0x6a4   :  { %v4333_v21 = vpop.permute.xlu0 %1241  ;;  %v4335_v9 = vpop.permute.xlu2 %1435 }
 0x6a7   :  { %1281 = vrot.lane.b32.xlu1 %v1055_v38, %s2850_s5 }
 0x6a9   :  { %v4338_v39 = vpop.permute.xlu1 %1587  ;;  %2103 = vrot.lane.b32.xlu2 %v1115_v45, %s2856_s19 }
 0x6aa   :  { %1751 = vrot.lane.b32.xlu0 %v4341_v62, %s2852_s17 }
 0x6ac   :  { %v4345_v54 = vpop.permute.xlu0 %1397  ;;  %v4347_v32 = vpop.permute.xlu2 %1591 }
 0x6af   :  { %1437 = vrot.lane.b32.xlu1 %v1094_v27, %s2849_s2 }
 0x6b1   :  { %v4352_v38 = vpop.permute.xlu1 %1743  ;;  %2221 = vrot.lane.b32.xlu2 %v4350_v47, %s2853_s18 }
 0x6b2   :  { %1247 = vrot.lane.b32.xlu0 %v4356_v56, %s2850_s5 }
 0x6b4   :  { %v4360_v31 = vpop.permute.xlu0 %1553  ;;  %v4362_v43 = vpop.permute.xlu2 %1747 }
 0x6b7   :  { %1593 = vrot.lane.b32.xlu1 %v1133_v10, %s2851_s16  ;;  %v1135_v10 = vld [vmem:[#allocation2 + $0xef] sm:$0xff] }
 0x6b9   :  { %v4365_v44 = vpop.permute.xlu1 %1239  ;;  %1285 = vrot.lane.b32.xlu2 %v1057_v29, %s2850_s5 }
 0x6ba   :  { %1403 = vrot.lane.b32.xlu0 %v1077_v40, %s2849_s2  ;;  %v1078_v40 = vld [vmem:[#allocation2 + $0x5a] sm:$0xff] }
 0x6bc   :  { %v4369_v55 = vpop.permute.xlu0 %1709  ;;  %v4371_v8 = vpop.permute.xlu2 %1243 }
 0x6bf   :  { %1749 = vrot.lane.b32.xlu1 %v4291_v6, %s2852_s17 }
 0x6c1   :  { %v4375_v7 = vpop.permute.xlu1 %1395  ;;  %1441 = vrot.lane.b32.xlu2 %v1096_v41, %s2849_s2 }
 0x6c2   :  { %1559 = vrot.lane.b32.xlu0 %v4378_v58, %s2851_s16 }
 0x6c4   :  { %v1864_v13 = vpop.permute.xlu0 %1863  ;;  %v4382_v46 = vpop.permute.xlu2 %1399 }
 0x6c7   :  { %1245 = vrot.lane.b32.xlu1 %v1037_v4, %s2850_s5  ;;  %v2467_v4 = vsel %vm2441_vm11, %v2427_v33, %v4320_v50 }
 0x6c8   :  { %v2507_v27 = vsel %vm2481_vm12, %v2467_v4, %v1864_v13  ;;  %v2426_v4 = vsel %vm2401_vm10, %v2386_v18, %v4338_v39 }
 0x6c9   :  { %v4385_v57 = vpop.permute.xlu1 %1551  ;;  %1597 = vrot.lane.b32.xlu2 %v1135_v10, %s2851_s16 }
 0x6ca   :  { %1715 = vrot.lane.b32.xlu0 %v4388_v36, %s2852_s17 }
 0x6cc   :  { %v2020_v60 = vpop.permute.xlu0 %2019  ;;  %v4392_v30 = vpop.permute.xlu2 %1555 }
 0x6cd   :  { %v2546_v16 = vsel %vm496_vm7, %v2507_v27, %v2020_v60  ;;  %v1174_v27 = vld [vmem:[#allocation2 + $0xe6] sm:$0xff] }
 0x6cf   :  { %1401 = vrot.lane.b32.xlu1 %v1076_v42, %s2849_s2  ;;  %v1117_v42 = vld [vmem:[#allocation2 + $0x5f] sm:$0xff] }
 0x6d1   :  { %v4397_v1 = vpop.permute.xlu1 %1707  ;;  %1753 = vrot.lane.b32.xlu2 %v4395_v12, %s2852_s17 }
 0x6d2   :  { %1869 = vrot.lane.b32.xlu0 %v1057_v29, %s2854_s6 }
 0x6d4   :  { %v2138_v63 = vpop.permute.xlu0 %2137  ;;  %v4402_v35 = vpop.permute.xlu2 %1711 }
 0x6d5   :  { %v2586_v23 = vsel %vm2560_vm13, %v2546_v16, %v2138_v63 }
 0x6d7   :  { %1557 = vrot.lane.b32.xlu1 %v1115_v45, %s2851_s16 }
 0x6d9   :  { %v1862_v17 = vpop.permute.xlu1 %1861  ;;  %1249 = vrot.lane.b32.xlu2 %v1039_v52, %s2850_s5 }
 0x6da   :  { %2025 = vrot.lane.b32.xlu0 %v1175_v20, %s2855_s7  ;;  %v2466_v20 = vsel %vm2441_vm11, %v2426_v4, %v4352_v38 }
 0x6db   :  { %v2506_v5 = vsel %vm2481_vm12, %v2466_v20, %v1862_v17 }
 0x6dc   :  { %v2256_v26 = vpop.permute.xlu0 %2255  ;;  %v1866_v45 = vpop.permute.xlu2 %1865 }
 0x6dd   :  { %v2626_v50 = vsel %vm2600_vm14, %v2586_v23, %v2256_v26  ;;  %v2666_v26 = vld [vmem:[%s5354_s3 + $0xd0] sm:$0xff] }
 0x6de   :  { %v2704_v29 = vmul.f32 %v2665_v14, %v2626_v50 }
 0x6df   :  { %1713 = vrot.lane.b32.xlu1 %v4350_v47, %s2852_s17 }
 0x6e0   :  { %2744 = vst.msk [vmem:[%s5355_s10 + $0xc8] sm:$0xff] %vm2718_vm15, %v2704_v29 }
 0x6e1   :  { %v2018_v41 = vpop.permute.xlu1 %2017  ;;  %1405 = vrot.lane.b32.xlu2 %v1078_v40, %s2849_s2 }
 0x6e2   :  { %2143 = vrot.lane.b32.xlu0 %v1135_v10, %s2856_s19  ;;  %v2545_v34 = vsel %vm496_vm7, %v2506_v5, %v2018_v41 }
 0x6e4   :  { %v1828_v13 = vpop.permute.xlu0 %1827  ;;  %v2022_v60 = vpop.permute.xlu2 %2021 }
 0x6e7   :  { %1867 = vrot.lane.b32.xlu1 %v4297_v25, %s2854_s6  ;;  %v2348_v25 = vsel %vm908_vm8, %v4092_v19, %v4322_v53  ;;  %v2664_v19 = vld [vmem:[%s5354_s3 + $0xc0] sm:$0xff] }
 0x6e8   :  { %v2388_v16 = vsel %vm2361_vm9, %v2348_v25, %v4335_v9  ;;  %v4458_v53 = vld [vmem:[#allocation2 + $0x60] sm:$0xff] }
 0x6e9   :  { %v2136_v63 = vpop.permute.xlu1 %2135  ;;  %1561 = vrot.lane.b32.xlu2 %v1117_v42, %s2851_s16  ;;  %v2428_v59 = vsel %vm2401_vm10, %v2388_v16, %v4347_v32  ;;  %v4517_v16 = vld [vmem:[#allocation2 + $0xf7] sm:$0xff] }
 0x6ea   :  { %2261 = vrot.lane.b32.xlu0 %v4395_v12, %s2853_s18  ;;  %v2468_v39 = vsel %vm2441_vm11, %v2428_v59, %v4362_v43  ;;  %v2585_v9 = vsel %vm2560_vm13, %v2545_v34, %v2136_v63  ;;  %v4491_v63 = vld [vmem:[#allocation2 + $0xf1] sm:$0xff]  ;;  %v2328_v59 = vsel %vm908_vm8, %v4009_v37, %v4365_v44 }
 0x6eb   :  { %v2508_v17 = vsel %vm2481_vm12, %v2468_v39, %v1866_v45  ;;  %v2330_v39 = vsel %vm908_vm8, %v4152_v2, %v4371_v8  ;;  %v2646_v2 = vld [vmem:[%s5354_s3 + $0x30] sm:$0xff]  ;;  %v4547_v8 = vld [vmem:[#allocation2 + $0xf8] sm:$0xff] }
 0x6ec   :  { %v1984_v10 = vpop.permute.xlu0 %1983  ;;  %v2140_v33 = vpop.permute.xlu2 %2139  ;;  %v2547_v14 = vsel %vm496_vm7, %v2508_v17, %v2022_v60  ;;  %v2370_v37 = vsel %vm2361_vm9, %v2330_v39, %v4382_v46 }
 0x6ed   :  { %v2587_v43 = vsel %vm2560_vm13, %v2547_v14, %v2140_v33 }
 0x6ef   :  { %2023 = vrot.lane.b32.xlu1 %v1174_v27, %s2855_s7 }
 0x6f1   :  { %v2254_v38 = vpop.permute.xlu1 %2253  ;;  %1717 = vrot.lane.b32.xlu2 %v4458_v53, %s2852_s17 }
 0x6f2   :  { %v2625_v32 = vsel %vm2600_vm14, %v2585_v9, %v2254_v38  ;;  %1833 = vrot.lane.b32.xlu0 %v1039_v52, %s2854_s6  ;;  %v2329_v52 = vsel %vm908_vm8, %v4104_v61, %v4333_v21  ;;  %v1156_v38 = vld [vmem:[#allocation2 + $0x56] sm:$0xff] }
 0x6f3   :  { %v2703_v23 = vmul.f32 %v2664_v19, %v2625_v32  ;;  %v2369_v41 = vsel %vm2361_vm9, %v2329_v52, %v4345_v54  ;;  %v1157_v54 = vld [vmem:[#allocation2 + $0x5e] sm:$0xff] }
 0x6f4   :  { %v2102_v50 = vpop.permute.xlu0 %2101  ;;  %v2258_v29 = vpop.permute.xlu2 %2257  ;;  %v2409_v60 = vsel %vm2401_vm10, %v2369_v41, %v4360_v31  ;;  %v4554_v32 = vld [vmem:[#allocation2 + $0xf9] sm:$0xff] }
 0x6f5   :  { %2743 = vst.msk [vmem:[%s5355_s10 + $0xc0] sm:$0xff] %vm2718_vm15, %v2703_v23  ;;  %v2627_v45 = vsel %vm2600_vm14, %v2587_v43, %v2258_v29  ;;  %v2449_v61 = vsel %vm2441_vm11, %v2409_v60, %v4369_v55  ;;  %v1098_v60 = vld [vmem:[#allocation2 + $0xfa] sm:$0xff] }
 0x6f6   :  { %v2705_v40 = vmul.f32 %v2666_v26, %v2627_v45 }
 0x6f7   :  { %2141 = vrot.lane.b32.xlu1 %v4329_v51, %s2856_s19  ;;  %v2489_v51 = vsel %vm2481_vm12, %v2449_v61, %v1828_v13  ;;  %v1176_v13 = vld [vmem:[#allocation2 + $0xf6] sm:$0xff] }
 0x6f8   :  { %2745 = vst.msk [vmem:[%s5355_s10 + $0xd0] sm:$0xff] %vm2718_vm15, %v2705_v40  ;;  %v2528_v31 = vsel %vm496_vm7, %v2489_v51, %v1984_v10  ;;  %v1040_v40 = vld [vmem:[#allocation2 + $0x61] sm:$0xff] }
 0x6f9   :  { %v1826_v21 = vpop.permute.xlu1 %1825  ;;  %1871 = vrot.lane.b32.xlu2 %v4491_v63, %s2854_s6  ;;  %v2568_v18 = vsel %vm2560_vm13, %v2528_v31, %v2102_v50  ;;  %v4591_v51 = vld [vmem:[#allocation2 + $0xff] sm:$0xff] }
 0x6fa   :  { %1989 = vrot.lane.b32.xlu0 %v1157_v54, %s2855_s7 }
 0x6fc   :  { %v2220_v33 = vpop.permute.xlu0 %2219  ;;  %v1830_v4 = vpop.permute.xlu2 %1829 }
 0x6fd   :  { %v2608_v55 = vsel %vm2600_vm14, %v2568_v18, %v2220_v33  ;;  %v1118_v18 = vld [vmem:[#allocation2 + $0x67] sm:$0xff] }
 0x6fe   :  { %v2686_v25 = vmul.f32 %v2647_v48, %v2608_v55 }
 0x6ff   :  { %2259 = vrot.lane.b32.xlu1 %v4341_v62, %s2853_s18 }
 0x700   :  { %2726 = vst.msk [vmem:[%s5355_s10 + $0x38] sm:$0xff] %vm2718_vm15, %v2686_v25 }
 0x701   :  { %v1982_v10 = vpop.permute.xlu1 %1981  ;;  %2027 = vrot.lane.b32.xlu2 %v1176_v13, %s2855_s7  ;;  %v1097_v13 = vld [vmem:[#allocation2 + $0xf2] sm:$0xff] }
 0x702   :  { %2107 = vrot.lane.b32.xlu0 %v1117_v42, %s2856_s19  ;;  %v2368_v42 = vsel %vm2361_vm9, %v2328_v59, %v4375_v7  ;;  %v2410_v7 = vsel %vm2401_vm10, %v2370_v37, %v4392_v30 }
 0x704   :  { %v4513_v20 = vpop.permute.xlu0 %1283  ;;  %v1986_v27 = vpop.permute.xlu2 %1985 }
 0x707   :  { %1831 = vrot.lane.b32.xlu1 %v4356_v56, %s2854_s6  ;;  %v2408_v56 = vsel %vm2401_vm10, %v2368_v42, %v4385_v57  ;;  %v1060_v42 = vld [vmem:[#allocation2 + $0x101] sm:$0xff] }
 0x708   :  { %v2448_v9 = vsel %vm2441_vm11, %v2408_v56, %v4397_v1  ;;  %v2450_v1 = vsel %vm2441_vm11, %v2410_v7, %v4402_v35  ;;  %v2648_v35 = vld [vmem:[%s5354_s3 + $0x40] sm:$0xff]  ;;  %v1080_v56 = vld [vmem:[#allocation2 + $0x6a] sm:$0xff] }
 0x709   :  { %v2100_v5 = vpop.permute.xlu1 %2099  ;;  %2145 = vrot.lane.b32.xlu2 %v4517_v16, %s2856_s19  ;;  %v2488_v44 = vsel %vm2481_vm12, %v2448_v9, %v1826_v21  ;;  %v2490_v30 = vsel %vm2481_vm12, %v2450_v1, %v1830_v4  ;;  %v4604_v4 = vld [vmem:[#allocation2 + $0x100] sm:$0xff]  ;;  %v4652_v1 = vld [vmem:[#allocation2 + $0x70] sm:$0xff] }
 0x70a   :  { %2225 = vrot.lane.b32.xlu0 %v4458_v53, %s2853_s18  ;;  %v2527_v57 = vsel %vm496_vm7, %v2488_v44, %v1982_v10  ;;  %v2529_v23 = vsel %vm496_vm7, %v2490_v30, %v1986_v27  ;;  %v4613_v10 = vld [vmem:[#allocation2 + $0x68] sm:$0xff] }
 0x70b   :  { %v2567_v46 = vsel %vm2560_vm13, %v2527_v57, %v2100_v5  ;;  %v4619_v27 = vld [vmem:[#allocation2 + $0x69] sm:$0xff] }
 0x70c   :  { %v4528_v34 = vpop.permute.xlu0 %1439  ;;  %v2104_v19 = vpop.permute.xlu2 %2103  ;;  %v1138_v57 = vld [vmem:[#allocation2 + $0x107] sm:$0xff] }
 0x70d   :  { %v2569_v43 = vsel %vm2560_vm13, %v2529_v23, %v2104_v19  ;;  %v1079_v30 = vld [vmem:[#allocation2 + $0x62] sm:$0xff] }
 0x70f   :  { %1987 = vrot.lane.b32.xlu1 %v1156_v38, %s2855_s7  ;;  %v1099_v38 = vld [vmem:[#allocation2 + $0x102] sm:$0xff] }
 0x711   :  { %v2218_v17 = vpop.permute.xlu1 %2217  ;;  %2263 = vrot.lane.b32.xlu2 %v4547_v8, %s2853_s18 }
 0x712   :  { %v2607_v14 = vsel %vm2600_vm14, %v2567_v46, %v2218_v17  ;;  %1289 = vrot.lane.b32.xlu0 %v4554_v32, %s2850_s5 }
 0x713   :  { %v2685_v26 = vmul.f32 %v2646_v2, %v2607_v14  ;;  %v4659_v14 = vld [vmem:[#allocation2 + $0x108] sm:$0xff] }
 0x714   :  { %v4565_v50 = vpop.permute.xlu0 %1595  ;;  %v2222_v29 = vpop.permute.xlu2 %2221 }
 0x715   :  { %2725 = vst.msk [vmem:[%s5355_s10 + $0x30] sm:$0xff] %vm2718_vm15, %v2685_v26  ;;  %v2609_v45 = vsel %vm2600_vm14, %v2569_v43, %v2222_v29  ;;  %v2350_v43 = vsel %vm908_vm8, %v4291_v6, %v4513_v20  ;;  %v2668_v20 = vld [vmem:[%s5354_s3 + $0xe0] sm:$0xff] }
 0x716   :  { %v2687_v52 = vmul.f32 %v2648_v35, %v2609_v45  ;;  %v2390_v29 = vsel %vm2361_vm9, %v2350_v43, %v4528_v34 }
 0x717   :  { %2105 = vrot.lane.b32.xlu1 %v4378_v58, %s2856_s19  ;;  %v1158_v58 = vld [vmem:[#allocation2 + $0x66] sm:$0xff]  ;;  %v2430_v45 = vsel %vm2401_vm10, %v2390_v29, %v4565_v50 }
 0x718   :  { %2727 = vst.msk [vmem:[%s5355_s10 + $0x40] sm:$0xff] %vm2718_vm15, %v2687_v52  ;;  %v1042_v52 = vld [vmem:[#allocation2 + $0x71] sm:$0xff] }
 0x719   :  { %v4578_v41 = vpop.permute.xlu1 %1281  ;;  %1835 = vrot.lane.b32.xlu2 %v1040_v40, %s2854_s6 }
 0x71a   :  { %1445 = vrot.lane.b32.xlu0 %v1098_v60, %s2849_s2  ;;  %v2349_v43 = vsel %vm908_vm8, %v4162_v28, %v4578_v41 }
 0x71c   :  { %v4582_v61 = vpop.permute.xlu0 %1751  ;;  %v4584_v21 = vpop.permute.xlu2 %1285 }
 0x71f   :  { %2223 = vrot.lane.b32.xlu1 %v4388_v36, %s2853_s18 }
 0x721   :  { %v4588_v54 = vpop.permute.xlu1 %1437  ;;  %1991 = vrot.lane.b32.xlu2 %v1158_v58, %s2855_s7  ;;  %v1178_v58 = vld [vmem:[#allocation2 + $0x106] sm:$0xff] }
 0x722   :  { %1601 = vrot.lane.b32.xlu0 %v4591_v51, %s2851_s16  ;;  %v2389_v29 = vsel %vm2361_vm9, %v2349_v43, %v4588_v54  ;;  %v2650_v43 = vld [vmem:[%s5354_s3 + $0x50] sm:$0xff] }
 0x724   :  { %v4595_v31 = vpop.permute.xlu0 %1247  ;;  %v4597_v48 = vpop.permute.xlu2 %1441 }
 0x727   :  { %1287 = vrot.lane.b32.xlu1 %v4491_v63, %s2850_s5 }
 0x729   :  { %v4601_v33 = vpop.permute.xlu1 %1593  ;;  %2109 = vrot.lane.b32.xlu2 %v1118_v18, %s2856_s19 }
 0x72a   :  { %1757 = vrot.lane.b32.xlu0 %v4604_v4, %s2852_s17 }
 0x72c   :  { %v4608_v55 = vpop.permute.xlu0 %1403  ;;  %v4610_v25 = vpop.permute.xlu2 %1597 }
 0x72f   :  { %1443 = vrot.lane.b32.xlu1 %v1097_v13, %s2849_s2 }
 0x731   :  { %v4615_v63 = vpop.permute.xlu1 %1749  ;;  %2227 = vrot.lane.b32.xlu2 %v4613_v10, %s2853_s18 }
 0x732   :  { %1253 = vrot.lane.b32.xlu0 %v4619_v27, %s2850_s5 }
 0x734   :  { %v4623_v5 = vpop.permute.xlu0 %1559  ;;  %v4625_v59 = vpop.permute.xlu2 %1753 }
 0x737   :  { %1599 = vrot.lane.b32.xlu1 %v4517_v16, %s2851_s16  ;;  %v4642_v16 = vld [vmem:[#allocation2 + $0x6f] sm:$0xff] }
 0x739   :  { %v4629_v19 = vpop.permute.xlu1 %1245  ;;  %1291 = vrot.lane.b32.xlu2 %v1060_v42, %s2850_s5 }
 0x73a   :  { %1409 = vrot.lane.b32.xlu0 %v1080_v56, %s2849_s2  ;;  %v1081_v56 = vld [vmem:[#allocation2 + $0x72] sm:$0xff] }
 0x73c   :  { %v4633_v39 = vpop.permute.xlu0 %1715  ;;  %v4635_v9 = vpop.permute.xlu2 %1249 }
 0x73f   :  { %1755 = vrot.lane.b32.xlu1 %v4547_v8, %s2852_s17 }
 0x741   :  { %v4639_v37 = vpop.permute.xlu1 %1401  ;;  %1447 = vrot.lane.b32.xlu2 %v1099_v38, %s2849_s2 }
 0x742   :  { %1565 = vrot.lane.b32.xlu0 %v4642_v16, %s2851_s16 }
 0x744   :  { %v1870_v44 = vpop.permute.xlu0 %1869  ;;  %v4646_v7 = vpop.permute.xlu2 %1405 }
 0x747   :  { %1251 = vrot.lane.b32.xlu1 %v1040_v40, %s2850_s5  ;;  %v2470_v40 = vsel %vm2441_vm11, %v2430_v45, %v4582_v61 }
 0x748   :  { %v2510_v13 = vsel %vm2481_vm12, %v2470_v40, %v1870_v44  ;;  %v2429_v40 = vsel %vm2401_vm10, %v2389_v29, %v4601_v33 }
 0x749   :  { %v4649_v2 = vpop.permute.xlu1 %1557  ;;  %1603 = vrot.lane.b32.xlu2 %v1138_v57, %s2851_s16 }
 0x74a   :  { %1721 = vrot.lane.b32.xlu0 %v4652_v1, %s2852_s17 }
 0x74c   :  { %v2026_v46 = vpop.permute.xlu0 %2025  ;;  %v4656_v17 = vpop.permute.xlu2 %1561 }
 0x74d   :  { %v2549_v6 = vsel %vm496_vm7, %v2510_v13, %v2026_v46  ;;  %v1177_v13 = vld [vmem:[#allocation2 + $0xfe] sm:$0xff] }
 0x74f   :  { %1407 = vrot.lane.b32.xlu1 %v1079_v30, %s2849_s2  ;;  %v1120_v30 = vld [vmem:[#allocation2 + $0x77] sm:$0xff] }
 0x751   :  { %v4661_v23 = vpop.permute.xlu1 %1713  ;;  %1759 = vrot.lane.b32.xlu2 %v4659_v14, %s2852_s17 }
 0x752   :  { %1875 = vrot.lane.b32.xlu0 %v1060_v42, %s2854_s6 }
 0x754   :  { %v2144_v26 = vpop.permute.xlu0 %2143  ;;  %v4666_v35 = vpop.permute.xlu2 %1717 }
 0x755   :  { %v2589_v34 = vsel %vm2560_vm13, %v2549_v6, %v2144_v26 }
 0x757   :  { %1563 = vrot.lane.b32.xlu1 %v1118_v18, %s2851_s16 }
 0x759   :  { %v1868_v60 = vpop.permute.xlu1 %1867  ;;  %1255 = vrot.lane.b32.xlu2 %v1042_v52, %s2850_s5 }
 0x75a   :  { %2031 = vrot.lane.b32.xlu0 %v1178_v58, %s2855_s7  ;;  %v2469_v58 = vsel %vm2441_vm11, %v2429_v40, %v4615_v63 }
 0x75b   :  { %v2509_v28 = vsel %vm2481_vm12, %v2469_v58, %v1868_v60 }
 0x75c   :  { %v2262_v50 = vpop.permute.xlu0 %2261  ;;  %v1872_v18 = vpop.permute.xlu2 %1871 }
 0x75d   :  { %v2629_v61 = vsel %vm2600_vm14, %v2589_v34, %v2262_v50  ;;  %v2669_v50 = vld [vmem:[%s5354_s3 + $0xe8] sm:$0xff] }
 0x75e   :  { %v2707_v42 = vmul.f32 %v2668_v20, %v2629_v61 }
 0x75f   :  { %1719 = vrot.lane.b32.xlu1 %v4613_v10, %s2852_s17 }
 0x760   :  { %2747 = vst.msk [vmem:[%s5355_s10 + $0xe0] sm:$0xff] %vm2718_vm15, %v2707_v42 }
 0x761   :  { %v2024_v38 = vpop.permute.xlu1 %2023  ;;  %1411 = vrot.lane.b32.xlu2 %v1081_v56, %s2849_s2 }
 0x762   :  { %2149 = vrot.lane.b32.xlu0 %v1138_v57, %s2856_s19  ;;  %v2548_v54 = vsel %vm496_vm7, %v2509_v28, %v2024_v38 }
 0x764   :  { %v1834_v44 = vpop.permute.xlu0 %1833  ;;  %v2028_v46 = vpop.permute.xlu2 %2027 }
 0x767   :  { %1873 = vrot.lane.b32.xlu1 %v4554_v32, %s2854_s6  ;;  %v2351_v32 = vsel %vm908_vm8, %v4341_v62, %v4584_v21  ;;  %v2667_v62 = vld [vmem:[%s5354_s3 + $0xd8] sm:$0xff] }
 0x768   :  { %v2391_v6 = vsel %vm2361_vm9, %v2351_v32, %v4597_v48  ;;  %v4722_v21 = vld [vmem:[#allocation2 + $0x78] sm:$0xff] }
 0x769   :  { %v2142_v26 = vpop.permute.xlu1 %2141  ;;  %1567 = vrot.lane.b32.xlu2 %v1120_v30, %s2851_s16  ;;  %v2431_v41 = vsel %vm2401_vm10, %v2391_v6, %v4610_v25  ;;  %v4779_v6 = vld [vmem:[#allocation2 + $0x10f] sm:$0xff] }
 0x76a   :  { %2267 = vrot.lane.b32.xlu0 %v4659_v14, %s2853_s18  ;;  %v2471_v33 = vsel %vm2441_vm11, %v2431_v41, %v4625_v59  ;;  %v2588_v48 = vsel %vm2560_vm13, %v2548_v54, %v2142_v26  ;;  %v4755_v26 = vld [vmem:[#allocation2 + $0x109] sm:$0xff]  ;;  %v2331_v41 = vsel %vm908_vm8, %v4227_v0, %v4629_v19 }
 0x76b   :  { %v2511_v60 = vsel %vm2481_vm12, %v2471_v33, %v1872_v18  ;;  %v1159_v19 = vld [vmem:[#allocation2 + $0x6e] sm:$0xff] }
 0x76c   :  { %v1990_v57 = vpop.permute.xlu0 %1989  ;;  %v2146_v45 = vpop.permute.xlu2 %2145  ;;  %v2550_v20 = vsel %vm496_vm7, %v2511_v60, %v2028_v46 }
 0x76d   :  { %v2590_v59 = vsel %vm2560_vm13, %v2550_v20, %v2146_v45  ;;  %v4817_v20 = vld [vmem:[#allocation2 + $0x111] sm:$0xff] }
 0x76f   :  { %2029 = vrot.lane.b32.xlu1 %v1177_v13, %s2855_s7 }
 0x771   :  { %v2260_v63 = vpop.permute.xlu1 %2259  ;;  %1723 = vrot.lane.b32.xlu2 %v4722_v21, %s2852_s17 }
 0x772   :  { %v2628_v25 = vsel %vm2600_vm14, %v2588_v48, %v2260_v63  ;;  %1839 = vrot.lane.b32.xlu0 %v1042_v52, %s2854_s6  ;;  %v2332_v52 = vsel %vm908_vm8, %v4350_v47, %v4595_v31  ;;  %v2333_v63 = vsel %vm908_vm8, %v4388_v36, %v4635_v9  ;;  %v2649_v36 = vld [vmem:[%s5354_s3 + $0x48] sm:$0xff]  ;;  %v4810_v9 = vld [vmem:[#allocation2 + $0x110] sm:$0xff] }
 0x773   :  { %v2706_v34 = vmul.f32 %v2667_v62, %v2628_v25  ;;  %v2372_v38 = vsel %vm2361_vm9, %v2332_v52, %v4608_v55  ;;  %v1160_v55 = vld [vmem:[#allocation2 + $0x76] sm:$0xff] }
 0x774   :  { %v2108_v61 = vpop.permute.xlu0 %2107  ;;  %v2264_v42 = vpop.permute.xlu2 %2263  ;;  %v2412_v46 = vsel %vm2401_vm10, %v2372_v38, %v4623_v5 }
 0x775   :  { %2746 = vst.msk [vmem:[%s5355_s10 + $0xd8] sm:$0xff] %vm2718_vm15, %v2706_v34  ;;  %v2630_v18 = vsel %vm2600_vm14, %v2590_v59, %v2264_v42  ;;  %v2452_v47 = vsel %vm2441_vm11, %v2412_v46, %v4633_v39  ;;  %v1043_v46 = vld [vmem:[#allocation2 + $0x79] sm:$0xff] }
 0x776   :  { %v2708_v56 = vmul.f32 %v2669_v50, %v2630_v18 }
 0x777   :  { %2147 = vrot.lane.b32.xlu1 %v4591_v51, %s2856_s19  ;;  %v2492_v51 = vsel %vm2481_vm12, %v2452_v47, %v1834_v44  ;;  %v1179_v44 = vld [vmem:[#allocation2 + $0x10e] sm:$0xff] }
 0x778   :  { %2748 = vst.msk [vmem:[%s5355_s10 + $0xe8] sm:$0xff] %vm2718_vm15, %v2708_v56  ;;  %v2531_v5 = vsel %vm496_vm7, %v2492_v51, %v1990_v57 }
 0x779   :  { %v1832_v31 = vpop.permute.xlu1 %1831  ;;  %1877 = vrot.lane.b32.xlu2 %v4755_v26, %s2854_s6  ;;  %v2571_v29 = vsel %vm2560_vm13, %v2531_v5, %v2108_v61  ;;  %v1161_v5 = vld [vmem:[#allocation2 + $0x7e] sm:$0xff] }
 0x77a   :  { %1995 = vrot.lane.b32.xlu0 %v1160_v55, %s2855_s7 }
 0x77c   :  { %v2226_v45 = vpop.permute.xlu0 %2225  ;;  %v1836_v40 = vpop.permute.xlu2 %1835 }
 0x77d   :  { %v2611_v39 = vsel %vm2600_vm14, %v2571_v29, %v2226_v45  ;;  %v4851_v29 = vld [vmem:[#allocation2 + $0x117] sm:$0xff] }
 0x77e   :  { %v2689_v32 = vmul.f32 %v2650_v43, %v2611_v39 }
 0x77f   :  { %2265 = vrot.lane.b32.xlu1 %v4604_v4, %s2853_s18 }
 0x780   :  { %2729 = vst.msk [vmem:[%s5355_s10 + $0x50] sm:$0xff] %vm2718_vm15, %v2689_v32 }
 0x781   :  { %v1988_v57 = vpop.permute.xlu1 %1987  ;;  %2033 = vrot.lane.b32.xlu2 %v1179_v44, %s2855_s7 }
 0x782   :  { %2113 = vrot.lane.b32.xlu0 %v1120_v30, %s2856_s19  ;;  %v2371_v30 = vsel %vm2361_vm9, %v2331_v41, %v4639_v37  ;;  %v2373_v37 = vsel %vm2361_vm9, %v2333_v63, %v4646_v7 }
 0x783   :  { %v2411_v33 = vsel %vm2401_vm10, %v2371_v30, %v4649_v2  ;;  %v2413_v2 = vsel %vm2401_vm10, %v2373_v37, %v4656_v17  ;;  %v1083_v37 = vld [vmem:[#allocation2 + $0x82] sm:$0xff] }
 0x784   :  { %v1290_v58 = vpop.permute.xlu0 %1289  ;;  %v1992_v13 = vpop.permute.xlu2 %1991  ;;  %v2451_v0 = vsel %vm2441_vm11, %v2411_v33, %v4661_v23  ;;  %v2453_v23 = vsel %vm2441_vm11, %v2413_v2, %v4666_v35  ;;  %v2651_v35 = vld [vmem:[%s5354_s3 + $0x58] sm:$0xff]  ;;  %v4882_v33 = vld [vmem:[#allocation2 + $0x81] sm:$0xff] }
 0x785   :  { %v2353_v54 = vsel %vm908_vm8, %v4547_v8, %v1290_v58  ;;  %v2491_v8 = vsel %vm2481_vm12, %v2451_v0, %v1832_v31  ;;  %v2493_v17 = vsel %vm2481_vm12, %v2453_v23, %v1836_v40  ;;  %v1101_v31 = vld [vmem:[#allocation2 + $0x112] sm:$0xff] }
 0x786   :  { %v2530_v60 = vsel %vm496_vm7, %v2491_v8, %v1988_v57  ;;  %v2532_v50 = vsel %vm496_vm7, %v2493_v17, %v1992_v13  ;;  %v4862_v58 = vld [vmem:[#allocation2 + $0x118] sm:$0xff] }
 0x787   :  { %1837 = vrot.lane.b32.xlu1 %v4619_v27, %s2854_s6  ;;  %v1063_v0 = vld [vmem:[#allocation2 + $0x119] sm:$0xff] }
 0x789   :  { %v2106_v28 = vpop.permute.xlu1 %2105  ;;  %2151 = vrot.lane.b32.xlu2 %v4779_v6, %s2856_s19 }
 0x78a   :  { %2231 = vrot.lane.b32.xlu0 %v4722_v21, %s2853_s18  ;;  %v2570_v7 = vsel %vm2560_vm13, %v2530_v60, %v2106_v28  ;;  %v1102_v60 = vld [vmem:[#allocation2 + $0x11a] sm:$0xff] }
 0x78c   :  { %v1446_v27 = vpop.permute.xlu0 %1445  ;;  %v2110_v62 = vpop.permute.xlu2 %2109 }
 0x78d   :  { %v2393_v48 = vsel %vm2361_vm9, %v2353_v54, %v1446_v27  ;;  %v2572_v61 = vsel %vm2560_vm13, %v2532_v50, %v2110_v62  ;;  %v1100_v54 = vld [vmem:[#allocation2 + $0x10a] sm:$0xff]  ;;  %v4876_v27 = vld [vmem:[#allocation2 + $0x80] sm:$0xff] }
 0x78f   :  { %1993 = vrot.lane.b32.xlu1 %v1159_v19, %s2855_s7 }
 0x791   :  { %v2224_v25 = vpop.permute.xlu1 %2223  ;;  %2269 = vrot.lane.b32.xlu2 %v4810_v9, %s2853_s18 }
 0x792   :  { %v2610_v34 = vsel %vm2600_vm14, %v2570_v7, %v2224_v25  ;;  %1295 = vrot.lane.b32.xlu0 %v4817_v20, %s2850_s5 }
 0x793   :  { %v2688_v59 = vmul.f32 %v2649_v36, %v2610_v34 }
 0x794   :  { %v1602_v42 = vpop.permute.xlu0 %1601  ;;  %v2228_v18 = vpop.permute.xlu2 %2227 }
 0x795   :  { %2728 = vst.msk [vmem:[%s5355_s10 + $0x48] sm:$0xff] %vm2718_vm15, %v2688_v59  ;;  %v4833_v52 = vsel %vm2401_vm10, %v2393_v48, %v1602_v42  ;;  %v2612_v56 = vsel %vm2600_vm14, %v2572_v61, %v2228_v18 }
 0x796   :  { %v2690_v38 = vmul.f32 %v2651_v35, %v2612_v56  ;;  %v4912_v35 = vld [vmem:[#allocation2 + $0x88] sm:$0xff]  ;;  %v1082_v56 = vld [vmem:[#allocation2 + $0x7a] sm:$0xff] }
 0x797   :  { %2111 = vrot.lane.b32.xlu1 %v4642_v16, %s2856_s19 }
 0x798   :  { %2730 = vst.msk [vmem:[%s5355_s10 + $0x58] sm:$0xff] %vm2718_vm15, %v2690_v38  ;;  %v4923_v38 = vld [vmem:[#allocation2 + $0x120] sm:$0xff] }
 0x799   :  { %v1288_v47 = vpop.permute.xlu1 %1287  ;;  %1841 = vrot.lane.b32.xlu2 %v1043_v46, %s2854_s6 }
 0x79a   :  { %1451 = vrot.lane.b32.xlu0 %v1101_v31, %s2849_s2  ;;  %v2352_v16 = vsel %vm908_vm8, %v4395_v12, %v1288_v47  ;;  %v1121_v12 = vld [vmem:[#allocation2 + $0x7f] sm:$0xff] }
 0x79c   :  { %v4844_v55 = vpop.permute.xlu0 %1757  ;;  %v1292_v51 = vpop.permute.xlu2 %1291 }
 0x79d   :  { %v2354_v40 = vsel %vm908_vm8, %v4604_v4, %v1292_v51  ;;  %v1045_v51 = vld [vmem:[#allocation2 + $0x89] sm:$0xff] }
 0x79f   :  { %2229 = vrot.lane.b32.xlu1 %v4652_v1, %s2853_s18 }
 0x7a1   :  { %v1444_v43 = vpop.permute.xlu1 %1443  ;;  %1997 = vrot.lane.b32.xlu2 %v1161_v5, %s2855_s7  ;;  %v2473_v5 = vsel %vm2441_vm11, %v4833_v52, %v4844_v55 }
 0x7a2   :  { %v2392_v45 = vsel %vm2361_vm9, %v2352_v16, %v1444_v43  ;;  %1607 = vrot.lane.b32.xlu0 %v4851_v29, %s2851_s16  ;;  %v1181_v43 = vld [vmem:[#allocation2 + $0x11e] sm:$0xff] }
 0x7a4   :  { %v1254_v39 = vpop.permute.xlu0 %1253  ;;  %v1448_v32 = vpop.permute.xlu2 %1447 }
 0x7a5   :  { %v2394_v44 = vsel %vm2361_vm9, %v2354_v40, %v1448_v32  ;;  %v2335_v4 = vsel %vm908_vm8, %v4613_v10, %v1254_v39  ;;  %v2671_v39 = vld [vmem:[%s5354_s3 + $0xf8] sm:$0xff] }
 0x7a7   :  { %1293 = vrot.lane.b32.xlu1 %v4755_v26, %s2850_s5 }
 0x7a9   :  { %v1600_v57 = vpop.permute.xlu1 %1599  ;;  %2115 = vrot.lane.b32.xlu2 %v1121_v12, %s2856_s19 }
 0x7aa   :  { %v4865_v13 = vsel %vm2401_vm10, %v2392_v45, %v1600_v57  ;;  %1763 = vrot.lane.b32.xlu0 %v4862_v58, %s2852_s17  ;;  %v1084_v57 = vld [vmem:[#allocation2 + $0x8a] sm:$0xff] }
 0x7ac   :  { %v1410_v28 = vpop.permute.xlu0 %1409  ;;  %v1604_v41 = vpop.permute.xlu2 %1603 }
 0x7ad   :  { %v2375_v30 = vsel %vm2361_vm9, %v2335_v4, %v1410_v28  ;;  %v4873_v26 = vsel %vm2401_vm10, %v2394_v44, %v1604_v41 }
 0x7af   :  { %1449 = vrot.lane.b32.xlu1 %v1100_v54, %s2849_s2 }
 0x7b1   :  { %v4878_v62 = vpop.permute.xlu1 %1755  ;;  %2233 = vrot.lane.b32.xlu2 %v4876_v27, %s2853_s18 }
 0x7b2   :  { %1259 = vrot.lane.b32.xlu0 %v4882_v33, %s2850_s5 }
 0x7b4   :  { %v1566_v10 = vpop.permute.xlu0 %1565  ;;  %v4886_v48 = vpop.permute.xlu2 %1759 }
 0x7b5   :  { %v4889_v63 = vsel %vm2401_vm10, %v2375_v30, %v1566_v10  ;;  %v1123_v30 = vld [vmem:[#allocation2 + $0x8f] sm:$0xff] }
 0x7b7   :  { %1605 = vrot.lane.b32.xlu1 %v4779_v6, %s2851_s16  ;;  %v4902_v6 = vld [vmem:[#allocation2 + $0x87] sm:$0xff] }
 0x7b9   :  { %v1252_v19 = vpop.permute.xlu1 %1251  ;;  %1297 = vrot.lane.b32.xlu2 %v1063_v0, %s2850_s5 }
 0x7ba   :  { %1415 = vrot.lane.b32.xlu0 %v1083_v37, %s2849_s2  ;;  %v2334_v36 = vsel %vm908_vm8, %v4458_v53, %v1252_v19  ;;  %v1141_v53 = vld [vmem:[#allocation2 + $0x11f] sm:$0xff]  ;;  %v2472_v19 = vsel %vm2441_vm11, %v4865_v13, %v4878_v62  ;;  %v1180_v37 = vld [vmem:[#allocation2 + $0x116] sm:$0xff] }
 0x7bc   :  { %v4895_v8 = vpop.permute.xlu0 %1721  ;;  %v1256_v2 = vpop.permute.xlu2 %1255 }
 0x7bd   :  { %v2336_v25 = vsel %vm908_vm8, %v4652_v1, %v1256_v2 }
 0x7bf   :  { %1761 = vrot.lane.b32.xlu1 %v4810_v9, %s2852_s17 }
 0x7c1   :  { %v1408_v23 = vpop.permute.xlu1 %1407  ;;  %1453 = vrot.lane.b32.xlu2 %v1102_v60, %s2849_s2  ;;  %v2670_v60 = vld [vmem:[%s5354_s3 + $0xf0] sm:$0xff] }
 0x7c2   :  { %v2374_v7 = vsel %vm2361_vm9, %v2334_v36, %v1408_v23  ;;  %1571 = vrot.lane.b32.xlu0 %v4902_v6, %s2851_s16  ;;  %v4967_v36 = vld [vmem:[#allocation2 + $0x90] sm:$0xff]  ;;  %v2474_v23 = vsel %vm2441_vm11, %v4873_v26, %v4886_v48 }
 0x7c4   :  { %v1876_v17 = vpop.permute.xlu0 %1875  ;;  %v1412_v34 = vpop.permute.xlu2 %1411 }
 0x7c5   :  { %v2376_v50 = vsel %vm2361_vm9, %v2336_v25, %v1412_v34  ;;  %v2513_v45 = vsel %vm2481_vm12, %v2473_v5, %v1876_v17 }
 0x7c7   :  { %1257 = vrot.lane.b32.xlu1 %v1043_v46, %s2850_s5 }
 0x7c9   :  { %v1564_v59 = vpop.permute.xlu1 %1563  ;;  %1609 = vrot.lane.b32.xlu2 %v1141_v53, %s2851_s16 }
 0x7ca   :  { %v4915_v61 = vsel %vm2401_vm10, %v2374_v7, %v1564_v59  ;;  %1727 = vrot.lane.b32.xlu0 %v4912_v35, %s2852_s17 }
 0x7cc   :  { %v2032_v42 = vpop.permute.xlu0 %2031  ;;  %v1568_v1 = vpop.permute.xlu2 %1567 }
 0x7cd   :  { %v4920_v18 = vsel %vm2401_vm10, %v2376_v50, %v1568_v1  ;;  %v2552_v40 = vsel %vm496_vm7, %v2513_v45, %v2032_v42  ;;  %v2672_v50 = vld [vmem:[%s5354_s3 + $0x100] sm:$0xff] }
 0x7ce   :  { %v4994_v1 = vld [vmem:[#allocation2 + $0x121] sm:$0xff] }
 0x7cf   :  { %1413 = vrot.lane.b32.xlu1 %v1082_v56, %s2849_s2  ;;  %v2455_v56 = vsel %vm2441_vm11, %v4889_v63, %v4895_v8 }
 0x7d1   :  { %v4925_v46 = vpop.permute.xlu1 %1719  ;;  %1765 = vrot.lane.b32.xlu2 %v4923_v38, %s2852_s17 }
 0x7d2   :  { %1881 = vrot.lane.b32.xlu0 %v1063_v0, %s2854_s6 }
 0x7d4   :  { %v2150_v47 = vpop.permute.xlu0 %2149  ;;  %v4930_v31 = vpop.permute.xlu2 %1723 }
 0x7d5   :  { %v2592_v32 = vsel %vm2560_vm13, %v2552_v40, %v2150_v47 }
 0x7d7   :  { %1569 = vrot.lane.b32.xlu1 %v1121_v12, %s2851_s16 }
 0x7d9   :  { %v1874_v16 = vpop.permute.xlu1 %1873  ;;  %1261 = vrot.lane.b32.xlu2 %v1045_v51, %s2850_s5 }
 0x7da   :  { %2037 = vrot.lane.b32.xlu0 %v1181_v43, %s2855_s7  ;;  %v2512_v2 = vsel %vm2481_vm12, %v2472_v19, %v1874_v16  ;;  %v2653_v16 = vld [vmem:[%s5354_s3 + $0x68] sm:$0xff]  ;;  %v2456_v19 = vsel %vm2441_vm11, %v4920_v18, %v4930_v31  ;;  %v2654_v18 = vld [vmem:[%s5354_s3 + $0x70] sm:$0xff] }
 0x7dc   :  { %v2268_v44 = vpop.permute.xlu0 %2267  ;;  %v1878_v12 = vpop.permute.xlu2 %1877 }
 0x7dd   :  { %v2632_v52 = vsel %vm2600_vm14, %v2592_v32, %v2268_v44  ;;  %v2514_v62 = vsel %vm2481_vm12, %v2474_v23, %v1878_v12 }
 0x7de   :  { %v2710_v55 = vmul.f32 %v2671_v39, %v2632_v52  ;;  %v1182_v39 = vld [vmem:[#allocation2 + $0x126] sm:$0xff] }
 0x7df   :  { %1725 = vrot.lane.b32.xlu1 %v4876_v27, %s2852_s17  ;;  %v5019_v52 = vld [vmem:[#allocation2 + $0x127] sm:$0xff] }
 0x7e0   :  { %2750 = vst.msk [vmem:[%s5355_s10 + $0xf8] sm:$0xff] %vm2718_vm15, %v2710_v55 }
 0x7e1   :  { %v2030_v4 = vpop.permute.xlu1 %2029  ;;  %1417 = vrot.lane.b32.xlu2 %v1084_v57, %s2849_s2 }
 0x7e2   :  { %2155 = vrot.lane.b32.xlu0 %v1141_v53, %s2856_s19 }
 0x7e4   :  { %v1840_v28 = vpop.permute.xlu0 %1839  ;;  %v2034_v41 = vpop.permute.xlu2 %2033 }
 0x7e5   :  { %v2553_v17 = vsel %vm496_vm7, %v2514_v62, %v2034_v41  ;;  %v2495_v5 = vsel %vm2481_vm12, %v2455_v56, %v1840_v28  ;;  %v5079_v56 = vld [vmem:[#allocation2 + $0x9f] sm:$0xff] }
 0x7e7   :  { %1879 = vrot.lane.b32.xlu1 %v4817_v20, %s2854_s6  ;;  %v2551_v20 = vsel %vm496_vm7, %v2512_v2, %v2030_v4 }
 0x7e9   :  { %v2148_v54 = vpop.permute.xlu1 %2147  ;;  %1573 = vrot.lane.b32.xlu2 %v1123_v30, %s2851_s16 }
 0x7ea   :  { %2273 = vrot.lane.b32.xlu0 %v4923_v38, %s2853_s18  ;;  %v2591_v7 = vsel %vm2560_vm13, %v2551_v20, %v2148_v54 }
 0x7ec   :  { %v1996_v10 = vpop.permute.xlu0 %1995  ;;  %v2152_v0 = vpop.permute.xlu2 %2151 }
 0x7ed   :  { %v2593_v26 = vsel %vm2560_vm13, %v2553_v17, %v2152_v0  ;;  %v2652_v0 = vld [vmem:[%s5354_s3 + $0x60] sm:$0xff] }
 0x7ef   :  { %2035 = vrot.lane.b32.xlu1 %v1180_v37, %s2855_s7 }
 0x7f1   :  { %v2266_v13 = vpop.permute.xlu1 %2265  ;;  %1729 = vrot.lane.b32.xlu2 %v4967_v36, %s2852_s17 }
 0x7f2   :  { %v2631_v25 = vsel %vm2600_vm14, %v2591_v7, %v2266_v13  ;;  %1845 = vrot.lane.b32.xlu0 %v1045_v51, %s2854_s6  ;;  %v1163_v51 = vld [vmem:[#allocation2 + $0x8e] sm:$0xff] }
 0x7f3   :  { %v2709_v34 = vmul.f32 %v2670_v60, %v2631_v25 }
 0x7f4   :  { %v2114_v48 = vpop.permute.xlu0 %2113  ;;  %v2270_v53 = vpop.permute.xlu2 %2269 }
 0x7f5   :  { %2749 = vst.msk [vmem:[%s5355_s10 + $0xf0] sm:$0xff] %vm2718_vm15, %v2709_v34  ;;  %v2633_v59 = vsel %vm2600_vm14, %v2593_v26, %v2270_v53  ;;  %v1046_v34 = vld [vmem:[#allocation2 + $0x91] sm:$0xff]  ;;  %v1086_v26 = vld [vmem:[#allocation2 + $0x9a] sm:$0xff] }
 0x7f6   :  { %v2711_v42 = vmul.f32 %v2672_v50, %v2633_v59  ;;  %v1164_v59 = vld [vmem:[#allocation2 + $0x96] sm:$0xff] }
 0x7f7   :  { %2153 = vrot.lane.b32.xlu1 %v4851_v29, %s2856_s19  ;;  %v2534_v29 = vsel %vm496_vm7, %v2495_v5, %v1996_v10 }
 0x7f8   :  { %2751 = vst.msk [vmem:[%s5355_s10 + $0x100] sm:$0xff] %vm2718_vm15, %v2711_v42  ;;  %v2574_v43 = vsel %vm2560_vm13, %v2534_v29, %v2114_v48 }
 0x7f9   :  { %v1838_v47 = vpop.permute.xlu1 %1837  ;;  %1883 = vrot.lane.b32.xlu2 %v4994_v1, %s2854_s6 }
 0x7fa   :  { %2001 = vrot.lane.b32.xlu0 %v1163_v51, %s2855_s7 }
 0x7fc   :  { %v2232_v45 = vpop.permute.xlu0 %2231  ;;  %v1842_v40 = vpop.permute.xlu2 %1841 }
 0x7fd   :  { %v2614_v63 = vsel %vm2600_vm14, %v2574_v43, %v2232_v45  ;;  %v2496_v2 = vsel %vm2481_vm12, %v2456_v19, %v1842_v40  ;;  %v5090_v45 = vld [vmem:[#allocation2 + $0x129] sm:$0xff] }
 0x7fe   :  { %v2692_v8 = vmul.f32 %v2653_v16, %v2614_v63  ;;  %v5130_v19 = vld [vmem:[#allocation2 + $0x130] sm:$0xff] }
 0x7ff   :  { %2271 = vrot.lane.b32.xlu1 %v4862_v58, %s2853_s18 }
 0x800   :  { %2732 = vst.msk [vmem:[%s5355_s10 + $0x68] sm:$0xff] %vm2718_vm15, %v2692_v8 }
 0x801   :  { %v1994_v32 = vpop.permute.xlu1 %1993  ;;  %2039 = vrot.lane.b32.xlu2 %v1182_v39, %s2855_s7 }
 0x802   :  { %2119 = vrot.lane.b32.xlu0 %v1123_v30, %s2856_s19  ;;  %v1162_v30 = vld [vmem:[#allocation2 + $0x86] sm:$0xff] }
 0x804   :  { %v1296_v44 = vpop.permute.xlu0 %1295  ;;  %v1998_v12 = vpop.permute.xlu2 %1997 }
 0x805   :  { %v2356_v57 = vsel %vm908_vm8, %v4810_v9, %v1296_v44  ;;  %v5037_v9 = vld [vmem:[#allocation2 + $0x128] sm:$0xff]  ;;  %v2535_v60 = vsel %vm496_vm7, %v2496_v2, %v1998_v12  ;;  %v5104_v44 = vld [vmem:[#allocation2 + $0x98] sm:$0xff] }
 0x807   :  { %1843 = vrot.lane.b32.xlu1 %v4882_v33, %s2854_s6  ;;  %v2454_v33 = vsel %vm2441_vm11, %v4915_v61, %v4925_v46  ;;  %v5045_v46 = vld [vmem:[#allocation2 + $0x99] sm:$0xff] }
 0x808   :  { %v2494_v54 = vsel %vm2481_vm12, %v2454_v33, %v1838_v47  ;;  %v5119_v33 = vld [vmem:[#allocation2 + $0x12f] sm:$0xff] }
 0x809   :  { %v2112_v55 = vpop.permute.xlu1 %2111  ;;  %2157 = vrot.lane.b32.xlu2 %v5019_v52, %s2856_s19  ;;  %v2533_v10 = vsel %vm496_vm7, %v2494_v54, %v1994_v32  ;;  %v1103_v32 = vld [vmem:[#allocation2 + $0x122] sm:$0xff] }
 0x80a   :  { %2237 = vrot.lane.b32.xlu0 %v4967_v36, %s2853_s18  ;;  %v2573_v37 = vsel %vm2560_vm13, %v2533_v10, %v2112_v55  ;;  %v1104_v55 = vld [vmem:[#allocation2 + $0x12a] sm:$0xff]  ;;  %v1105_v10 = vld [vmem:[#allocation2 + $0x132] sm:$0xff] }
 0x80c   :  { %v1452_v4 = vpop.permute.xlu0 %1451  ;;  %v2116_v28 = vpop.permute.xlu2 %2115 }
 0x80d   :  { %v2396_v41 = vsel %vm2361_vm9, %v2356_v57, %v1452_v4  ;;  %v2575_v31 = vsel %vm2560_vm13, %v2535_v60, %v2116_v28  ;;  %v1066_v28 = vld [vmem:[#allocation2 + $0x131] sm:$0xff] }
 0x80f   :  { %1999 = vrot.lane.b32.xlu1 %v1162_v30, %s2855_s7 }
 0x811   :  { %v2230_v61 = vpop.permute.xlu1 %2229  ;;  %2275 = vrot.lane.b32.xlu2 %v5037_v9, %s2853_s18 }
 0x812   :  { %v2613_v20 = vsel %vm2600_vm14, %v2573_v37, %v2230_v61  ;;  %1265 = vrot.lane.b32.xlu0 %v5045_v46, %s2850_s5 }
 0x813   :  { %v2691_v23 = vmul.f32 %v2652_v0, %v2613_v20 }
 0x814   :  { %v1608_v7 = vpop.permute.xlu0 %1607  ;;  %v2234_v13 = vpop.permute.xlu2 %2233 }
 0x815   :  { %2731 = vst.msk [vmem:[%s5355_s10 + $0x60] sm:$0xff] %vm2718_vm15, %v2691_v23  ;;  %v5061_v62 = vsel %vm2401_vm10, %v2396_v41, %v1608_v7  ;;  %v2615_v25 = vsel %vm2600_vm14, %v2575_v31, %v2234_v13 }
 0x816   :  { %v2693_v17 = vmul.f32 %v2654_v18, %v2615_v25  ;;  %v1145_v25 = vld [vmem:[#allocation2 + $0x138] sm:$0xff] }
 0x817   :  { %2117 = vrot.lane.b32.xlu1 %v4902_v6, %s2856_s19 }
 0x818   :  { %2733 = vst.msk [vmem:[%s5355_s10 + $0x70] sm:$0xff] %vm2718_vm15, %v2693_v17 }
 0x819   :  { %v1294_v50 = vpop.permute.xlu1 %1293  ;;  %1847 = vrot.lane.b32.xlu2 %v1046_v34, %s2854_s6 }
 0x81a   :  { %1421 = vrot.lane.b32.xlu0 %v1086_v26, %s2849_s2  ;;  %v2355_v6 = vsel %vm908_vm8, %v4659_v14, %v1294_v50  ;;  %v1124_v14 = vld [vmem:[#allocation2 + $0x97] sm:$0xff] }
 0x81c   :  { %v5072_v48 = vpop.permute.xlu0 %1763  ;;  %v1298_v53 = vpop.permute.xlu2 %1297 }
 0x81d   :  { %v2357_v51 = vsel %vm908_vm8, %v4862_v58, %v1298_v53  ;;  %v1146_v53 = vld [vmem:[#allocation2 + $0x139] sm:$0xff] }
 0x81f   :  { %2235 = vrot.lane.b32.xlu1 %v4912_v35, %s2853_s18 }
 0x821   :  { %v1450_v42 = vpop.permute.xlu1 %1449  ;;  %2003 = vrot.lane.b32.xlu2 %v1164_v59, %s2855_s7  ;;  %v2476_v59 = vsel %vm2441_vm11, %v5061_v62, %v5072_v48  ;;  %v1185_v48 = vld [vmem:[#allocation2 + $0x13e] sm:$0xff] }
 0x822   :  { %v2395_v47 = vsel %vm2361_vm9, %v2355_v6, %v1450_v42  ;;  %1577 = vrot.lane.b32.xlu0 %v5079_v56, %s2851_s16 }
 0x824   :  { %v1260_v5 = vpop.permute.xlu0 %1259  ;;  %v1454_v29 = vpop.permute.xlu2 %1453 }
 0x825   :  { %v2397_v16 = vsel %vm2361_vm9, %v2357_v51, %v1454_v29  ;;  %v2338_v58 = vsel %vm908_vm8, %v4876_v27, %v1260_v5  ;;  %v2674_v51 = vld [vmem:[%s5354_s3 + $0x110] sm:$0xff] }
 0x827   :  { %1299 = vrot.lane.b32.xlu1 %v4994_v1, %s2850_s5 }
 0x829   :  { %v1606_v43 = vpop.permute.xlu1 %1605  ;;  %2121 = vrot.lane.b32.xlu2 %v1124_v14, %s2856_s19 }
 0x82a   :  { %v5093_v40 = vsel %vm2401_vm10, %v2395_v47, %v1606_v43  ;;  %1301 = vrot.lane.b32.xlu0 %v5090_v45, %s2850_s5 }
 0x82c   :  { %v1416_v63 = vpop.permute.xlu0 %1415  ;;  %v1610_v8 = vpop.permute.xlu2 %1609 }
 0x82d   :  { %v2378_v39 = vsel %vm2361_vm9, %v2338_v58, %v1416_v63  ;;  %v5101_v1 = vsel %vm2401_vm10, %v2397_v16, %v1610_v8  ;;  %v1186_v8 = vld [vmem:[#allocation2 + $0x13f] sm:$0xff] }
 0x82f   :  { %1455 = vrot.lane.b32.xlu1 %v1103_v32, %s2849_s2 }
 0x831   :  { %v5106_v12 = vpop.permute.xlu1 %1761  ;;  %2239 = vrot.lane.b32.xlu2 %v5104_v44, %s2853_s18 }
 0x832   :  { %1457 = vrot.lane.b32.xlu0 %v1104_v55, %s2849_s2 }
 0x834   :  { %v1572_v27 = vpop.permute.xlu0 %1571  ;;  %v5111_v57 = vpop.permute.xlu2 %1765 }
 0x835   :  { %v5114_v4 = vsel %vm2401_vm10, %v2378_v39, %v1572_v27  ;;  %v2475_v27 = vsel %vm2441_vm11, %v5093_v40, %v5106_v12 }
 0x837   :  { %1611 = vrot.lane.b32.xlu1 %v5019_v52, %s2851_s16 }
 0x839   :  { %v1258_v41 = vpop.permute.xlu1 %1257  ;;  %1303 = vrot.lane.b32.xlu2 %v1066_v28, %s2850_s5 }
 0x83a   :  { %1613 = vrot.lane.b32.xlu0 %v5119_v33, %s2851_s16  ;;  %v2337_v0 = vsel %vm908_vm8, %v4722_v21, %v1258_v41  ;;  %v1144_v21 = vld [vmem:[#allocation2 + $0x137] sm:$0xff]  ;;  %v1187_v41 = vld [vmem:[#allocation2 + $0x140] sm:$0xff] }
 0x83c   :  { %v5123_v30 = vpop.permute.xlu0 %1727  ;;  %v1262_v54 = vpop.permute.xlu2 %1261 }
 0x83d   :  { %v2339_v61 = vsel %vm908_vm8, %v4912_v35, %v1262_v54  ;;  %v1085_v35 = vld [vmem:[#allocation2 + $0x92] sm:$0xff] }
 0x83f   :  { %1767 = vrot.lane.b32.xlu1 %v5037_v9, %s2852_s17 }
 0x841   :  { %v1414_v52 = vpop.permute.xlu1 %1413  ;;  %1459 = vrot.lane.b32.xlu2 %v1105_v10, %s2849_s2 }
 0x842   :  { %v2377_v37 = vsel %vm2361_vm9, %v2337_v0, %v1414_v52  ;;  %1769 = vrot.lane.b32.xlu0 %v5130_v19, %s2852_s17  ;;  %v2477_v0 = vsel %vm2441_vm11, %v5101_v1, %v5111_v57 }
 0x844   :  { %v1882_v2 = vpop.permute.xlu0 %1881  ;;  %v1418_v20 = vpop.permute.xlu2 %1417 }
 0x845   :  { %v2379_v60 = vsel %vm2361_vm9, %v2339_v61, %v1418_v20  ;;  %v2516_v42 = vsel %vm2481_vm12, %v2476_v59, %v1882_v2  ;;  %v2675_v20 = vld [vmem:[%s5354_s3 + $0x118] sm:$0xff] }
 0x847   :  { %1263 = vrot.lane.b32.xlu1 %v1046_v34, %s2850_s5  ;;  %v1184_v34 = vld [vmem:[#allocation2 + $0x136] sm:$0xff] }
 0x849   :  { %v1570_v23 = vpop.permute.xlu1 %1569  ;;  %1615 = vrot.lane.b32.xlu2 %v1144_v21, %s2851_s16 }
 0x84a   :  { %v5141_v18 = vsel %vm2401_vm10, %v2377_v37, %v1570_v23  ;;  %1887 = vrot.lane.b32.xlu0 %v1066_v28, %s2854_s6  ;;  %v1165_v28 = vld [vmem:[#allocation2 + $0x9e] sm:$0xff] }
 0x84c   :  { %v2038_v31 = vpop.permute.xlu0 %2037  ;;  %v1574_v7 = vpop.permute.xlu2 %1573 }
 0x84d   :  { %v5145_v13 = vsel %vm2401_vm10, %v2379_v60, %v1574_v7  ;;  %v2555_v47 = vsel %vm496_vm7, %v2516_v42, %v2038_v31  ;;  %v2458_v31 = vsel %vm2441_vm11, %v5114_v4, %v5123_v30 }
 0x84f   :  { %1419 = vrot.lane.b32.xlu1 %v1085_v35, %s2849_s2 }
 0x851   :  { %v5148_v17 = vpop.permute.xlu1 %1725  ;;  %1771 = vrot.lane.b32.xlu2 %v1145_v25, %s2852_s17 }
 0x852   :  { %2043 = vrot.lane.b32.xlu0 %v1184_v34, %s2855_s7  ;;  %v2656_v34 = vld [vmem:[%s5354_s3 + $0x80] sm:$0xff] }
 0x854   :  { %v2156_v50 = vpop.permute.xlu0 %2155  ;;  %v5152_v26 = vpop.permute.xlu2 %1729 }
 0x855   :  { %v2595_v5 = vsel %vm2560_vm13, %v2555_v47, %v2156_v50  ;;  %v1183_v47 = vld [vmem:[#allocation2 + $0x12e] sm:$0xff] }
 0x857   :  { %1575 = vrot.lane.b32.xlu1 %v1124_v14, %s2851_s16 }
 0x859   :  { %v1880_v6 = vpop.permute.xlu1 %1879  ;;  %1889 = vrot.lane.b32.xlu2 %v1146_v53, %s2854_s6 }
 0x85a   :  { %2161 = vrot.lane.b32.xlu0 %v1144_v21, %s2856_s19  ;;  %v2515_v54 = vsel %vm2481_vm12, %v2475_v27, %v1880_v6 }
 0x85c   :  { %v2274_v29 = vpop.permute.xlu0 %2273  ;;  %v1884_v16 = vpop.permute.xlu2 %1883 }
 0x85d   :  { %v2635_v14 = vsel %vm2600_vm14, %v2595_v5, %v2274_v29  ;;  %v2517_v40 = vsel %vm2481_vm12, %v2477_v0, %v1884_v16  ;;  %v2457_v16 = vsel %vm2441_vm11, %v5141_v18, %v5148_v17 }
 0x85e   :  { %v2713_v62 = vmul.f32 %v2674_v51, %v2635_v14 }
 0x85f   :  { %1731 = vrot.lane.b32.xlu1 %v5104_v44, %s2852_s17 }
 0x860   :  { %2753 = vst.msk [vmem:[%s5355_s10 + $0x110] sm:$0xff] %vm2718_vm15, %v2713_v62  ;;  %v2655_v62 = vld [vmem:[%s5354_s3 + $0x78] sm:$0xff] }
 0x861   :  { %v2036_v43 = vpop.permute.xlu1 %2035  ;;  %2045 = vrot.lane.b32.xlu2 %v1185_v48, %s2855_s7  ;;  %v2459_v48 = vsel %vm2441_vm11, %v5145_v13, %v5152_v26 }
 0x862   :  { %2279 = vrot.lane.b32.xlu0 %v1145_v25, %s2853_s18  ;;  %v2554_v10 = vsel %vm496_vm7, %v2515_v54, %v2036_v43 }
 0x864   :  { %v1846_v58 = vpop.permute.xlu0 %1845  ;;  %v2040_v63 = vpop.permute.xlu2 %2039 }
 0x865   :  { %v2556_v61 = vsel %vm496_vm7, %v2517_v40, %v2040_v63  ;;  %v2498_v35 = vsel %vm2481_vm12, %v2458_v31, %v1846_v58 }
 0x867   :  { %1849 = vrot.lane.b32.xlu1 %v5045_v46, %s2854_s6  ;;  %v2673_v46 = vld [vmem:[%s5354_s3 + $0x108] sm:$0xff] }
 0x869   :  { %v2154_v39 = vpop.permute.xlu1 %2153  ;;  %2163 = vrot.lane.b32.xlu2 %v1186_v8, %s2856_s19 }
 0x86a   :  { %v2594_v52 = vsel %vm2560_vm13, %v2554_v10, %v2154_v39  ;;  %v2657_v39 = vld [vmem:[%s5354_s3 + $0x88] sm:$0xff]  ;;  %v2659_v10 = vld [vmem:[%s5354_s3 + $0x98] sm:$0xff] }
 0x86c   :  { %v2002_v32 = vpop.permute.xlu0 %2001  ;;  %v2158_v55 = vpop.permute.xlu2 %2157 }
 0x86d   :  { %v2596_v60 = vsel %vm2560_vm13, %v2556_v61, %v2158_v55  ;;  %v2537_v25 = vsel %vm496_vm7, %v2498_v35, %v2002_v32 }
 0x86f   :  { %2005 = vrot.lane.b32.xlu1 %v1165_v28, %s2855_s7 }
 0x871   :  { %v2272_v37 = vpop.permute.xlu1 %2271  ;;  %2281 = vrot.lane.b32.xlu2 %v1187_v41, %s2853_s18 }
 0x872   :  { %v2634_v12 = vsel %vm2600_vm14, %v2594_v52, %v2272_v37 }
 0x873   :  { %v2712_v2 = vmul.f32 %v2673_v46, %v2634_v12 }
 0x874   :  { %v2120_v21 = vpop.permute.xlu0 %2119  ;;  %v2276_v1 = vpop.permute.xlu2 %2275 }
 0x875   :  { %2752 = vst.msk [vmem:[%s5355_s10 + $0x108] sm:$0xff] %vm2718_vm15, %v2712_v2  ;;  %v2636_v57 = vsel %vm2600_vm14, %v2596_v60, %v2276_v1 }
 0x876   :  { %v2714_v23 = vmul.f32 %v2675_v20, %v2636_v57 }
 0x877   :  { %2123 = vrot.lane.b32.xlu1 %v5079_v56, %s2856_s19  ;;  %v2577_v56 = vsel %vm2560_vm13, %v2537_v25, %v2120_v21 }
 0x878   :  { %2754 = vst.msk [vmem:[%s5355_s10 + $0x118] sm:$0xff] %vm2718_vm15, %v2714_v23 }
 0x879   :  { %v1844_v7 = vpop.permute.xlu1 %1843 }
 0x87c   :  { %v2238_v50 = vpop.permute.xlu0 %2237  ;;  %v1848_v53 = vpop.permute.xlu2 %1847 }
 0x87d   :  { %v2617_v59 = vsel %vm2600_vm14, %v2577_v56, %v2238_v50  ;;  %v2499_v18 = vsel %vm2481_vm12, %v2459_v48, %v1848_v53  ;;  %v2678_v48 = vld [vmem:[%s5354_s3 + $0x130] sm:$0xff] }
 0x87e   :  { %v2695_v6 = vmul.f32 %v2656_v34, %v2617_v59 }
 0x87f   :  { %1885 = vrot.lane.b32.xlu1 %v5090_v45, %s2854_s6  ;;  %v2497_v45 = vsel %vm2481_vm12, %v2457_v16, %v1844_v7 }
 0x880   :  { %2735 = vst.msk [vmem:[%s5355_s10 + $0x80] sm:$0xff] %vm2718_vm15, %v2695_v6 }
 0x881   :  { %v2000_v4 = vpop.permute.xlu1 %1999 }
 0x882   :  { %v2536_v14 = vsel %vm496_vm7, %v2497_v45, %v2000_v4 }
 0x884   :  { %v1266_v30 = vpop.permute.xlu0 %1265  ;;  %v2004_v42 = vpop.permute.xlu2 %2003 }
 0x885   :  { %v2538_v63 = vsel %vm496_vm7, %v2499_v18, %v2004_v42 }
 0x887   :  { %2041 = vrot.lane.b32.xlu1 %v1183_v47, %s2855_s7 }
 0x889   :  { %v2118_v51 = vpop.permute.xlu1 %2117 }
 0x88a   :  { %v2576_v43 = vsel %vm2560_vm13, %v2536_v14, %v2118_v51 }
 0x88c   :  { %v1422_v5 = vpop.permute.xlu0 %1421  ;;  %v2122_v29 = vpop.permute.xlu2 %2121 }
 0x88d   :  { %v2578_v13 = vsel %vm2560_vm13, %v2538_v63, %v2122_v29 }
 0x88f   :  { %2159 = vrot.lane.b32.xlu1 %v5119_v33, %s2856_s19  ;;  %v2341_v33 = vsel %vm908_vm8, %v5104_v44, %v1266_v30 }
 0x890   :  { %v2381_v32 = vsel %vm2361_vm9, %v2341_v33, %v1422_v5 }
 0x891   :  { %v2236_v58 = vpop.permute.xlu1 %2235 }
 0x892   :  { %v2616_v17 = vsel %vm2600_vm14, %v2576_v43, %v2236_v58 }
 0x893   :  { %v2694_v8 = vmul.f32 %v2655_v62, %v2616_v17  ;;  %v2677_v62 = vld [vmem:[%s5354_s3 + $0x128] sm:$0xff] }
 0x894   :  { %v1578_v26 = vpop.permute.xlu0 %1577  ;;  %v2240_v55 = vpop.permute.xlu2 %2239 }
 0x895   :  { %2734 = vst.msk [vmem:[%s5355_s10 + $0x78] sm:$0xff] %vm2718_vm15, %v2694_v8  ;;  %v2421_v44 = vsel %vm2401_vm10, %v2381_v32, %v1578_v26  ;;  %v2618_v27 = vsel %vm2600_vm14, %v2578_v13, %v2240_v55 }
 0x896   :  { %v2461_v28 = vsel %vm2441_vm11, %v2421_v44, %v3846_v22  ;;  %v2696_v41 = vmul.f32 %v2657_v39, %v2618_v27 }
 0x897   :  { %v2501_v54 = vsel %vm2481_vm12, %v2461_v28, %v3879_v24  ;;  %2277 = vrot.lane.b32.xlu1 %v5130_v19, %s2853_s18 }
 0x898   :  { %v2540_v46 = vsel %vm496_vm7, %v2501_v54, %v3895_v11  ;;  %2736 = vst.msk [vmem:[%s5355_s10 + $0x88] sm:$0xff] %vm2718_vm15, %v2696_v41  ;;  %v2658_v54 = vld [vmem:[%s5354_s3 + $0x90] sm:$0xff] }
 0x899   :  { %v2580_v22 = vsel %vm2560_vm13, %v2540_v46, %v3906_v49  ;;  %v1300_v0 = vpop.permute.xlu1 %1299 }
 0x89a   :  { %v2620_v24 = vsel %vm2600_vm14, %v2580_v22, %v3914_v15  ;;  %v2358_v11 = vsel %vm908_vm8, %v4923_v38, %v1300_v0 }
 0x89b   :  { %v2698_v52 = vmul.f32 %v2659_v10, %v2620_v24 }
 0x89c   :  { %v1302_v37 = vpop.permute.xlu0 %1301  ;;  %v1304_v40 = vpop.permute.xlu2 %1303 }
 0x89d   :  { %2738 = vst.msk [vmem:[%s5355_s10 + $0x98] sm:$0xff] %vm2718_vm15, %v2698_v52  ;;  %v2359_v6 = vsel %vm908_vm8, %v5037_v9, %v1302_v37  ;;  %v2360_v4 = vsel %vm908_vm8, %v5130_v19, %v1304_v40 }
 0x8a1   :  { %v1456_v12 = vpop.permute.xlu1 %1455 }
 0x8a2   :  { %v2398_v61 = vsel %vm2361_vm9, %v2358_v11, %v1456_v12  ;;  %v2676_v11 = vld [vmem:[%s5354_s3 + $0x120] sm:$0xff] }
 0x8a4   :  { %v1458_v2 = vpop.permute.xlu0 %1457  ;;  %v1460_v49 = vpop.permute.xlu2 %1459 }
 0x8a5   :  { %v2399_v30 = vsel %vm2361_vm9, %v2359_v6, %v1458_v2  ;;  %v2400_v42 = vsel %vm2361_vm9, %v2360_v4, %v1460_v49 }
 0x8a9   :  { %v1612_v20 = vpop.permute.xlu1 %1611 }
 0x8aa   :  { %v2438_v60 = vsel %vm2401_vm10, %v2398_v61, %v1612_v20 }
 0x8ac   :  { %v1614_v15 = vpop.permute.xlu0 %1613  ;;  %v1616_v21 = vpop.permute.xlu2 %1615 }
 0x8ad   :  { %v2439_v47 = vsel %vm2401_vm10, %v2399_v30, %v1614_v15  ;;  %v2440_v51 = vsel %vm2401_vm10, %v2400_v42, %v1616_v21 }
 0x8b1   :  { %v1768_v1 = vpop.permute.xlu1 %1767 }
 0x8b2   :  { %v2478_v57 = vsel %vm2441_vm11, %v2438_v60, %v1768_v1 }
 0x8b4   :  { %v1770_v23 = vpop.permute.xlu0 %1769  ;;  %v1772_v31 = vpop.permute.xlu2 %1771 }
 0x8b5   :  { %v2479_v5 = vsel %vm2441_vm11, %v2439_v47, %v1770_v23  ;;  %v2480_v29 = vsel %vm2441_vm11, %v2440_v51, %v1772_v31 }
 0x8b9   :  { %v1264_v7 = vpop.permute.xlu1 %1263 }
 0x8ba   :  { %v2340_v26 = vsel %vm908_vm8, %v4967_v36, %v1264_v7 }
 0x8bc   :  { %v1888_v35 = vpop.permute.xlu0 %1887  ;;  %v1890_v25 = vpop.permute.xlu2 %1889 }
 0x8bd   :  { %v2519_v45 = vsel %vm2481_vm12, %v2479_v5, %v1888_v35  ;;  %v2520_v9 = vsel %vm2481_vm12, %v2480_v29, %v1890_v25 }
 0x8c1   :  { %v1420_v34 = vpop.permute.xlu1 %1419 }
 0x8c2   :  { %v2380_v55 = vsel %vm2361_vm9, %v2340_v26, %v1420_v34 }
 0x8c4   :  { %v2044_v38 = vpop.permute.xlu0 %2043  ;;  %v2046_v56 = vpop.permute.xlu2 %2045 }
 0x8c5   :  { %v2558_v14 = vsel %vm496_vm7, %v2519_v45, %v2044_v38  ;;  %v2559_v19 = vsel %vm496_vm7, %v2520_v9, %v2046_v56 }
 0x8c9   :  { %v1576_v50 = vpop.permute.xlu1 %1575 }
 0x8ca   :  { %v2420_v44 = vsel %vm2401_vm10, %v2380_v55, %v1576_v50 }
 0x8cc   :  { %v2162_v53 = vpop.permute.xlu0 %2161  ;;  %v2164_v59 = vpop.permute.xlu2 %2163 }
 0x8cd   :  { %v2598_v43 = vsel %vm2560_vm13, %v2558_v14, %v2162_v53  ;;  %v2599_v58 = vsel %vm2560_vm13, %v2559_v19, %v2164_v59 }
 0x8d1   :  { %v1732_v16 = vpop.permute.xlu1 %1731 }
 0x8d2   :  { %v2460_v27 = vsel %vm2441_vm11, %v2420_v44, %v1732_v16 }
 0x8d4   :  { %v2280_v18 = vpop.permute.xlu0 %2279  ;;  %v2282_v17 = vpop.permute.xlu2 %2281 }
 0x8d5   :  { %v2638_v33 = vsel %vm2600_vm14, %v2598_v43, %v2280_v18  ;;  %v2639_v63 = vsel %vm2600_vm14, %v2599_v58, %v2282_v17 }
 0x8d6   :  { %v2716_v8 = vmul.f32 %v2677_v62, %v2638_v33  ;;  %v2717_v39 = vmul.f32 %v2678_v48, %v2639_v63 }
 0x8d8   :  { %2756 = vst.msk [vmem:[%s5355_s10 + $0x128] sm:$0xff] %vm2718_vm15, %v2716_v8 }
 0x8d9   :  { %2757 = vst.msk [vmem:[%s5355_s10 + $0x130] sm:$0xff] %vm2718_vm15, %v2717_v39  ;;  %v1850_v32 = vpop.permute.xlu1 %1849 }
 0x8da   :  { %v2500_v28 = vsel %vm2481_vm12, %v2460_v27, %v1850_v32 }
 0x8e1   :  { %v2006_v13 = vpop.permute.xlu1 %2005 }
 0x8e2   :  { %v2539_v41 = vsel %vm496_vm7, %v2500_v28, %v2006_v13 }
 0x8e9   :  { %v2124_v10 = vpop.permute.xlu1 %2123 }
 0x8ea   :  { %v2579_v46 = vsel %vm2560_vm13, %v2539_v41, %v2124_v10 }
 0x8eb   :  { %v2619_v36 = vsel %vm2600_vm14, %v2579_v46, %v3852_v3 }
 0x8ec   :  { %v2697_v22 = vmul.f32 %v2658_v54, %v2619_v36 }
 0x8ee   :  { %2737 = vst.msk [vmem:[%s5355_s10 + $0x90] sm:$0xff] %vm2718_vm15, %v2697_v22 }
 0x8f1   :  { %v1886_v0 = vpop.permute.xlu1 %1885 }
 0x8f2   :  { %v2518_v37 = vsel %vm2481_vm12, %v2478_v57, %v1886_v0 }
 0x8f9   :  { %v2042_v24 = vpop.permute.xlu1 %2041 }
 0x8fa   :  { %v2557_v40 = vsel %vm496_vm7, %v2518_v37, %v2042_v24 }
 0x901   :  { %v2160_v52 = vpop.permute.xlu1 %2159 }
 0x902   :  { %v2597_v12 = vsel %vm2560_vm13, %v2557_v40, %v2160_v52 }
 0x909   :  { %v2278_v3 = vpop.permute.xlu1 %2277 }
 0x90a   :  { %v2637_v61 = vsel %vm2600_vm14, %v2597_v12, %v2278_v3 }
 0x90b   :  { %v2715_v2 = vmul.f32 %v2676_v11, %v2637_v61 }
 0x90d   :  { %2755 = vst.msk [vmem:[%s5355_s10 + $0x120] sm:$0xff] %vm2718_vm15, %v2715_v2 }

// kernel: forward.3
= control target key start
LH: loop header
LB: loop body
LE: loop exit
PB: predicated region body
PF: predicated region fallthrough
CT: control target
= control target key end

     0   :  { %19 = vsyncpa [#allocation8], 0  ;;  %s10408_s0 = inlined_call_operand.vmem [shape: f32[312,64], index: 0, kind: input, shape index: {}]   ;;  %s10409_s1 = inlined_call_operand.vmem [shape: f32[312,9], index: 1, kind: input, shape index: {}]   ;;  %s10410_s2 = inlined_call_operand.vmem [shape: f32[104,9], index: 2, kind: input, shape index: {}]   ;;  %s10411_s3 = inlined_call_operand.vmem [shape: f32[2,104], index: 3, kind: input, shape index: {}]   ;;  %s10412_s4 = inlined_call_operand.vmem [shape: f32[9,4], index: 4, kind: input, shape index: {}]   ;;  %s10413_s5 = inlined_call_operand.vmem [shape: f32[9,4], index: 5, kind: input, shape index: {}]   ;;  %s10414_s6 = inlined_call_operand.vmem [shape: f32[1,4], index: 6, kind: input, shape index: {}]   ;;  %s10415_s7 = inlined_call_operand.vmem [shape: bf16[576,128], index: 7, kind: input, shape index: {}]   ;;  %s10416_s8 = inlined_call_operand.vmem [shape: bf16[288,128], index: 8, kind: input, shape index: {}]   ;;  %s10417_s9 = inlined_call_operand.vmem [shape: f32[1,128], index: 9, kind: input, shape index: {}]   ;;  %s10418_s10 = inlined_call_operand.vmem [shape: f32[32,8], index: 10, kind: input, shape index: {}]   ;;  %s10419_s11 = inlined_call_operand.vmem [shape: f32[1,8], index: 11, kind: input, shape index: {}]   ;;  %s10420_s12 = inlined_call_operand.hbm [shape: f32[2,8], index: 12, kind: output, shape index: {0}]   ;;  %s10421_s13 = inlined_call_operand.hbm [shape: f32[2,32], index: 13, kind: output, shape index: {1}]  }
   0x1   :  { %20 = vsyncpa [#allocation10], 0  ;;  %s6931_s25 = smov 0  }
   0x2 LB: > { %s6937_s26 = sadd.s32 4294967295, %s6833_s25   ;;  %p5695_p0 = scmp.ge.s32.totalorder %s6833_s25, 1  ;;  %s6833_s25 = sphi %s6931_s25, %s26_s25  }
   0x3   : > { %p394_p1 = scmp.lt.s32.totalorder %s6833_s25, 4 }
   0x5   : > { %p395_p2 = pnand %p5695_p0, %p394_p1 }
   0x7   : > { %398 = sbr.rel (%p395_p2) target bundleno = 2519 (0x9d7), region = 68 }
   0xc   : > { %s438_s27 = smul.u32 13, %s6937_s26  ;;  %p5698_p4 = scmp.ne.s32.totalorder %s6937_s26, 0 }
   0xe   : > { %p439_p3 = scmp.lt.s32.totalorder %s438_s27, 38  ;;  %454 = sbr.rel (%p5698_p4) target bundleno = 91 (0x5b), region = 72 }
  0x10   : > { %s10815_s27 = smov (!%p439_p3, %s438_s27), 38 }
  0x11   : > { %s5696_s28 = sshll.u32 %s10815_s27, 3 }
  0x12   : > { %s6945_s14 = scalar_lea.vmem %s10408_s0, %s5696_s28  ;;  %s6950_s17 = scalar_lea.vmem %s10409_s1, %s5696_s28 }
  0x13   : > { %vm455_vm0 = vcmask 7168   ;;  %v6835_v0 = vmov 0.0   ;;  %vm484_vm1 = vcmask 261120   ;;  %vm513_vm2 = vcmask 523264  }
  0x14   : > { %456 = vst.msk [vmem:[#allocation2] sm:$0xff] %vm455_vm0, %v6835_v0 }
  0x15   : > { %457 = vst.msk [vmem:[#allocation2 + $0x8] sm:$0xff] %vm455_vm0, %v6835_v0 }
  0x16   : > { %458 = vst.msk [vmem:[#allocation2 + $0x10] sm:$0xff] %vm455_vm0, %v6835_v0 }
  0x17   : > { %459 = vst.msk [vmem:[#allocation2 + $0x18] sm:$0xff] %vm455_vm0, %v6835_v0 }
  0x18   : > { %460 = vst.msk [vmem:[#allocation2 + $0x20] sm:$0xff] %vm455_vm0, %v6835_v0 }
  0x19   : > { %461 = vst.msk [vmem:[#allocation2 + $0x28] sm:$0xff] %vm455_vm0, %v6835_v0 }
  0x1a   : > { %462 = vst.msk [vmem:[#allocation2 + $0x30] sm:$0xff] %vm455_vm0, %v6835_v0 }
  0x1b   : > { %463 = vst.msk [vmem:[#allocation2 + $0x38] sm:$0xff] %vm455_vm0, %v6835_v0 }
  0x1c   : > { %464 = vst.msk [vmem:[#allocation2 + $0x40] sm:$0xff] %vm455_vm0, %v6835_v0 }
  0x1d   : > { %465 = vst.msk [vmem:[#allocation2 + $0x48] sm:$0xff] %vm455_vm0, %v6835_v0 }
  0x1e   : > { %466 = vst.msk [vmem:[#allocation2 + $0x50] sm:$0xff] %vm455_vm0, %v6835_v0 }
  0x1f   : > { %467 = vst.msk [vmem:[#allocation2 + $0x58] sm:$0xff] %vm455_vm0, %v6835_v0 }
  0x20   : > { %468 = vst.msk [vmem:[#allocation2 + $0x60] sm:$0xff] %vm455_vm0, %v6835_v0 }
  0x21   : > { %469 = vst.msk [vmem:[#allocation2 + $0x68] sm:$0xff] %vm455_vm0, %v6835_v0 }
  0x22   : > { %470 = vst.msk [vmem:[#allocation2 + $0x70] sm:$0xff] %vm455_vm0, %v6835_v0 }
  0x23   : > { %471 = vst.msk [vmem:[#allocation3] sm:$0xff] %vm455_vm0, %v6835_v0 }
  0x24   : > { %472 = vst.msk [vmem:[#allocation3 + $0x8] sm:$0xff] %vm455_vm0, %v6835_v0 }
  0x25   : > { %473 = vst.msk [vmem:[#allocation3 + $0x10] sm:$0xff] %vm455_vm0, %v6835_v0 }
  0x26   : > { %474 = vst.msk [vmem:[#allocation3 + $0x18] sm:$0xff] %vm455_vm0, %v6835_v0 }
  0x27   : > { %475 = vst.msk [vmem:[#allocation3 + $0x20] sm:$0xff] %vm455_vm0, %v6835_v0 }
  0x28   : > { %476 = vst.msk [vmem:[#allocation3 + $0x28] sm:$0xff] %vm455_vm0, %v6835_v0 }
  0x29   : > { %477 = vst.msk [vmem:[#allocation3 + $0x30] sm:$0xff] %vm455_vm0, %v6835_v0 }
  0x2a   : > { %478 = vst.msk [vmem:[#allocation3 + $0x38] sm:$0xff] %vm455_vm0, %v6835_v0 }
  0x2b   : > { %479 = vst.msk [vmem:[#allocation3 + $0x40] sm:$0xff] %vm455_vm0, %v6835_v0 }
  0x2c   : > { %480 = vst.msk [vmem:[#allocation3 + $0x48] sm:$0xff] %vm455_vm0, %v6835_v0 }
  0x2d   : > { %481 = vst.msk [vmem:[#allocation3 + $0x50] sm:$0xff] %vm455_vm0, %v6835_v0 }
  0x2e   : > { %482 = vst.msk [vmem:[#allocation3 + $0x58] sm:$0xff] %vm455_vm0, %v6835_v0 }
  0x2f   : > { %483 = vst.msk [vmem:[#allocation3 + $0x60] sm:$0xff] %vm455_vm0, %v6835_v0 }
  0x30   : > { %485 = vst.msk [vmem:[#allocation4] sm:$0xff] %vm484_vm1, %v6835_v0 }
  0x31   : > { %486 = vst.msk [vmem:[#allocation4 + $0x8] sm:$0xff] %vm484_vm1, %v6835_v0 }
  0x32   : > { %487 = vst.msk [vmem:[#allocation4 + $0x10] sm:$0xff] %vm484_vm1, %v6835_v0 }
  0x33   : > { %488 = vst.msk [vmem:[#allocation4 + $0x18] sm:$0xff] %vm484_vm1, %v6835_v0 }
  0x34   : > { %489 = vst.msk [vmem:[#allocation4 + $0x20] sm:$0xff] %vm484_vm1, %v6835_v0 }
  0x35   : > { %490 = vst.msk [vmem:[#allocation4 + $0x28] sm:$0xff] %vm484_vm1, %v6835_v0 }
  0x36   : > { %491 = vst.msk [vmem:[#allocation4 + $0x30] sm:$0xff] %vm484_vm1, %v6835_v0 }
  0x37   : > { %492 = vst.msk [vmem:[#allocation4 + $0x38] sm:$0xff] %vm484_vm1, %v6835_v0 }
  0x38   : > { %493 = vst.msk [vmem:[#allocation4 + $0x40] sm:$0xff] %vm484_vm1, %v6835_v0 }
  0x39   : > { %494 = vst.msk [vmem:[#allocation4 + $0x48] sm:$0xff] %vm484_vm1, %v6835_v0 }
  0x3a   : > { %495 = vst.msk [vmem:[#allocation4 + $0x50] sm:$0xff] %vm484_vm1, %v6835_v0 }
  0x3b   : > { %496 = vst.msk [vmem:[#allocation4 + $0x58] sm:$0xff] %vm484_vm1, %v6835_v0 }
  0x3c   : > { %497 = vst.msk [vmem:[#allocation4 + $0x60] sm:$0xff] %vm484_vm1, %v6835_v0 }
  0x3d   : > { %498 = vst.msk [vmem:[#allocation4 + $0x68] sm:$0xff] %vm484_vm1, %v6835_v0 }
  0x3e   : > { %499 = vst.msk [vmem:[#allocation4 + $0x70] sm:$0xff] %vm484_vm1, %v6835_v0 }
  0x3f   : > { %500 = vst.msk [vmem:[#allocation5] sm:$0xff] %vm484_vm1, %v6835_v0 }
  0x40   : > { %501 = vst.msk [vmem:[#allocation5 + $0x8] sm:$0xff] %vm484_vm1, %v6835_v0 }
  0x41   : > { %502 = vst.msk [vmem:[#allocation5 + $0x10] sm:$0xff] %vm484_vm1, %v6835_v0 }
  0x42   : > { %503 = vst.msk [vmem:[#allocation5 + $0x18] sm:$0xff] %vm484_vm1, %v6835_v0 }
  0x43   : > { %504 = vst.msk [vmem:[#allocation5 + $0x20] sm:$0xff] %vm484_vm1, %v6835_v0 }
  0x44   : > { %505 = vst.msk [vmem:[#allocation5 + $0x28] sm:$0xff] %vm484_vm1, %v6835_v0 }
  0x45   : > { %506 = vst.msk [vmem:[#allocation5 + $0x30] sm:$0xff] %vm484_vm1, %v6835_v0 }
  0x46   : > { %507 = vst.msk [vmem:[#allocation5 + $0x38] sm:$0xff] %vm484_vm1, %v6835_v0 }
  0x47   : > { %508 = vst.msk [vmem:[#allocation5 + $0x40] sm:$0xff] %vm484_vm1, %v6835_v0 }
  0x48   : > { %509 = vst.msk [vmem:[#allocation5 + $0x48] sm:$0xff] %vm484_vm1, %v6835_v0 }
  0x49   : > { %510 = vst.msk [vmem:[#allocation5 + $0x50] sm:$0xff] %vm484_vm1, %v6835_v0 }
  0x4a   : > { %511 = vst.msk [vmem:[#allocation5 + $0x58] sm:$0xff] %vm484_vm1, %v6835_v0 }
  0x4b   : > { %512 = vst.msk [vmem:[#allocation5 + $0x60] sm:$0xff] %vm484_vm1, %v6835_v0 }
  0x4c   : > { %514 = vst.msk [vmem:[#allocation6] sm:$0xff] %vm513_vm2, %v6835_v0 }
  0x4d   : > { %515 = vst.msk [vmem:[#allocation6 + $0x8] sm:$0xff] %vm513_vm2, %v6835_v0 }
  0x4e   : > { %516 = vst.msk [vmem:[#allocation6 + $0x10] sm:$0xff] %vm513_vm2, %v6835_v0 }
  0x4f   : > { %517 = vst.msk [vmem:[#allocation6 + $0x18] sm:$0xff] %vm513_vm2, %v6835_v0 }
  0x50   : > { %518 = vst.msk [vmem:[#allocation6 + $0x20] sm:$0xff] %vm513_vm2, %v6835_v0 }
  0x51   : > { %519 = vst.msk [vmem:[#allocation6 + $0x28] sm:$0xff] %vm513_vm2, %v6835_v0 }
  0x52   : > { %520 = vst.msk [vmem:[#allocation6 + $0x30] sm:$0xff] %vm513_vm2, %v6835_v0 }
  0x53   : > { %521 = vst.msk [vmem:[#allocation6 + $0x38] sm:$0xff] %vm513_vm2, %v6835_v0 }
  0x54   : > { %522 = vst.msk [vmem:[#allocation6 + $0x40] sm:$0xff] %vm513_vm2, %v6835_v0 }
  0x55   : > { %523 = vst.msk [vmem:[#allocation6 + $0x48] sm:$0xff] %vm513_vm2, %v6835_v0 }
  0x56   : > { %524 = vst.msk [vmem:[#allocation6 + $0x50] sm:$0xff] %vm513_vm2, %v6835_v0 }
  0x57   : > { %525 = vst.msk [vmem:[#allocation6 + $0x58] sm:$0xff] %vm513_vm2, %v6835_v0 }
  0x58   : > { %526 = vst.msk [vmem:[#allocation6 + $0x60] sm:$0xff] %vm513_vm2, %v6835_v0 }
  0x59   : > { %527 = vst.msk [vmem:[#allocation6 + $0x68] sm:$0xff] %vm513_vm2, %v6835_v0 }
  0x5a   : > { %528 = vst.msk [vmem:[#allocation6 + $0x70] sm:$0xff] %vm513_vm2, %v6835_v0 }
  0x5b PF: > { %v7095_v1 = vld [vmem:[#allocation2 + $0x21] sm:$0xff]  ;;  %v7097_v2 = vld [vmem:[#allocation2 + $0x11] sm:$0xff]  ;;  %s6836_s18 = smov 1   ;;  %v7104_v4 = vld [vmem:[#allocation2 + $0x29] sm:$0xff]  ;;  %s6837_s19 = smov 2   ;;  %vm1173_vm3 = vcmask 1040384  }
  0x5c   : > { %v555_v3 = vld [vmem:[#allocation2 + $0x1] sm:$0xff]  ;;  %632 = vrot.lane.b32.xlu2 %v7095_v1, %s6836_s18  ;;  %628 = vrot.lane.b32.xlu1 %v7097_v2, %s6836_s18  ;;  %v7106_v5 = vld [vmem:[#allocation2 + $0x19] sm:$0xff]  ;;  %v7108_v6 = vld [vmem:[#allocation2 + $0x9] sm:$0xff]  ;;  %s6838_s20 = smov 3   ;;  %s6839_s21 = smov 4   ;;  %vm1133_vm4 = vcmask 72704  }
  0x5d   : > { %624 = vrot.lane.b32.xlu0 %v555_v3, %s6836_s18  ;;  %v7116_v7 = vld [vmem:[#allocation2 + $0x41] sm:$0xff]  ;;  %v7118_v8 = vld [vmem:[#allocation2 + $0x39] sm:$0xff]  ;;  %v7120_v9 = vld [vmem:[#allocation2 + $0x31] sm:$0xff]  ;;  %s6840_s22 = smov 5   ;;  %s6841_s23 = smov 6   ;;  %vm991_vm5 = vcmask 7168  }
  0x5e   : > { %v7128_v10 = vld [vmem:[#allocation2 + $0x59] sm:$0xff]  ;;  %v7130_v11 = vld [vmem:[#allocation2 + $0x51] sm:$0xff]  ;;  %v7132_v12 = vld [vmem:[#allocation2 + $0x49] sm:$0xff]  ;;  %s6842_s24 = smov 7   ;;  %s6843_s27 = smov 8   ;;  %vm1019_vm6 = vcmask 23552  }
  0x5f   : > { %v569_v13 = vld [vmem:[#allocation2 + $0xa] sm:$0xff]  ;;  %v568_v14 = vld [vmem:[#allocation2 + $0x2] sm:$0xff]  ;;  %v571_v17 = vld [vmem:[#allocation2 + $0x1a] sm:$0xff]  ;;  %vm1005_vm7 = vcmask 15360   ;;  %vm1033_vm8 = vcmask 31744   ;;  %vm1061_vm9 = vcmask 48128  }
  0x60   : > { %v7140_v15 = vld [vmem:[#allocation2 + $0x61] sm:$0xff]  ;;  %v570_v18 = vld [vmem:[#allocation2 + $0x12] sm:$0xff]  ;;  %v573_v21 = vld [vmem:[#allocation2 + $0x2a] sm:$0xff]  ;;  %vm1047_vm10 = vcmask 39936   ;;  %vm1075_vm11 = vcmask 56320   ;;  %vm1089_vm12 = vcmask 64512  }
  0x61   : > { %v572_v16 = vld [vmem:[#allocation2 + $0x22] sm:$0xff]  ;;  %v575_v19 = vld [vmem:[#allocation2 + $0x3a] sm:$0xff]  ;;  %v574_v20 = vld [vmem:[#allocation2 + $0x32] sm:$0xff]  ;;  %p5996_p5 = scmp.ne.s32.totalorder %s6937_s26, 2 }
  0x62   : > { %v578_v22 = vld [vmem:[#allocation2 + $0x52] sm:$0xff]  ;;  %v577_v23 = vld [vmem:[#allocation2 + $0x4a] sm:$0xff]  ;;  %v576_v24 = vld [vmem:[#allocation2 + $0x42] sm:$0xff] }
  0x63   : > { %v581_v25 = vld [vmem:[#allocation2 + $0x7] sm:$0xff]  ;;  %v579_v27 = vld [vmem:[#allocation2 + $0x5a] sm:$0xff]  ;;  %v7148_v30 = vld [vmem:[#allocation2 + $0xf] sm:$0xff] }
  0x64   : > { %634 = vrot.lane.b32.xlu2 %v7104_v4, %s6836_s18  ;;  %630 = vrot.lane.b32.xlu1 %v7106_v5, %s6836_s18  ;;  %v580_v26 = vld [vmem:[#allocation2 + $0x62] sm:$0xff]  ;;  %v7146_v29 = vld [vmem:[#allocation2 + $0x17] sm:$0xff]  ;;  %v7155_v32 = vld [vmem:[#allocation2 + $0x2f] sm:$0xff] }
  0x65   : > { %626 = vrot.lane.b32.xlu0 %v7108_v6, %s6836_s18  ;;  %v7144_v28 = vld [vmem:[#allocation2 + $0x1f] sm:$0xff]  ;;  %v7153_v31 = vld [vmem:[#allocation2 + $0x37] sm:$0xff]  ;;  %v7157_v33 = vld [vmem:[#allocation2 + $0x27] sm:$0xff] }
  0x66   : > { %v7162_v34 = vld [vmem:[#allocation2 + $0x4f] sm:$0xff]  ;;  %v7164_v35 = vld [vmem:[#allocation2 + $0x47] sm:$0xff]  ;;  %v7166_v36 = vld [vmem:[#allocation2 + $0x3f] sm:$0xff] }
  0x67   : > { %v7173_v38 = vld [vmem:[#allocation2 + $0x67] sm:$0xff]  ;;  %v7175_v39 = vld [vmem:[#allocation2 + $0x5f] sm:$0xff]  ;;  %v7177_v40 = vld [vmem:[#allocation2 + $0x57] sm:$0xff] }
  0x68   : > { %v7184_v42 = vld [vmem:[#allocation2 + $0x18] sm:$0xff]  ;;  %v7186_v43 = vld [vmem:[#allocation2 + $0x10] sm:$0xff]  ;;  %v7188_v44 = vld [vmem:[#allocation2 + $0x8] sm:$0xff] }
  0x69   : > { %v7198_v46 = vld [vmem:[#allocation2 + $0x28] sm:$0xff]  ;;  %v7200_v47 = vld [vmem:[#allocation2 + $0x30] sm:$0xff]  ;;  %v7202_v48 = vld [vmem:[#allocation2 + $0x20] sm:$0xff] }
  0x6a   : > { %10521 = vst [vmem:[#allocation13_spill] sm:$0xff] %v7198_v46  ;;  %v7216_v52 = vld [vmem:[#allocation2 + $0x40] sm:$0xff]  ;;  %v7218_v53 = vld [vmem:[#allocation2 + $0x48] sm:$0xff]  ;;  %v7220_v54 = vld [vmem:[#allocation2 + $0x38] sm:$0xff] }
  0x6b   : > { %10522 = vst [vmem:[#allocation14_spill] sm:$0xff] %v7200_v47  ;;  %v7234_v58 = vld [vmem:[#allocation2 + $0x58] sm:$0xff]  ;;  %v7236_v59 = vld [vmem:[#allocation2 + $0x60] sm:$0xff]  ;;  %v7238_v60 = vld [vmem:[#allocation2 + $0x50] sm:$0xff] }
  0x6c   : > { %640 = vrot.lane.b32.xlu2 %v7116_v7, %s6836_s18  ;;  %638 = vrot.lane.b32.xlu1 %v7118_v8, %s6836_s18  ;;  %10524 = vst [vmem:[#allocation16_spill] sm:$0xff] %v7220_v54  ;;  %v7252_v0 = vld [vmem:[#allocation2 + $0x68] sm:$0xff] }
  0x6d   : > { %636 = vrot.lane.b32.xlu0 %v7120_v9, %s6836_s18  ;;  %10525 = vst [vmem:[#allocation17_spill] sm:$0xff] %v7234_v58 }
  0x6e   : > { %10526 = vst [vmem:[#allocation18_spill] sm:$0xff] %v7236_v59 }
  0x6f   : > { %10527 = vst [vmem:[#allocation19_spill] sm:$0xff] %v7238_v60 }
  0x74   : > { %646 = vrot.lane.b32.xlu2 %v7128_v10, %s6836_s18  ;;  %644 = vrot.lane.b32.xlu1 %v7130_v11, %s6836_s18 }
  0x75   : > { %642 = vrot.lane.b32.xlu0 %v7132_v12, %s6836_s18 }
  0x7c   : > { %678 = vrot.lane.b32.xlu2 %v569_v13, %s6837_s19  ;;  %676 = vrot.lane.b32.xlu1 %v568_v14, %s6837_s19 }
  0x7d   : > { %648 = vrot.lane.b32.xlu0 %v7140_v15, %s6836_s18 }
  0x84   : > { %684 = vrot.lane.b32.xlu2 %v572_v16, %s6837_s19  ;;  %682 = vrot.lane.b32.xlu1 %v571_v17, %s6837_s19 }
  0x85   : > { %680 = vrot.lane.b32.xlu0 %v570_v18, %s6837_s19 }
  0x8c   : > { %690 = vrot.lane.b32.xlu2 %v575_v19, %s6837_s19  ;;  %688 = vrot.lane.b32.xlu1 %v574_v20, %s6837_s19  ;;  %v598_v20 = vld [vmem:[#allocation2 + $0x1e] sm:$0xff] }
  0x8d   : > { %686 = vrot.lane.b32.xlu0 %v573_v21, %s6837_s19  ;;  %v597_v21 = vld [vmem:[#allocation2 + $0x16] sm:$0xff] }
  0x94   : > { %696 = vrot.lane.b32.xlu2 %v578_v22, %s6837_s19  ;;  %694 = vrot.lane.b32.xlu1 %v577_v23, %s6837_s19 }
  0x95   : > { %692 = vrot.lane.b32.xlu0 %v576_v24, %s6837_s19  ;;  %v602_v24 = vld [vmem:[#allocation2 + $0x3e] sm:$0xff] }
  0x9c   : > { %728 = vrot.lane.b32.xlu2 %v581_v25, %s6838_s20  ;;  %700 = vrot.lane.b32.xlu1 %v580_v26, %s6837_s19  ;;  %v601_v25 = vld [vmem:[#allocation2 + $0x36] sm:$0xff]  ;;  %v600_v26 = vld [vmem:[#allocation2 + $0x2e] sm:$0xff] }
  0x9d   : > { %698 = vrot.lane.b32.xlu0 %v579_v27, %s6837_s19 }
  0xa4   : > { %734 = vrot.lane.b32.xlu2 %v7144_v28, %s6838_s20  ;;  %732 = vrot.lane.b32.xlu1 %v7146_v29, %s6838_s20 }
  0xa5   : > { %730 = vrot.lane.b32.xlu0 %v7148_v30, %s6838_s20 }
  0xac   : > { %740 = vrot.lane.b32.xlu2 %v7153_v31, %s6838_s20  ;;  %738 = vrot.lane.b32.xlu1 %v7155_v32, %s6838_s20 }
  0xad   : > { %736 = vrot.lane.b32.xlu0 %v7157_v33, %s6838_s20 }
  0xb4   : > { %746 = vrot.lane.b32.xlu2 %v7162_v34, %s6838_s20  ;;  %744 = vrot.lane.b32.xlu1 %v7164_v35, %s6838_s20 }
  0xb5   : > { %742 = vrot.lane.b32.xlu0 %v7166_v36, %s6838_s20 }
  0xb6   : > { %v7171_v37 = vpop.permute.xlu2 %632 }
  0xbc   : > { %752 = vrot.lane.b32.xlu2 %v7173_v38, %s6838_s20  ;;  %750 = vrot.lane.b32.xlu1 %v7175_v39, %s6838_s20 }
  0xbd   : > { %748 = vrot.lane.b32.xlu0 %v7177_v40, %s6838_s20 }
  0xbe   : > { %v7182_v41 = vpop.permute.xlu2 %634 }
  0xc4   : > { %784 = vrot.lane.b32.xlu2 %v7184_v42, %s6839_s21  ;;  %782 = vrot.lane.b32.xlu1 %v7186_v43, %s6839_s21 }
  0xc5   : > { %780 = vrot.lane.b32.xlu0 %v7188_v44, %s6839_s21 }
  0xc6   : > { %v7196_v45 = vpop.permute.xlu2 %640 }
  0xcc   : > { %790 = vrot.lane.b32.xlu2 %v7200_v47, %s6839_s21  ;;  %788 = vrot.lane.b32.xlu1 %v7198_v46, %s6839_s21 }
  0xcd   : > { %786 = vrot.lane.b32.xlu0 %v7202_v48, %s6839_s21 }
  0xce   : > { %v7210_v49 = vpop.permute.xlu2 %646  ;;  %v7212_v50 = vpop.permute.xlu1 %628 }
  0xcf   : > { %10523 = vst [vmem:[#allocation15_spill] sm:$0xff] %v7210_v49  ;;  %v7214_v51 = vpop.permute.xlu0 %624 }
  0xd4   : > { %796 = vrot.lane.b32.xlu2 %v7218_v53, %s6839_s21  ;;  %794 = vrot.lane.b32.xlu1 %v7216_v52, %s6839_s21 }
  0xd5   : > { %792 = vrot.lane.b32.xlu0 %v7220_v54, %s6839_s21 }
  0xd6   : > { %v7228_v55 = vpop.permute.xlu2 %678  ;;  %v7230_v56 = vpop.permute.xlu1 %630 }
  0xd7   : > { %v7232_v57 = vpop.permute.xlu0 %626 }
  0xdc   : > { %802 = vrot.lane.b32.xlu2 %v7236_v59, %s6839_s21  ;;  %800 = vrot.lane.b32.xlu1 %v7234_v58, %s6839_s21 }
  0xdd   : > { %798 = vrot.lane.b32.xlu0 %v7238_v60, %s6839_s21 }
  0xde   : > { %v7246_v61 = vpop.permute.xlu2 %684  ;;  %v7248_v62 = vpop.permute.xlu1 %638 }
  0xdf   : > { %10528 = vst [vmem:[#allocation20_spill] sm:$0xff] %v7248_v62  ;;  %v7250_v63 = vpop.permute.xlu0 %636 }
  0xe0   : > { %10529 = vst [vmem:[#allocation21_spill] sm:$0xff] %v7250_v63 }
  0xe4   : > { %822 = vrot.lane.b32.xlu2 %v7097_v2, %s6840_s22  ;;  %820 = vrot.lane.b32.xlu1 %v7108_v6, %s6840_s22 }
  0xe5   : > { %804 = vrot.lane.b32.xlu0 %v7252_v0, %s6839_s21 }
  0xe6   : > { %v7258_v3 = vpop.permute.xlu2 %690  ;;  %v7260_v13 = vpop.permute.xlu1 %644 }
  0xe7   : > { %10530 = vst [vmem:[#allocation22_spill] sm:$0xff] %v7258_v3  ;;  %v7262_v14 = vpop.permute.xlu0 %642 }
  0xe8   : > { %10531 = vst [vmem:[#allocation23_spill] sm:$0xff] %v7260_v13  ;;  %v1118_v13 = vld [vmem:[%s6950_s17 + $0x10] sm:$0xff] }
  0xec   : > { %828 = vrot.lane.b32.xlu2 %v7104_v4, %s6840_s22  ;;  %826 = vrot.lane.b32.xlu1 %v7095_v1, %s6840_s22 }
  0xed   : > { %824 = vrot.lane.b32.xlu0 %v7106_v5, %s6840_s22 }
  0xee   : > { %v7267_v16 = vpop.permute.xlu2 %696  ;;  %v7269_v2 = vpop.permute.xlu1 %676 }
  0xef   : > { %10532 = vst [vmem:[#allocation24_spill] sm:$0xff] %v7267_v16  ;;  %v7271_v6 = vpop.permute.xlu0 %648 }
  0xf0   : > { %10533 = vst [vmem:[#allocation25_spill] sm:$0xff] %v7271_v6  ;;  %v606_v6 = vld [vmem:[#allocation2 + $0x5e] sm:$0xff] }
  0xf4   : > { %834 = vrot.lane.b32.xlu2 %v7116_v7, %s6840_s22  ;;  %832 = vrot.lane.b32.xlu1 %v7118_v8, %s6840_s22  ;;  %v596_v8 = vld [vmem:[#allocation2 + $0xe] sm:$0xff] }
  0xf5   : > { %830 = vrot.lane.b32.xlu0 %v7120_v9, %s6840_s22  ;;  %v595_v9 = vld [vmem:[#allocation2 + $0x69] sm:$0xff] }
  0xf6   : > { %v7276_v17 = vpop.permute.xlu2 %728  ;;  %v7278_v18 = vpop.permute.xlu1 %682 }
  0xf7   : > { %v7280_v4 = vpop.permute.xlu0 %680 }
  0xfc   : > { %840 = vrot.lane.b32.xlu2 %v7128_v10, %s6840_s22  ;;  %838 = vrot.lane.b32.xlu1 %v7130_v11, %s6840_s22 }
  0xfd   : > { %836 = vrot.lane.b32.xlu0 %v7132_v12, %s6840_s22  ;;  %v599_v12 = vld [vmem:[#allocation2 + $0x26] sm:$0xff] }
  0xfe   : > { %v7285_v1 = vpop.permute.xlu2 %734  ;;  %v7287_v5 = vpop.permute.xlu1 %688 }
  0xff   : > { %10534 = vst [vmem:[#allocation26_spill] sm:$0xff] %v7287_v5  ;;  %v7289_v7 = vpop.permute.xlu0 %686 }
 0x100   : > { %10535 = vst [vmem:[#allocation27_spill] sm:$0xff] %v7289_v7  ;;  %v1117_v7 = vld [vmem:[%s6950_s17 + $0x8] sm:$0xff] }
 0x104   : > { %872 = vrot.lane.b32.xlu2 %v596_v8, %s6841_s23  ;;  %844 = vrot.lane.b32.xlu1 %v595_v9, %s6840_s22 }
 0x105   : > { %842 = vrot.lane.b32.xlu0 %v7140_v15, %s6840_s22  ;;  %s6847_s22 = smov 127  }
 0x106   : > { %v7293_v19 = vpop.permute.xlu2 %740  ;;  %v7295_v10 = vpop.permute.xlu1 %694 }
 0x107   : > { %10536 = vst [vmem:[#allocation28_spill] sm:$0xff] %v7293_v19  ;;  %v7297_v11 = vpop.permute.xlu0 %692 }
 0x10c   : > { %878 = vrot.lane.b32.xlu2 %v599_v12, %s6841_s23  ;;  %876 = vrot.lane.b32.xlu1 %v598_v20, %s6841_s23  ;;  %v605_v12 = vld [vmem:[#allocation2 + $0x56] sm:$0xff]  ;;  %v604_v20 = vld [vmem:[#allocation2 + $0x4e] sm:$0xff] }
 0x10d   : > { %874 = vrot.lane.b32.xlu0 %v597_v21, %s6841_s23  ;;  %v603_v21 = vld [vmem:[#allocation2 + $0x46] sm:$0xff] }
 0x10e   : > { %v7302_v22 = vpop.permute.xlu2 %746  ;;  %v7304_v23 = vpop.permute.xlu1 %700 }
 0x10f   : > { %10537 = vst [vmem:[#allocation29_spill] sm:$0xff] %v7304_v23  ;;  %v7306_v15 = vpop.permute.xlu0 %698  ;;  %v607_v23 = vld [vmem:[#allocation2 + $0x66] sm:$0xff] }
 0x110   : > { %10538 = vst [vmem:[#allocation30_spill] sm:$0xff] %v7306_v15 }
 0x114   : > { %884 = vrot.lane.b32.xlu2 %v602_v24, %s6841_s23  ;;  %882 = vrot.lane.b32.xlu1 %v601_v25, %s6841_s23 }
 0x115   : > { %880 = vrot.lane.b32.xlu0 %v600_v26, %s6841_s23 }
 0x116   : > { %v7311_v27 = vpop.permute.xlu2 %752  ;;  %v7313_v8 = vpop.permute.xlu1 %732 }
 0x117   : > { %10539 = vst [vmem:[#allocation31_spill] sm:$0xff] %v7311_v27  ;;  %v7315_v9 = vpop.permute.xlu0 %730  ;;  %v608_v27 = vld [vmem:[#allocation2 + $0x6e] sm:$0xff] }
 0x11c   : > { %890 = vrot.lane.b32.xlu2 %v605_v12, %s6841_s23  ;;  %888 = vrot.lane.b32.xlu1 %v604_v20, %s6841_s23 }
 0x11d   : > { %886 = vrot.lane.b32.xlu0 %v603_v21, %s6841_s23 }
 0x11e   : > { %v7320_v24 = vpop.permute.xlu1 %738  ;;  %v7322_v25 = vpop.permute.xlu2 %784 }
 0x11f   : > { %10540 = vst [vmem:[#allocation32_spill] sm:$0xff] %v7320_v24  ;;  %v7324_v26 = vpop.permute.xlu0 %736 }
 0x124   : > { %896 = vrot.lane.b32.xlu2 %v608_v27, %s6841_s23  ;;  %894 = vrot.lane.b32.xlu1 %v607_v23, %s6841_s23 }
 0x125   : > { %892 = vrot.lane.b32.xlu0 %v606_v6, %s6841_s23 }
 0x126   : > { %v7329_v12 = vpop.permute.xlu1 %744  ;;  %v7331_v20 = vpop.permute.xlu2 %790 }
 0x127   : > { %10541 = vst [vmem:[#allocation33_spill] sm:$0xff] %v7331_v20  ;;  %v7333_v21 = vpop.permute.xlu0 %742 }
 0x128   : > { %10542 = vst [vmem:[#allocation34_spill] sm:$0xff] %v7333_v21 }
 0x12c   : > { %916 = vrot.lane.b32.xlu2 %v7144_v28, %s6842_s24  ;;  %914 = vrot.lane.b32.xlu1 %v7146_v29, %s6842_s24 }
 0x12d   : > { %912 = vrot.lane.b32.xlu0 %v7148_v30, %s6842_s24 }
 0x12e   : > { %v7338_v3 = vpop.permute.xlu1 %750  ;;  %v7340_v27 = vpop.permute.xlu2 %796 }
 0x12f   : > { %10543 = vst [vmem:[#allocation35_spill] sm:$0xff] %v7338_v3  ;;  %v7342_v23 = vpop.permute.xlu0 %748  ;;  %v610_v3 = vld [vmem:[#allocation2 + $0x70] sm:$0xff] }
 0x130   : > { %10544 = vst [vmem:[#allocation36_spill] sm:$0xff] %v7342_v23 }
 0x134   : > { %922 = vrot.lane.b32.xlu2 %v7153_v31, %s6842_s24  ;;  %920 = vrot.lane.b32.xlu1 %v7155_v32, %s6842_s24 }
 0x135   : > { %918 = vrot.lane.b32.xlu0 %v7157_v33, %s6842_s24 }
 0x136   : > { %v7347_v6 = vpop.permute.xlu2 %802  ;;  %v7349_v21 = vpop.permute.xlu1 %782 }
 0x137   : > { %10545 = vst [vmem:[#allocation37_spill] sm:$0xff] %v7347_v6  ;;  %v7351_v28 = vpop.permute.xlu0 %780 }
 0x13c   : > { %928 = vrot.lane.b32.xlu2 %v7162_v34, %s6842_s24  ;;  %926 = vrot.lane.b32.xlu1 %v7164_v35, %s6842_s24  ;;  %v609_v35 = vld [vmem:[#allocation2 + $0x6f] sm:$0xff] }
 0x13d   : > { %924 = vrot.lane.b32.xlu0 %v7166_v36, %s6842_s24 }
 0x13e   : > { %v7356_v29 = vpop.permute.xlu1 %788  ;;  %v7360_v31 = vpop.permute.xlu2 %822 }
 0x13f   : > { %v7358_v30 = vpop.permute.xlu0 %786 }
 0x144   : > { %934 = vrot.lane.b32.xlu2 %v7173_v38, %s6842_s24  ;;  %932 = vrot.lane.b32.xlu1 %v7175_v39, %s6842_s24 }
 0x145   : > { %930 = vrot.lane.b32.xlu0 %v7177_v40, %s6842_s24 }
 0x146   : > { %v7365_v32 = vpop.permute.xlu1 %794  ;;  %v7369_v34 = vpop.permute.xlu2 %828 }
 0x147   : > { %10546 = vst [vmem:[#allocation38_spill] sm:$0xff] %v7365_v32  ;;  %v7367_v33 = vpop.permute.xlu0 %792 }
 0x148   : > { %10547 = vst [vmem:[#allocation39_spill] sm:$0xff] %v7367_v33 }
 0x14c   : > { %954 = vrot.lane.b32.xlu2 %v7184_v42, %s6843_s27  ;;  %952 = vrot.lane.b32.xlu1 %v7186_v43, %s6843_s27 }
 0x14d   : > { %936 = vrot.lane.b32.xlu0 %v609_v35, %s6842_s24  ;;  %s6844_s24 = smov 125  }
 0x14e   : > { %v7373_v36 = vpop.permute.xlu1 %800  ;;  %v7377_v39 = vpop.permute.xlu2 %834 }
 0x14f   : > { %10548 = vst [vmem:[#allocation40_spill] sm:$0xff] %v7373_v36  ;;  %v7375_v38 = vpop.permute.xlu0 %798 }
 0x150   : > { %10549 = vst [vmem:[#allocation41_spill] sm:$0xff] %v7377_v39 }
 0x154   : > { %960 = vrot.lane.b32.xlu2 %v7200_v47, %s6843_s27  ;;  %958 = vrot.lane.b32.xlu1 %v7198_v46, %s6843_s27 }
 0x155   : > { %956 = vrot.lane.b32.xlu0 %v7202_v48, %s6843_s27 }
 0x156   : > { %v7382_v40 = vpop.permute.xlu1 %820  ;;  %v7389_v35 = vpop.permute.xlu2 %840 }
 0x157   : > { %v7384_v32 = vpop.permute.xlu0 %804  ;;  %10551 = vst [vmem:[#allocation43_spill] sm:$0xff] %v7389_v35 }
 0x158   : > { %10550 = vst [vmem:[#allocation42_spill] sm:$0xff] %v7384_v32 }
 0x15c   : > { %966 = vrot.lane.b32.xlu2 %v7218_v53, %s6843_s27  ;;  %964 = vrot.lane.b32.xlu1 %v7216_v52, %s6843_s27 }
 0x15d   : > { %962 = vrot.lane.b32.xlu0 %v7220_v54, %s6843_s27 }
 0x15e   : > { %v7391_v62 = vpop.permute.xlu1 %826  ;;  %v7402_v33 = vpop.permute.xlu2 %872 }
 0x15f   : > { %v7393_v39 = vpop.permute.xlu0 %824 }
 0x164   : > { %972 = vrot.lane.b32.xlu2 %v7236_v59, %s6843_s27  ;;  %970 = vrot.lane.b32.xlu1 %v7234_v58, %s6843_s27 }
 0x165   : > { %968 = vrot.lane.b32.xlu0 %v7238_v60, %s6843_s27 }
 0x166   : > { %v7398_v6 = vpop.permute.xlu1 %832  ;;  %v7409_v19 = vpop.permute.xlu2 %878 }
 0x167   : > { %10552 = vst [vmem:[#allocation44_spill] sm:$0xff] %v7398_v6  ;;  %v7400_v32 = vpop.permute.xlu0 %830 }
 0x168   : > { %10553 = vst [vmem:[#allocation45_spill] sm:$0xff] %v7400_v32 }
 0x16c   : > { %976 = vrot.lane.b32.xlu1 %v610_v3, %s6843_s27 }
 0x16d   : > { %974 = vrot.lane.b32.xlu0 %v7252_v0, %s6843_s27  ;;  %s6851_s27 = smov 126  }
 0x16e   : > { %v7405_v54 = vpop.permute.xlu1 %838  ;;  %v7415_v58 = vpop.permute.xlu2 %884 }
 0x16f   : > { %v7407_v15 = vpop.permute.xlu0 %836  ;;  %10556 = vst [vmem:[#allocation48_spill] sm:$0xff] %v7415_v58 }
 0x176   : > { %v7411_v59 = vpop.permute.xlu1 %844  ;;  %v7421_v47 = vpop.permute.xlu2 %890 }
 0x177   : > { %10554 = vst [vmem:[#allocation46_spill] sm:$0xff] %v7411_v59  ;;  %v7413_v5 = vpop.permute.xlu0 %842 }
 0x178   : > { %10555 = vst [vmem:[#allocation47_spill] sm:$0xff] %v7413_v5 }
 0x17e   : > { %v7417_v6 = vpop.permute.xlu1 %876  ;;  %v7431_v32 = vpop.permute.xlu2 %896 }
 0x17f   : > { %v7419_v49 = vpop.permute.xlu0 %874  ;;  %10559 = vst [vmem:[#allocation51_spill] sm:$0xff] %v7431_v32  ;;  %v1131_v32 = vld [vmem:[%s10413_s5] sm:$0xff] }
 0x186   : > { %v7423_v3 = vpop.permute.xlu1 %882  ;;  %v7437_v58 = vpop.permute.xlu2 %916 }
 0x187   : > { %10557 = vst [vmem:[#allocation49_spill] sm:$0xff] %v7423_v3  ;;  %v7425_v0 = vpop.permute.xlu0 %880  ;;  %v1132_v3 = vld [vmem:[%s10413_s5 + $0x8] sm:$0x1] }
 0x188   : > { %5699 = vmatpush.msk.msra.mxu0 %vm1173_vm3, %v1132_v3  ;;  %6059 = vmatpush.msk.msra.mxu2 %vm1173_vm3, %v1132_v3 }
 0x18a   : > { %1192 = vmatpush.msra.mxu0 %v1131_v32  ;;  %6060 = vmatpush.msra.mxu2 %v1131_v32 }
 0x18e   : > { %v7427_v63 = vpop.permute.xlu1 %888  ;;  %v7455_v20 = vpop.permute.xlu2 %922 }
 0x18f   : > { %v7429_v35 = vpop.permute.xlu0 %886  ;;  %10562 = vst [vmem:[#allocation54_spill] sm:$0xff] %v7455_v20 }
 0x190   : > { %10558 = vst [vmem:[#allocation50_spill] sm:$0xff] %v7429_v35  ;;  %v1130_v35 = vld [vmem:[%s10412_s4 + $0x8] sm:$0x1] }
 0x191   : > { %5713 = vmatpush.msk.msra.mxu1 %vm1173_vm3, %v1130_v35  ;;  %6061 = vmatpush.msk.msra.mxu3 %vm1173_vm3, %v1130_v35 }
 0x196   : > { %v7433_v59 = vpop.permute.xlu1 %894  ;;  %v7463_v35 = vpop.permute.xlu2 %928 }
 0x197   : > { %10560 = vst [vmem:[#allocation52_spill] sm:$0xff] %v7433_v59  ;;  %v7435_v5 = vpop.permute.xlu0 %892  ;;  %v1129_v59 = vld [vmem:[%s10412_s4] sm:$0xff] }
 0x198   : > { %10561 = vst [vmem:[#allocation53_spill] sm:$0xff] %v7435_v5  ;;  %1290 = vmatpush.msra.mxu1 %v1129_v59  ;;  %v1116_v5 = vld [vmem:[%s6950_s17] sm:$0xff]  ;;  %6062 = vmatpush.msra.mxu3 %v1129_v59 }
 0x199   : > { %5714 = vmatmul.msk.f32.vlgmr.msra.gmra.mxu1 %vm1133_vm4, %v1116_v5  ;;  %v1123_v5 = vld [vmem:[%s6950_s17 + $0x38] sm:$0xff]  ;;  %v542_v59 = vld [vmem:[#allocation2] sm:$0xff] }
 0x19a   : > { %5721 = vmatmul.msk.f32.vlgmr.msra.gmra.mxu3 %vm1133_vm4, %v1123_v5  ;;  %v1119_v5 = vld [vmem:[%s6950_s17 + $0x18] sm:$0xff] }
 0x19e   : > { %v7439_v36 = vpop.permute.xlu1 %914 }
 0x19f   : > { %v913_v23 = vpop.permute.xlu0 %912 }
 0x1a1   : > { %5715 = vmatmul.msk.f32.gmra.mxu1 %vm1133_vm4, %v1117_v7 }
 0x1a6   : > { %v7457_v24 = vpop.permute.xlu1 %920 }
 0x1a7   : > { %v7459_v16 = vpop.permute.xlu0 %918 }
 0x1a9   : > { %5716 = vmatmul.msk.f32.gmra.mxu1 %vm1133_vm4, %v1118_v13 }
 0x1ae   : > { %v7465_v3 = vpop.permute.xlu1 %926 }
 0x1af   : > { %10563 = vst [vmem:[#allocation55_spill] sm:$0xff] %v7465_v3  ;;  %v7467_v60 = vpop.permute.xlu0 %924  ;;  %v992_v3 = vsel %vm991_vm5, %v542_v59, %v7214_v51  ;;  %v993_v51 = vsel %vm991_vm5, %v7188_v44, %v7232_v57 }
 0x1b0   : > { %10564 = vst [vmem:[#allocation56_spill] sm:$0xff] %v7467_v60  ;;  %v7479_v60 = vpop.permute.xlu2 %934  ;;  %v1006_v20 = vsel %vm1005_vm7, %v992_v3, %v7269_v2  ;;  %v1007_v44 = vsel %vm1005_vm7, %v993_v51, %v7228_v55  ;;  %v1125_v55 = vld [vmem:[%s6950_s17 + $0x48] sm:$0xff]  ;;  %v994_v51 = vsel %vm991_vm5, %v7186_v43, %v7212_v50  ;;  %v1126_v43 = vld [vmem:[%s6950_s17 + $0x50] sm:$0xff] }
 0x1b1   : > { %v1020_v13 = vsel %vm1019_vm6, %v1006_v20, %v7276_v17  ;;  %5717 = vmatmul.msk.f32.gmra.mxu1 %vm1133_vm4, %v1119_v5  ;;  %v7501_v20 = vld [vmem:[%s10410_s2] sm:$0xff] }
 0x1b2   : > { %v1034_v46 = vsel %vm1033_vm8, %v1020_v13, %v7351_v28  ;;  %v1120_v13 = vld [vmem:[%s6950_s17 + $0x20] sm:$0xff] }
 0x1b3   : > { %v1048_v2 = vsel %vm1047_vm10, %v1034_v46, %v7382_v40 }
 0x1b4   : > { %v1062_v17 = vsel %vm1061_vm9, %v1048_v2, %v7402_v33  ;;  %v1021_v33 = vsel %vm1019_vm6, %v1007_v44, %v7315_v9 }
 0x1b5   : > { %v1076_v28 = vsel %vm1075_vm11, %v1062_v17, %v913_v23  ;;  %v1035_v59 = vsel %vm1033_vm8, %v1021_v33, %v7349_v21  ;;  %v7528_v21 = vld [vmem:[%s10410_s2 + $0x8] sm:$0xff] }
 0x1b6   : > { %v7473_v32 = vpop.permute.xlu1 %932  ;;  %v1049_v23 = vsel %vm1047_vm10, %v1035_v59, %v7360_v31 }
 0x1b7   : > { %10565 = vst [vmem:[#allocation57_spill] sm:$0xff] %v7473_v32  ;;  %v7475_v7 = vpop.permute.xlu0 %930  ;;  %v1124_v32 = vld [vmem:[%s6950_s17 + $0x40] sm:$0xff]  ;;  %v1063_v5 = vsel %vm1061_vm9, %v1049_v23, %v7419_v49  ;;  %v1008_v49 = vsel %vm1005_vm7, %v994_v51, %v7280_v4  ;;  %v1000_v23 = vsel %vm991_vm5, %v7216_v52, %v7196_v45 }
 0x1b8   : > { %5722 = vmatmul.msk.f32.gmra.mxu3 %vm1133_vm4, %v1124_v32  ;;  %v955_v32 = vpop.permute.xlu2 %954  ;;  %v1077_v9 = vsel %vm1075_vm11, %v1063_v5, %v7439_v36  ;;  %v1609_v52 = vld [vmem:[#allocation3 + $0x8] sm:$0xff]  ;;  %v996_v5 = vsel %vm991_vm5, %v7202_v48, %v7171_v37 }
 0x1b9   : > { %5718 = vmatmul.msk.f32.gmra.mxu1 %vm1133_vm4, %v1120_v13  ;;  %v1091_v31 = vsel %vm1089_vm12, %v1077_v9, %v955_v32  ;;  %1636 = vrot.lane.b32.xlu0 %v1609_v52, %s6836_s18  ;;  %v1001_v9 = vsel %vm991_vm5, %v7218_v53, %v7262_v14 }
 0x1ba   : > { %v1104_v36 = vmul.f32 %v1091_v31, %v7528_v21  ;;  %v1015_v48 = vsel %vm1005_vm7, %v1001_v9, %v7295_v10 }
 0x1be   : > { %v953_v3 = vpop.permute.xlu1 %952 }
 0x1bf   : > { %v1090_v46 = vsel %vm1089_vm12, %v1076_v28, %v953_v3  ;;  %v7507_v57 = vpop.permute.xlu0 %936  ;;  %v1022_v28 = vsel %vm1019_vm6, %v1008_v49, %v7313_v8  ;;  %v7555_v8 = vld [vmem:[%s10410_s2 + $0x10] sm:$0xff] }
 0x1c0   : > { %v1103_v40 = vmul.f32 %v1090_v46, %v7501_v20  ;;  %5723 = vmatmul.msk.f32.gmra.mxu3 %vm1133_vm4, %v1125_v55  ;;  %v1036_v3 = vsel %vm1033_vm8, %v1022_v28, %v7322_v25  ;;  %v1121_v46 = vld [vmem:[%s6950_s17 + $0x28] sm:$0xff]  ;;  %v961_v33 = vpop.permute.xlu2 %960 }
 0x1c1   : > { %v1050_v44 = vsel %vm1047_vm10, %v1036_v3, %v7393_v39  ;;  %5719 = vmatmul.msk.f32.gmra.mxu1 %vm1133_vm4, %v1121_v46  ;;  %v1610_v28 = vld [vmem:[#allocation3 + $0x10] sm:$0xff] }
 0x1c2   : > { %5700 = vmatmul.msk.f32.vlgmr.msra.gmra.mxu0 %vm1133_vm4, %v1103_v40  ;;  %v1064_v50 = vsel %vm1061_vm9, %v1050_v44, %v7417_v6  ;;  %v995_v6 = vsel %vm991_vm5, %v7184_v42, %v7230_v56  ;;  %v1014_v42 = vsel %vm1005_vm7, %v1000_v23, %v7297_v11  ;;  %1638 = vrot.lane.b32.xlu1 %v1610_v28, %s6836_s18  ;;  %v7664_v46 = vld [vmem:[%s10410_s2 + $0x48] sm:$0xff]  ;;  %v10572_v23 = vld [vmem:[#allocation33_spill] sm:$0xff] }
 0x1c3   : > { %v1078_v4 = vsel %vm1075_vm11, %v1064_v50, %v7437_v58  ;;  %v1009_v39 = vsel %vm1005_vm7, %v995_v6, %v7278_v18  ;;  %v1122_v18 = vld [vmem:[%s6950_s17 + $0x30] sm:$0xff]  ;;  %v1028_v55 = vsel %vm1019_vm6, %v1014_v42, %v7329_v12 }
 0x1c4   : > { %v1023_v58 = vsel %vm1019_vm6, %v1009_v39, %v7285_v1  ;;  %v1127_v1 = vld [vmem:[%s6950_s17 + $0x58] sm:$0xff]  ;;  %v1042_v11 = vsel %vm1033_vm8, %v1028_v55, %v7340_v27  ;;  %v10567_v50 = vld [vmem:[#allocation23_spill] sm:$0xff] }
 0x1c5   : > { %v1037_v32 = vsel %vm1033_vm8, %v1023_v58, %v7358_v30  ;;  %v1056_v30 = vsel %vm1047_vm10, %v1042_v11, %v7407_v15  ;;  %v1010_v15 = vsel %vm1005_vm7, %v996_v5, %v7246_v61  ;;  %v1029_v61 = vsel %vm1019_vm6, %v1015_v48, %v7302_v22  ;;  %v10569_v6 = vld [vmem:[#allocation27_spill] sm:$0xff]  ;;  %v10570_v39 = vld [vmem:[#allocation24_spill] sm:$0xff]  ;;  %v10575_v11 = vld [vmem:[#allocation45_spill] sm:$0xff] }
 0x1c6   : > { %v959_v2 = vpop.permute.xlu1 %958  ;;  %v1051_v56 = vsel %vm1047_vm10, %v1037_v32, %v7391_v62  ;;  %v1070_v27 = vsel %vm1061_vm9, %v1056_v30, %v7427_v63  ;;  %v1024_v63 = vsel %vm1019_vm6, %v1010_v15, %v7324_v26  ;;  %v1043_v26 = vsel %vm1033_vm8, %v1029_v61, %v7375_v38  ;;  %v10571_v58 = vld [vmem:[#allocation32_spill] sm:$0xff]  ;;  %v10579_v48 = vld [vmem:[#allocation53_spill] sm:$0xff]  ;;  %v7703_v61 = vld [vmem:[%s10410_s2 + $0x28] sm:$0xff] }
 0x1c7   : > { %v957_v17 = vpop.permute.xlu0 %956  ;;  %v1065_v45 = vsel %vm1061_vm9, %v1051_v56, %v7409_v19  ;;  %v7598_v19 = vld [vmem:[%s10410_s2 + $0x18] sm:$0xff]  ;;  %v1084_v31 = vsel %vm1075_vm11, %v1070_v27, %v7463_v35  ;;  %v1038_v53 = vsel %vm1033_vm8, %v1024_v63, %v7356_v29  ;;  %v1611_v55 = vld [vmem:[#allocation3 + $0x18] sm:$0xff] }
 0x1c8   : > { %5724 = vmatmul.msk.f32.gmra.mxu3 %vm1133_vm4, %v1126_v43  ;;  %v1092_v25 = vsel %vm1089_vm12, %v1078_v4, %v957_v17  ;;  %v1079_v62 = vsel %vm1075_vm11, %v1065_v45, %v7459_v16  ;;  %v7609_v16 = vld [vmem:[%s10410_s2 + $0x40] sm:$0xff]  ;;  %v7628_v14 = vpop.permute.xlu2 %966  ;;  %v1052_v10 = vsel %vm1047_vm10, %v1038_v53, %v7369_v34  ;;  %v1057_v17 = vsel %vm1047_vm10, %v1043_v26, %v7405_v54  ;;  %v1612_v54 = vld [vmem:[#allocation3 + $0x20] sm:$0xff]  ;;  %v10568_v4 = vld [vmem:[#allocation19_spill] sm:$0xff] }
 0x1c9   : > { %v1105_v59 = vmul.f32 %v1092_v25, %v7555_v8  ;;  %5720 = vmatmul.msk.f32.gmra.mxu1 %vm1133_vm4, %v1122_v18  ;;  %v1093_v12 = vsel %vm1089_vm12, %v1079_v62, %v959_v2  ;;  %v1128_v2 = vld [vmem:[%s6950_s17 + $0x60] sm:$0xff]  ;;  %v1066_v22 = vsel %vm1061_vm9, %v1052_v10, %v7425_v0  ;;  %v1071_v34 = vsel %vm1061_vm9, %v1057_v17, %v7421_v47  ;;  %v10573_v42 = vld [vmem:[#allocation36_spill] sm:$0xff] }
 0x1ca   : > { %5701 = vmatmul.msk.f32.gmra.mxu0 %vm1133_vm4, %v1104_v36  ;;  %v1106_v51 = vmul.f32 %v1093_v12, %v7598_v19  ;;  %v1608_v36 = vld [vmem:[#allocation3] sm:$0xff]  ;;  %v1080_v38 = vsel %vm1075_vm11, %v1066_v22, %v7457_v24  ;;  %v7652_v0 = vld [vmem:[%s10410_s2 + $0x20] sm:$0xff]  ;;  %v1085_v44 = vsel %vm1075_vm11, %v1071_v34, %v7475_v7  ;;  %1642 = vrot.lane.b32.xlu0 %v1612_v54, %s6836_s18  ;;  %v1615_v30 = vld [vmem:[#allocation3 + $0x38] sm:$0xff] }
 0x1cb   : > { %1634 = vrot.lane.b32.xlu2 %v1608_v36, %s6836_s18  ;;  %v1094_v3 = vsel %vm1089_vm12, %v1080_v38, %v961_v33  ;;  %v10566_v47 = vld [vmem:[#allocation13_spill] sm:$0xff]  ;;  %v1002_v25 = vsel %vm991_vm5, %v10568_v4, %v10567_v50  ;;  %v10574_v45 = vld [vmem:[#allocation40_spill] sm:$0xff]  ;;  %v10576_v12 = vld [vmem:[#allocation43_spill] sm:$0xff] }
 0x1cc   : > { %v997_v24 = vsel %vm991_vm5, %v10566_v47, %v7182_v41  ;;  %v1016_v33 = vsel %vm1005_vm7, %v1002_v25, %v10570_v39  ;;  %v10577_v27 = vld [vmem:[#allocation49_spill] sm:$0xff]  ;;  %v10582_v10 = vld [vmem:[#allocation14_spill] sm:$0xff]  ;;  %v10583_v22 = vld [vmem:[#allocation15_spill] sm:$0xff] }
 0x1cd   : > { %v1011_v7 = vsel %vm1005_vm7, %v997_v24, %v10569_v6  ;;  %v1030_v56 = vsel %vm1019_vm6, %v1016_v33, %v10573_v42  ;;  %v10585_v36 = vld [vmem:[#allocation26_spill] sm:$0xff]  ;;  %v10586_v34 = vld [vmem:[#allocation28_spill] sm:$0xff]  ;;  %v10588_v47 = vld [vmem:[#allocation35_spill] sm:$0xff] }
 0x1ce   : > { %v7573_v13 = vpop.permute.xlu1 %964  ;;  %v1025_v41 = vsel %vm1019_vm6, %v1011_v7, %v10571_v58  ;;  %v1044_v52 = vsel %vm1033_vm8, %v1030_v56, %v10574_v45  ;;  %v10587_v54 = vld [vmem:[#allocation30_spill] sm:$0xff]  ;;  %v1616_v25 = vld [vmem:[#allocation3 + $0x40] sm:$0xff] }
 0x1cf   : > { %v7563_v40 = vpop.permute.xlu0 %962  ;;  %v1039_v32 = vsel %vm1033_vm8, %v1025_v41, %v10572_v23  ;;  %v1058_v5 = vsel %vm1047_vm10, %v1044_v52, %v10576_v12  ;;  %v1614_v6 = vld [vmem:[#allocation3 + $0x30] sm:$0xff]  ;;  %v10590_v7 = vld [vmem:[#allocation37_spill] sm:$0xff]  ;;  %v10591_v33 = vld [vmem:[#allocation44_spill] sm:$0xff] }
 0x1d0   : > { %5725 = vmatmul.msk.f32.gmra.mxu3 %vm1133_vm4, %v1127_v1  ;;  %v1613_v1 = vld [vmem:[#allocation3 + $0x28] sm:$0xff]  ;;  %v1053_v62 = vsel %vm1047_vm10, %v1039_v32, %v10575_v11  ;;  %v973_v9 = vpop.permute.xlu2 %972  ;;  %v1072_v63 = vsel %vm1061_vm9, %v1058_v5, %v10579_v48  ;;  %v1618_v41 = vld [vmem:[#allocation3 + $0x50] sm:$0xff]  ;;  %v7753_v11 = vld [vmem:[%s10410_s2 + $0x30] sm:$0xff] }
 0x1d1   : > { %v1067_v15 = vsel %vm1061_vm9, %v1053_v62, %v10577_v27  ;;  %1644 = vrot.lane.b32.xlu1 %v1613_v1, %s6836_s18  ;;  %v10593_v32 = vld [vmem:[#allocation47_spill] sm:$0xff]  ;;  %v10597_v12 = vld [vmem:[#allocation16_spill] sm:$0xff]  ;;  %v10601_v48 = vld [vmem:[#allocation29_spill] sm:$0xff] }
 0x1d2   : > { %5702 = vmatmul.msk.f32.gmra.mxu0 %vm1133_vm4, %v1105_v59  ;;  %v1107_v59 = vmul.f32 %v1094_v3, %v7652_v0  ;;  %1648 = vrot.lane.b32.xlu0 %v1615_v30, %s6836_s18  ;;  %v10596_v30 = vld [vmem:[#allocation20_spill] sm:$0xff] }
 0x1d3   : > { %1640 = vrot.lane.b32.xlu2 %v1611_v55, %s6836_s18  ;;  %v10595_v55 = vld [vmem:[#allocation56_spill] sm:$0xff]  ;;  %v999_v5 = vsel %vm991_vm5, %v10597_v12, %v10596_v30 }
 0x1d4   : > { %v7764_v27 = vld [vmem:[%s10410_s2 + $0x58] sm:$0xff] }
 0x1d6   : > { %v971_v29 = vpop.permute.xlu1 %970 }
 0x1d7   : > { %v969_v37 = vpop.permute.xlu0 %968  ;;  %v1099_v43 = vsel %vm1089_vm12, %v1085_v44, %v971_v29  ;;  %v10584_v29 = vld [vmem:[#allocation17_spill] sm:$0xff] }
 0x1d8   : > { %v1098_v49 = vsel %vm1089_vm12, %v1084_v31, %v969_v37  ;;  %5726 = vmatmul.msk.f32.gmra.mxu3 %vm1133_vm4, %v1128_v2  ;;  %v1112_v18 = vmul.f32 %v1099_v43, %v7664_v46  ;;  %v10578_v31 = vld [vmem:[#allocation54_spill] sm:$0xff]  ;;  %v7714_v2 = vld [vmem:[%s10410_s2 + $0x50] sm:$0xff]  ;;  %v1003_v28 = vsel %vm991_vm5, %v10584_v29, %v10583_v22 }
 0x1d9   : > { %v1111_v35 = vmul.f32 %v1098_v49, %v7609_v16  ;;  %v1081_v37 = vsel %vm1075_vm11, %v1067_v15, %v10578_v31  ;;  %v1017_v3 = vsel %vm1005_vm7, %v1003_v28, %v10587_v54  ;;  %v10589_v43 = vld [vmem:[#allocation39_spill] sm:$0xff]  ;;  %1650 = vrot.lane.b32.xlu1 %v1616_v25, %s6836_s18  ;;  %v10598_v15 = vld [vmem:[#allocation22_spill] sm:$0xff]  ;;  %v10599_v31 = vld [vmem:[#allocation25_spill] sm:$0xff] }
 0x1da   : > { %5703 = vmatmul.msk.f32.gmra.mxu0 %vm1133_vm4, %v1106_v51  ;;  %v10580_v51 = vld [vmem:[#allocation57_spill] sm:$0xff]  ;;  %v1095_v53 = vsel %vm1089_vm12, %v1081_v37, %v7563_v40  ;;  %v1031_v24 = vsel %vm1019_vm6, %v1017_v3, %v10588_v47  ;;  %1654 = vrot.lane.b32.xlu0 %v1618_v41, %s6836_s18  ;;  %v10600_v37 = vld [vmem:[#allocation18_spill] sm:$0xff]  ;;  %v1619_v29 = vld [vmem:[#allocation3 + $0x58] sm:$0xff] }
 0x1db   : > { %5708 = vmatmul.msk.f32.vlgmr.msra.gmra.mxu2 %vm1133_vm4, %v1111_v35  ;;  %v1086_v49 = vsel %vm1075_vm11, %v1072_v63, %v10580_v51  ;;  %v10581_v35 = vld [vmem:[#allocation21_spill] sm:$0xff]  ;;  %v1108_v44 = vmul.f32 %v1095_v53, %v7703_v61  ;;  %v1045_v39 = vsel %vm1033_vm8, %v1031_v24, %v10590_v7  ;;  %1646 = vrot.lane.b32.xlu2 %v1614_v6, %s6836_s18  ;;  %v10602_v51 = vld [vmem:[#allocation34_spill] sm:$0xff] }
 0x1dc   : > { %v998_v26 = vsel %vm991_vm5, %v10582_v10, %v10581_v35  ;;  %v1100_v17 = vsel %vm1089_vm12, %v1086_v49, %v973_v9  ;;  %v1059_v42 = vsel %vm1047_vm10, %v1045_v39, %v10593_v32  ;;  %v1013_v9 = vsel %vm1005_vm7, %v999_v5, %v10598_v15  ;;  %v10603_v35 = vld [vmem:[#allocation31_spill] sm:$0xff]  ;;  %v1617_v28 = vld [vmem:[#allocation3 + $0x48] sm:$0xff]  ;;  %v7801_v6 = vld [vmem:[%s10410_s2 + $0x38] sm:$0xff] }
 0x1dd   : > { %v1012_v40 = vsel %vm1005_vm7, %v998_v26, %v10585_v36  ;;  %v1113_v4 = vmul.f32 %v1100_v17, %v7714_v2  ;;  %v1027_v49 = vsel %vm1019_vm6, %v1013_v9, %v10602_v51  ;;  %v10604_v26 = vld [vmem:[#allocation38_spill] sm:$0xff]  ;;  %v10605_v36 = vld [vmem:[#allocation41_spill] sm:$0xff] }
 0x1de   : > { %v1026_v38 = vsel %vm1019_vm6, %v1012_v40, %v10586_v34  ;;  %v1041_v17 = vsel %vm1033_vm8, %v1027_v49, %v10604_v26  ;;  %v10606_v34 = vld [vmem:[#allocation42_spill] sm:$0xff]  ;;  %v977_v24 = vpop.permute.xlu1 %976  ;;  %v7821_v32 = vld [vmem:[%s10414_s6] ss:$0 sm:$0xff] }
 0x1df   : > { %v1040_v50 = vsel %vm1033_vm8, %v1026_v38, %v10589_v43  ;;  %v975_v56 = vpop.permute.xlu0 %974  ;;  %v1055_v40 = vsel %vm1047_vm10, %v1041_v17, %v10605_v36  ;;  %v10607_v54 = vld [vmem:[#allocation46_spill] sm:$0xff]  ;;  %v10609_v43 = vld [vmem:[#allocation51_spill] sm:$0xff] }
 0x1e0   : > { %v1054_v58 = vsel %vm1047_vm10, %v1040_v50, %v10591_v33  ;;  %v7810_v33 = vld [vmem:[%s10410_s2 + $0x60] sm:$0xff] }
 0x1e1   : > { %1656 = vrot.lane.b32.xlu1 %v1619_v29, %s6836_s18 }
 0x1e2   : > { %5704 = vmatmul.msk.f32.gmra.mxu0 %vm1133_vm4, %v1107_v59  ;;  %v10592_v59 = vld [vmem:[#allocation48_spill] sm:$0xff] }
 0x1e3   : > { %5709 = vmatmul.msk.f32.gmra.mxu2 %vm1133_vm4, %v1112_v18  ;;  %v1068_v23 = vsel %vm1061_vm9, %v1054_v58, %v10592_v59  ;;  %v10594_v18 = vld [vmem:[#allocation52_spill] sm:$0xff]  ;;  %1652 = vrot.lane.b32.xlu2 %v1617_v28, %s6836_s18 }
 0x1e4   : > { %v1073_v1 = vsel %vm1061_vm9, %v1059_v42, %v10594_v18  ;;  %v1082_v45 = vsel %vm1075_vm11, %v1068_v23, %v10595_v55  ;;  %v1620_v23 = vld [vmem:[#allocation3 + $0x60] sm:$0xff] }
 0x1e5   : > { %v1087_v52 = vsel %vm1075_vm11, %v1073_v1, %v7479_v60  ;;  %v1096_v62 = vsel %vm1089_vm12, %v1082_v45, %v7573_v13  ;;  %v1004_v13 = vsel %vm991_vm5, %v10600_v37, %v10599_v31 }
 0x1e6   : > { %v1101_v60 = vsel %vm1089_vm12, %v1087_v52, %v975_v56  ;;  %v1018_v63 = vsel %vm1005_vm7, %v1004_v13, %v10601_v48  ;;  %v1109_v53 = vmul.f32 %v1096_v62, %v7753_v11 }
 0x1e7   : > { %v1032_v10 = vsel %vm1019_vm6, %v1018_v63, %v10603_v35  ;;  %v1114_v22 = vmul.f32 %v1101_v60, %v7764_v27 }
 0x1e8   : > { %v1046_v38 = vsel %vm1033_vm8, %v1032_v10, %v10606_v34 }
 0x1e9   : > { %v1060_v3 = vsel %vm1047_vm10, %v1046_v38, %v10607_v54 }
 0x1ea   : > { %5705 = vmatmul.msk.f32.gmra.mxu0 %vm1133_vm4, %v1108_v44  ;;  %v10608_v44 = vld [vmem:[#allocation50_spill] sm:$0xff]  ;;  %v1074_v50 = vsel %vm1061_vm9, %v1060_v3, %v10609_v43 }
 0x1eb   : > { %5710 = vmatmul.msk.f32.gmra.mxu2 %vm1133_vm4, %v1113_v4  ;;  %v1069_v47 = vsel %vm1061_vm9, %v1055_v40, %v10608_v44  ;;  %v10610_v4 = vld [vmem:[#allocation55_spill] sm:$0xff]  ;;  %v1088_v39 = vsel %vm1075_vm11, %v1074_v50, %v7507_v57  ;;  %1658 = vrot.lane.b32.xlu2 %v1620_v23, %s6836_s18 }
 0x1ec   : > { %v1083_v25 = vsel %vm1075_vm11, %v1069_v47, %v10610_v4  ;;  %v1102_v58 = vsel %vm1089_vm12, %v1088_v39, %v977_v24 }
 0x1ed   : > { %v1097_v7 = vsel %vm1089_vm12, %v1083_v25, %v7628_v14  ;;  %v1115_v59 = vmul.f32 %v1102_v58, %v7810_v33 }
 0x1ee   : > { %v1110_v41 = vmul.f32 %v1097_v7, %v7801_v6 }
 0x1f2   : > { %5706 = vmatmul.msk.f32.gmra.mxu0 %vm1133_vm4, %v1109_v53 }
 0x1f3   : > { %5711 = vmatmul.msk.f32.gmra.mxu2 %vm1133_vm4, %v1114_v22 }
 0x1fa   : > { %5707 = vmatmul.msk.f32.gmra.mxu0 %vm1133_vm4, %v1110_v41 }
 0x1fb   : > { %5712 = vmatmul.msk.f32.gmra.mxu2 %vm1133_vm4, %v1115_v59 }
 0x216   : > { %v1292_v14 = vpop.f32.mrf.mxu1 }
 0x21d   : > { %v1313_v30 = vpop.f32.mrf.mxu3 }
 0x21e   : > { %v1295_v57 = vpop.f32.mrf.mxu1 }
 0x226   : > { %v1298_v1 = vpop.f32.mrf.mxu1 }
 0x22e   : > { %v1301_v5 = vpop.f32.mrf.mxu1 }
 0x236   : > { %v1304_v48 = vpop.f32.mrf.mxu1 }
 0x23b   : > { %v1316_v31 = vpop.f32.mrf.mxu3 }
 0x23e   : > { %v1307_v22 = vpop.f32.mrf.mxu1 }
 0x23f   : > { %v1194_v42 = vpop.f32.mrf.mxu0 }
 0x240   : > { %v1293_v56 = vadd.f32 %v1292_v14, %v1194_v42 }
 0x242   : > { %v7824_v18 = vadd.f32 %v7821_v32, %v1293_v56 }
 0x243   : > { %v1319_v53 = vpop.f32.mrf.mxu3 }
 0x244   : > { %6468 = vtanh.f32 %v7824_v18 }
 0x246   : > { %v1310_v3 = vpop.f32.mrf.mxu1 }
 0x247   : > { %v1197_v55 = vpop.f32.mrf.mxu0 }
 0x248   : > { %v1296_v45 = vadd.f32 %v1295_v57, %v1197_v55 }
 0x24a   : > { %v6469_v52 = vpop.eup %6468  ;;  %v7828_v62 = vadd.f32 %v7821_v32, %v1296_v45 }
 0x24b   : > { %1699 = vrot.lane.b32.xlu0 %v6469_v52, %s6844_s24  ;;  %v1322_v40 = vpop.f32.mrf.mxu3 }
 0x24c   : > { %6470 = vtanh.f32 %v7828_v62 }
 0x24f   : > { %v1200_v12 = vpop.f32.mrf.mxu0 }
 0x250   : > { %v1299_v60 = vadd.f32 %v1298_v1, %v1200_v12 }
 0x252   : > { %v6471_v15 = vpop.eup %6470  ;;  %v7833_v9 = vadd.f32 %v7821_v32, %v1299_v60 }
 0x253   : > { %1701 = vrot.lane.b32.xlu1 %v6471_v15, %s6844_s24  ;;  %v1325_v25 = vpop.f32.mrf.mxu3 }
 0x254   : > { %6472 = vtanh.f32 %v7833_v9 }
 0x257   : > { %v1203_v37 = vpop.f32.mrf.mxu0 }
 0x258   : > { %v1302_v13 = vadd.f32 %v1301_v5, %v1203_v37 }
 0x25a   : > { %v6473_v63 = vpop.eup %6472  ;;  %v7838_v51 = vadd.f32 %v7821_v32, %v1302_v13  ;;  %v6845_v13 = vmov 0  }
 0x25b   : > { %1703 = vrot.lane.b32.xlu2 %v6473_v63, %s6844_s24  ;;  %v1328_v1 = vpop.f32.mrf.mxu3  ;;  %6109 = vset.pattern.permute.xlu1 %v6845_v13  ;;  %v7893_v63 = vpop.permute.xlu2 %1634 }
 0x25c   : > { %6474 = vtanh.f32 %v7838_v51  ;;  %6110 = vset.pattern.permute.xlu2 %v6845_v13  ;;  %6111 = vset.pattern.permute.xlu0 %v6845_v13 }
 0x25e   : > { %v1218_v49 = vpop.f32.mrf.mxu2 }
 0x25f   : > { %v1206_v35 = vpop.f32.mrf.mxu0  ;;  %v1317_v54 = vadd.f32 %v1316_v31, %v1218_v49  ;;  %v7895_v49 = vpop.permute.xlu0 %1636 }
 0x260   : > { %v1305_v10 = vadd.f32 %v1304_v48, %v1206_v35  ;;  %v5728_v48 = vmul.f32 -1.442695, %v7828_v62 }
 0x261   : > { %v7853_v47 = vadd.f32 %v7821_v32, %v1317_v54 }
 0x262   : > { %v6475_v26 = vpop.eup %6474  ;;  %v7843_v17 = vadd.f32 %v7821_v32, %v1305_v10 }
 0x263   : > { %1705 = vrot.lane.b32.xlu0 %v6475_v26, %s6844_s24 }
 0x264   : > { %6476 = vtanh.f32 %v7843_v17 }
 0x266   : > { %v1221_v29 = vpop.f32.mrf.mxu2 }
 0x267   : > { %v1209_v28 = vpop.f32.mrf.mxu0  ;;  %v1320_v7 = vadd.f32 %v1319_v53, %v1221_v29 }
 0x268   : > { %v1308_v36 = vadd.f32 %v1307_v22, %v1209_v28 }
 0x269   : > { %v7862_v58 = vadd.f32 %v7821_v32, %v1320_v7 }
 0x26a   : > { %v6477_v34 = vpop.eup %6476  ;;  %v7848_v38 = vadd.f32 %v7821_v32, %v1308_v36 }
 0x26b   : > { %1707 = vrot.lane.b32.xlu1 %v6477_v34, %s6844_s24  ;;  %v5729_v34 = vmul.f32 -1.442695, %v7833_v9 }
 0x26c   : > { %6478 = vtanh.f32 %v7848_v38 }
 0x26d   : > { %6480 = vtanh.f32 %v7853_v47 }
 0x26e   : > { %v1224_v44 = vpop.f32.mrf.mxu2 }
 0x26f   : > { %v1212_v24 = vpop.f32.mrf.mxu0  ;;  %v1323_v55 = vadd.f32 %v1322_v40, %v1224_v44 }
 0x270   : > { %v1311_v43 = vadd.f32 %v1310_v3, %v1212_v24 }
 0x271   : > { %v7876_v12 = vadd.f32 %v7821_v32, %v1323_v55 }
 0x272   : > { %v6479_v50 = vpop.eup %6478  ;;  %v7856_v4 = vadd.f32 %v7821_v32, %v1311_v43 }
 0x273   : > { %1709 = vrot.lane.b32.xlu2 %v6479_v50, %s6844_s24  ;;  %v6481_v14 = vpop.eup %6480 }
 0x274   : > { %6482 = vtanh.f32 %v7856_v4 }
 0x275   : > { %6484 = vtanh.f32 %v7862_v58 }
 0x276   : > { %v1227_v39 = vpop.f32.mrf.mxu2 }
 0x277   : > { %v1326_v41 = vadd.f32 %v1325_v25, %v1227_v39  ;;  %v1215_v59 = vpop.f32.mrf.mxu0 }
 0x278   : > { %v1314_v23 = vadd.f32 %v1313_v30, %v1215_v59 }
 0x279   : > { %v7865_v42 = vadd.f32 %v7821_v32, %v1326_v41 }
 0x27a   : > { %v6483_v57 = vpop.eup %6482  ;;  %v7868_v56 = vadd.f32 %v7821_v32, %v1314_v23 }
 0x27b   : > { %1715 = vrot.lane.b32.xlu2 %v6481_v14, %s6844_s24  ;;  %1711 = vrot.lane.b32.xlu0 %v6483_v57, %s6844_s24  ;;  %6486 = vtanh.f32 %v7865_v42  ;;  %v6485_v30 = vpop.eup %6484  ;;  %v5738_v39 = vmul.f32 -1.442695, %v7865_v42 }
 0x27c   : > { %6488 = vtanh.f32 %v7868_v56 }
 0x27e   : > { %v1230_v45 = vpop.f32.mrf.mxu2 }
 0x27f   : > { %v1329_v52 = vadd.f32 %v1328_v1, %v1230_v45 }
 0x281   : > { %v6487_v5 = vpop.eup %6486  ;;  %v7879_v60 = vadd.f32 %v7821_v32, %v1329_v52  ;;  %v5727_v32 = vmul.f32 -1.442695, %v7824_v18 }
 0x282   : > { %v6489_v15 = vpop.eup %6488 }
 0x283   : > { %1721 = vrot.lane.b32.xlu2 %v6487_v5, %s6844_s24  ;;  %1717 = vrot.lane.b32.xlu0 %v6485_v30, %s6844_s24  ;;  %6490 = vtanh.f32 %v7879_v60 }
 0x284   : > { %1713 = vrot.lane.b32.xlu1 %v6489_v15, %s6844_s24  ;;  %6492 = vtanh.f32 %v7876_v12 }
 0x285   : > { %6494 = vpow2.f32 %v5727_v32 }
 0x286   : > { %6496 = vpow2.f32 %v5728_v48 }
 0x289   : > { %v6491_v31 = vpop.eup %6490 }
 0x28a   : > { %v6493_v37 = vpop.eup %6492 }
 0x28b   : > { %1723 = vrot.lane.b32.xlu0 %v6491_v31, %s6844_s24  ;;  %2396 = vperm.xlu2 %6110, %v7528_v21   ;;  %v6495_v53 = vpop.eup %6494  ;;  %v7900_v21 = vpop.permute.xlu1 %1638 }
 0x28c   : > { %1719 = vrot.lane.b32.xlu1 %v6493_v37, %s6844_s24  ;;  %v1387_v18 = vadd.f32 1.0, %v6495_v53  ;;  %v6497_v62 = vpop.eup %6496  ;;  %v5732_v37 = vmul.f32 -1.442695, %v7848_v38  ;;  %s6857_s24 = smov 96  }
 0x28d   : > { %v1388_v35 = vadd.f32 1.0, %v6497_v62 }
 0x28e   : > { %6498 = vrcp.f32 %v1387_v18  ;;  %v1411_v7 = vand.u32 2147483648, %v1387_v18  ;;  %vm1405_vm14 = vweird.f32 %v1387_v18  ;;  %v1409_v9 = vand.u32 2147483647, %v1387_v18 }
 0x28f   : > { %6500 = vrcp.f32 %v1388_v35  ;;  %v1426_v15 = vand.u32 2147483648, %v1388_v35  ;;  %vm1420_vm2 = vweird.f32 %v1388_v35  ;;  %v1424_v31 = vand.u32 2147483647, %v1388_v35 }
 0x290   : > { %v1412_v14 = vor.u32 1.1754944e-38, %v1411_v7  ;;  %vm1410_vm0 = vcmp.eq.f32.partialorder %v1409_v9, 8.507059e+37 }
 0x291   : > { %v1427_v53 = vor.u32 1.1754944e-38, %v1426_v15  ;;  %vm1425_vm4 = vcmp.eq.f32.partialorder %v1424_v31, 8.507059e+37 }
 0x293   : > { %2401 = vperm.xlu0 %6111, %v7555_v8   ;;  %2411 = vperm.xlu2 %6110, %v7652_v0   ;;  %v7904_v8 = vpop.permute.xlu0 %1642  ;;  %v7910_v22 = vpop.permute.xlu1 %1644 }
 0x294   : > { %2391 = vperm.xlu1 %6109, %v7501_v20   ;;  %v7902_v20 = vpop.permute.xlu2 %1640  ;;  %v6499_v10 = vpop.eup %6498 }
 0x295   : > { %v1401_v26 = vmul.f32 %v6499_v10, %v1387_v18  ;;  %v6501_v40 = vpop.eup %6500  ;;  %vm1406_vm13 = vweird.f32 %v6499_v10 }
 0x296   : > { %v1416_v44 = vmul.f32 %v6501_v40, %v1388_v35  ;;  %vm1407_vm15 = vmor %vm1405_vm14, %vm1406_vm13  ;;  %vm1421_vm1 = vweird.f32 %v6501_v40 }
 0x297   : > { %v1402_v36 = vsub.f32 1.0, %v1401_v26  ;;  %vm1422_vm3 = vmor %vm1420_vm2, %vm1421_vm1 }
 0x298   : > { %v1417_v25 = vsub.f32 1.0, %v1416_v44 }
 0x299   : > { %v1403_v3 = vmul.f32 %v6499_v10, %v1402_v36  ;;  %v5736_v36 = vmul.f32 -1.442695, %v7862_v58  ;;  %v5730_v58 = vmul.f32 -1.442695, %v7838_v51 }
 0x29a   : > { %v1418_v23 = vmul.f32 %v6501_v40, %v1417_v25 }
 0x29b   : > { %2426 = vperm.xlu0 %6111, %v7801_v6   ;;  %2421 = vperm.xlu2 %6110, %v7753_v11   ;;  %v7914_v28 = vpop.permute.xlu0 %1648 }
 0x29c   : > { %2406 = vperm.xlu1 %6109, %v7598_v19   ;;  %v5735_v19 = vmul.f32 -1.442695, %v7853_v47  ;;  %v7912_v29 = vpop.permute.xlu2 %1646  ;;  %v7919_v47 = vpop.permute.xlu1 %1650  ;;  %v1419_v30 = vadd.f32 %v6501_v40, %v1418_v23 }
 0x29e   : > { %6502 = vpow2.f32 %v5735_v19  ;;  %v1423_v13 = vsel %vm1422_vm3, %v6501_v40, %v1419_v30 }
 0x29f   : > { %6504 = vpow2.f32 %v5729_v34  ;;  %v7943_v18 = vsel %vm1425_vm4, %v1427_v53, %v1423_v13 }
 0x2a3   : > { %2441 = vperm.xlu0 %6111, %v7714_v2   ;;  %2436 = vperm.xlu2 %6110, %v7664_v46   ;;  %v7925_v50 = vpop.permute.xlu0 %1654  ;;  %v1404_v46 = vadd.f32 %v6499_v10, %v1403_v3 }
 0x2a4   : > { %2416 = vperm.xlu1 %6109, %v7703_v61   ;;  %v6503_v54 = vpop.eup %6502  ;;  %v7923_v43 = vpop.permute.xlu2 %1652 }
 0x2a5   : > { %v7921_v24 = vadd.f32 1.0, %v6503_v54  ;;  %v6505_v41 = vpop.eup %6504  ;;  %v1408_v59 = vsel %vm1407_vm15, %v6499_v10, %v1404_v46  ;;  %v7930_v57 = vpop.permute.xlu1 %1656 }
 0x2a6   : > { %v7932_v1 = vadd.f32 1.0, %v6505_v41  ;;  %v7934_v55 = vsel %vm1410_vm0, %v1412_v14, %v1408_v59 }
 0x2a7   : > { %6506 = vrcp.f32 %v7921_v24  ;;  %v1531_v9 = vand.u32 2147483648, %v7921_v24  ;;  %vm1525_vm7 = vweird.f32 %v7921_v24  ;;  %v1529_v41 = vand.u32 2147483647, %v7921_v24 }
 0x2a8   : > { %6508 = vpow2.f32 %v5738_v39  ;;  %v5737_v39 = vmul.f32 -1.442695, %v7876_v12  ;;  %vm1435_vm11 = vweird.f32 %v7932_v1  ;;  %v1439_v13 = vand.u32 2147483647, %v7932_v1 }
 0x2a9   : > { %6510 = vrcp.f32 %v7932_v1  ;;  %v1532_v30 = vor.u32 1.1754944e-38, %v1531_v9  ;;  %vm1530_vm9 = vcmp.eq.f32.partialorder %v1529_v41, 8.507059e+37  ;;  %v6846_v9 = vmov 1  }
 0x2aa   : > { %6512 = vpow2.f32 %v5732_v37  ;;  %vm1440_vm13 = vcmp.eq.f32.partialorder %v1439_v13, 8.507059e+37 }
 0x2ab   : > { %2451 = vperm.xlu2 %6110, %v7810_v33   ;;  %6112 = vset.pattern.permute.xlu0 %v6846_v9 }
 0x2ac   : > { %2431 = vperm.xlu1 %6109, %v7609_v16   ;;  %v7936_v45 = vpop.permute.xlu2 %1658 }
 0x2ad   : > { %v6507_v5 = vpop.eup %6506 }
 0x2ae   : > { %v6509_v32 = vpop.eup %6508  ;;  %v1521_v48 = vmul.f32 %v6507_v5, %v7921_v24  ;;  %vm1526_vm6 = vweird.f32 %v6507_v5 }
 0x2af   : > { %v7945_v62 = vadd.f32 1.0, %v6509_v32  ;;  %v6511_v26 = vpop.eup %6510  ;;  %vm1527_vm8 = vmor %vm1525_vm7, %vm1526_vm6  ;;  %v1441_v32 = vand.u32 2147483648, %v7932_v1 }
 0x2b0   : > { %v1522_v38 = vsub.f32 1.0, %v1521_v48  ;;  %v6513_v40 = vpop.eup %6512  ;;  %v1431_v34 = vmul.f32 %v6511_v26, %v7932_v1  ;;  %vm1436_vm10 = vweird.f32 %v6511_v26  ;;  %v5739_v48 = vmul.f32 -1.442695, %v7879_v60 }
 0x2b1   : > { %6514 = vrcp.f32 %v7945_v62  ;;  %v7955_v3 = vadd.f32 1.0, %v6513_v40  ;;  %vm1437_vm12 = vmor %vm1435_vm11, %vm1436_vm10  ;;  %vm1570_vm15 = vweird.f32 %v7945_v62 }
 0x2b2   : > { %v1523_v54 = vmul.f32 %v6507_v5, %v1522_v38  ;;  %6516 = vpow2.f32 %v5736_v36  ;;  %v1432_v46 = vsub.f32 1.0, %v1431_v34  ;;  %v1442_v36 = vor.u32 1.1754944e-38, %v1441_v32 }
 0x2b3   : > { %6518 = vrcp.f32 %v7955_v3  ;;  %6114 = vset.pattern.permute.xlu2 %v6846_v9  ;;  %vm1480_vm3 = vweird.f32 %v7955_v3 }
 0x2b4   : > { %v1524_v25 = vadd.f32 %v6507_v5, %v1523_v54  ;;  %v1433_v23 = vmul.f32 %v6511_v26, %v1432_v46  ;;  %6520 = vpow2.f32 %v5730_v58  ;;  %v1574_v58 = vand.u32 2147483647, %v7945_v62 }
 0x2b5   : > { %v7947_v10 = vpop.permute.xlu2 %1703  ;;  %6522 = vpow2.f32 %v5737_v39 }
 0x2b6   : > { %v1528_v14 = vsel %vm1527_vm8, %v6507_v5, %v1524_v25  ;;  %v1434_v15 = vadd.f32 %v6511_v26, %v1433_v23  ;;  %v5731_v5 = vmul.f32 -1.442695, %v7843_v17  ;;  %v1576_v25 = vand.u32 2147483648, %v7945_v62 }
 0x2b7   : > { %v7959_v7 = vpop.eup %6514  ;;  %v7971_v12 = vsel %vm1530_vm9, %v1532_v30, %v1528_v14  ;;  %vm1575_vm1 = vcmp.eq.f32.partialorder %v1574_v58, 8.507059e+37 }
 0x2b8   : > { %v6517_v59 = vpop.eup %6516  ;;  %v1438_v38 = vsel %vm1437_vm12, %v6511_v26, %v1434_v15  ;;  %vm1571_vm14 = vweird.f32 %v7959_v7  ;;  %v1577_v23 = vor.u32 1.1754944e-38, %v1576_v25 }
 0x2b9   : > { %v7969_v51 = vadd.f32 1.0, %v6517_v59  ;;  %v7974_v37 = vpop.eup %6518  ;;  %v7988_v60 = vsel %vm1440_vm13, %v1442_v36, %v1438_v38  ;;  %vm1572_vm0 = vmor %vm1570_vm15, %vm1571_vm14 }
 0x2ba   : > { %v6521_v53 = vpop.eup %6520  ;;  %v1740_v26 = vmul.f32 %v7947_v10, %v7988_v60  ;;  %vm1481_vm2 = vweird.f32 %v7974_v37 }
 0x2bb   : > { %6524 = vrcp.f32 %v7969_v51  ;;  %v7986_v1 = vadd.f32 1.0, %v6521_v53  ;;  %v1484_v53 = vand.u32 2147483647, %v7955_v3  ;;  %vm1482_vm4 = vmor %vm1480_vm3, %vm1481_vm2  ;;  %v1546_v58 = vand.u32 2147483648, %v7969_v51 }
 0x2bc   : > { %6526 = vpow2.f32 %v5731_v5  ;;  %vm1540_vm8 = vweird.f32 %v7969_v51 }
 0x2bd   : > { %v1700_v52 = vpop.permute.xlu0 %1699  ;;  %6528 = vpow2.f32 %v5739_v48  ;;  %v5733_v48 = vmul.f32 -1.442695, %v7856_v4  ;;  %vm1485_vm6 = vcmp.eq.f32.partialorder %v1484_v53, 8.507059e+37  ;;  %vm1450_vm13 = vweird.f32 %v7986_v1 }
 0x2be   : > { %v1738_v42 = vmul.f32 %v1700_v52, %v7934_v55  ;;  %v1566_v52 = vmul.f32 %v7959_v7, %v7945_v62  ;;  %6530 = vrcp.f32 %v7986_v1 }
 0x2c0   : > { %1764 = vrot.lane.b32.xlu1 %v1738_v42, %s6836_s18  ;;  %v1567_v24 = vsub.f32 1.0, %v1566_v52 }
 0x2c2   : > { %v1568_v17 = vmul.f32 %v7959_v7, %v1567_v24 }
 0x2c4   : > { %v1569_v54 = vadd.f32 %v7959_v7, %v1568_v17 }
 0x2c5   : > { %v1702_v35 = vpop.permute.xlu1 %1701 }
 0x2c6   : > { %v1739_v19 = vmul.f32 %v1702_v35, %v7943_v18  ;;  %v6523_v35 = vpop.eup %6522  ;;  %v1573_v62 = vsel %vm1572_vm0, %v7959_v7, %v1569_v54  ;;  %v1486_v7 = vand.u32 2147483648, %v7955_v3 }
 0x2c7   : > { %v7990_v40 = vadd.f32 1.0, %v6523_v35  ;;  %v7996_v46 = vpop.eup %6524 }
 0x2c8   : > { %1766 = vrot.lane.b32.xlu2 %v1739_v19, %s6836_s18  ;;  %2446 = vperm.xlu1 %6109, %v7764_v27   ;;  %v1476_v19 = vmul.f32 %v7974_v37, %v7955_v3  ;;  %v6527_v39 = vpop.eup %6526  ;;  %v1536_v59 = vmul.f32 %v7996_v46, %v7969_v51  ;;  %v1487_v17 = vor.u32 1.1754944e-38, %v1486_v7  ;;  %vm1541_vm7 = vweird.f32 %v7996_v46 }
 0x2c9   : > { %v6529_v41 = vpop.eup %6528  ;;  %6532 = vrcp.f32 %v7990_v40  ;;  %v8008_v52 = vadd.f32 1.0, %v6527_v39  ;;  %vm1542_vm9 = vmor %vm1540_vm8, %vm1541_vm7  ;;  %vm1555_vm15 = vweird.f32 %v7990_v40 }
 0x2ca   : > { %v1477_v34 = vsub.f32 1.0, %v1476_v19  ;;  %v8010_v30 = vadd.f32 1.0, %v6529_v41  ;;  %v8019_v32 = vpop.eup %6530  ;;  %v1544_v41 = vand.u32 2147483647, %v7969_v51 }
 0x2cb   : > { %v1446_v35 = vmul.f32 %v8019_v32, %v7986_v1  ;;  %vm1451_vm11 = vweird.f32 %v8019_v32  ;;  %vm1465_vm7 = vweird.f32 %v8008_v52 }
 0x2cc   : > { %v1478_v10 = vmul.f32 %v7974_v37, %v1477_v34  ;;  %6534 = vrcp.f32 %v8010_v30  ;;  %vm1545_vm10 = vcmp.eq.f32.partialorder %v1544_v41, 8.507059e+37  ;;  %vm1452_vm14 = vmor %vm1450_vm13, %vm1451_vm11 }
 0x2cd   : > { %v7957_v44 = vpop.permute.xlu2 %1709  ;;  %6536 = vrcp.f32 %v8008_v52  ;;  %v1447_v34 = vsub.f32 1.0, %v1446_v35  ;;  %v1456_v35 = vand.u32 2147483648, %v7986_v1 }
 0x2ce   : > { %v1479_v24 = vadd.f32 %v7974_v37, %v1478_v10  ;;  %6538 = vpow2.f32 %v5733_v48 }
 0x2cf   : > { %v8022_v13 = vpop.eup %6532 }
 0x2d0   : > { %6113 = vset.pattern.permute.xlu1 %v6846_v9  ;;  %v1483_v38 = vsel %vm1482_vm4, %v7974_v37, %v1479_v24  ;;  %v1551_v4 = vmul.f32 %v8022_v13, %v7990_v40  ;;  %vm1556_vm12 = vweird.f32 %v8022_v13 }
 0x2d1   : > { %v8036_v3 = vsel %vm1485_vm6, %v1487_v17, %v1483_v38  ;;  %v1454_v17 = vand.u32 2147483647, %v7986_v1  ;;  %v1559_v1 = vand.u32 2147483647, %v7990_v40  ;;  %vm1557_vm0 = vmor %vm1555_vm15, %vm1556_vm12  ;;  %vm1585_vm6 = vweird.f32 %v8010_v30 }
 0x2d2   : > { %v1743_v37 = vmul.f32 %v7957_v44, %v8036_v3  ;;  %v8046_v25 = vpop.eup %6534  ;;  %v1552_v9 = vsub.f32 1.0, %v1551_v4  ;;  %v1561_v4 = vand.u32 2147483648, %v7990_v40 }
 0x2d3   : > { %v8049_v39 = vpop.eup %6536  ;;  %vm1560_vm2 = vcmp.eq.f32.partialorder %v1559_v1, 8.507059e+37  ;;  %vm1586_vm3 = vweird.f32 %v8046_v25 }
 0x2d4   : > { %v6539_v10 = vpop.eup %6538  ;;  %v1553_v24 = vmul.f32 %v8022_v13, %v1552_v9  ;;  %v1457_v9 = vor.u32 1.1754944e-38, %v1456_v35  ;;  %vm1466_vm4 = vweird.f32 %v8049_v39  ;;  %vm1587_vm8 = vmor %vm1585_vm6, %vm1586_vm3 }
 0x2d5   : > { %v1716_v42 = vpop.permute.xlu2 %1715  ;;  %v8014_v15 = vpop.permute.xlu0 %1705 }
 0x2d6   : > { %v1746_v31 = vmul.f32 %v1716_v42, %v7971_v12  ;;  %v8012_v42 = vsel %vm1575_vm1, %v1577_v23, %v1573_v62  ;;  %v1581_v62 = vmul.f32 %v8046_v25, %v8010_v30  ;;  %v1461_v23 = vmul.f32 %v8049_v39, %v8008_v52 }
 0x2d7   : > { %vm1455_vm1 = vcmp.eq.f32.partialorder %v1454_v17, 8.507059e+37 }
 0x2d8   : > { %1780 = vrot.lane.b32.xlu0 %v1746_v31, %s6836_s18  ;;  %v1537_v31 = vsub.f32 1.0, %v1536_v59  ;;  %v1448_v59 = vmul.f32 %v8019_v32, %v1447_v34  ;;  %v1462_v38 = vsub.f32 1.0, %v1461_v23  ;;  %v8080_v34 = vld [vmem:[%s10410_s2] sm:$0xff] }
 0x2da   : > { %v1538_v19 = vmul.f32 %v7996_v46, %v1537_v31  ;;  %v8061_v31 = vadd.f32 1.0, %v6539_v10  ;;  %v1449_v7 = vadd.f32 %v8019_v32, %v1448_v59  ;;  %v1463_v41 = vmul.f32 %v8049_v39, %v1462_v38 }
 0x2db   : > { %v1562_v59 = vor.u32 1.1754944e-38, %v1561_v4 }
 0x2dc   : > { %v1539_v54 = vadd.f32 %v7996_v46, %v1538_v19  ;;  %v1554_v19 = vadd.f32 %v8022_v13, %v1553_v24  ;;  %6540 = vrcp.f32 %v8061_v31  ;;  %vm1495_vm13 = vweird.f32 %v8061_v31 }
 0x2dd   : > { %v1722_v14 = vpop.permute.xlu2 %1721 }
 0x2de   : > { %v1749_v5 = vmul.f32 %v1722_v14, %v8012_v42  ;;  %v1543_v44 = vsel %vm1542_vm9, %v7996_v46, %v1539_v54  ;;  %v1547_v14 = vor.u32 1.1754944e-38, %v1546_v58  ;;  %v1582_v46 = vsub.f32 1.0, %v1581_v62  ;;  %vm1467_vm9 = vmor %vm1465_vm7, %vm1466_vm4 }
 0x2df   : > { %v5734_v54 = vmul.f32 -1.442695, %v7868_v56  ;;  %v1558_v10 = vsel %vm1557_vm0, %v8022_v13, %v1554_v19  ;;  %v1591_v13 = vand.u32 2147483648, %v8010_v30 }
 0x2e0   : > { %1768 = vrot.lane.b32.xlu0 %v1740_v26, %s6836_s18  ;;  %v8044_v26 = vpop.permute.xlu1 %1707  ;;  %v8063_v51 = vsel %vm1545_vm10, %v1547_v14, %v1543_v44  ;;  %v1583_v58 = vmul.f32 %v8046_v25, %v1582_v46  ;;  %v8095_v56 = vsel %vm1560_vm2, %v1562_v59, %v1558_v10  ;;  %v1464_v14 = vadd.f32 %v8049_v39, %v1463_v41 }
 0x2e1   : > { %6542 = vpow2.f32 %v5734_v54  ;;  %v1592_v38 = vor.u32 1.1754944e-38, %v1591_v13  ;;  %v1499_v10 = vand.u32 2147483647, %v8061_v31 }
 0x2e2   : > { %v1584_v40 = vadd.f32 %v8046_v25, %v1583_v58  ;;  %v6541_v23 = vpop.eup %6540 }
 0x2e3   : > { %v1491_v46 = vmul.f32 %v6541_v23, %v8061_v31  ;;  %vm1496_vm12 = vweird.f32 %v6541_v23  ;;  %vm1500_vm15 = vcmp.eq.f32.partialorder %v1499_v10, 8.507059e+37 }
 0x2e5   : > { %v1492_v4 = vsub.f32 1.0, %v1491_v46 }
 0x2e7   : > { %v6543_v35 = vpop.eup %6542 }
 0x2e8   : > { %1786 = vrot.lane.b32.xlu0 %v1749_v5, %s6836_s18 }
 0x2ed   : > { %v8038_v36 = vpop.permute.xlu0 %1711 }
 0x2f0   : > { %1774 = vrot.lane.b32.xlu0 %v1743_v37, %s6836_s18  ;;  %v1453_v37 = vsel %vm1452_vm14, %v8019_v32, %v1449_v7  ;;  %v1589_v7 = vand.u32 2147483647, %v8010_v30  ;;  %v1468_v30 = vsel %vm1467_vm9, %v8049_v39, %v1464_v14  ;;  %vm1497_vm14 = vmor %vm1495_vm13, %vm1496_vm12 }
 0x2f1   : > { %v8093_v44 = vsel %vm1455_vm1, %v1457_v9, %v1453_v37  ;;  %v1501_v9 = vand.u32 2147483648, %v8061_v31 }
 0x2f2   : > { %v1741_v32 = vmul.f32 %v8014_v15, %v8093_v44  ;;  %v1469_v15 = vand.u32 2147483647, %v8008_v52  ;;  %vm1590_vm10 = vcmp.eq.f32.partialorder %v1589_v7, 8.507059e+37  ;;  %v8159_v7 = vld [vmem:[%s10410_s2 + $0x18] sm:$0xff] }
 0x2f4   : > { %vm1470_vm11 = vcmp.eq.f32.partialorder %v1469_v15, 8.507059e+37  ;;  %v8162_v15 = vpop.permute.xlu2 %2396 }
 0x2f5   : > { %v1718_v5 = vpop.permute.xlu0 %1717  ;;  %10614 = vst [vmem:[#allocation27_spill] sm:$0xff] %v8162_v15 }
 0x2f6   : > { %v1747_v48 = vmul.f32 %v1718_v5, %v8063_v51  ;;  %v8068_v53 = vpop.permute.xlu1 %1713  ;;  %v1471_v5 = vand.u32 2147483648, %v8008_v52  ;;  %v1394_v52 = vadd.f32 1.0, %v6543_v35 }
 0x2f8   : > { %1782 = vrot.lane.b32.xlu1 %v1747_v48, %s6836_s18  ;;  %2507 = vperm.xlu0 %6112, %v8080_v34   ;;  %v1588_v48 = vsel %vm1587_vm8, %v8046_v25, %v1584_v40  ;;  %6544 = vrcp.f32 %v1394_v52  ;;  %v1493_v25 = vmul.f32 %v6541_v23, %v1492_v4  ;;  %v1502_v40 = vor.u32 1.1754944e-38, %v1501_v9  ;;  %v8219_v9 = vld [vmem:[%s10410_s2 + $0x40] sm:$0xff] }
 0x2f9   : > { %v8118_v17 = vsel %vm1590_vm10, %v1592_v38, %v1588_v48  ;;  %vm1510_vm1 = vweird.f32 %v1394_v52 }
 0x2fa   : > { %v1494_v58 = vadd.f32 %v6541_v23, %v1493_v25 }
 0x2fc   : > { %v1498_v59 = vsel %vm1497_vm14, %v6541_v23, %v1494_v58  ;;  %v1516_v23 = vand.u32 2147483648, %v1394_v52  ;;  %v8173_v38 = vpop.permute.xlu2 %2411  ;;  %v8212_v58 = vld [vmem:[%s10410_s2 + $0x28] sm:$0xff] }
 0x2fd   : > { %v1724_v19 = vpop.permute.xlu0 %1723  ;;  %10616 = vst [vmem:[#allocation32_spill] sm:$0xff] %v8173_v38 }
 0x2fe   : > { %v1720_v62 = vpop.permute.xlu1 %1719  ;;  %v1750_v1 = vmul.f32 %v1724_v19, %v8118_v17  ;;  %v6545_v41 = vpop.eup %6544  ;;  %v1517_v46 = vor.u32 1.1754944e-38, %v1516_v23  ;;  %v8178_v19 = vld [vmem:[%s10410_s2 + $0x48] sm:$0xff] }
 0x2ff   : > { %v1748_v24 = vmul.f32 %v1720_v62, %v8095_v56  ;;  %v1506_v31 = vmul.f32 %v6545_v41, %v1394_v52  ;;  %v8148_v62 = vsel %vm1500_vm15, %v1502_v40, %v1498_v59  ;;  %vm1511_vm0 = vweird.f32 %v6545_v41 }
 0x300   : > { %1770 = vrot.lane.b32.xlu1 %v1741_v32, %s6836_s18  ;;  %2527 = vperm.xlu0 %6112, %v7703_v61   ;;  %v1472_v61 = vor.u32 1.1754944e-38, %v1471_v5  ;;  %v1744_v14 = vmul.f32 %v8038_v36, %v8148_v62  ;;  %v1514_v36 = vand.u32 2147483647, %v1394_v52  ;;  %vm1512_vm2 = vmor %vm1510_vm1, %vm1511_vm0  ;;  %v1681_v59 = vmul.f32 %v7919_v47, %v7971_v12 }
 0x301   : > { %1784 = vrot.lane.b32.xlu2 %v1748_v24, %s6836_s18  ;;  %v1674_v40 = vmul.f32 %v7895_v49, %v7943_v18  ;;  %v1675_v49 = vmul.f32 %v7900_v21, %v7988_v60 }
 0x302   : > { %v8120_v54 = vsel %vm1470_vm11, %v1472_v61, %v1468_v30  ;;  %vm1515_vm3 = vcmp.eq.f32.partialorder %v1514_v36, 8.507059e+37  ;;  %v1673_v61 = vmul.f32 %v7893_v63, %v7934_v55  ;;  %v1683_v36 = vmul.f32 %v7925_v50, %v8095_v56 }
 0x303   : > { %v1742_v37 = vmul.f32 %v8044_v26, %v8120_v54  ;;  %v8136_v26 = vld [vmem:[%s10410_s2 + $0x8] sm:$0xff] }
 0x304   : > { %v8184_v52 = vpop.permute.xlu2 %2421 }
 0x305   : > { %10617 = vst [vmem:[#allocation33_spill] sm:$0xff] %v8184_v52  ;;  %v8186_v4 = vpop.permute.xlu0 %2401 }
 0x306   : > { %v8128_v39 = vpop.permute.xlu1 %2391  ;;  %10618 = vst [vmem:[#allocation36_spill] sm:$0xff] %v8186_v4 }
 0x307   : > { %10611 = vst [vmem:[#allocation13_spill] sm:$0xff] %v8128_v39 }
 0x308   : > { %1788 = vrot.lane.b32.xlu1 %v1750_v1, %s6836_s18  ;;  %2539 = vperm.xlu0 %6112, %v7609_v16   ;;  %v8143_v16 = vld [vmem:[%s10410_s2 + $0x10] sm:$0xff]  ;;  %v10428_v1 = vmov 2  }
 0x309   : > { %1772 = vrot.lane.b32.xlu2 %v1742_v37, %s6836_s18 }
 0x30c   : > { %v8192_v37 = vpop.permute.xlu2 %2436 }
 0x30d   : > { %10619 = vst [vmem:[#allocation40_spill] sm:$0xff] %v8192_v37  ;;  %v8194_v63 = vpop.permute.xlu0 %2426 }
 0x30e   : > { %v8146_v32 = vpop.permute.xlu1 %2406  ;;  %10620 = vst [vmem:[#allocation45_spill] sm:$0xff] %v8194_v63 }
 0x30f   : > { %10612 = vst [vmem:[#allocation23_spill] sm:$0xff] %v8146_v32 }
 0x310   : > { %2511 = vperm.xlu1 %6113, %v8136_v26   ;;  %2551 = vperm.xlu0 %6112, %v7764_v27   ;;  %v1507_v27 = vsub.f32 1.0, %v1506_v31 }
 0x311   : > { %2515 = vperm.xlu2 %6114, %v8143_v16  }
 0x312   : > { %v1508_v13 = vmul.f32 %v6545_v41, %v1507_v27 }
 0x314   : > { %v1509_v5 = vadd.f32 %v6545_v41, %v1508_v13 }
 0x315   : > { %v8201_v25 = vpop.permute.xlu0 %2441 }
 0x316   : > { %v8154_v24 = vpop.permute.xlu1 %2416  ;;  %10622 = vst [vmem:[#allocation49_spill] sm:$0xff] %v8201_v25 }
 0x317   : > { %10613 = vst [vmem:[#allocation19_spill] sm:$0xff] %v8154_v24 }
 0x318   : > { %1776 = vrot.lane.b32.xlu1 %v1744_v14, %s6836_s18 }
 0x319   : > { %2523 = vperm.xlu2 %6114, %v7652_v0   ;;  %v1513_v0 = vsel %vm1512_vm2, %v6545_v41, %v1509_v5 }
 0x31a   : > { %v8165_v48 = vsel %vm1515_vm3, %v1517_v46, %v1513_v0 }
 0x31b   : > { %v1745_v35 = vmul.f32 %v8068_v53, %v8165_v48 }
 0x31e   : > { %v8170_v30 = vpop.permute.xlu1 %2431 }
 0x31f   : > { %10615 = vst [vmem:[#allocation24_spill] sm:$0xff] %v8170_v30 }
 0x320   : > { %2519 = vperm.xlu1 %6113, %v8159_v7  }
 0x321   : > { %2535 = vperm.xlu2 %6114, %v7801_v6  }
 0x328   : > { %2531 = vperm.xlu1 %6113, %v7753_v11  }
 0x329   : > { %1778 = vrot.lane.b32.xlu2 %v1745_v35, %s6836_s18  ;;  %v1682_v35 = vmul.f32 %v7923_v43, %v8063_v51 }
 0x330   : > { %2543 = vperm.xlu1 %6113, %v8178_v19  }
 0x331   : > { %2547 = vperm.xlu2 %6114, %v7714_v2   ;;  %v8199_v2 = vpop.permute.xlu2 %2451 }
 0x332   : > { %v1765_v53 = vpop.permute.xlu1 %1764  ;;  %10621 = vst [vmem:[#allocation43_spill] sm:$0xff] %v8199_v2 }
 0x333   : > { %v1803_v11 = vadd.f32 %v1765_v53, %v1673_v61 }
 0x335   : > { %2154 = vrot.lane.b32.xlu0 %v1803_v11, %s6847_s22 }
 0x338   : > { %2555 = vperm.xlu1 %6113, %v7810_v33   ;;  %v8206_v33 = vld [vmem:[%s10410_s2 + $0x20] sm:$0xff] }
 0x339   : > { %6115 = vset.pattern.permute.xlu2 %v10428_v1  ;;  %v1767_v41 = vpop.permute.xlu2 %1766 }
 0x33a   : > { %2611 = vperm.xlu2 %6115, %v8080_v34   ;;  %v1804_v14 = vadd.f32 %v1767_v41, %v1674_v40  ;;  %v8229_v5 = vpop.permute.xlu1 %2446  ;;  %v1684_v40 = vmul.f32 %v7930_v57, %v8012_v42 }
 0x33b   : > { %10623 = vst [vmem:[#allocation54_spill] sm:$0xff] %v8229_v5  ;;  %v10630_v5 = vmov 4  }
 0x340   : > { %6116 = vset.pattern.permute.xlu1 %v10428_v1 }
 0x341   : > { %2619 = vperm.xlu1 %6116, %v8143_v16  }
 0x342   : > { %2623 = vperm.xlu2 %6115, %v8159_v7  }
 0x349   : > { %2627 = vperm.xlu1 %6116, %v8206_v33  }
 0x34a   : > { %2631 = vperm.xlu2 %6115, %v8212_v58   ;;  %v1781_v10 = vpop.permute.xlu0 %1780 }
 0x34b   : > { %v1811_v31 = vadd.f32 %v1781_v10, %v1681_v59 }
 0x34d   : > { %6546 = vtanh.f32 %v1811_v31 }
 0x34e   : > { %6548 = vtanh.f32 %v1803_v11 }
 0x351   : > { %2639 = vperm.xlu1 %6116, %v7801_v6  }
 0x352   : > { %2643 = vperm.xlu2 %6115, %v8219_v9   ;;  %v1769_v47 = vpop.permute.xlu0 %1768 }
 0x353   : > { %v6547_v27 = vpop.eup %6546  ;;  %v1805_v0 = vadd.f32 %v1769_v47, %v1675_v49 }
 0x354   : > { %v6549_v13 = vpop.eup %6548 }
 0x355   : > { %6550 = vtanh.f32 %v1805_v0 }
 0x359   : > { %2156 = vrot.lane.b32.xlu1 %v1804_v14, %s6847_s22 }
 0x35a   : > { %2170 = vrot.lane.b32.xlu2 %v1811_v31, %s6847_s22  ;;  %v1787_v21 = vpop.permute.xlu0 %1786  ;;  %v1677_v31 = vmul.f32 %v7904_v8, %v8120_v54  ;;  %v6849_v8 = vmov 3  }
 0x35b   : > { %v1785_v6 = vpop.permute.xlu2 %1784  ;;  %v6551_v50 = vpop.eup %6550  ;;  %6119 = vset.pattern.permute.xlu0 %v6849_v8 }
 0x35c   : > { %v1813_v46 = vadd.f32 %v1785_v6, %v1683_v36  ;;  %v1676_v6 = vmul.f32 %v7902_v20, %v8093_v44 }
 0x361   : > { %1858 = vrot.lane.b32.xlu1 %v6547_v27, %s6836_s18 }
 0x362   : > { %1842 = vrot.lane.b32.xlu2 %v6549_v13, %s6836_s18  ;;  %v1775_v13 = vpop.permute.xlu0 %1774 }
 0x363   : > { %v1773_v23 = vpop.permute.xlu2 %1772 }
 0x364   : > { %v1807_v27 = vadd.f32 %v1773_v23, %v1677_v31 }
 0x369   : > { %2174 = vrot.lane.b32.xlu1 %v1813_v46, %s6847_s22 }
 0x36a   : > { %2158 = vrot.lane.b32.xlu2 %v1805_v0, %s6847_s22  ;;  %v1783_v61 = vpop.permute.xlu1 %1782  ;;  %v8259_v0 = vpop.permute.xlu0 %2507 }
 0x36b   : > { %v8240_v53 = vpop.permute.xlu2 %2515  ;;  %v1812_v11 = vadd.f32 %v1783_v61, %v1682_v35 }
 0x36d   : > { %6552 = vtanh.f32 %v1812_v11  ;;  %2172 = vrot.lane.b32.xlu0 %v1812_v11, %s6847_s22  ;;  %v1678_v11 = vmul.f32 %v7910_v22, %v8036_v3 }
 0x36e   : > { %6554 = vtanh.f32 %v1804_v14  ;;  %v1814_v14 = vadd.f32 %v1787_v21, %v1684_v40  ;;  %v1685_v21 = vmul.f32 %v7936_v45, %v8118_v17 }
 0x370   : > { %6556 = vtanh.f32 %v1814_v14 }
 0x371   : > { %1846 = vrot.lane.b32.xlu1 %v6551_v50, %s6836_s18 }
 0x372   : > { %v1771_v41 = vpop.permute.xlu1 %1770 }
 0x373   : > { %v6553_v10 = vpop.eup %6552  ;;  %v8244_v43 = vpop.permute.xlu2 %2523  ;;  %v1806_v47 = vadd.f32 %v1771_v41, %v1676_v6  ;;  %v8273_v41 = vld [vmem:[%s10410_s2 + $0x50] sm:$0xff] }
 0x374   : > { %v6555_v59 = vpop.eup %6554  ;;  %1860 = vrot.lane.b32.xlu2 %v6553_v10, %s6836_s18 }
 0x375   : > { %1844 = vrot.lane.b32.xlu0 %v6555_v59, %s6836_s18  ;;  %6558 = vtanh.f32 %v1806_v47  ;;  %v8276_v59 = vpop.permute.xlu0 %2527 }
 0x376   : > { %6560 = vtanh.f32 %v1813_v46  ;;  %v6557_v57 = vpop.eup %6556  ;;  %v1808_v46 = vadd.f32 %v1775_v13, %v1678_v11  ;;  %v1680_v13 = vmul.f32 %v7914_v28, %v8165_v48  ;;  %v8303_v11 = vld [vmem:[%s10410_s2 + $0x58] sm:$0xff] }
 0x378   : > { %6562 = vtanh.f32 %v1808_v46 }
 0x379   : > { %2162 = vrot.lane.b32.xlu1 %v1807_v27, %s6847_s22 }
 0x37a   : > { %v1789_v49 = vpop.permute.xlu1 %1788 }
 0x37b   : > { %v8255_v36 = vpop.permute.xlu2 %2535  ;;  %v6559_v23 = vpop.eup %6558  ;;  %v1815_v50 = vadd.f32 %v1789_v49, %v1685_v21 }
 0x37c   : > { %2176 = vrot.lane.b32.xlu2 %v1814_v14, %s6847_s22  ;;  %v6561_v61 = vpop.eup %6560 }
 0x37d   : > { %2160 = vrot.lane.b32.xlu0 %v1806_v47, %s6847_s22  ;;  %6564 = vtanh.f32 %v1815_v50  ;;  %v8290_v47 = vpop.permute.xlu0 %2539 }
 0x37e   : > { %6566 = vtanh.f32 %v1807_v27  ;;  %v6563_v45 = vpop.eup %6562  ;;  %v1679_v27 = vmul.f32 %v7912_v29, %v8148_v62 }
 0x381   : > { %1864 = vrot.lane.b32.xlu1 %v6557_v57, %s6836_s18 }
 0x382   : > { %v8262_v20 = vpop.permute.xlu1 %2511 }
 0x383   : > { %v1779_v35 = vpop.permute.xlu2 %1778  ;;  %v6565_v31 = vpop.eup %6564 }
 0x384   : > { %1848 = vrot.lane.b32.xlu2 %v6559_v23, %s6836_s18  ;;  %v6567_v14 = vpop.eup %6566  ;;  %v1810_v49 = vadd.f32 %v1779_v35, %v1680_v13 }
 0x385   : > { %1862 = vrot.lane.b32.xlu0 %v6561_v61, %s6836_s18  ;;  %v8307_v28 = vpop.permute.xlu0 %2551 }
 0x389   : > { %2651 = vperm.xlu1 %6116, %v8273_v41  }
 0x38a   : > { %v1777_v10 = vpop.permute.xlu1 %1776 }
 0x38b   : > { %v8278_v22 = vpop.permute.xlu2 %2547  ;;  %v1809_v57 = vadd.f32 %v1777_v10, %v1679_v27 }
 0x38c   : > { %2164 = vrot.lane.b32.xlu2 %v1808_v46, %s6847_s22 }
 0x38d   : > { %2178 = vrot.lane.b32.xlu0 %v1815_v50, %s6847_s22  ;;  %6568 = vtanh.f32 %v1809_v57 }
 0x38e   : > { %6570 = vtanh.f32 %v1810_v49 }
 0x391   : > { %1852 = vrot.lane.b32.xlu1 %v6563_v45, %s6836_s18  ;;  %v8326_v45 = vld [vmem:[%s10410_s2 + $0x38] sm:$0xff] }
 0x392   : > { %v8283_v40 = vpop.permute.xlu1 %2519  ;;  %6117 = vset.pattern.permute.xlu1 %v6849_v8 }
 0x393   : > { %v6569_v35 = vpop.eup %6568 }
 0x394   : > { %v8285_v6 = vpop.permute.xlu2 %2611  ;;  %1866 = vrot.lane.b32.xlu2 %v6565_v31, %s6836_s18  ;;  %v6571_v13 = vpop.eup %6570 }
 0x395   : > { %10624 = vst [vmem:[#allocation53_spill] sm:$0xff] %v8285_v6  ;;  %1850 = vrot.lane.b32.xlu0 %v6567_v14, %s6836_s18 }
 0x399   : > { %2168 = vrot.lane.b32.xlu1 %v1810_v49, %s6847_s22 }
 0x39a   : > { %v8296_v23 = vpop.permute.xlu1 %2531 }
 0x39c   : > { %v8298_v61 = vpop.permute.xlu2 %2623  ;;  %2655 = vperm.xlu2 %6115, %v8303_v11  }
 0x39d   : > { %2166 = vrot.lane.b32.xlu0 %v1809_v57, %s6847_s22  ;;  %v8341_v57 = vld [vmem:[%s10410_s2 + $0x30] sm:$0xff] }
 0x3a1   : > { %2715 = vperm.xlu1 %6117, %v8080_v34  }
 0x3a2   : > { %v8310_v29 = vpop.permute.xlu1 %2543 }
 0x3a4   : > { %v8312_v46 = vpop.permute.xlu2 %2631  ;;  %1854 = vrot.lane.b32.xlu2 %v6569_v35, %s6836_s18  ;;  %v10430_v35 = vmov 4  }
 0x3a5   : > { %10625 = vst [vmem:[#allocation57_spill] sm:$0xff] %v8312_v46  ;;  %2723 = vperm.xlu0 %6119, %v8143_v16   ;;  %6118 = vset.pattern.permute.xlu2 %v6849_v8 }
 0x3a7   : > { %v2155_v21 = vpop.permute.xlu0 %2154 }
 0x3a8   : > { %2193 = vst.msk [vmem:[#allocation3] sm:$0xff] %vm991_vm5, %v2155_v21 }
 0x3a9   : > { %2727 = vperm.xlu1 %6117, %v8159_v7  }
 0x3aa   : > { %v8318_v50 = vpop.permute.xlu1 %2555 }
 0x3ab   : > { %10626 = vst [vmem:[#allocation21_spill] sm:$0xff] %v8318_v50 }
 0x3ac   : > { %v8320_v10 = vpop.permute.xlu2 %2643  ;;  %2719 = vperm.xlu2 %6118, %v8136_v26  }
 0x3ad   : > { %10627 = vst [vmem:[#allocation14_spill] sm:$0xff] %v8320_v10  ;;  %2743 = vperm.xlu0 %6119, %v8326_v45  }
 0x3b1   : > { %2735 = vperm.xlu1 %6117, %v8212_v58  }
 0x3b3   : > { %v8330_v8 = vpop.permute.xlu1 %2619 }
 0x3b4   : > { %v2171_v31 = vpop.permute.xlu2 %2170  ;;  %2731 = vperm.xlu2 %6118, %v8206_v33  }
 0x3b5   : > { %2201 = vst.msk [vmem:[#allocation3 + $0x40] sm:$0xff] %vm991_vm5, %v2171_v31  ;;  %2755 = vperm.xlu0 %6119, %v8273_v41  }
 0x3b9   : > { %2747 = vperm.xlu1 %6117, %v8219_v9  }
 0x3bb   : > { %v8336_v14 = vpop.permute.xlu1 %2627 }
 0x3bc   : > { %10628 = vst [vmem:[#allocation15_spill] sm:$0xff] %v8336_v14  ;;  %v1843_v27 = vpop.permute.xlu2 %1842  ;;  %2739 = vperm.xlu2 %6118, %v8341_v57  }
 0x3bd   : > { %1856 = vrot.lane.b32.xlu0 %v6571_v13, %s6836_s18  ;;  %v8358_v13 = vld [vmem:[%s10410_s2 + $0x60] sm:$0xff]  ;;  %s6856_s18 = smov 64  }
 0x3be   : > { %6120 = vset.pattern.permute.xlu0 %v10430_v35 }
 0x3c1   : > { %2759 = vperm.xlu1 %6117, %v8303_v11  }
 0x3c3   : > { %v8347_v49 = vpop.permute.xlu1 %2639 }
 0x3c4   : > { %10629 = vst [vmem:[#allocation17_spill] sm:$0xff] %v8347_v49  ;;  %v2159_v21 = vpop.permute.xlu2 %2158  ;;  %2751 = vperm.xlu2 %6118, %v8178_v19  }
 0x3c5   : > { %2195 = vst.msk [vmem:[#allocation3 + $0x10] sm:$0xff] %vm991_vm5, %v2159_v21  ;;  %2819 = vperm.xlu0 %6120, %v8080_v34   ;;  %v1881_v21 = vmul.f32 %v1843_v27, %v7934_v55 }
 0x3c7   : > { %v5740_v34 = vmul.f32 -1.442695, %v1881_v21 }
 0x3c9   : > { %6121 = vset.pattern.permute.xlu1 %v10430_v35  ;;  %6572 = vpow2.f32 %v5740_v34 }
 0x3ca   : > { %2823 = vperm.xlu1 %6121, %v8136_v26  }
 0x3cb   : > { %v2157_v31 = vpop.permute.xlu1 %2156 }
 0x3cc   : > { %2194 = vst.msk [vmem:[#allocation3 + $0x8] sm:$0xff] %vm991_vm5, %v2157_v31  ;;  %2763 = vperm.xlu2 %6118, %v8358_v13  }
 0x3cd   : > { %2839 = vperm.xlu0 %6120, %v8212_v58   ;;  %v10631_v58 = vmov 2  }
 0x3ce   : > { %v1861_v1 = vpop.permute.xlu2 %1860 }
 0x3d2   : > { %2831 = vperm.xlu1 %6121, %v8159_v7   ;;  %v6573_v7 = vpop.eup %6572 }
 0x3d3   : > { %v1859_v35 = vpop.permute.xlu1 %1858 }
 0x3d4   : > { %v1889_v2 = vmul.f32 %v1859_v35, %v7971_v12  ;;  %6122 = vset.pattern.permute.xlu2 %v10630_v5  ;;  %v1890_v35 = vmul.f32 %v1861_v1, %v8063_v51 }
 0x3d5   : > { %2827 = vperm.xlu2 %6122, %v8143_v16   ;;  %v8373_v16 = vadd.f32 1.0, %v6573_v7 }
 0x3d6   : > { %v2177_v31 = vpop.permute.xlu2 %2176  ;;  %2235 = vrot.lane.b32.xlu0 %v1889_v2, %s6851_s27  ;;  %v5748_v34 = vmul.f32 -1.442695, %v1889_v2 }
 0x3d7   : > { %2204 = vst.msk [vmem:[#allocation3 + $0x58] sm:$0xff] %vm991_vm5, %v2177_v31  ;;  %6574 = vrcp.f32 %v8373_v16  ;;  %vm1951_vm4 = vweird.f32 %v8373_v16 }
 0x3d8   : > { %6576 = vpow2.f32 %v5748_v34 }
 0x3da   : > { %2219 = vrot.lane.b32.xlu1 %v1881_v21, %s6851_s27 }
 0x3db   : > { %v2175_v55 = vpop.permute.xlu1 %2174  ;;  %6124 = vset.pattern.permute.xlu1 %v10631_v58 }
 0x3dc   : > { %2203 = vst.msk [vmem:[#allocation3 + $0x50] sm:$0xff] %vm991_vm5, %v2175_v55 }
 0x3dd   : > { %2835 = vperm.xlu2 %6122, %v8206_v33   ;;  %v8385_v2 = vpop.eup %6574 }
 0x3de   : > { %v1849_v12 = vpop.permute.xlu2 %1848  ;;  %vm1952_vm6 = vweird.f32 %v8385_v2 }
 0x3df   : > { %v2173_v27 = vpop.permute.xlu0 %2172  ;;  %v1884_v7 = vmul.f32 %v1849_v12, %v8093_v44  ;;  %vm8435_vm8 = vmor %vm1951_vm4, %vm1952_vm6 }
 0x3e0   : > { %2202 = vst.msk [vmem:[#allocation3 + $0x48] sm:$0xff] %vm991_vm5, %v2173_v27  ;;  %v5749_v27 = vmul.f32 -1.442695, %v1890_v35 }
 0x3e1   : > { %v5743_v34 = vmul.f32 -1.442695, %v1884_v7 }
 0x3e2   : > { %2237 = vrot.lane.b32.xlu1 %v1890_v35, %s6851_s27 }
 0x3e3   : > { %v1847_v21 = vpop.permute.xlu1 %1846 }
 0x3e4   : > { %v1883_v31 = vmul.f32 %v1847_v21, %v7988_v60  ;;  %v6577_v60 = vpop.eup %6576 }
 0x3e5   : > { %6123 = vset.pattern.permute.xlu2 %v10631_v58  ;;  %v8390_v12 = vadd.f32 1.0, %v6577_v60 }
 0x3e6   : > { %v5742_v33 = vmul.f32 -1.442695, %v1883_v31  ;;  %v2165_v55 = vpop.permute.xlu2 %2164  ;;  %2223 = vrot.lane.b32.xlu0 %v1883_v31, %s6851_s27 }
 0x3e7   : > { %2198 = vst.msk [vmem:[#allocation3 + $0x28] sm:$0xff] %vm991_vm5, %v2165_v55  ;;  %v1845_v51 = vpop.permute.xlu0 %1844  ;;  %vm2071_vm14 = vweird.f32 %v8390_v12 }
 0x3e8   : > { %6578 = vpow2.f32 %v5742_v33  ;;  %v1882_v1 = vmul.f32 %v1845_v51, %v7943_v18  ;;  %v1947_v18 = vmul.f32 %v8385_v2, %v8373_v16 }
 0x3ea   : > { %v5741_v25 = vmul.f32 -1.442695, %v1882_v1  ;;  %2221 = vrot.lane.b32.xlu2 %v1882_v1, %s6851_s27  ;;  %2225 = vrot.lane.b32.xlu1 %v1884_v7, %s6851_s27 }
 0x3eb   : > { %v2163_v21 = vpop.permute.xlu1 %2162 }
 0x3ec   : > { %2197 = vst.msk [vmem:[#allocation3 + $0x20] sm:$0xff] %vm991_vm5, %v2163_v21  ;;  %6580 = vpow2.f32 %v5741_v25  ;;  %v1948_v25 = vsub.f32 1.0, %v1947_v18 }
 0x3ed   : > { %6582 = vpow2.f32 %v5749_v27 }
 0x3ee   : > { %v6579_v44 = vpop.eup %6578  ;;  %v1867_v31 = vpop.permute.xlu2 %1866  ;;  %6584 = vpow2.f32 %v5743_v34  ;;  %v1949_v21 = vmul.f32 %v8385_v2, %v1948_v25 }
 0x3ef   : > { %v1935_v35 = vadd.f32 1.0, %v6579_v44  ;;  %v8395_v33 = vmul.f32 %v1867_v31, %v8118_v17  ;;  %v2161_v55 = vpop.permute.xlu0 %2160 }
 0x3f0   : > { %2196 = vst.msk [vmem:[#allocation3 + $0x18] sm:$0xff] %vm991_vm5, %v2161_v55 }
 0x3f1   : > { %6586 = vrcp.f32 %v1935_v35  ;;  %v1985_v24 = vand.u32 2147483647, %v1935_v35  ;;  %vm1981_vm9 = vweird.f32 %v1935_v35 }
 0x3f2   : > { %6588 = vrcp.f32 %v8390_v12  ;;  %2243 = vrot.lane.b32.xlu1 %v8395_v33, %s6851_s27  ;;  %v6581_v7 = vpop.eup %6580 }
 0x3f3   : > { %v1865_v51 = vpop.permute.xlu1 %1864  ;;  %v6583_v1 = vpop.eup %6582  ;;  %v8404_v34 = vadd.f32 1.0, %v6581_v7  ;;  %v1955_v7 = vand.u32 2147483647, %v8373_v16  ;;  %vm1986_vm12 = vcmp.eq.f32.partialorder %v1985_v24, 8.507059e+37 }
 0x3f4   : > { %v8402_v27 = vmul.f32 %v1865_v51, %v8012_v42  ;;  %v6585_v60 = vpop.eup %6584  ;;  %v8411_v31 = vadd.f32 1.0, %v6583_v1  ;;  %v1950_v1 = vadd.f32 %v8385_v2, %v1949_v21 }
 0x3f5   : > { %v8415_v37 = vadd.f32 1.0, %v6585_v60  ;;  %6590 = vrcp.f32 %v8404_v34  ;;  %vm1956_vm11 = vcmp.eq.f32.partialorder %v1955_v7, 8.507059e+37  ;;  %vm1966_vm2 = vweird.f32 %v8404_v34 }
 0x3f6   : > { %v8406_v17 = vpop.permute.xlu2 %2655  ;;  %2241 = vrot.lane.b32.xlu0 %v8402_v27, %s6851_s27  ;;  %6592 = vrcp.f32 %v8411_v31 }
 0x3f7   : > { %10632 = vst [vmem:[#allocation26_spill] sm:$0xff] %v8406_v17  ;;  %v6587_v44 = vpop.eup %6586  ;;  %v1863_v18 = vpop.permute.xlu0 %1862  ;;  %6594 = vrcp.f32 %v8415_v37  ;;  %vm1996_vm6 = vweird.f32 %v8415_v37 }
 0x3f8   : > { %v8413_v55 = vpop.eup %6588  ;;  %v1891_v42 = vmul.f32 %v1863_v18, %v8095_v56  ;;  %v1977_v51 = vmul.f32 %v6587_v44, %v1935_v35  ;;  %v1957_v56 = vand.u32 2147483648, %v8373_v16  ;;  %v1987_v18 = vand.u32 2147483648, %v1935_v35 }
 0x3f9   : > { %v2067_v63 = vmul.f32 %v8413_v55, %v8390_v12  ;;  %vm1982_vm7 = vweird.f32 %v6587_v44  ;;  %vm2072_vm13 = vweird.f32 %v8413_v55 }
 0x3fa   : > { %v5750_v25 = vmul.f32 -1.442695, %v1891_v42  ;;  %2239 = vrot.lane.b32.xlu2 %v1891_v42, %s6851_s27  ;;  %v1978_v30 = vsub.f32 1.0, %v1977_v51  ;;  %v1954_v51 = vsel %vm8435_vm8, %v8385_v2, %v1950_v1  ;;  %vm1983_vm10 = vmor %vm1981_vm9, %vm1982_vm7  ;;  %v1988_v4 = vor.u32 1.1754944e-38, %v1987_v18 }
 0x3fb   : > { %v8425_v60 = vpop.permute.xlu1 %2651  ;;  %v2068_v15 = vsub.f32 1.0, %v2067_v63  ;;  %v2075_v18 = vand.u32 2147483647, %v8390_v12  ;;  %vm8478_vm15 = vmor %vm2071_vm14, %vm2072_vm13 }
 0x3fc   : > { %10633 = vst [vmem:[#allocation28_spill] sm:$0xff] %v8425_v60  ;;  %v1979_v52 = vmul.f32 %v6587_v44, %v1978_v30  ;;  %6596 = vpow2.f32 %v5750_v25  ;;  %v1958_v30 = vor.u32 1.1754944e-38, %v1957_v56  ;;  %v8442_v25 = vpop.eup %6590 }
 0x3fd   : > { %v8445_v17 = vpop.eup %6592  ;;  %v1962_v35 = vmul.f32 %v8442_v25, %v8404_v34  ;;  %v2069_v24 = vmul.f32 %v8413_v55, %v2068_v15  ;;  %vm2076_vm0 = vcmp.eq.f32.partialorder %v2075_v18, 8.507059e+37  ;;  %vm1967_vm1 = vweird.f32 %v8442_v25 }
 0x3fe   : > { %v1855_v42 = vpop.permute.xlu2 %1854  ;;  %v1980_v38 = vadd.f32 %v6587_v44, %v1979_v52  ;;  %v1959_v39 = vsel %vm1956_vm11, %v1958_v30, %v1954_v51  ;;  %v8447_v21 = vpop.eup %6594  ;;  %vm8503_vm4 = vmor %vm1966_vm2, %vm1967_vm1  ;;  %vm2087_vm13 = vweird.f32 %v8445_v17 }
 0x3ff   : > { %v2179_v32 = vpop.permute.xlu0 %2178  ;;  %v2070_v7 = vadd.f32 %v8413_v55, %v2069_v24  ;;  %v5752_v24 = vmul.f32 -1.442695, %v8395_v33  ;;  %vm1997_vm7 = vweird.f32 %v8447_v21 }
 0x400   : > { %2205 = vst.msk [vmem:[#allocation3 + $0x60] sm:$0xff] %vm991_vm5, %v2179_v32  ;;  %v1984_v16 = vsel %vm1983_vm10, %v6587_v44, %v1980_v38  ;;  %v1963_v44 = vsub.f32 1.0, %v1962_v35 }
 0x401   : > { %v1989_v60 = vsel %vm1986_vm12, %v1988_v4, %v1984_v16  ;;  %v2082_v4 = vmul.f32 %v8445_v17, %v8411_v31  ;;  %vm8525_vm12 = vmor %vm1996_vm6, %vm1997_vm7 }
 0x402   : > { %2286 = vperm.xlu2 %6123, %v1959_v39   ;;  %2296 = vperm.xlu1 %6124, %v1989_v60   ;;  %v6597_v52 = vpop.eup %6596  ;;  %v1992_v39 = vmul.f32 %v8447_v21, %v8415_v37  ;;  %v2077_v60 = vand.u32 2147483648, %v8390_v12  ;;  %v1964_v30 = vmul.f32 %v8442_v25, %v1963_v44 }
 0x403   : > { %v1853_v2 = vpop.permute.xlu1 %1852  ;;  %v8451_v1 = vadd.f32 1.0, %v6597_v52  ;;  %v5751_v52 = vmul.f32 -1.442695, %v8402_v27 }
 0x404   : > { %v8454_v32 = vmul.f32 %v1853_v2, %v8036_v3  ;;  %v8467_v3 = vmul.f32 %v1855_v42, %v8148_v62  ;;  %v1993_v62 = vsub.f32 1.0, %v1992_v39  ;;  %v2083_v42 = vsub.f32 1.0, %v2082_v4 }
 0x405   : > { %6598 = vrcp.f32 %v8451_v1  ;;  %v2074_v2 = vsel %vm8478_vm15, %v8413_v55, %v2070_v7  ;;  %v2078_v12 = vor.u32 1.1754944e-38, %v2077_v60  ;;  %v1965_v55 = vadd.f32 %v8442_v25, %v1964_v30 }
 0x406   : > { %2229 = vrot.lane.b32.xlu0 %v8454_v32, %s6851_s27  ;;  %v8460_v38 = vpop.permute.xlu2 %2719  ;;  %v1994_v4 = vmul.f32 %v8447_v21, %v1993_v62  ;;  %v2084_v27 = vmul.f32 %v8445_v17, %v2083_v42  ;;  %v2107_v33 = vand.u32 2147483648, %v8451_v1  ;;  %v2105_v60 = vand.u32 2147483647, %v8451_v1 }
 0x407   : > { %v1851_v63 = vpop.permute.xlu0 %1850  ;;  %v2079_v44 = vsel %vm2076_vm0, %v2078_v12, %v2074_v2  ;;  %v2000_v42 = vand.u32 2147483647, %v8415_v37  ;;  %vm2101_vm8 = vweird.f32 %v8451_v1  ;;  %vm2086_vm15 = vweird.f32 %v8411_v31 }
 0x408   : > { %v1885_v15 = vmul.f32 %v1851_v63, %v8120_v54  ;;  %v1995_v62 = vadd.f32 %v8447_v21, %v1994_v4  ;;  %v2108_v12 = vor.u32 1.1754944e-38, %v2107_v33  ;;  %vm2106_vm10 = vcmp.eq.f32.partialorder %v2105_v60, 8.507059e+37  ;;  %vm2088_vm0 = vmor %vm2086_vm15, %vm2087_vm13 }
 0x409   : > { %vm2001_vm14 = vcmp.eq.f32.partialorder %v2000_v42, 8.507059e+37  ;;  %v2092_v33 = vand.u32 2147483648, %v8411_v31 }
 0x40a   : > { %v5744_v56 = vmul.f32 -1.442695, %v1885_v15  ;;  %2227 = vrot.lane.b32.xlu2 %v1885_v15, %s6851_s27  ;;  %2231 = vrot.lane.b32.xlu1 %v8467_v3, %s6851_s27 }
 0x40b   : > { %v2169_v51 = vpop.permute.xlu1 %2168  ;;  %v6599_v16 = vpop.eup %6598 }
 0x40c   : > { %2200 = vst.msk [vmem:[#allocation3 + $0x38] sm:$0xff] %vm991_vm5, %v2169_v51  ;;  %6600 = vpow2.f32 %v5744_v56  ;;  %v2097_v35 = vmul.f32 %v6599_v16, %v8451_v1  ;;  %vm2102_vm3 = vweird.f32 %v6599_v16  ;;  %v1970_v56 = vand.u32 2147483647, %v8404_v34 }
 0x40d   : > { %6602 = vpow2.f32 %v5751_v52  ;;  %v2002_v52 = vand.u32 2147483648, %v8415_v37  ;;  %vm2103_vm9 = vmor %vm2101_vm8, %vm2102_vm3 }
 0x40e   : > { %2851 = vperm.xlu0 %6120, %v8219_v9   ;;  %v8491_v39 = vpop.permute.xlu2 %2731  ;;  %v2098_v15 = vsub.f32 1.0, %v2097_v35  ;;  %v1972_v9 = vand.u32 2147483648, %v8404_v34  ;;  %v1969_v34 = vsel %vm8503_vm4, %v8442_v25, %v1965_v55  ;;  %6604 = vpow2.f32 %v5752_v24 }
 0x40f   : > { %v2167_v63 = vpop.permute.xlu0 %2166  ;;  %vm1971_vm11 = vcmp.eq.f32.partialorder %v1970_v56, 8.507059e+37  ;;  %v2003_v37 = vor.u32 1.1754944e-38, %v2002_v52  ;;  %v2085_v55 = vadd.f32 %v8445_v17, %v2084_v27 }
 0x410   : > { %2199 = vst.msk [vmem:[#allocation3 + $0x30] sm:$0xff] %vm991_vm5, %v2167_v63  ;;  %v2099_v7 = vmul.f32 %v6599_v16, %v2098_v15  ;;  %v1973_v35 = vor.u32 1.1754944e-38, %v1972_v9 }
 0x411   : > { %v2089_v18 = vsel %vm2088_vm0, %v8445_v17, %v2085_v55 }
 0x412   : > { %2326 = vperm.xlu2 %6123, %v2079_v44   ;;  %v6601_v51 = vpop.eup %6600  ;;  %v2100_v30 = vadd.f32 %v6599_v16, %v2099_v7  ;;  %v1974_v63 = vsel %vm1971_vm11, %v1973_v35, %v1969_v34 }
 0x413   : > { %v8511_v54 = vpop.permute.xlu1 %2715  ;;  %v8518_v2 = vadd.f32 1.0, %v6601_v51  ;;  %v6603_v25 = vpop.eup %6602 }
 0x414   : > { %v2104_v4 = vsel %vm2103_vm9, %v6599_v16, %v2100_v30  ;;  %v1999_v16 = vsel %vm8525_vm12, %v8447_v21, %v1995_v62  ;;  %v8541_v9 = vadd.f32 1.0, %v6603_v25  ;;  %v2090_v21 = vand.u32 2147483647, %v8411_v31  ;;  %v6605_v60 = vpop.eup %6604 }
 0x415   : > { %6606 = vrcp.f32 %v8518_v2  ;;  %v2109_v24 = vsel %vm2106_vm10, %v2108_v12, %v2104_v4  ;;  %v2004_v7 = vsel %vm2001_vm14, %v2003_v37, %v1999_v16  ;;  %v2093_v62 = vor.u32 1.1754944e-38, %v2092_v33 }
 0x416   : > { %6127 = vset.pattern.permute.xlu0 %v10631_v58  ;;  %v8534_v44 = vpop.permute.xlu2 %2739  ;;  %2336 = vperm.xlu1 %6124, %v2109_v24   ;;  %v8548_v51 = vadd.f32 1.0, %v6605_v60  ;;  %6608 = vrcp.f32 %v8541_v9  ;;  %vm2091_vm1 = vcmp.eq.f32.partialorder %v2090_v21, 8.507059e+37  ;;  %v5745_v30 = vmul.f32 -1.442695, %v8454_v32 }
 0x417   : > { %v8536_v15 = vpop.permute.xlu0 %2723  ;;  %2291 = vperm.xlu0 %6127, %v1974_v63   ;;  %v2094_v34 = vsel %vm2091_vm1, %v2093_v62, %v2089_v18  ;;  %v5746_v12 = vmul.f32 -1.442695, %v8467_v3  ;;  %v2017_v32 = vand.u32 2147483648, %v8518_v2  ;;  %vm2011_vm3 = vweird.f32 %v8518_v2 }
 0x418   : > { %6610 = vrcp.f32 %v8548_v51  ;;  %v2015_v24 = vand.u32 2147483647, %v8518_v2  ;;  %vm2116_vm8 = vweird.f32 %v8541_v9  ;;  %vm2131_vm12 = vweird.f32 %v8548_v51 }
 0x419   : > { %6612 = vpow2.f32 %v5745_v30  ;;  %v2018_v16 = vor.u32 1.1754944e-38, %v2017_v32 }
 0x41a   : > { %2301 = vperm.xlu2 %6123, %v2004_v7   ;;  %6614 = vpow2.f32 %v5746_v12  ;;  %vm2016_vm6 = vcmp.eq.f32.partialorder %v2015_v24, 8.507059e+37  ;;  %v2122_v24 = vand.u32 2147483648, %v8541_v9 }
 0x41b   : > { %v8545_v56 = vpop.permute.xlu1 %2727  ;;  %v6607_v27 = vpop.eup %6606 }
 0x41c   : > { %v2007_v42 = vmul.f32 %v6607_v27, %v8518_v2  ;;  %vm2012_vm2 = vweird.f32 %v6607_v27  ;;  %v6609_v4 = vpop.eup %6608 }
 0x41d   : > { %vm2013_vm4 = vmor %vm2011_vm3, %vm2012_vm2  ;;  %v2112_v3 = vmul.f32 %v6609_v4, %v8541_v9  ;;  %vm2117_vm7 = vweird.f32 %v6609_v4 }
 0x41e   : > { %v8553_v31 = vpop.permute.xlu2 %2751  ;;  %6125 = vset.pattern.permute.xlu1 %v10630_v5  ;;  %v2008_v17 = vsub.f32 1.0, %v2007_v42  ;;  %v8569_v55 = vpop.eup %6610  ;;  %vm2118_vm9 = vmor %vm2116_vm8, %vm2117_vm7 }
 0x41f   : > { %v8556_v52 = vpop.permute.xlu0 %2743  ;;  %2331 = vperm.xlu0 %6127, %v2094_v34   ;;  %2843 = vperm.xlu1 %6125, %v8341_v57   ;;  %v6613_v7 = vpop.eup %6612  ;;  %v2113_v2 = vsub.f32 1.0, %v2112_v3  ;;  %v2127_v62 = vmul.f32 %v8569_v55, %v8548_v51  ;;  %vm2132_vm10 = vweird.f32 %v8569_v55 }
 0x420   : > { %v2009_v35 = vmul.f32 %v6607_v27, %v2008_v17  ;;  %v6615_v60 = vpop.eup %6614  ;;  %v8575_v18 = vadd.f32 1.0, %v6613_v7  ;;  %vm2133_vm13 = vmor %vm2131_vm12, %vm2132_vm10  ;;  %vm2362_vm12 = vcmask 523264  }
 0x421   : > { %v8581_v42 = vadd.f32 1.0, %v6615_v60  ;;  %v2114_v30 = vmul.f32 %v6609_v4, %v2113_v2  ;;  %v2128_v34 = vsub.f32 1.0, %v2127_v62  ;;  %v2137_v62 = vand.u32 2147483648, %v8548_v51 }
 0x422   : > { %v2010_v25 = vadd.f32 %v6607_v27, %v2009_v35  ;;  %6616 = vrcp.f32 %v8575_v18  ;;  %vm2026_vm0 = vweird.f32 %v8575_v18 }
 0x423   : > { %v8562_v1 = vpop.permute.xlu1 %2735  ;;  %6618 = vrcp.f32 %v8581_v42  ;;  %v2115_v32 = vadd.f32 %v6609_v4, %v2114_v30 }
 0x424   : > { %10642 = vst [vmem:[#allocation30_spill] sm:$0xff] %v8562_v1  ;;  %v2014_v63 = vsel %vm2013_vm4, %v6607_v27, %v2010_v25  ;;  %vm2041_vm4 = vweird.f32 %v8581_v42 }
 0x425   : > { %v2019_v21 = vsel %vm2016_vm6, %v2018_v16, %v2014_v63  ;;  %v2129_v63 = vmul.f32 %v8569_v55, %v2128_v34  ;;  %v2119_v3 = vsel %vm2118_vm9, %v6609_v4, %v2115_v32 }
 0x426   : > { %v8566_v37 = vpop.permute.xlu2 %2763 }
 0x427   : > { %10643 = vst [vmem:[#allocation35_spill] sm:$0xff] %v8566_v37  ;;  %v8571_v33 = vpop.permute.xlu0 %2755  ;;  %2615 = vperm.xlu0 %6127, %v8136_v26   ;;  %6128 = vset.pattern.permute.xlu1 %v10631_v58  ;;  %v2130_v2 = vadd.f32 %v8569_v55, %v2129_v63 }
 0x428   : > { %10644 = vst [vmem:[#allocation39_spill] sm:$0xff] %v8571_v33  ;;  %2306 = vperm.xlu1 %6128, %v2019_v21   ;;  %v8598_v16 = vpop.eup %6616  ;;  %v2123_v21 = vor.u32 1.1754944e-38, %v2122_v24  ;;  %v2138_v24 = vor.u32 1.1754944e-38, %v2137_v62  ;;  %v2779_v33 = vld [vmem:[#allocation4 + $0x7] sm:$0xff] }
 0x429   : > { %v8605_v60 = vpop.eup %6618  ;;  %vm2027_vm15 = vweird.f32 %v8598_v16 }
 0x42a   : > { %vm8636_vm1 = vmor %vm2026_vm0, %vm2027_vm15  ;;  %vm2042_vm2 = vweird.f32 %v8605_v60 }
 0x42b   : > { %v8577_v27 = vpop.permute.xlu1 %2747  ;;  %vm8649_vm8 = vmor %vm2041_vm4, %vm2042_vm2 }
 0x42f   : > { %2635 = vperm.xlu0 %6127, %v8341_v57   ;;  %v1857_v26 = vpop.permute.xlu0 %1856  ;;  %v8586_v12 = vpop.permute.xlu2 %2827 }
 0x430   : > { %v1888_v17 = vmul.f32 %v1857_v26, %v8165_v48  ;;  %10645 = vst [vmem:[#allocation37_spill] sm:$0xff] %v8586_v12  ;;  %6129 = vset.pattern.permute.xlu1 %v10630_v5  ;;  %v2120_v48 = vand.u32 2147483647, %v8541_v9  ;;  %v2022_v9 = vmul.f32 %v8598_v16, %v8575_v18 }
 0x431   : > { %2855 = vperm.xlu1 %6129, %v8178_v19  }
 0x432   : > { %v5747_v35 = vmul.f32 -1.442695, %v1888_v17  ;;  %2233 = vrot.lane.b32.xlu2 %v1888_v17, %s6851_s27  ;;  %vm2121_vm11 = vcmp.eq.f32.partialorder %v2120_v48, 8.507059e+37  ;;  %v2134_v17 = vsel %vm2133_vm13, %v8569_v55, %v2130_v2  ;;  %v2023_v63 = vsub.f32 1.0, %v2022_v9  ;;  %s6858_s27 = smov 32  }
 0x433   : > { %v8592_v25 = vpop.permute.xlu1 %2759  ;;  %v2124_v30 = vsel %vm2121_vm11, %v2123_v21, %v2119_v3  ;;  %vm3959_vm13 = vcmask 785408  }
 0x434   : > { %10646 = vst [vmem:[#allocation44_spill] sm:$0xff] %v8592_v25  ;;  %6620 = vpow2.f32 %v5747_v35  ;;  %v2037_v35 = vmul.f32 %v8605_v60, %v8581_v42  ;;  %v2024_v21 = vmul.f32 %v8598_v16, %v2023_v63 }
 0x436   : > { %v2038_v3 = vsub.f32 1.0, %v2037_v35 }
 0x437   : > { %2647 = vperm.xlu0 %6127, %v8178_v19   ;;  %v8601_v7 = vpop.permute.xlu0 %2819  ;;  %v2135_v19 = vand.u32 2147483647, %v8548_v51  ;;  %v8612_v26 = vpop.permute.xlu2 %2835 }
 0x438   : > { %10647 = vst [vmem:[#allocation48_spill] sm:$0xff] %v8601_v7  ;;  %v2039_v2 = vmul.f32 %v8605_v60, %v2038_v3  ;;  %v2047_v3 = vand.u32 2147483648, %v8581_v42 }
 0x439   : > { %10648 = vst [vmem:[#allocation47_spill] sm:$0xff] %v8612_v26  ;;  %2867 = vperm.xlu1 %6129, %v8358_v13   ;;  %vm2136_vm14 = vcmp.eq.f32.partialorder %v2135_v19, 8.507059e+37  ;;  %v2045_v26 = vand.u32 2147483647, %v8581_v42 }
 0x43a   : > { %v6621_v4 = vpop.eup %6620  ;;  %2341 = vperm.xlu2 %6123, %v2124_v30   ;;  %v2139_v51 = vsel %vm2136_vm14, %v2138_v24, %v2134_v17  ;;  %v2025_v30 = vadd.f32 %v8598_v16, %v2024_v21  ;;  %v2030_v17 = vand.u32 2147483647, %v8575_v18  ;;  %v2048_v42 = vor.u32 1.1754944e-38, %v2047_v3 }
 0x43b   : > { %v1940_v34 = vadd.f32 1.0, %v6621_v4  ;;  %v2032_v4 = vand.u32 2147483648, %v8575_v18  ;;  %vm2046_vm11 = vcmp.eq.f32.partialorder %v2045_v26, 8.507059e+37  ;;  %v8666_v26 = vld [vmem:[%s10410_s2 + $0x10] sm:$0xff] }
 0x43c   : > { %v8618_v32 = vpop.permute.xlu1 %2823  ;;  %vm2031_vm6 = vcmp.eq.f32.partialorder %v2030_v17, 8.507059e+37 }
 0x43d   : > { %10649 = vst [vmem:[#allocation52_spill] sm:$0xff] %v8618_v32  ;;  %6622 = vrcp.f32 %v1940_v34  ;;  %v2062_v63 = vand.u32 2147483648, %v1940_v34  ;;  %vm2056_vm7 = vweird.f32 %v1940_v34 }
 0x43f   : > { %2346 = vperm.xlu0 %6127, %v2139_v51   ;;  %v8620_v48 = vpop.permute.xlu0 %2839  ;;  %v2040_v51 = vadd.f32 %v8605_v60, %v2039_v2 }
 0x440   : > { %10650 = vst [vmem:[#allocation56_spill] sm:$0xff] %v8620_v48  ;;  %v2033_v48 = vor.u32 1.1754944e-38, %v2032_v4 }
 0x441   : > { %6135 = vset.pattern.permute.xlu1 %v10631_v58  ;;  %v2044_v4 = vsel %vm8649_vm8, %v8605_v60, %v2040_v51  ;;  %v6852_v60 = vmov 5  }
 0x442   : > { %6126 = vset.pattern.permute.xlu2 %v10630_v5  ;;  %v2049_v17 = vsel %vm2046_vm11, %v2048_v42, %v2044_v4  ;;  %v8715_v42 = vld [vmem:[%s10410_s2 + $0x48] sm:$0xff] }
 0x443   : > { %v6623_v55 = vpop.eup %6622  ;;  %2847 = vperm.xlu2 %6126, %v8326_v45  }
 0x444   : > { %v2222_v62 = vpop.permute.xlu2 %2221  ;;  %v8627_v9 = vpop.permute.xlu1 %2831  ;;  %v2052_v19 = vmul.f32 %v6623_v55, %v1940_v34  ;;  %vm2057_vm3 = vweird.f32 %v6623_v55 }
 0x445   : > { %10651 = vst [vmem:[#allocation20_spill] sm:$0xff] %v8627_v9  ;;  %vm2058_vm9 = vmor %vm2056_vm7, %vm2057_vm3  ;;  %v2271_v9 = vld [vmem:[%s6945_s14] sm:$0xff] }
 0x446   : > { %2259 = vst.msk [vmem:[#allocation2 + $0x10] sm:$0xff] %vm991_vm5, %v2222_v62  ;;  %v2053_v35 = vsub.f32 1.0, %v2052_v19  ;;  %v2029_v62 = vsel %vm8636_vm1, %v8598_v16, %v2025_v30  ;;  %v2060_v19 = vand.u32 2147483647, %v1940_v34  ;;  %v2063_v30 = vor.u32 1.1754944e-38, %v2062_v63 }
 0x447   : > { %2659 = vperm.xlu0 %6127, %v8358_v13   ;;  %v2034_v16 = vsel %vm2031_vm6, %v2033_v48, %v2029_v62  ;;  %v8689_v62 = vld [vmem:[%s10410_s2 + $0x8] sm:$0xff] }
 0x448   : > { %v2236_v21 = vpop.permute.xlu0 %2235  ;;  %v2054_v18 = vmul.f32 %v6623_v55, %v2053_v35  ;;  %vm2061_vm10 = vcmp.eq.f32.partialorder %v2060_v19, 8.507059e+37 }
 0x449   : > { %2266 = vst.msk [vmem:[#allocation2 + $0x48] sm:$0xff] %vm991_vm5, %v2236_v21  ;;  %v8683_v21 = vld [vmem:[%s10410_s2 + $0x20] sm:$0xff] }
 0x44a   : > { %v2055_v2 = vadd.f32 %v6623_v55, %v2054_v18 }
 0x44b   : > { %6130 = vset.pattern.permute.xlu2 %v10631_v58 }
 0x44c   : > { %v2220_v35 = vpop.permute.xlu1 %2219  ;;  %2311 = vperm.xlu2 %6130, %v2034_v16   ;;  %v2059_v24 = vsel %vm2058_vm9, %v6623_v55, %v2055_v2  ;;  %v8697_v2 = vld [vmem:[%s10410_s2 + $0x18] sm:$0xff] }
 0x44d   : > { %2258 = vst.msk [vmem:[#allocation2 + $0x8] sm:$0xff] %vm991_vm5, %v2220_v35  ;;  %v2064_v34 = vsel %vm2061_vm10, %v2063_v30, %v2059_v24  ;;  %v2279_v30 = vld [vmem:[%s6945_s14 + $0x40] sm:$0xff]  ;;  %v8707_v24 = vld [vmem:[%s10410_s2 + $0x28] sm:$0xff] }
 0x44e   : > { %2321 = vperm.xlu1 %6135, %v2064_v34   ;;  %v2274_v34 = vld [vmem:[%s6945_s14 + $0x18] sm:$0xff] }
 0x44f   : > { %2316 = vperm.xlu0 %6127, %v2049_v17   ;;  %v2273_v17 = vld [vmem:[%s6945_s14 + $0x10] sm:$0xff] }
 0x454   : > { %v2240_v58 = vpop.permute.xlu2 %2239  ;;  %v2238_v48 = vpop.permute.xlu1 %2237  ;;  %6131 = vset.pattern.permute.xlu2 %v10630_v5 }
 0x455   : > { %2268 = vst.msk [vmem:[#allocation2 + $0x58] sm:$0xff] %vm991_vm5, %v2240_v58  ;;  %2859 = vperm.xlu2 %6131, %v8273_v41  }
 0x456   : > { %2267 = vst.msk [vmem:[#allocation2 + $0x50] sm:$0xff] %vm991_vm5, %v2238_v48  ;;  %6136 = vset.pattern.permute.xlu1 %v6852_v60 }
 0x457   : > { %6132 = vset.pattern.permute.xlu0 %v10630_v5  ;;  %2931 = vperm.xlu1 %6136, %v8666_v26   ;;  %v8676_v5 = vld [vmem:[%s10410_s2] sm:$0xff] }
 0x458   : > { %2863 = vperm.xlu0 %6132, %v8303_v11   ;;  %v2224_v55 = vpop.permute.xlu0 %2223 }
 0x459   : > { %2260 = vst.msk [vmem:[#allocation2 + $0x18] sm:$0xff] %vm991_vm5, %v2224_v55 }
 0x45c   : > { %v2287_v63 = vpop.permute.xlu2 %2286  ;;  %v2226_v51 = vpop.permute.xlu1 %2225 }
 0x45d   : > { %v2349_v3 = vmul.f32 %v2287_v63, %v2271_v9  ;;  %2261 = vst.msk [vmem:[#allocation2 + $0x20] sm:$0xff] %vm991_vm5, %v2226_v51  ;;  %6133 = vset.pattern.permute.xlu2 %v6852_v60  ;;  %v8723_v9 = vld [vmem:[%s10410_s2 + $0x40] sm:$0xff] }
 0x45e   : > { %2923 = vperm.xlu2 %6133, %v8676_v5  }
 0x45f   : > { %2363 = vst.msk [vmem:[#allocation6 + $0x8] sm:$0xff] %vm2362_vm12, %v2349_v3  ;;  %2939 = vperm.xlu1 %6136, %v8683_v21  }
 0x460   : > { %6134 = vset.pattern.permute.xlu0 %v6852_v60 }
 0x461   : > { %2927 = vperm.xlu0 %6134, %v8689_v62  }
 0x464   : > { %v2228_v18 = vpop.permute.xlu2 %2227  ;;  %v2244_v19 = vpop.permute.xlu1 %2243 }
 0x465   : > { %2262 = vst.msk [vmem:[#allocation2 + $0x28] sm:$0xff] %vm991_vm5, %v2228_v18  ;;  %v2281_v18 = vld [vmem:[%s6945_s14 + $0x50] sm:$0xff] }
 0x466   : > { %2270 = vst.msk [vmem:[#allocation2 + $0x68] sm:$0xff] %vm991_vm5, %v2244_v19  ;;  %2935 = vperm.xlu2 %6133, %v8697_v2   ;;  %v2272_v19 = vld [vmem:[%s6945_s14 + $0x8] sm:$0xff] }
 0x467   : > { %2951 = vperm.xlu1 %6136, %v8326_v45  }
 0x468   : > { %v2242_v16 = vpop.permute.xlu0 %2241 }
 0x469   : > { %2269 = vst.msk [vmem:[#allocation2 + $0x60] sm:$0xff] %vm991_vm5, %v2242_v16  ;;  %2947 = vperm.xlu0 %6134, %v8341_v57  }
 0x46c   : > { %v2327_v4 = vpop.permute.xlu2 %2326 }
 0x46d   : > { %v2357_v35 = vmul.f32 %v2327_v4, %v2279_v30 }
 0x46e   : > { %2943 = vperm.xlu2 %6133, %v8707_v24  }
 0x46f   : > { %2371 = vst.msk [vmem:[#allocation6 + $0x48] sm:$0xff] %vm2362_vm12, %v2357_v35  ;;  %2963 = vperm.xlu1 %6136, %v8273_v41   ;;  %v6853_v41 = vmov 6  }
 0x471   : > { %2959 = vperm.xlu0 %6134, %v8715_v42  }
 0x474   : > { %v2302_v58 = vpop.permute.xlu2 %2301  ;;  %v2297_v48 = vpop.permute.xlu1 %2296 }
 0x475   : > { %v2352_v60 = vmul.f32 %v2302_v58, %v2274_v34  ;;  %v2351_v55 = vmul.f32 %v2297_v48, %v2273_v17  ;;  %v2280_v17 = vld [vmem:[%s6945_s14 + $0x48] sm:$0xff] }
 0x476   : > { %2955 = vperm.xlu2 %6133, %v8723_v9  }
 0x477   : > { %2366 = vst.msk [vmem:[#allocation6 + $0x20] sm:$0xff] %vm2362_vm12, %v2352_v60  ;;  %6137 = vset.pattern.permute.xlu1 %v6853_v41 }
 0x478   : > { %2365 = vst.msk [vmem:[#allocation6 + $0x18] sm:$0xff] %vm2362_vm12, %v2351_v55  ;;  %3027 = vperm.xlu1 %6137, %v8676_v5   ;;  %v2230_v63 = vpop.permute.xlu0 %2229  ;;  %v2282_v55 = vld [vmem:[%s6945_s14 + $0x58] sm:$0xff] }
 0x479   : > { %2263 = vst.msk [vmem:[#allocation2 + $0x30] sm:$0xff] %vm991_vm5, %v2230_v63  ;;  %2971 = vperm.xlu0 %6134, %v8358_v13  }
 0x47c   : > { %v2232_v51 = vpop.permute.xlu1 %2231 }
 0x47d   : > { %2264 = vst.msk [vmem:[#allocation2 + $0x38] sm:$0xff] %vm991_vm5, %v2232_v51 }
 0x47e   : > { %2967 = vperm.xlu2 %6133, %v8303_v11  }
 0x480   : > { %3039 = vperm.xlu1 %6137, %v8697_v2   ;;  %v8734_v3 = vpop.permute.xlu0 %2851 }
 0x481   : > { %10656 = vst [vmem:[#allocation16_spill] sm:$0xff] %v8734_v3  ;;  %6139 = vset.pattern.permute.xlu0 %v6853_v41 }
 0x482   : > { %3035 = vperm.xlu0 %6139, %v8666_v26  }
 0x486   : > { %6138 = vset.pattern.permute.xlu2 %v6853_v41 }
 0x487   : > { %3031 = vperm.xlu2 %6138, %v8689_v62  }
 0x488   : > { %3047 = vperm.xlu1 %6137, %v8707_v24   ;;  %v2337_v16 = vpop.permute.xlu1 %2336 }
 0x489   : > { %v2292_v30 = vpop.permute.xlu0 %2291  ;;  %v2359_v4 = vmul.f32 %v2337_v16, %v2281_v18  ;;  %v2275_v18 = vld [vmem:[%s6945_s14 + $0x20] sm:$0xff] }
 0x48a   : > { %v2350_v35 = vmul.f32 %v2292_v30, %v2272_v19  ;;  %3055 = vperm.xlu0 %6139, %v8326_v45   ;;  %v8753_v45 = vld [vmem:[%s10410_s2 + $0x50] sm:$0xff]  ;;  %v6854_v19 = vmov 7  }
 0x48b   : > { %2373 = vst.msk [vmem:[#allocation6 + $0x58] sm:$0xff] %vm2362_vm12, %v2359_v4 }
 0x48c   : > { %v2234_v34 = vpop.permute.xlu2 %2233  ;;  %2364 = vst.msk [vmem:[#allocation6 + $0x10] sm:$0xff] %vm2362_vm12, %v2350_v35  ;;  %v2276_v35 = vld [vmem:[%s6945_s14 + $0x28] sm:$0xff] }
 0x48d   : > { %2265 = vst.msk [vmem:[#allocation2 + $0x40] sm:$0xff] %vm991_vm5, %v2234_v34  ;;  %vm3932_vm5 = vcmask 261120  }
 0x48f   : > { %3043 = vperm.xlu2 %6138, %v8683_v21  }
 0x490   : > { %3059 = vperm.xlu1 %6137, %v8723_v9  }
 0x491   : > { %v2332_v58 = vpop.permute.xlu0 %2331  ;;  %v8748_v60 = vpop.permute.xlu1 %2843 }
 0x492   : > { %v2358_v48 = vmul.f32 %v2332_v58, %v2280_v17  ;;  %10657 = vst [vmem:[#allocation22_spill] sm:$0xff] %v8748_v60  ;;  %3067 = vperm.xlu0 %6139, %v8753_v45  }
 0x494   : > { %2372 = vst.msk [vmem:[#allocation6 + $0x50] sm:$0xff] %vm2362_vm12, %v2358_v48  ;;  %v2342_v41 = vpop.permute.xlu2 %2341 }
 0x495   : > { %v2360_v63 = vmul.f32 %v2342_v41, %v2282_v55  ;;  %v2283_v55 = vld [vmem:[%s6945_s14 + $0x60] sm:$0xff] }
 0x497   : > { %2374 = vst.msk [vmem:[#allocation6 + $0x60] sm:$0xff] %vm2362_vm12, %v2360_v63  ;;  %3051 = vperm.xlu2 %6138, %v8341_v57  }
 0x498   : > { %3071 = vperm.xlu1 %6137, %v8303_v11  }
 0x499   : > { %v8761_v51 = vpop.permute.xlu0 %2615 }
 0x49a   : > { %10658 = vst [vmem:[#allocation25_spill] sm:$0xff] %v8761_v51  ;;  %6140 = vset.pattern.permute.xlu0 %v6854_v19  ;;  %v2307_v16 = vpop.permute.xlu1 %2306 }
 0x49b   : > { %3131 = vperm.xlu0 %6140, %v8676_v5   ;;  %v2353_v30 = vmul.f32 %v2307_v16, %v2275_v18  ;;  %v8790_v16 = vld [vmem:[%s10410_s2 + $0x58] sm:$0xff] }
 0x49d   : > { %v8765_v4 = vpop.permute.xlu2 %2847  ;;  %2367 = vst.msk [vmem:[#allocation6 + $0x28] sm:$0xff] %vm2362_vm12, %v2353_v30 }
 0x49e   : > { %10659 = vst [vmem:[#allocation18_spill] sm:$0xff] %v8765_v4 }
 0x49f   : > { %3063 = vperm.xlu2 %6138, %v8715_v42  }
 0x4a0   : > { %6141 = vset.pattern.permute.xlu1 %v6854_v19 }
 0x4a1   : > { %3135 = vperm.xlu1 %6141, %v8689_v62   ;;  %v8770_v11 = vpop.permute.xlu0 %2635 }
 0x4a2   : > { %10660 = vst [vmem:[#allocation29_spill] sm:$0xff] %v8770_v11 }
 0x4a3   : > { %3151 = vperm.xlu0 %6140, %v8707_v24   ;;  %v8783_v41 = vpop.permute.xlu1 %2855 }
 0x4a4   : > { %10663 = vst [vmem:[#allocation38_spill] sm:$0xff] %v8783_v41 }
 0x4a6   : > { %v2312_v34 = vpop.permute.xlu2 %2311 }
 0x4a7   : > { %v2354_v17 = vmul.f32 %v2312_v34, %v2276_v35  ;;  %3075 = vperm.xlu2 %6138, %v8358_v13   ;;  %v6855_v35 = vmov 8   ;;  %v2278_v34 = vld [vmem:[%s6945_s14 + $0x38] sm:$0xff] }
 0x4a9   : > { %2368 = vst.msk [vmem:[#allocation6 + $0x30] sm:$0xff] %vm2362_vm12, %v2354_v17  ;;  %3143 = vperm.xlu1 %6141, %v8697_v2   ;;  %v8777_v58 = vpop.permute.xlu0 %2647  ;;  %v2277_v17 = vld [vmem:[%s6945_s14 + $0x30] sm:$0xff] }
 0x4aa   : > { %10661 = vst [vmem:[#allocation34_spill] sm:$0xff] %v8777_v58 }
 0x4ab   : > { %3163 = vperm.xlu0 %6140, %v8723_v9  }
 0x4af   : > { %6142 = vset.pattern.permute.xlu2 %v6854_v19  ;;  %v8780_v48 = vpop.permute.xlu2 %2859  ;;  %v8794_v19 = vpop.permute.xlu1 %2867 }
 0x4b0   : > { %10662 = vst [vmem:[#allocation31_spill] sm:$0xff] %v8780_v48  ;;  %3139 = vperm.xlu2 %6142, %v8666_v26  }
 0x4b1   : > { %3155 = vperm.xlu1 %6141, %v8341_v57   ;;  %v2347_v63 = vpop.permute.xlu0 %2346  ;;  %10664 = vst [vmem:[#allocation41_spill] sm:$0xff] %v8794_v19 }
 0x4b2   : > { %v2361_v18 = vmul.f32 %v2347_v63, %v2283_v55  ;;  %v6751_v55 = vld [vmem:[%s10410_s2 + $0x38] sm:$0xff] }
 0x4b3   : > { %3175 = vperm.xlu0 %6140, %v8790_v16  }
 0x4b4   : > { %2375 = vst.msk [vmem:[#allocation6 + $0x68] sm:$0xff] %vm2362_vm12, %v2361_v18 }
 0x4b8   : > { %3147 = vperm.xlu2 %6142, %v8683_v21   ;;  %v8797_v30 = vpop.permute.xlu2 %2923 }
 0x4b9   : > { %3167 = vperm.xlu1 %6141, %v8715_v42   ;;  %v8800_v57 = vpop.permute.xlu0 %2659 }
 0x4ba   : > { %10665 = vst [vmem:[#allocation42_spill] sm:$0xff] %v8800_v57 }
 0x4bb   : > { %6144 = vset.pattern.permute.xlu0 %v6855_v35 }
 0x4bc   : > { %3239 = vperm.xlu0 %6144, %v8689_v62   ;;  %v6752_v62 = vld [vmem:[%s10410_s2 + $0x30] sm:$0xff] }
 0x4c0   : > { %3159 = vperm.xlu2 %6142, %v6751_v55   ;;  %v8808_v63 = vpop.permute.xlu2 %2935  ;;  %v2322_v18 = vpop.permute.xlu1 %2321 }
 0x4c1   : > { %v2356_v19 = vmul.f32 %v2322_v18, %v2278_v34  ;;  %3179 = vperm.xlu1 %6141, %v8358_v13   ;;  %v2317_v48 = vpop.permute.xlu0 %2316  ;;  %v2913_v34 = vld [vmem:[#allocation6 + $0x29] sm:$0xff] }
 0x4c2   : > { %v2355_v41 = vmul.f32 %v2317_v48, %v2277_v17  ;;  %v2910_v17 = vld [vmem:[#allocation6 + $0x11] sm:$0xff] }
 0x4c3   : > { %2370 = vst.msk [vmem:[#allocation6 + $0x40] sm:$0xff] %vm2362_vm12, %v2356_v19  ;;  %v2909_v19 = vld [vmem:[#allocation6 + $0x9] sm:$0xff] }
 0x4c4   : > { %2369 = vst.msk [vmem:[#allocation6 + $0x38] sm:$0xff] %vm2362_vm12, %v2355_v41  ;;  %3259 = vperm.xlu0 %6144, %v6752_v62  }
 0x4c8   : > { %3171 = vperm.xlu2 %6142, %v8753_v45   ;;  %v8817_v3 = vpop.permute.xlu2 %2943 }
 0x4c9   : > { %6145 = vset.pattern.permute.xlu1 %v6855_v35  ;;  %v8819_v4 = vpop.permute.xlu1 %2931 }
 0x4ca   : > { %3243 = vperm.xlu1 %6145, %v8666_v26   ;;  %v8822_v13 = vpop.permute.xlu0 %2863  ;;  %v8834_v26 = vmul.f32 %v8797_v30, %v2909_v19 }
 0x4cb   : > { %10666 = vst [vmem:[#allocation46_spill] sm:$0xff] %v8822_v13 }
 0x4cc   : > { %3271 = vperm.xlu0 %6144, %v8715_v42   ;;  %10667 = vst [vmem:[#allocation50_spill] sm:$0xff] %v8834_v26  ;;  %v6753_v42 = vld [vmem:[%s10410_s2 + $0x60] sm:$0xff] }
 0x4cd   : > { %v8867_v26 = vld [vmem:[#allocation6 + $0x27] sm:$0xff] }
 0x4ce   : > { %10673 = vst [vmem:[#allocation61_spill] sm:$0xff] %v8867_v26 }
 0x4d0   : > { %6143 = vset.pattern.permute.xlu2 %v6855_v35  ;;  %v8825_v48 = vpop.permute.xlu2 %2955  ;;  %v2563_v35 = vmul.f32 %v2913_v34, %v8276_v59 }
 0x4d1   : > { %3235 = vperm.xlu2 %6143, %v8676_v5   ;;  %v8828_v41 = vpop.permute.xlu1 %2939  ;;  %v8842_v5 = vld [vmem:[#allocation6 + $0x21] sm:$0xff] }
 0x4d2   : > { %3251 = vperm.xlu1 %6145, %v8683_v21   ;;  %10669 = vst [vmem:[#allocation55_spill] sm:$0xff] %v8842_v5  ;;  %v2562_v60 = vmul.f32 %v8842_v5, %v8244_v43  ;;  %v2918_v21 = vld [vmem:[#allocation6 + $0x51] sm:$0xff] }
 0x4d3   : > { %v8831_v18 = vpop.permute.xlu0 %2927  ;;  %v2568_v57 = vmul.f32 %v2918_v21, %v8278_v22  ;;  %v2770_v21 = vmul.f32 %v8491_v39, %v8867_v26 }
 0x4d4   : > { %v8837_v62 = vmul.f32 %v8831_v18, %v2910_v17  ;;  %3283 = vperm.xlu0 %6144, %v6753_v42   ;;  %v6156_v32 = vpack.i.bf16 %v2563_v35, %v2562_v60  ;;  %v2919_v42 = vld [vmem:[#allocation6 + $0x59] sm:$0xff]  ;;  %v2493_v35 = vld [vmem:[#allocation6 + $0x1] sm:$0xff] }
 0x4d5   : > { %v2569_v34 = vmul.f32 %v2919_v42, %v8307_v28  ;;  %v8871_v42 = vld [vmem:[#allocation6 + $0x1f] sm:$0xff] }
 0x4d6   : > { %10668 = vst [vmem:[#allocation51_spill] sm:$0xff] %v8837_v62 }
 0x4d7   : > { %v6171_v60 = vpack.i.bf16 %v2569_v34, %v2568_v57  ;;  %10674 = vst [vmem:[#allocation62_spill] sm:$0xff] %v8871_v42  ;;  %v8878_v57 = vld [vmem:[#allocation6 + $0x31] sm:$0xff]  ;;  %v2915_v34 = vld [vmem:[#allocation6 + $0x39] sm:$0xff] }
 0x4d8   : > { %v8847_v13 = vpop.permute.xlu2 %2967  ;;  %10675 = vst [vmem:[#allocation63_spill] sm:$0xff] %v8878_v57 }
 0x4d9   : > { %10670 = vst [vmem:[#allocation58_spill] sm:$0xff] %v8847_v13  ;;  %3247 = vperm.xlu2 %6143, %v8697_v2   ;;  %v8852_v12 = vpop.permute.xlu1 %2951  ;;  %v2920_v13 = vld [vmem:[#allocation6 + $0x61] sm:$0xff] }
 0x4da   : > { %3263 = vperm.xlu1 %6145, %v6751_v55  }
 0x4db   : > { %v8854_v7 = vpop.permute.xlu0 %2947 }
 0x4dc   : > { %6157 = vrot.lane.b32.xlu0 %v6156_v32, %s6856_s18  ;;  %v2559_v32 = vmul.f32 %v2909_v19, %v8262_v20 }
 0x4e1   : > { %3255 = vperm.xlu2 %6143, %v8707_v24   ;;  %v8860_v5 = vpop.permute.xlu2 %3031  ;;  %v8862_v2 = vpop.permute.xlu1 %2963  ;;  %v2558_v24 = vmul.f32 %v8259_v0, %v2493_v35  ;;  %v2780_v35 = vld [vmem:[#allocation4 + $0xf] sm:$0xff] }
 0x4e2   : > { %10671 = vst [vmem:[#allocation59_spill] sm:$0xff] %v8860_v5  ;;  %3275 = vperm.xlu1 %6145, %v8753_v45   ;;  %v2769_v45 = vmul.f32 %v8545_v56, %v8871_v42  ;;  %v2792_v42 = vmul.f32 %v2779_v33, %v8511_v54 }
 0x4e3   : > { %10672 = vst [vmem:[#allocation60_spill] sm:$0xff] %v8862_v2  ;;  %v8865_v55 = vpop.permute.xlu0 %2959  ;;  %v6146_v62 = vpack.i.bf16 %v2559_v32, %v2558_v24  ;;  %v2564_v32 = vmul.f32 %v8878_v57, %v8296_v23  ;;  %v2565_v24 = vmul.f32 %v2915_v34, %v8255_v36  ;;  %v2701_v34 = vld [vmem:[#allocation6 + $0x7] sm:$0xff] }
 0x4e4   : > { %6172 = vrot.lane.b32.xlu0 %v6171_v60, %s6856_s18  ;;  %v6186_v19 = vpack.i.bf16 %v2770_v21, %v2769_v45  ;;  %v8897_v45 = vld [vmem:[#allocation6 + $0x19] sm:$0xff]  ;;  %v2572_v57 = vld [vmem:[#allocation4 + $0x9] sm:$0xff] }
 0x4e5   : > { %v6161_v26 = vpack.i.bf16 %v2565_v24, %v2564_v32  ;;  %10680 = vst [vmem:[#allocation68_spill] sm:$0xff] %v8897_v45  ;;  %v8910_v24 = vld [vmem:[#allocation6 + $0x41] sm:$0xff] }
 0x4e6   : > { %10683 = vst [vmem:[#allocation71_spill] sm:$0xff] %v8910_v24 }
 0x4e9   : > { %3267 = vperm.xlu2 %6143, %v8723_v9   ;;  %v8881_v37 = vpop.permute.xlu2 %3043  ;;  %v2793_v9 = vmul.f32 %v2780_v35, %v8460_v38  ;;  %v2570_v35 = vmul.f32 %v2920_v13, %v8318_v50  ;;  %v2566_v13 = vmul.f32 %v8910_v24, %v8290_v47  ;;  %v2988_v50 = vld [vmem:[#allocation4 + $0x11] sm:$0xff] }
 0x4ea   : > { %10676 = vst [vmem:[#allocation64_spill] sm:$0xff] %v8881_v37  ;;  %v8883_v60 = vpop.permute.xlu1 %3027  ;;  %6147 = vrot.lane.b32.xlu1 %v6146_v62, %s6856_s18 }
 0x4eb   : > { %10677 = vst [vmem:[#allocation65_spill] sm:$0xff] %v8883_v60  ;;  %v8886_v25 = vpop.permute.xlu0 %2971  ;;  %v6201_v21 = vpack.i.bf16 %v2793_v9, %v2792_v42  ;;  %v2766_v42 = vmul.f32 %v8511_v54, %v2701_v34 }
 0x4ec   : > { %10678 = vst [vmem:[#allocation66_spill] sm:$0xff] %v8886_v25  ;;  %6187 = vrot.lane.b32.xlu0 %v6186_v19, %s6856_s18  ;;  %v2560_v19 = vmul.f32 %v2910_v17, %v8240_v53 }
 0x4ed   : > { %v6176_v9 = vpack.i.bf16 %v2766_v42, %v2570_v35 }
 0x4f1   : > { %3279 = vperm.xlu2 %6143, %v8790_v16   ;;  %v8895_v62 = vpop.permute.xlu2 %3051  ;;  %v2561_v16 = vmul.f32 %v8897_v45, %v8283_v40  ;;  %v8925_v45 = vld [vmem:[#allocation6 + $0xf] sm:$0xff] }
 0x4f2   : > { %10679 = vst [vmem:[#allocation67_spill] sm:$0xff] %v8895_v62  ;;  %v8899_v25 = vpop.permute.xlu1 %3039  ;;  %6162 = vrot.lane.b32.xlu1 %v6161_v26, %s6856_s18  ;;  %v2571_v26 = vld [vmem:[#allocation4 + $0x1] sm:$0xff] }
 0x4f3   : > { %10681 = vst [vmem:[#allocation69_spill] sm:$0xff] %v8899_v25  ;;  %v6151_v32 = vpack.i.bf16 %v2561_v16, %v2560_v19  ;;  %v2584_v54 = vmul.f32 %v2571_v26, %v8259_v0  ;;  %v2585_v19 = vmul.f32 %v2572_v57, %v8262_v20  ;;  %v2987_v0 = vld [vmem:[#allocation4 + $0x9] sm:$0xff]  ;;  %v2767_v20 = vmul.f32 %v8460_v38, %v8925_v45  ;;  %v2573_v38 = vld [vmem:[#allocation4 + $0x11] sm:$0xff] }
 0x4f4   : > { %6202 = vrot.lane.b32.xlu0 %v6201_v21, %s6857_s24  ;;  %v8904_v33 = vpop.permute.xlu0 %3035  ;;  %v2917_v21 = vld [vmem:[#allocation6 + $0x49] sm:$0xff]  ;;  %10687 = vst [vmem:[#allocation75_spill] sm:$0xff] %v8925_v45  ;;  %v3001_v26 = vmul.f32 %v2988_v50, %v8831_v18  ;;  %v2990_v45 = vld [vmem:[#allocation4 + $0x21] sm:$0xff] }
 0x4f5   : > { %10682 = vst [vmem:[#allocation70_spill] sm:$0xff] %v8904_v33  ;;  %v2567_v35 = vmul.f32 %v2917_v21, %v8310_v29  ;;  %v6191_v42 = vpack.i.bf16 %v2585_v19, %v2584_v54  ;;  %v2676_v19 = vld [vmem:[#allocation4 + $0xa] sm:$0xff] }
 0x4f6   : > { %v2689_v50 = vmul.f32 %v2676_v19, %v8761_v51  ;;  %v2989_v19 = vld [vmem:[#allocation4 + $0x19] sm:$0xff] }
 0x4f7   : > { %v6166_v16 = vpack.i.bf16 %v2567_v35, %v2566_v13  ;;  %v3000_v13 = vmul.f32 %v2987_v0, %v8797_v30 }
 0x4f9   : > { %v8912_v17 = vpop.permute.xlu2 %3063  ;;  %6152 = vrot.lane.b32.xlu2 %v6151_v32, %s6856_s18  ;;  %v8927_v32 = vld [vmem:[#allocation6 + $0x17] sm:$0xff]  ;;  %v6206_v35 = vpack.i.bf16 %v3001_v26, %v3000_v13  ;;  %v3195_v13 = vld [vmem:[#allocation4 + $0xf] sm:$0xff] }
 0x4fa   : > { %10684 = vst [vmem:[#allocation72_spill] sm:$0xff] %v8912_v17  ;;  %v8915_v2 = vpop.permute.xlu1 %3047  ;;  %6177 = vrot.lane.b32.xlu1 %v6176_v9, %s6856_s18  ;;  %v2768_v57 = vmul.f32 %v8536_v15, %v8927_v32 }
 0x4fb   : > { %10685 = vst [vmem:[#allocation73_spill] sm:$0xff] %v8915_v2 }
 0x4fc   : > { %v8922_v34 = vpop.permute.xlu0 %3055  ;;  %10688 = vst [vmem:[#allocation76_spill] sm:$0xff] %v8927_v32  ;;  %v6181_v54 = vpack.i.bf16 %v2768_v57, %v2767_v20  ;;  %v2586_v20 = vmul.f32 %v2573_v38, %v8240_v53  ;;  %v6058_v57 = vld [vmem:[%s10416_s8 + $0x88] sm:$0xff] }
 0x4fd   : > { %10686 = vst [vmem:[#allocation74_spill] sm:$0xff] %v8922_v34  ;;  %v3091_v32 = vld [vmem:[#allocation4 + $0xe] sm:$0xff]  ;;  %4362 = vmatpush.bf16.msrb.mxu0 %v6058_v57 }
 0x501   : > { %v8929_v17 = vpop.permute.xlu2 %3075  ;;  %6167 = vrot.lane.b32.xlu2 %v6166_v16, %s6856_s18  ;;  %v2574_v16 = vld [vmem:[#allocation4 + $0x19] sm:$0xff] }
 0x502   : > { %10689 = vst [vmem:[#allocation77_spill] sm:$0xff] %v8929_v17  ;;  %v8932_v9 = vpop.permute.xlu1 %3059  ;;  %6192 = vrot.lane.b32.xlu1 %v6191_v42, %s6858_s27  ;;  %v2675_v42 = vld [vmem:[#allocation4 + $0x2] sm:$0xff]  ;;  %v2587_v18 = vmul.f32 %v2574_v16, %v8283_v40  ;;  %v3196_v40 = vld [vmem:[#allocation4 + $0x17] sm:$0xff] }
 0x503   : > { %10690 = vst [vmem:[#allocation78_spill] sm:$0xff] %v8932_v9  ;;  %v2688_v30 = vmul.f32 %v2675_v42, %v8285_v6  ;;  %v6057_v16 = vld [vmem:[%s10416_s8 + $0x80] sm:$0xff]  ;;  %v2677_v6 = vld [vmem:[#allocation4 + $0x12] sm:$0xff] }
 0x504   : > { %v8940_v21 = vpop.permute.xlu0 %3067  ;;  %4363 = vmatpush.bf16.msrb.mxu0 %v6057_v16 }
 0x505   : > { %10691 = vst [vmem:[#allocation79_spill] sm:$0xff] %v8940_v21  ;;  %v6196_v26 = vpack.i.bf16 %v2689_v50, %v2688_v30  ;;  %v3104_v50 = vmul.f32 %v3091_v32, %v8883_v60  ;;  %v3003_v30 = vmul.f32 %v2990_v45, %v8808_v63  ;;  %v2576_v32 = vld [vmem:[#allocation4 + $0x29] sm:$0xff]  ;;  %v2781_v60 = vld [vmem:[#allocation4 + $0x17] sm:$0xff] }
 0x506   : > { %v2678_v45 = vld [vmem:[#allocation4 + $0x1a] sm:$0xff] }
 0x509   : > { %6182 = vrot.lane.b32.xlu2 %v6181_v54, %s6856_s18  ;;  %v6221_v54 = vpack.i.bf16 %v2587_v18, %v2586_v20  ;;  %v3002_v20 = vmul.f32 %v2989_v19, %v8819_v4 }
 0x50a   : > { %v8944_v24 = vpop.permute.xlu2 %3139  ;;  %v8946_v17 = vpop.permute.xlu1 %3071  ;;  %6207 = vrot.lane.b32.xlu1 %v6206_v35, %s6858_s27  ;;  %v3092_v35 = vld [vmem:[#allocation4 + $0x16] sm:$0xff] }
 0x50b   : > { %10692 = vst [vmem:[#allocation80_spill] sm:$0xff] %v8946_v17  ;;  %v3105_v38 = vmul.f32 %v3092_v35, %v8860_v5  ;;  %v2575_v35 = vld [vmem:[#allocation4 + $0x21] sm:$0xff] }
 0x50d   : > { %v8952_v0 = vpop.permute.xlu0 %3131  ;;  %v6211_v51 = vpack.i.bf16 %v3105_v38, %v3104_v50  ;;  %v2589_v38 = vmul.f32 %v2576_v32, %v8276_v59  ;;  %v2794_v50 = vmul.f32 %v2781_v60, %v8536_v15  ;;  %v2992_v32 = vld [vmem:[#allocation4 + $0x31] sm:$0xff] }
 0x50e   : > { %10693 = vst [vmem:[#allocation81_spill] sm:$0xff] %v8952_v0  ;;  %v3208_v53 = vmul.f32 %v3195_v13, %v8952_v0  ;;  %v2782_v0 = vld [vmem:[#allocation4 + $0x1f] sm:$0xff] }
 0x50f   : > { %v2795_v19 = vmul.f32 %v2782_v0, %v8545_v56  ;;  %v3197_v0 = vld [vmem:[#allocation4 + $0x1f] sm:$0xff] }
 0x510   : > { %v3210_v59 = vmul.f32 %v3197_v0, %v8944_v24 }
 0x511   : > { %6197 = vrot.lane.b32.xlu2 %v6196_v26, %s6856_s18 }
 0x512   : > { %v8963_v42 = vpop.permute.xlu2 %3147  ;;  %6222 = vrot.lane.b32.xlu1 %v6221_v54, %s6858_s27  ;;  %v6236_v54 = vpack.i.bf16 %v3003_v30, %v3002_v20  ;;  %v2691_v30 = vmul.f32 %v2678_v45, %v8298_v61  ;;  %v6231_v20 = vpack.i.bf16 %v2795_v19, %v2794_v50  ;;  %v3005_v50 = vmul.f32 %v2992_v32, %v8817_v3 }
 0x513   : > { %v8968_v18 = vpop.permute.xlu1 %3135 }
 0x514   : > { %v3209_v57 = vmul.f32 %v3196_v40, %v8968_v18  ;;  %v2690_v40 = vmul.f32 %v2677_v6, %v8330_v8  ;;  %v2991_v6 = vld [vmem:[#allocation4 + $0x29] sm:$0xff] }
 0x515   : > { %v8973_v26 = vpop.permute.xlu0 %3151 }
 0x516   : > { %v6216_v13 = vpack.i.bf16 %v3209_v57, %v3208_v53  ;;  %v2588_v53 = vmul.f32 %v2575_v35, %v8244_v43  ;;  %v6226_v56 = vpack.i.bf16 %v2691_v30, %v2690_v40  ;;  %v3198_v57 = vld [vmem:[#allocation4 + $0x27] sm:$0xff]  ;;  %v6012_v35 = vld [vmem:[%s10415_s7 + $0x38] sm:$0xff]  ;;  %v3004_v40 = vmul.f32 %v2991_v6, %v8828_v41  ;;  %v6011_v6 = vld [vmem:[%s10415_s7 + $0x30] sm:$0xff] }
 0x517   : > { %v3094_v43 = vld [vmem:[#allocation4 + $0x26] sm:$0xff]  ;;  %4636 = vmatpush.bf16.msrb.mxu1 %v6012_v35 }
 0x518   : > { %6217 = vrot.lane.b32.xlu0 %v6216_v13, %s6857_s24  ;;  %v6251_v13 = vpack.i.bf16 %v2589_v38, %v2588_v53  ;;  %v3107_v53 = vmul.f32 %v3094_v43, %v8899_v25  ;;  %v2680_v43 = vld [vmem:[#allocation4 + $0x2a] sm:$0xff]  ;;  %v3200_v25 = vld [vmem:[#allocation4 + $0x37] sm:$0xff] }
 0x519   : > { %6212 = vrot.lane.b32.xlu2 %v6211_v51, %s6856_s18 }
 0x51a   : > { %v8978_v5 = vpop.permute.xlu2 %3159  ;;  %6237 = vrot.lane.b32.xlu1 %v6236_v54, %s6858_s27  ;;  %v3093_v54 = vld [vmem:[#allocation4 + $0x1e] sm:$0xff] }
 0x51b   : > { %v8982_v16 = vpop.permute.xlu1 %3143  ;;  %v3106_v45 = vmul.f32 %v3093_v54, %v8904_v33  ;;  %v2577_v54 = vld [vmem:[#allocation4 + $0x31] sm:$0xff]  ;;  %4637 = vmatpush.bf16.msrb.mxu1 %v6011_v6 }
 0x51c   : > { %v3211_v15 = vmul.f32 %v3198_v57, %v8982_v16  ;;  %v2679_v57 = vld [vmem:[#allocation4 + $0x22] sm:$0xff]  ;;  %v3199_v33 = vld [vmem:[#allocation4 + $0x2f] sm:$0xff] }
 0x51d   : > { %v8988_v51 = vpop.permute.xlu0 %3163  ;;  %v6241_v0 = vpack.i.bf16 %v3107_v53, %v3106_v45  ;;  %v2692_v45 = vmul.f32 %v2679_v57, %v8336_v14 }
 0x51e   : > { %10694 = vst [vmem:[#allocation82_spill] sm:$0xff] %v8988_v51  ;;  %v6246_v30 = vpack.i.bf16 %v3211_v15, %v3210_v59  ;;  %v3299_v59 = vld [vmem:[#allocation4 + $0x10] sm:$0xff]  ;;  %v2578_v15 = vld [vmem:[#allocation4 + $0x39] sm:$0xff] }
 0x520   : > { %6232 = vrot.lane.b32.xlu0 %v6231_v20, %s6857_s24  ;;  %v2783_v20 = vld [vmem:[#allocation4 + $0x27] sm:$0xff] }
 0x521   : > { %6227 = vrot.lane.b32.xlu2 %v6226_v56, %s6856_s18  ;;  %v2784_v56 = vld [vmem:[#allocation4 + $0x2f] sm:$0xff]  ;;  %v2796_v35 = vmul.f32 %v2783_v20, %v8491_v39  ;;  %v3300_v39 = vld [vmem:[#allocation4 + $0x18] sm:$0xff]  ;;  %v2693_v20 = vmul.f32 %v2680_v43, %v8312_v46 }
 0x522   : > { %v8994_v60 = vpop.permute.xlu2 %3171  ;;  %6252 = vrot.lane.b32.xlu1 %v6251_v13, %s6858_s27  ;;  %v6266_v13 = vpack.i.bf16 %v3005_v50, %v3004_v40  ;;  %v2797_v32 = vmul.f32 %v2784_v56, %v8562_v1  ;;  %v6010_v50 = vld [vmem:[%s10415_s7 + $0x28] sm:$0xff]  ;;  %v3096_v1 = vld [vmem:[#allocation4 + $0x36] sm:$0xff]  ;;  %v3201_v46 = vld [vmem:[#allocation4 + $0x3f] sm:$0xff] }
 0x523   : > { %v9001_v19 = vpop.permute.xlu1 %3155  ;;  %v6256_v14 = vpack.i.bf16 %v2693_v20, %v2692_v45  ;;  %4638 = vmatpush.bf16.msrb.mxu1 %v6010_v50  ;;  %v2993_v43 = vld [vmem:[#allocation4 + $0x39] sm:$0xff]  ;;  %v3109_v45 = vmul.f32 %v3096_v1, %v8915_v2 }
 0x524   : > { %v2785_v1 = vld [vmem:[#allocation4 + $0x37] sm:$0xff] }
 0x525   : > { %v9005_v38 = vpop.permute.xlu0 %3175 }
 0x528   : > { %6247 = vrot.lane.b32.xlu0 %v6246_v30, %s6857_s24  ;;  %v2590_v30 = vmul.f32 %v2577_v54, %v8296_v23  ;;  %v6009_v23 = vld [vmem:[%s10415_s7 + $0x20] sm:$0xff] }
 0x529   : > { %6242 = vrot.lane.b32.xlu2 %v6241_v0, %s6856_s18  ;;  %v2591_v0 = vmul.f32 %v2578_v15, %v8255_v36  ;;  %v2994_v15 = vld [vmem:[#allocation4 + $0x41] sm:$0xff]  ;;  %4639 = vmatpush.bf16.msrb.mxu1 %v6009_v23  ;;  %v2681_v23 = vld [vmem:[#allocation4 + $0x32] sm:$0xff] }
 0x52a   : > { %6267 = vrot.lane.b32.xlu1 %v6266_v13, %s6858_s27  ;;  %v6261_v13 = vpack.i.bf16 %v2797_v32, %v2796_v35  ;;  %v3095_v35 = vld [vmem:[#allocation4 + $0x2e] sm:$0xff]  ;;  %v3212_v32 = vmul.f32 %v3199_v33, %v8963_v42  ;;  %v3006_v33 = vmul.f32 %v2993_v43, %v8854_v7  ;;  %v2579_v43 = vld [vmem:[#allocation4 + $0x41] sm:$0xff] }
 0x52b   : > { %v9017_v40 = vpop.permute.xlu2 %3235  ;;  %v9019_v53 = vpop.permute.xlu1 %3167  ;;  %v6281_v54 = vpack.i.bf16 %v2591_v0, %v2590_v30  ;;  %v2786_v0 = vld [vmem:[#allocation4 + $0x3f] sm:$0xff] }
 0x52c   : > { %10695 = vst [vmem:[#allocation83_spill] sm:$0xff] %v9017_v40  ;;  %v3312_v56 = vmul.f32 %v3299_v59, %v9017_v40  ;;  %v3213_v59 = vmul.f32 %v3200_v25, %v8973_v26  ;;  %v3108_v25 = vmul.f32 %v3095_v35, %v8881_v37  ;;  %v2580_v35 = vld [vmem:[#allocation4 + $0x49] sm:$0xff] }
 0x52d   : > { %v10717_v40 = vld [vmem:[#allocation39_spill] sm:$0xff] }
 0x52e   : > { %v9028_v57 = vpop.permute.xlu0 %3239  ;;  %v6276_v20 = vpack.i.bf16 %v3213_v59, %v3212_v32  ;;  %v2682_v32 = vld [vmem:[#allocation4 + $0x3a] sm:$0xff]  ;;  %v2798_v59 = vmul.f32 %v2785_v1, %v8534_v44  ;;  %v2593_v1 = vmul.f32 %v2580_v35, %v8310_v29  ;;  %v3098_v35 = vld [vmem:[#allocation4 + $0x46] sm:$0xff] }
 0x52f   : > { %10696 = vst [vmem:[#allocation84_spill] sm:$0xff] %v9028_v57  ;;  %v3313_v6 = vmul.f32 %v3300_v39, %v9028_v57  ;;  %v3007_v39 = vmul.f32 %v2994_v15, %v8852_v12  ;;  %v2799_v15 = vmul.f32 %v2786_v0, %v8556_v52  ;;  %v2695_v0 = vmul.f32 %v2682_v32, %v8347_v49  ;;  %v6056_v29 = vld [vmem:[%s10416_s8 + $0x78] sm:$0xff]  ;;  %v6047_v32 = vld [vmem:[%s10416_s8 + $0x30] sm:$0xff]  ;;  %v10718_v57 = vld [vmem:[#allocation66_spill] sm:$0xff] }
 0x530   : > { %6262 = vrot.lane.b32.xlu0 %v6261_v13, %s6857_s24  ;;  %v6271_v13 = vpack.i.bf16 %v3109_v45, %v3108_v25  ;;  %v3301_v45 = vld [vmem:[#allocation4 + $0x20] sm:$0xff]  ;;  %4313 = vmatpush.bf16.msrb.mxu3 %v6056_v29  ;;  %v6046_v29 = vld [vmem:[%s10416_s8 + $0x28] sm:$0xff] }
 0x531   : > { %v4014_v36 = vpack.c.bf16 %v3313_v6, %v3312_v56  ;;  %6257 = vrot.lane.b32.xlu2 %v6256_v14, %s6856_s18  ;;  %v6008_v14 = vld [vmem:[%s10415_s7 + $0x18] sm:$0xff]  ;;  %v6007_v6 = vld [vmem:[%s10415_s7 + $0x10] sm:$0xff] }
 0x532   : > { %6282 = vrot.lane.b32.xlu1 %v6281_v54, %s6858_s27  ;;  %4640 = vmatpush.bf16.msrb.mxu1 %v6008_v14  ;;  %v6296_v54 = vpack.i.bf16 %v3007_v39, %v3006_v33  ;;  %v2694_v14 = vmul.f32 %v2681_v23, %v8770_v11  ;;  %v6006_v39 = vld [vmem:[%s10415_s7 + $0x8] sm:$0xff]  ;;  %v6048_v23 = vld [vmem:[%s10416_s8 + $0x38] sm:$0xff] }
 0x533   : > { %v9040_v50 = vpop.permute.xlu2 %3247  ;;  %v9042_v30 = vpop.permute.xlu1 %3179  ;;  %5825 = vmatmul.msk.bf16.vlgmr.msrb.gmra.mxu0 %vm3932_vm5, %v4014_v36  ;;  %v3302_v36 = vld [vmem:[#allocation4 + $0x28] sm:$0xff]  ;;  %4270 = vmatpush.bf16.msrb.mxu2 %v6048_v23 }
 0x534   : > { %10697 = vst [vmem:[#allocation85_spill] sm:$0xff] %v9040_v50  ;;  %v3315_v25 = vmul.f32 %v3302_v36, %v9040_v50  ;;  %v6291_v36 = vpack.i.bf16 %v2799_v15, %v2798_v59  ;;  %v6286_v11 = vpack.i.bf16 %v2695_v0, %v2694_v14  ;;  %v2996_v59 = vld [vmem:[#allocation4 + $0x51] sm:$0xff]  ;;  %v3202_v15 = vld [vmem:[#allocation4 + $0x47] sm:$0xff]  ;;  %v3214_v14 = vmul.f32 %v3201_v46, %v9001_v19  ;;  %v10715_v50 = vld [vmem:[#allocation13_spill] sm:$0xff] }
 0x535   : > { %v3215_v0 = vmul.f32 %v3202_v15, %v8978_v5  ;;  %v6045_v15 = vld [vmem:[%s10416_s8 + $0x20] sm:$0xff] }
 0x536   : > { %v9051_v56 = vpop.permute.xlu0 %3259  ;;  %4641 = vmatpush.bf16.msrb.mxu1 %v6007_v6 }
 0x537   : > { %10698 = vst [vmem:[#allocation86_spill] sm:$0xff] %v9051_v56  ;;  %4271 = vmatpush.bf16.msrb.mxu2 %v6047_v32  ;;  %v6306_v23 = vpack.i.bf16 %v3215_v0, %v3214_v14  ;;  %v2581_v14 = vld [vmem:[#allocation4 + $0x51] sm:$0xff] }
 0x538   : > { %6277 = vrot.lane.b32.xlu0 %v6276_v20, %s6857_s24  ;;  %v2592_v20 = vmul.f32 %v2579_v43, %v8290_v47  ;;  %v6005_v47 = vld [vmem:[%s10415_s7] sm:$0xff] }
 0x539   : > { %6272 = vrot.lane.b32.xlu2 %v6271_v13, %s6856_s18 }
 0x53a   : > { %6297 = vrot.lane.b32.xlu1 %v6296_v54, %s6858_s27  ;;  %4642 = vmatpush.bf16.msrb.mxu1 %v6006_v39  ;;  %v6311_v43 = vpack.i.bf16 %v2593_v1, %v2592_v20  ;;  %v3111_v39 = vmul.f32 %v3098_v35, %v8922_v34  ;;  %v3009_v1 = vmul.f32 %v2996_v59, %v8865_v55  ;;  %v2684_v59 = vld [vmem:[#allocation4 + $0x4a] sm:$0xff] }
 0x53b   : > { %v9063_v33 = vpop.permute.xlu2 %3255  ;;  %4272 = vmatpush.bf16.msrb.mxu2 %v6046_v29 }
 0x53c   : > { %10699 = vst [vmem:[#allocation87_spill] sm:$0xff] %v9063_v33  ;;  %v9070_v13 = vpop.permute.xlu1 %3243 }
 0x53d   : > { %10700 = vst [vmem:[#allocation88_spill] sm:$0xff] %v9070_v13  ;;  %v3314_v54 = vmul.f32 %v3301_v45, %v9070_v13  ;;  %v3097_v45 = vld [vmem:[#allocation4 + $0x3e] sm:$0xff] }
 0x53e   : > { %v9077_v6 = vpop.permute.xlu0 %3271  ;;  %4643 = vmatpush.bf16.msrb.mxu1 %v6005_v47  ;;  %v2788_v47 = vld [vmem:[#allocation4 + $0x4f] sm:$0xff] }
 0x53f   : > { %10701 = vst [vmem:[#allocation89_spill] sm:$0xff] %v9077_v6  ;;  %v4017_v2 = vpack.c.bf16 %v3315_v25, %v3314_v54  ;;  %v2995_v25 = vld [vmem:[#allocation4 + $0x49] sm:$0xff]  ;;  %v2801_v0 = vmul.f32 %v2788_v47, %v8553_v31  ;;  %4273 = vmatpush.bf16.msrb.mxu2 %v6045_v15 }
 0x540   : > { %6292 = vrot.lane.b32.xlu0 %v6291_v36, %s6857_s24  ;;  %v3008_v46 = vmul.f32 %v2995_v25, %v8825_v48  ;;  %v2683_v25 = vld [vmem:[#allocation4 + $0x42] sm:$0xff] }
 0x541   : > { %6287 = vrot.lane.b32.xlu2 %v6286_v11, %s6856_s18  ;;  %v3110_v11 = vmul.f32 %v3097_v45, %v8895_v62  ;;  %v2582_v45 = vld [vmem:[#allocation4 + $0x59] sm:$0xff]  ;;  %v2696_v47 = vmul.f32 %v2683_v25, %v8320_v10  ;;  %v3232_v10 = vld [vmem:[#allocation6 + $0x68] sm:$0xff] }
 0x542   : > { %6312 = vrot.lane.b32.xlu1 %v6311_v43, %s6858_s27  ;;  %v2787_v43 = vld [vmem:[#allocation4 + $0x47] sm:$0xff]  ;;  %v6326_v32 = vpack.i.bf16 %v3009_v1, %v3008_v46  ;;  %v2697_v1 = vmul.f32 %v2684_v59, %v8777_v58  ;;  %v2595_v46 = vmul.f32 %v2582_v45, %v8307_v28  ;;  %v3204_v45 = vld [vmem:[#allocation4 + $0x57] sm:$0xff] }
 0x543   : > { %v9093_v20 = vpop.permute.xlu2 %3267  ;;  %5826 = vmatmul.msk.bf16.gmra.mxu0 %vm3932_vm5, %v4017_v2  ;;  %v6055_v2 = vld [vmem:[%s10416_s8 + $0x70] sm:$0xff]  ;;  %v6301_v35 = vpack.i.bf16 %v3111_v39, %v3110_v11  ;;  %v2800_v49 = vmul.f32 %v2787_v43, %v8577_v27  ;;  %v6044_v25 = vld [vmem:[%s10416_s8 + $0x18] sm:$0xff] }
 0x544   : > { %v9098_v54 = vpop.permute.xlu1 %3251  ;;  %4314 = vmatpush.bf16.msrb.mxu3 %v6055_v2  ;;  %v3303_v39 = vld [vmem:[#allocation4 + $0x30] sm:$0xff]  ;;  %v6054_v2 = vld [vmem:[%s10416_s8 + $0x68] sm:$0xff]  ;;  %v6316_v28 = vpack.i.bf16 %v2697_v1, %v2696_v47  ;;  %v6053_v1 = vld [vmem:[%s10416_s8 + $0x60] sm:$0xff]  ;;  %v3217_v47 = vmul.f32 %v3204_v45, %v9019_v53  ;;  %4274 = vmatpush.bf16.msrb.mxu2 %v6044_v25 }
 0x545   : > { %10702 = vst [vmem:[#allocation90_spill] sm:$0xff] %v9098_v54  ;;  %v3316_v43 = vmul.f32 %v3303_v39, %v9098_v54  ;;  %v2997_v39 = vld [vmem:[#allocation4 + $0x59] sm:$0xff] }
 0x546   : > { %v9102_v36 = vpop.permute.xlu0 %3283  ;;  %v10707_v25 = vld [vmem:[#allocation72_spill] sm:$0xff] }
 0x547   : > { %10703 = vst [vmem:[#allocation91_spill] sm:$0xff] %v9102_v36  ;;  %v10720_v36 = vld [vmem:[#allocation21_spill] sm:$0xff] }
 0x548   : > { %6307 = vrot.lane.b32.xlu0 %v6306_v23, %s6857_s24  ;;  %v2594_v23 = vmul.f32 %v2581_v14, %v8278_v22  ;;  %4315 = vmatpush.bf16.msrb.mxu3 %v6054_v2  ;;  %v3099_v14 = vld [vmem:[#allocation4 + $0x4e] sm:$0xff]  ;;  %v3100_v2 = vld [vmem:[#allocation4 + $0x56] sm:$0xff] }
 0x549   : > { %6302 = vrot.lane.b32.xlu2 %v6301_v35, %s6856_s18  ;;  %v6321_v35 = vpack.i.bf16 %v2801_v0, %v2800_v49  ;;  %v3203_v49 = vld [vmem:[#allocation4 + $0x4f] sm:$0xff]  ;;  %v3113_v34 = vmul.f32 %v3100_v2, %v10707_v25 }
 0x54a   : > { %6327 = vrot.lane.b32.xlu1 %v6326_v32, %s6858_s27  ;;  %v9130_v32 = vld [vmem:[#allocation4 + $0x38] sm:$0xff]  ;;  %v6341_v15 = vpack.i.bf16 %v2595_v46, %v2594_v23  ;;  %v6043_v46 = vld [vmem:[%s10416_s8 + $0x10] sm:$0xff]  ;;  %v2998_v23 = vld [vmem:[#allocation4 + $0x61] sm:$0xff]  ;;  %v3216_v45 = vmul.f32 %v3203_v49, %v8988_v51 }
 0x54b   : > { %v9119_v11 = vpop.permute.xlu2 %3279  ;;  %10705 = vst [vmem:[#allocation93_spill] sm:$0xff] %v9130_v32  ;;  %v3317_v22 = vmul.f32 %v9063_v33, %v9130_v32  ;;  %4275 = vmatpush.bf16.msrb.mxu2 %v6043_v46  ;;  %v6042_v2 = vld [vmem:[%s10416_s8 + $0x8] sm:$0xff]  ;;  %v2685_v25 = vld [vmem:[#allocation4 + $0x52] sm:$0xff] }
 0x54c   : > { %v9123_v29 = vpop.permute.xlu1 %3263  ;;  %4316 = vmatpush.bf16.msrb.mxu3 %v6053_v1  ;;  %v9159_v62 = vmul.f32 %v9119_v11, %v3232_v10  ;;  %v6052_v10 = vld [vmem:[%s10416_s8 + $0x58] sm:$0xff]  ;;  %v3306_v49 = vld [vmem:[#allocation4 + $0x48] sm:$0xff] }
 0x54d   : > { %10704 = vst [vmem:[#allocation92_spill] sm:$0xff] %v9123_v29  ;;  %v4020_v0 = vpack.c.bf16 %v3317_v22, %v3316_v43  ;;  %v2816_v43 = vld [vmem:[#allocation6 + $0x60] sm:$0xff]  ;;  %v2789_v46 = vld [vmem:[#allocation4 + $0x57] sm:$0xff] }
 0x54e   : > { %v9132_v59 = vpop.permute.xlu0 %6157  ;;  %10708 = vst [vmem:[#allocation94_spill] sm:$0xff] %v9159_v62  ;;  %v6041_v62 = vld [vmem:[%s10416_s8] sm:$0xff] }
 0x54f   : > { %4276 = vmatpush.bf16.msrb.mxu2 %v6042_v2  ;;  %v3319_v2 = vmul.f32 %v3306_v49, %v9123_v29  ;;  %v6051_v49 = vld [vmem:[%s10416_s8 + $0x50] sm:$0xff] }
 0x550   : > { %6322 = vrot.lane.b32.xlu0 %v6321_v35, %s6857_s24  ;;  %v3112_v35 = vmul.f32 %v3099_v14, %v8932_v9  ;;  %v10710_v9 = vld [vmem:[#allocation58_spill] sm:$0xff]  ;;  %4317 = vmatpush.bf16.msrb.mxu3 %v6052_v10 }
 0x551   : > { %6317 = vrot.lane.b32.xlu2 %v6316_v28, %s6856_s18  ;;  %v10706_v28 = vld [vmem:[#allocation60_spill] sm:$0xff]  ;;  %v3011_v37 = vmul.f32 %v2998_v23, %v10710_v9 }
 0x552   : > { %6342 = vrot.lane.b32.xlu1 %v6341_v15, %s6858_s27  ;;  %v3010_v22 = vmul.f32 %v2997_v39, %v10706_v28  ;;  %v2790_v39 = vld [vmem:[#allocation4 + $0x5f] sm:$0xff]  ;;  %v6331_v33 = vpack.i.bf16 %v3113_v34, %v3112_v35  ;;  %v10712_v34 = vld [vmem:[#allocation44_spill] sm:$0xff] }
 0x553   : > { %v9150_v58 = vpop.permute.xlu2 %6152  ;;  %5827 = vmatmul.msk.bf16.gmra.mxu0 %vm3932_vm5, %v4020_v0  ;;  %v6336_v0 = vpack.i.bf16 %v3217_v47, %v3216_v45  ;;  %v2686_v47 = vld [vmem:[#allocation4 + $0x5a] sm:$0xff]  ;;  %v2999_v45 = vld [vmem:[#allocation4 + $0x69] sm:$0xff]  ;;  %v2803_v35 = vmul.f32 %v2790_v39, %v10712_v34  ;;  %v2802_v39 = vmul.f32 %v2789_v46, %v10717_v40  ;;  %4277 = vmatpush.bf16.msrb.mxu2 %v6041_v62 }
 0x554   : > { %v9155_v15 = vpop.permute.xlu1 %3275  ;;  %v6356_v23 = vpack.i.bf16 %v3011_v37, %v3010_v22  ;;  %v2583_v37 = vld [vmem:[#allocation4 + $0x61] sm:$0xff]  ;;  %v10713_v22 = vld [vmem:[#allocation28_spill] sm:$0xff]  ;;  %v3012_v32 = vmul.f32 %v2999_v45, %v10718_v57  ;;  %v10719_v34 = vld [vmem:[#allocation27_spill] sm:$0xff]  ;;  %4318 = vmatpush.bf16.msrb.mxu3 %v6051_v49 }
 0x555   : > { %v9162_v14 = vmul.f32 %v9155_v15, %v2816_v43  ;;  %v2376_v43 = vld [vmem:[#allocation6] sm:$0xff]  ;;  %v2596_v51 = vmul.f32 %v2583_v37, %v10720_v36 }
 0x556   : > { %v9165_v1 = vpop.permute.xlu0 %6172  ;;  %v2454_v13 = vmul.f32 %v10715_v50, %v2376_v43  ;;  %v2791_v49 = vld [vmem:[#allocation4 + $0x67] sm:$0xff] }
 0x557   : > { %10709 = vst [vmem:[#allocation95_spill] sm:$0xff] %v9162_v14  ;;  %v2377_v14 = vld [vmem:[#allocation6 + $0x8] sm:$0xff] }
 0x558   : > { %10711 = vst [vmem:[#allocation96_spill] sm:$0xff] %v9165_v1  ;;  %6337 = vrot.lane.b32.xlu0 %v6336_v0, %s6857_s24  ;;  %v2698_v0 = vmul.f32 %v2685_v25, %v10713_v22  ;;  %v2455_v28 = vmul.f32 %v10719_v34, %v2377_v14  ;;  %v6351_v25 = vpack.i.bf16 %v2803_v35, %v2802_v39  ;;  %v9192_v22 = vld [vmem:[#allocation4 + $0x40] sm:$0xff] }
 0x559   : > { %6332 = vrot.lane.b32.xlu2 %v6331_v33, %s6856_s18  ;;  %v10716_v33 = vld [vmem:[#allocation26_spill] sm:$0xff]  ;;  %v6371_v14 = vpack.i.bf16 %v3012_v32, %v2596_v51 }
 0x55a   : > { %6357 = vrot.lane.b32.xlu1 %v6356_v23, %s6858_s27  ;;  %v2699_v10 = vmul.f32 %v2686_v47, %v10716_v33  ;;  %v3318_v47 = vmul.f32 %v9051_v56, %v9192_v22  ;;  %v3205_v35 = vld [vmem:[#allocation4 + $0x5f] sm:$0xff]  ;;  %v9225_v33 = vld [vmem:[#allocation6 + $0x10] sm:$0xff] }
 0x55b   : > { %v9183_v54 = vpop.permute.xlu2 %6167  ;;  %10724 = vst [vmem:[#allocation27_spill] sm:$0xff] %v9225_v33 }
 0x55c   : > { %10714 = vst [vmem:[#allocation97_spill] sm:$0xff] %v9183_v54  ;;  %v6148_v23 = vpop.permute.xlu1 %6147  ;;  %v6346_v43 = vpack.i.bf16 %v2699_v10, %v2698_v0  ;;  %v3206_v54 = vld [vmem:[#allocation4 + $0x67] sm:$0xff]  ;;  %v4023_v37 = vpack.c.bf16 %v3319_v2, %v3318_v47  ;;  %v2599_v0 = vld [vmem:[#allocation6 + $0x12] sm:$0xff]  ;;  %v3218_v10 = vmul.f32 %v3205_v35, %v8994_v60 }
 0x55d   : > { %v6150_v1 = vunpack.i.h.bf16 %v6148_v23  ;;  %v6149_v9 = vunpack.i.l.bf16 %v6148_v23  ;;  %v3102_v23 = vld [vmem:[#allocation4 + $0x66] sm:$0xff] }
 0x55e   : > { %v9201_v36 = vpop.permute.xlu0 %6187  ;;  %v3115_v51 = vmul.f32 %v3102_v23, %v8946_v17  ;;  %v3207_v23 = vld [vmem:[#allocation4 + $0x6f] sm:$0xff] }
 0x55f   : > { %v3533_v46 = vsel %vm2362_vm12, %v2454_v13, %v6149_v9  ;;  %v3534_v45 = vsel %vm2362_vm12, %v2455_v28, %v6150_v1  ;;  %10721 = vst [vmem:[#allocation13_spill] sm:$0xff] %v9201_v36  ;;  %v3101_v9 = vld [vmem:[#allocation4 + $0x5e] sm:$0xff]  ;;  %v3219_v13 = vmul.f32 %v3206_v54, %v9005_v38  ;;  %v6189_v32 = vunpack.i.l.bf16 %v9201_v36  ;;  %v6050_v54 = vld [vmem:[%s10416_s8 + $0x48] sm:$0xff]  ;;  %v10731_v36 = vld [vmem:[#allocation36_spill] sm:$0xff] }
 0x560   : > { %6352 = vrot.lane.b32.xlu0 %v6351_v25, %s6857_s24  ;;  %v3585_v62 = vpack.c.bf16 %v3534_v45, %v3533_v46  ;;  %v2600_v28 = vld [vmem:[#allocation6 + $0x1a] sm:$0xff]  ;;  %v2664_v25 = vmul.f32 %v8330_v8, %v2599_v0  ;;  %4319 = vmatpush.bf16.msrb.mxu3 %v6050_v54  ;;  %v2687_v0 = vld [vmem:[#allocation4 + $0x62] sm:$0xff] }
 0x561   : > { %6347 = vrot.lane.b32.xlu2 %v6346_v43, %s6856_s18  ;;  %v3114_v43 = vmul.f32 %v3101_v9, %v8940_v21  ;;  %v2665_v47 = vmul.f32 %v8298_v61, %v2600_v28  ;;  %v6366_v46 = vpack.i.bf16 %v3219_v13, %v3218_v10  ;;  %v9227_v8 = vld [vmem:[#allocation6 + $0x18] sm:$0xff]  ;;  %v6155_v9 = vunpack.i.h.bf16 %v9150_v58  ;;  %v6049_v28 = vld [vmem:[%s10416_s8 + $0x40] sm:$0xff] }
 0x562   : > { %4644 = vmatmul.bf16.vlgmr.msrb.gmra.mxu1 %v3585_v62  ;;  %6372 = vrot.lane.b32.xlu1 %v6371_v14, %s6858_s27  ;;  %v2597_v62 = vld [vmem:[#allocation6 + $0x2] sm:$0xff]  ;;  %v6154_v13 = vunpack.i.l.bf16 %v9150_v58  ;;  %v3220_v10 = vmul.f32 %v3207_v23, %v9042_v30  ;;  %v9245_v61 = vld [vmem:[#allocation4 + $0x58] sm:$0xff] }
 0x563   : > { %v6183_v1 = vpop.permute.xlu2 %6182  ;;  %5828 = vmatmul.msk.bf16.gmra.mxu0 %vm3932_vm5, %v4023_v37  ;;  %v6361_v14 = vpack.i.bf16 %v3115_v51, %v3114_v43  ;;  %v9223_v35 = vsel %vm2362_vm12, %v2665_v47, %v6189_v32  ;;  %v3103_v37 = vld [vmem:[#allocation4 + $0x6e] sm:$0xff]  ;;  %v10727_v54 = vld [vmem:[#allocation50_spill] sm:$0xff]  ;;  %v10729_v43 = vld [vmem:[#allocation53_spill] sm:$0xff] }
 0x564   : > { %v6185_v39 = vunpack.i.h.bf16 %v6183_v1  ;;  %v9211_v2 = vpop.permute.xlu1 %6162  ;;  %10723 = vst [vmem:[#allocation66_spill] sm:$0xff] %v9223_v35  ;;  %v10725_v51 = vld [vmem:[#allocation35_spill] sm:$0xff]  ;;  %v2662_v47 = vmul.f32 %v10729_v43, %v2597_v62  ;;  %v10730_v58 = vld [vmem:[#allocation77_spill] sm:$0xff]  ;;  %v6184_v17 = vunpack.i.l.bf16 %v6183_v1  ;;  %4320 = vmatpush.bf16.msrb.mxu3 %v6049_v28  ;;  %v10734_v62 = vld [vmem:[#allocation42_spill] sm:$0xff]  ;;  %v3321_v1 = vmul.f32 %v9077_v6, %v9245_v61 }
 0x565   : > { %v2804_v32 = vmul.f32 %v2791_v49, %v10725_v51  ;;  %v2456_v49 = vmul.f32 %v9225_v33, %v10731_v36  ;;  %v10733_v35 = vld [vmem:[#allocation25_spill] sm:$0xff] }
 0x566   : > { %v9220_v45 = vsel %vm2362_vm12, %v2664_v25, %v6185_v39  ;;  %v10726_v39 = vld [vmem:[#allocation51_spill] sm:$0xff]  ;;  %v10735_v43 = vld [vmem:[#allocation61_spill] sm:$0xff] }
 0x567   : > { %10722 = vst [vmem:[#allocation39_spill] sm:$0xff] %v9220_v45  ;;  %v10728_v25 = vpack.i.bf16 %v10726_v39, %v10727_v54  ;;  %v10732_v45 = vld [vmem:[#allocation23_spill] sm:$0xff]  ;;  %v3185_v56 = vmul.f32 %v8982_v16, %v10735_v43  ;;  %v3535_v28 = vsel %vm2362_vm12, %v2456_v49, %v6154_v13  ;;  %v6020_v6 = vld [vmem:[%s10415_s7 + $0x78] sm:$0xff] }
 0x568   : > { %6367 = vrot.lane.b32.xlu0 %v6366_v46, %s6857_s24  ;;  %v2598_v46 = vld [vmem:[#allocation6 + $0xa] sm:$0xff]  ;;  %v2457_v23 = vmul.f32 %v9227_v8, %v10732_v45  ;;  %v6028_v13 = vld [vmem:[%s10415_s7 + $0xb8] sm:$0xff]  ;;  %4679 = vmatpush.bf16.msra.mxu2 %v6020_v6 }
 0x569   : > { %6362 = vrot.lane.b32.xlu2 %v6361_v14, %s6856_s18  ;;  %v3116_v14 = vmul.f32 %v3103_v37, %v10730_v58  ;;  %v2663_v39 = vmul.f32 %v10733_v35, %v2598_v46  ;;  %v9255_v54 = vld [vmem:[#allocation4 + $0x50] sm:$0xff]  ;;  %v10736_v46 = vld [vmem:[#allocation62_spill] sm:$0xff]  ;;  %4722 = vmatpush.bf16.msra.mxu3 %v6028_v13 }
 0x56a   : > { %6387 = vrot.lane.b32.xlu1 %v10728_v25, %s6856_s18  ;;  %v2700_v25 = vmul.f32 %v2687_v0, %v10734_v62  ;;  %v3320_v58 = vmul.f32 %v9093_v20, %v9255_v54  ;;  %v3536_v35 = vsel %vm2362_vm12, %v2457_v23, %v6155_v9  ;;  %v3184_v0 = vmul.f32 %v8944_v24, %v10736_v46  ;;  %v10738_v49 = vld [vmem:[#allocation76_spill] sm:$0xff]  ;;  %v10740_v6 = vld [vmem:[#allocation75_spill] sm:$0xff] }
 0x56b   : > { %v9248_v21 = vpop.permute.xlu2 %6197  ;;  %v6381_v62 = vpack.i.bf16 %v3220_v10, %v2804_v32  ;;  %v9272_v16 = vsel %vm2362_vm12, %v2663_v39, %v6184_v17  ;;  %v3590_v32 = vpack.c.bf16 %v3536_v35, %v3535_v28  ;;  %v2468_v17 = vld [vmem:[#allocation4 + $0x8] sm:$0xff]  ;;  %v2467_v10 = vld [vmem:[#allocation4] sm:$0xff]  ;;  %v3183_v23 = vmul.f32 %v8968_v18, %v10738_v49  ;;  %v2707_v39 = vld [vmem:[#allocation6 + $0x37] sm:$0xff]  ;;  %v6203_v28 = vpop.permute.xlu0 %6202 }
 0x56c   : > { %v9262_v37 = vpop.permute.xlu1 %6177  ;;  %v6376_v33 = vpack.i.bf16 %v3116_v14, %v2700_v25  ;;  %v6401_v9 = vpack.i.bf16 %v3185_v56, %v3184_v0  ;;  %v10737_v14 = vld [vmem:[#allocation68_spill] sm:$0xff]  ;;  %v10739_v56 = vld [vmem:[#allocation55_spill] sm:$0xff]  ;;  %v3187_v18 = vmul.f32 %v8973_v26, %v2707_v39  ;;  %v2772_v0 = vmul.f32 %v8534_v44, %v2707_v39 }
 0x56d   : > { %v6180_v29 = vunpack.i.h.bf16 %v9262_v37  ;;  %v6199_v13 = vunpack.i.l.bf16 %v9248_v21  ;;  %v6036_v26 = vld [vmem:[%s10415_s7 + $0xf8] sm:$0xff]  ;;  %v9310_v44 = vld [vmem:[#allocation6 + $0x28] sm:$0xff]  ;;  %v6160_v39 = vunpack.i.h.bf16 %v9132_v59 }
 0x56e   : > { %4765 = vmatpush.bf16.msra.mxu0 %v6036_v26 }
 0x56f   : > { %v9275_v43 = vsel %vm2362_vm12, %v2662_v47, %v6180_v29  ;;  %v2976_v29 = vmul.f32 %v8819_v4, %v10737_v14  ;;  %v4026_v47 = vpack.c.bf16 %v3321_v1, %v3320_v58  ;;  %v2481_v4 = vmul.f32 %v2468_v17, %v10719_v34  ;;  %v10741_v58 = vld [vmem:[#allocation81_spill] sm:$0xff] }
 0x570   : > { %v3586_v24 = vpack.c.bf16 %v9272_v16, %v9275_v43  ;;  %6382 = vrot.lane.b32.xlu0 %v6381_v62, %s6857_s24  ;;  %v2977_v62 = vmul.f32 %v8808_v63, %v10739_v56  ;;  %v3182_v1 = vmul.f32 %v10741_v58, %v10740_v6  ;;  %v6200_v14 = vunpack.i.h.bf16 %v9248_v21 }
 0x571   : > { %6377 = vrot.lane.b32.xlu2 %v6376_v33, %s6856_s18  ;;  %v2480_v33 = vmul.f32 %v2467_v10, %v10715_v50  ;;  %v6205_v34 = vunpack.i.h.bf16 %v6203_v28  ;;  %v6204_v50 = vunpack.i.l.bf16 %v6203_v28  ;;  %v6159_v56 = vunpack.i.l.bf16 %v9132_v59  ;;  %v2709_v59 = vld [vmem:[#allocation6 + $0x47] sm:$0xff] }
 0x572   : > { %4649 = vmatmul.bf16.gmra.mxu1 %v3590_v32  ;;  %6402 = vrot.lane.b32.xlu1 %v6401_v9, %s6856_s18  ;;  %v6396_v46 = vpack.i.bf16 %v2977_v62, %v2976_v29  ;;  %v6391_v32 = vpack.i.bf16 %v3183_v23, %v3182_v1  ;;  %v6416_v29 = vpack.i.bf16 %v2772_v0, %v3187_v18  ;;  %v2706_v23 = vld [vmem:[#allocation6 + $0x2f] sm:$0xff] }
 0x573   : > { %v9294_v25 = vpop.permute.xlu2 %6212  ;;  %5829 = vmatmul.msk.bf16.gmra.mxu0 %vm3932_vm5, %v4026_v47  ;;  %v9312_v47 = vld [vmem:[#allocation6 + $0x20] sm:$0xff]  ;;  %v3186_v6 = vmul.f32 %v8963_v42, %v2706_v23  ;;  %v6754_v1 = vld [vmem:[#allocation6 + $0x29] sm:$0xff] }
 0x574   : > { %v6193_v35 = vpop.permute.xlu1 %6192  ;;  %v2978_v18 = vmul.f32 %v6754_v1, %v8828_v41  ;;  %v10743_v0 = vld [vmem:[#allocation19_spill] sm:$0xff]  ;;  %v9336_v42 = vld [vmem:[#allocation4 + $0x60] sm:$0xff] }
 0x575   : > { %v6195_v63 = vunpack.i.h.bf16 %v6193_v35  ;;  %v6194_v9 = vunpack.i.l.bf16 %v6193_v35  ;;  %v10742_v35 = vld [vmem:[#allocation32_spill] sm:$0xff] }
 0x576   : > { %v6019_v41 = vld [vmem:[%s10415_s7 + $0x70] sm:$0xff] }
 0x577   : > { %v3934_v17 = vsel %vm3932_vm5, %v2481_v4, %v6195_v63  ;;  %v3933_v10 = vsel %vm3932_vm5, %v2480_v33, %v6194_v9  ;;  %v6040_v33 = vld [vmem:[%s10415_s7 + $0x118] sm:$0xff]  ;;  %v2459_v63 = vmul.f32 %v9310_v44, %v10743_v0  ;;  %v10744_v9 = vld [vmem:[#allocation63_spill] sm:$0xff]  ;;  %4680 = vmatpush.bf16.msra.mxu2 %v6019_v41 }
 0x578   : > { %6397 = vrot.lane.b32.xlu0 %v6396_v46, %s6856_s18  ;;  %v3946_v21 = vsel %vm2362_vm12, %v3933_v10, %v6199_v13  ;;  %v3947_v49 = vsel %vm2362_vm12, %v3934_v17, %v6200_v14  ;;  %v2458_v46 = vmul.f32 %v9312_v47, %v10742_v35  ;;  %4812 = vmatpush.bf16.msra.mxu1 %v6040_v33  ;;  %v2710_v1 = vld [vmem:[#allocation6 + $0x4f] sm:$0xff] }
 0x579   : > { %6392 = vrot.lane.b32.xlu2 %v6391_v32, %s6856_s18  ;;  %v3960_v62 = vsel %vm3959_vm13, %v3946_v21, %v6204_v50  ;;  %v3961_v4 = vsel %vm3959_vm13, %v3947_v49, %v6205_v34  ;;  %v2979_v32 = vmul.f32 %v8817_v3, %v10744_v9  ;;  %v3189_v14 = vmul.f32 %v8978_v5, %v2709_v59  ;;  %v10745_v34 = vld [vmem:[#allocation30_spill] sm:$0xff]  ;;  %v2469_v41 = vld [vmem:[#allocation4 + $0x10] sm:$0xff] }
 0x57a   : > { %6417 = vrot.lane.b32.xlu1 %v6416_v29, %s6856_s18  ;;  %v4012_v58 = vpack.c.bf16 %v3961_v4, %v3960_v62  ;;  %v2771_v50 = vmul.f32 %v10745_v34, %v2706_v23  ;;  %v3322_v17 = vmul.f32 %v9155_v15, %v9336_v42  ;;  %v3537_v10 = vsel %vm2362_vm12, %v2458_v46, %v6159_v56  ;;  %v9347_v3 = vld [vmem:[#allocation4 + $0x68] sm:$0xff]  ;;  %v6027_v23 = vld [vmem:[%s10415_s7 + $0xb0] sm:$0xff]  ;;  %v2708_v56 = vld [vmem:[#allocation6 + $0x3f] sm:$0xff] }
 0x57b   : > { %v9328_v28 = vpop.permute.xlu2 %6227  ;;  %v3538_v26 = vsel %vm2362_vm12, %v2459_v63, %v6160_v39  ;;  %v6411_v29 = vpack.i.bf16 %v3186_v6, %v2979_v32  ;;  %v2774_v5 = vmul.f32 %v8577_v27, %v2709_v59  ;;  %v3323_v49 = vmul.f32 %v9119_v11, %v9347_v3  ;;  %4723 = vmatpush.bf16.msra.mxu3 %v6027_v23  ;;  %v2883_v4 = vld [vmem:[#allocation4 + $0x8] sm:$0xff]  ;;  %v6755_v11 = vld [vmem:[#allocation6 + $0x39] sm:$0xff]  ;;  %v9366_v63 = vld [vmem:[#allocation6 + $0x30] sm:$0xff] }
 0x57c   : > { %v6208_v13 = vpop.permute.xlu1 %6207  ;;  %4278 = vmatmul.bf16.vlgmr.msrb.gmra.mxu2 %v4012_v58  ;;  %v6406_v21 = vpack.i.bf16 %v2978_v18, %v2771_v50  ;;  %v3595_v15 = vpack.c.bf16 %v3538_v26, %v3537_v10  ;;  %v3188_v27 = vmul.f32 %v9001_v19, %v2708_v56  ;;  %v2980_v33 = vmul.f32 %v6755_v11, %v8854_v7  ;;  %v2711_v6 = vld [vmem:[#allocation6 + $0x57] sm:$0xff]  ;;  %v10746_v18 = vld [vmem:[#allocation71_spill] sm:$0xff] }
 0x57d   : > { %v6431_v62 = vpack.i.bf16 %v2774_v5, %v3189_v14  ;;  %v4029_v39 = vpack.c.bf16 %v3323_v49, %v3322_v17  ;;  %v2981_v59 = vmul.f32 %v8852_v12, %v10746_v18  ;;  %v3191_v46 = vmul.f32 %v9019_v53, %v2711_v6  ;;  %v9371_v32 = vld [vmem:[#allocation6 + $0x38] sm:$0xff] }
 0x57e   : > { %v2773_v9 = vmul.f32 %v8556_v52, %v2708_v56  ;;  %v6210_v7 = vunpack.i.h.bf16 %v6208_v13  ;;  %v6209_v14 = vunpack.i.l.bf16 %v6208_v13  ;;  %v10747_v34 = vld [vmem:[#allocation48_spill] sm:$0xff]  ;;  %v2776_v10 = vmul.f32 %v10717_v40, %v2711_v6  ;;  %v10749_v5 = vld [vmem:[#allocation33_spill] sm:$0xff]  ;;  %v6756_v56 = vld [vmem:[#allocation6 + $0x49] sm:$0xff] }
 0x57f   : > { %v2896_v50 = vmul.f32 %v2883_v4, %v10747_v34  ;;  %v6426_v17 = vpack.i.bf16 %v3188_v27, %v2981_v59  ;;  %v10748_v26 = vld [vmem:[#allocation52_spill] sm:$0xff]  ;;  %v2775_v53 = vmul.f32 %v8553_v31, %v2710_v1  ;;  %v6165_v23 = vunpack.i.h.bf16 %v9211_v2  ;;  %v10750_v40 = vld [vmem:[#allocation45_spill] sm:$0xff]  ;;  %v6018_v31 = vld [vmem:[%s10415_s7 + $0x68] sm:$0xff] }
 0x580   : > { %6412 = vrot.lane.b32.xlu0 %v6411_v29, %s6856_s18  ;;  %v2897_v12 = vmul.f32 %v10748_v26, %v2469_v41  ;;  %v6421_v29 = vpack.i.bf16 %v2980_v33, %v2773_v9  ;;  %v6035_v52 = vld [vmem:[%s10415_s7 + $0xf0] sm:$0xff]  ;;  %v6446_v49 = vpack.i.bf16 %v2776_v10, %v3191_v46  ;;  %v9395_v33 = vld [vmem:[#allocation6 + $0x67] sm:$0xff]  ;;  %v6215_v59 = vunpack.i.h.bf16 %v9294_v25  ;;  %4681 = vmatpush.bf16.msra.mxu2 %v6018_v31  ;;  %v2470_v10 = vld [vmem:[#allocation4 + $0x18] sm:$0xff] }
 0x581   : > { %6407 = vrot.lane.b32.xlu2 %v6406_v21, %s6856_s18  ;;  %v2460_v21 = vmul.f32 %v9366_v63, %v10749_v5  ;;  %v3311_v13 = vld [vmem:[#allocation4 + $0x70] sm:$0xff]  ;;  %v3973_v4 = vsel %vm3932_vm5, %v2896_v50, %v6209_v14  ;;  %4766 = vmatpush.bf16.msra.mxu0 %v6035_v52  ;;  %v10751_v6 = vld [vmem:[#allocation82_spill] sm:$0xff]  ;;  %v6214_v46 = vunpack.i.l.bf16 %v9294_v25  ;;  %v3193_v9 = vmul.f32 %v9005_v38, %v9395_v33 }
 0x582   : > { %6432 = vrot.lane.b32.xlu1 %v6431_v62, %s6856_s18  ;;  %4654 = vmatmul.bf16.gmra.mxu1 %v3595_v15  ;;  %v6164_v62 = vunpack.i.l.bf16 %v9211_v2  ;;  %v2461_v15 = vmul.f32 %v9371_v32, %v10750_v40  ;;  %v3974_v27 = vsel %vm3932_vm5, %v2897_v12, %v6210_v7  ;;  %v6757_v2 = vld [vmem:[#allocation6 + $0x51] sm:$0xff]  ;;  %v3190_v18 = vmul.f32 %v10751_v6, %v2710_v1  ;;  %v6026_v38 = vld [vmem:[%s10415_s7 + $0xa8] sm:$0xff] }
 0x583   : > { %v9360_v58 = vpop.permute.xlu2 %6242  ;;  %5830 = vmatmul.msk.bf16.gmra.mxu0 %vm3932_vm5, %v4029_v39  ;;  %v2982_v39 = vmul.f32 %v6756_v56, %v8825_v48  ;;  %v2983_v11 = vmul.f32 %v6757_v2, %v8865_v55  ;;  %v10752_v7 = vld [vmem:[#allocation91_spill] sm:$0xff]  ;;  %v3986_v1 = vsel %vm2362_vm12, %v3973_v4, %v6214_v46  ;;  %v3987_v25 = vsel %vm2362_vm12, %v3974_v27, %v6215_v59 }
 0x584   : > { %v9368_v19 = vpop.permute.xlu1 %6222  ;;  %v3324_v14 = vmul.f32 %v3311_v13, %v10752_v7  ;;  %v3540_v52 = vsel %vm2362_vm12, %v2461_v15, %v6165_v23  ;;  %4724 = vmatpush.bf16.msra.mxu3 %v6026_v38  ;;  %v2482_v23 = vmul.f32 %v2469_v41, %v10731_v36  ;;  %v10753_v41 = vld [vmem:[#allocation60_spill] sm:$0xff] }
 0x585   : > { %v6225_v13 = vunpack.i.h.bf16 %v9368_v19  ;;  %v6224_v31 = vunpack.i.l.bf16 %v9368_v19  ;;  %v6441_v4 = vpack.i.bf16 %v3190_v18, %v2983_v11  ;;  %v6229_v11 = vunpack.i.l.bf16 %v9328_v28 }
 0x586   : > { %v4032_v19 = vpack.c.bf16 %v3324_v14, %v3324_v14  ;;  %v2886_v14 = vld [vmem:[#allocation4 + $0x20] sm:$0xff] }
 0x588   : > { %6427 = vrot.lane.b32.xlu0 %v6426_v17, %s6856_s18 }
 0x589   : > { %6422 = vrot.lane.b32.xlu2 %v6421_v29, %s6856_s18  ;;  %v3539_v29 = vsel %vm2362_vm12, %v2460_v21, %v6164_v62  ;;  %v2483_v21 = vmul.f32 %v2470_v10, %v10732_v45  ;;  %v6436_v62 = vpack.i.bf16 %v2982_v39, %v2775_v53  ;;  %v6758_v45 = vld [vmem:[#allocation6 + $0x59] sm:$0xff] }
 0x58a   : > { %6447 = vrot.lane.b32.xlu1 %v6446_v49, %s6856_s18  ;;  %v6218_v48 = vpop.permute.xlu0 %6217  ;;  %v2712_v49 = vld [vmem:[#allocation6 + $0x5f] sm:$0xff]  ;;  %v3600_v59 = vpack.c.bf16 %v3540_v52, %v3539_v29  ;;  %v2984_v53 = vmul.f32 %v6758_v45, %v10753_v41  ;;  %v6034_v29 = vld [vmem:[%s10415_s7 + $0xe8] sm:$0xff]  ;;  %v6245_v41 = vunpack.i.h.bf16 %v9360_v58 }
 0x58b   : > { %v6220_v50 = vunpack.i.h.bf16 %v6218_v48  ;;  %v6219_v17 = vunpack.i.l.bf16 %v6218_v48  ;;  %v9404_v55 = vpop.permute.xlu2 %6257  ;;  %v3192_v27 = vmul.f32 %v8994_v60, %v2712_v49  ;;  %v3936_v46 = vsel %vm3932_vm5, %v2483_v21, %v6225_v13  ;;  %4767 = vmatpush.bf16.msra.mxu0 %v6034_v29  ;;  %v10757_v21 = vld [vmem:[#allocation20_spill] sm:$0xff]  ;;  %v2921_v45 = vld [vmem:[#allocation6 + $0x69] sm:$0xff] }
 0x58c   : > { %v9406_v12 = vpop.permute.xlu1 %6237  ;;  %v3935_v48 = vsel %vm3932_vm5, %v2482_v23, %v6224_v31  ;;  %v6230_v60 = vunpack.i.h.bf16 %v9328_v28  ;;  %v2899_v23 = vmul.f32 %v2886_v14, %v10757_v21 }
 0x58d   : > { %v3999_v56 = vsel %vm3959_vm13, %v3986_v1, %v6219_v17  ;;  %v4000_v2 = vsel %vm3959_vm13, %v3987_v25, %v6220_v50  ;;  %v6456_v15 = vpack.i.bf16 %v3193_v9, %v3192_v27  ;;  %v10754_v50 = vld [vmem:[#allocation44_spill] sm:$0xff]  ;;  %v3948_v28 = vsel %vm2362_vm12, %v3935_v48, %v6229_v11  ;;  %v10756_v27 = vld [vmem:[#allocation37_spill] sm:$0xff] }
 0x58e   : > { %v4013_v6 = vpack.c.bf16 %v4000_v2, %v3999_v56  ;;  %v2777_v17 = vmul.f32 %v10754_v50, %v2712_v49  ;;  %v3949_v25 = vsel %vm2362_vm12, %v3936_v46, %v6230_v60  ;;  %v6240_v52 = vunpack.i.h.bf16 %v9406_v12  ;;  %v6759_v56 = vld [vmem:[#allocation6 + $0x61] sm:$0xff]  ;;  %v10760_v50 = vld [vmem:[#allocation40_spill] sm:$0xff] }
 0x58f   : > { %v6239_v38 = vunpack.i.l.bf16 %v9406_v12  ;;  %v10755_v49 = vld [vmem:[#allocation58_spill] sm:$0xff]  ;;  %v6039_v12 = vld [vmem:[%s10415_s7 + $0x110] sm:$0xff] }
 0x590   : > { %6442 = vrot.lane.b32.xlu0 %v6441_v4, %s6856_s18  ;;  %4321 = vmatmul.bf16.vlgmr.msrb.gmra.mxu3 %v4013_v6  ;;  %v2985_v2 = vmul.f32 %v6759_v56, %v10755_v49  ;;  %v2898_v6 = vmul.f32 %v10756_v27, %v2470_v10  ;;  %v6017_v10 = vld [vmem:[%s10415_s7 + $0x60] sm:$0xff]  ;;  %v3976_v11 = vsel %vm3932_vm5, %v2899_v23, %v6240_v52 }
 0x591   : > { %6437 = vrot.lane.b32.xlu2 %v6436_v62, %s6856_s18  ;;  %v6451_v62 = vpack.i.bf16 %v2984_v53, %v2777_v17  ;;  %v6025_v60 = vld [vmem:[%s10415_s7 + $0xa0] sm:$0xff]  ;;  %4813 = vmatpush.bf16.msra.mxu1 %v6039_v12  ;;  %v6244_v53 = vunpack.i.l.bf16 %v9360_v58  ;;  %v2472_v58 = vld [vmem:[#allocation4 + $0x28] sm:$0xff]  ;;  %v3989_v49 = vsel %vm2362_vm12, %v3976_v11, %v6245_v41 }
 0x592   : > { %6457 = vrot.lane.b32.xlu1 %v6456_v15, %s6856_s18  ;;  %v6233_v36 = vpop.permute.xlu0 %6232  ;;  %4659 = vmatmul.bf16.gmra.mxu1 %v3600_v59  ;;  %v9448_v15 = vld [vmem:[#allocation6 + $0x40] sm:$0xff]  ;;  %v9450_v59 = vld [vmem:[#allocation6 + $0x48] sm:$0xff] }
 0x593   : > { %v6235_v39 = vunpack.i.h.bf16 %v6233_v36  ;;  %v6234_v18 = vunpack.i.l.bf16 %v6233_v36  ;;  %v9430_v9 = vpop.permute.xlu2 %6272  ;;  %5831 = vmatmul.msk.bf16.gmra.mxu0 %vm3932_vm5, %v4032_v19  ;;  %v10758_v19 = vld [vmem:[#allocation97_spill] sm:$0xff]  ;;  %v3975_v36 = vsel %vm3932_vm5, %v2898_v6, %v6239_v38  ;;  %v2463_v17 = vmul.f32 %v9450_v59, %v10760_v50  ;;  %4682 = vmatpush.bf16.msra.mxu2 %v6017_v10  ;;  %v3129_v6 = vld [vmem:[#allocation6 + $0x6f] sm:$0xff] }
 0x594   : > { %v9434_v1 = vpop.permute.xlu1 %6252  ;;  %v6170_v46 = vunpack.i.h.bf16 %v10758_v19  ;;  %v6169_v48 = vunpack.i.l.bf16 %v10758_v19  ;;  %4725 = vmatpush.bf16.msra.mxu3 %v6025_v60  ;;  %v3988_v56 = vsel %vm2362_vm12, %v3975_v36, %v6244_v53  ;;  %v2485_v10 = vmul.f32 %v2472_v58, %v10743_v0  ;;  %v2888_v53 = vld [vmem:[#allocation4 + $0x30] sm:$0xff] }
 0x595   : > { %v3962_v13 = vsel %vm3959_vm13, %v3948_v28, %v6234_v18  ;;  %v3963_v31 = vsel %vm3959_vm13, %v3949_v25, %v6235_v39  ;;  %v10759_v18 = vld [vmem:[#allocation24_spill] sm:$0xff]  ;;  %v2778_v28 = vmul.f32 %v10725_v51, %v9395_v33  ;;  %v2986_v25 = vmul.f32 %v10718_v57, %v2921_v45 }
 0x596   : > { %v4015_v4 = vpack.c.bf16 %v3963_v31, %v3962_v13  ;;  %v2462_v14 = vmul.f32 %v9448_v15, %v10759_v18  ;;  %v2471_v13 = vld [vmem:[#allocation4 + $0x20] sm:$0xff]  ;;  %v6255_v51 = vunpack.i.h.bf16 %v9434_v1  ;;  %v6254_v57 = vunpack.i.l.bf16 %v9434_v1 }
 0x597   : > { %v2484_v19 = vmul.f32 %v2471_v13, %v10742_v35  ;;  %v6461_v60 = vpack.i.bf16 %v2986_v25, %v2778_v28  ;;  %v6033_v1 = vld [vmem:[%s10415_s7 + $0xe0] sm:$0xff]  ;;  %v6259_v35 = vunpack.i.l.bf16 %v9404_v55  ;;  %v10761_v13 = vld [vmem:[#allocation47_spill] sm:$0xff] }
 0x598   : > { %3464 = vrot.lane.b32.xlu0 %v2985_v2, %s6856_s18  ;;  %4283 = vmatmul.bf16.gmra.mxu2 %v4015_v4  ;;  %v3541_v2 = vsel %vm2362_vm12, %v2462_v14, %v6169_v48  ;;  %v3542_v4 = vsel %vm2362_vm12, %v2463_v17, %v6170_v46  ;;  %v3938_v48 = vsel %vm3932_vm5, %v2485_v10, %v6255_v51  ;;  %v6016_v51 = vld [vmem:[%s10415_s7 + $0x58] sm:$0xff]  ;;  %v6274_v10 = vunpack.i.l.bf16 %v9430_v9 }
 0x599   : > { %6452 = vrot.lane.b32.xlu2 %v6451_v62, %s6856_s18  ;;  %v3194_v62 = vmul.f32 %v9042_v30, %v3129_v6  ;;  %v3605_v46 = vpack.c.bf16 %v3542_v4, %v3541_v2  ;;  %v3937_v11 = vsel %vm3932_vm5, %v2484_v19, %v6254_v57  ;;  %v6260_v30 = vunpack.i.h.bf16 %v9404_v55  ;;  %4768 = vmatpush.bf16.msra.mxu0 %v6033_v1  ;;  %v2386_v4 = vld [vmem:[#allocation6 + $0x50] sm:$0xff]  ;;  %v2387_v6 = vld [vmem:[#allocation6 + $0x58] sm:$0xff] }
 0x59a   : > { %v6248_v39 = vpop.permute.xlu0 %6247  ;;  %v3950_v14 = vsel %vm2362_vm12, %v3937_v11, %v6259_v35  ;;  %v10763_v57 = vld [vmem:[#allocation96_spill] sm:$0xff]  ;;  %4683 = vmatpush.bf16.msra.mxu2 %v6016_v51  ;;  %v6275_v19 = vunpack.i.h.bf16 %v9430_v9 }
 0x59b   : > { %v6250_v29 = vunpack.i.h.bf16 %v6248_v39  ;;  %v6249_v52 = vunpack.i.l.bf16 %v6248_v39  ;;  %v9476_v38 = vpop.permute.xlu2 %6287  ;;  %v3951_v17 = vsel %vm2362_vm12, %v3938_v48, %v6260_v30  ;;  %v10765_v48 = vld [vmem:[#allocation54_spill] sm:$0xff]  ;;  %v6031_v51 = vld [vmem:[%s10415_s7 + $0xd0] sm:$0xff] }
 0x59c   : > { %v6268_v31 = vpop.permute.xlu1 %6267  ;;  %v2465_v11 = vmul.f32 %v10765_v48, %v2387_v6 }
 0x59d   : > { %v4001_v33 = vsel %vm3959_vm13, %v3988_v56, %v6249_v52  ;;  %v4002_v23 = vsel %vm3959_vm13, %v3989_v49, %v6250_v29  ;;  %v6270_v28 = vunpack.i.h.bf16 %v6268_v31  ;;  %v6269_v25 = vunpack.i.l.bf16 %v6268_v31  ;;  %v10762_v49 = vld [vmem:[#allocation56_spill] sm:$0xff] }
 0x59e   : > { %v4016_v12 = vpack.c.bf16 %v4002_v23, %v4001_v33  ;;  %v2900_v56 = vmul.f32 %v10761_v13, %v2472_v58  ;;  %v2901_v2 = vmul.f32 %v2888_v53, %v10762_v49  ;;  %v6175_v33 = vunpack.i.h.bf16 %v10763_v57  ;;  %v6024_v31 = vld [vmem:[%s10415_s7 + $0x98] sm:$0xff] }
 0x59f   : > { %v6174_v23 = vunpack.i.l.bf16 %v10763_v57  ;;  %v6032_v58 = vld [vmem:[%s10415_s7 + $0xd8] sm:$0xff]  ;;  %4726 = vmatpush.bf16.msra.mxu3 %v6024_v31  ;;  %v6037_v57 = vld [vmem:[%s10415_s7 + $0x100] sm:$0xff] }
 0x5a0   : > { %3518 = vrot.lane.b32.xlu0 %v3194_v62, %s6856_s18  ;;  %4326 = vmatmul.bf16.gmra.mxu3 %v4016_v12  ;;  %v3978_v62 = vsel %vm3932_vm5, %v2901_v2, %v6270_v28  ;;  %v3977_v12 = vsel %vm3932_vm5, %v2900_v56, %v6269_v25  ;;  %v2474_v53 = vld [vmem:[#allocation4 + $0x38] sm:$0xff]  ;;  %v3544_v25 = vsel %vm2362_vm12, %v2465_v11, %v6175_v33 }
 0x5a1   : > { %6462 = vrot.lane.b32.xlu2 %v6461_v60, %s6856_s18  ;;  %4769 = vmatpush.bf16.msra.mxu0 %v6032_v58  ;;  %v3990_v9 = vsel %vm2362_vm12, %v3977_v12, %v6274_v10  ;;  %v2487_v6 = vmul.f32 %v2474_v53, %v10750_v40  ;;  %v6290_v40 = vunpack.i.h.bf16 %v9476_v38  ;;  %v6289_v58 = vunpack.i.l.bf16 %v9476_v38  ;;  %v2388_v38 = vld [vmem:[#allocation6 + $0x60] sm:$0xff] }
 0x5a2   : > { %v6263_v0 = vpop.permute.xlu0 %6262  ;;  %4664 = vmatmul.bf16.gmra.mxu1 %v3605_v46  ;;  %v10764_v46 = vld [vmem:[#allocation49_spill] sm:$0xff] }
 0x5a3   : > { %v6265_v36 = vunpack.i.h.bf16 %v6263_v0  ;;  %v6264_v45 = vunpack.i.l.bf16 %v6263_v0  ;;  %v9498_v41 = vpop.permute.xlu2 %6302  ;;  %v2464_v1 = vmul.f32 %v10764_v46, %v2386_v4 }
 0x5a4   : > { %v6283_v39 = vpop.permute.xlu1 %6282 }
 0x5a5   : > { %v3964_v29 = vsel %vm3959_vm13, %v3950_v14, %v6264_v45  ;;  %v3965_v52 = vsel %vm3959_vm13, %v3951_v17, %v6265_v36  ;;  %v6038_v36 = vld [vmem:[%s10415_s7 + $0x108] sm:$0xff]  ;;  %v2473_v45 = vld [vmem:[#allocation4 + $0x30] sm:$0xff]  ;;  %v3991_v17 = vsel %vm2362_vm12, %v3978_v62, %v6275_v19  ;;  %v3543_v28 = vsel %vm2362_vm12, %v2464_v1, %v6174_v23  ;;  %4770 = vmatpush.bf16.msra.mxu0 %v6031_v51 }
 0x5a6   : > { %v4018_v55 = vpack.c.bf16 %v3965_v52, %v3964_v29  ;;  %v6285_v29 = vunpack.i.h.bf16 %v6283_v39  ;;  %v6284_v52 = vunpack.i.l.bf16 %v6283_v39  ;;  %4814 = vmatpush.bf16.msra.mxu1 %v6038_v36  ;;  %v2486_v4 = vmul.f32 %v2473_v45, %v10749_v5  ;;  %v6030_v5 = vld [vmem:[%s10415_s7 + $0xc8] sm:$0xff] }
 0x5a7   : > { %v3610_v33 = vpack.c.bf16 %v3544_v25, %v3543_v28  ;;  %v10768_v25 = vld [vmem:[#allocation18_spill] sm:$0xff]  ;;  %v6304_v51 = vunpack.i.l.bf16 %v9498_v41 }
 0x5a8   : > { %4288 = vmatmul.bf16.gmra.mxu2 %v4018_v55  ;;  %v3940_v23 = vsel %vm3932_vm5, %v2487_v6, %v6285_v29  ;;  %v3939_v31 = vsel %vm3932_vm5, %v2486_v4, %v6284_v52  ;;  %v2903_v29 = vmul.f32 %v9192_v22, %v10768_v25  ;;  %v6015_v52 = vld [vmem:[%s10415_s7 + $0x50] sm:$0xff]  ;;  %v6305_v6 = vunpack.i.h.bf16 %v9498_v41 }
 0x5a9   : > { %v3952_v1 = vsel %vm2362_vm12, %v3939_v31, %v6289_v58  ;;  %v3953_v11 = vsel %vm2362_vm12, %v3940_v23, %v6290_v40  ;;  %4771 = vmatpush.bf16.msra.mxu0 %v6030_v5  ;;  %4684 = vmatpush.bf16.msra.mxu2 %v6015_v52  ;;  %v2476_v40 = vld [vmem:[#allocation4 + $0x48] sm:$0xff]  ;;  %v2475_v58 = vld [vmem:[#allocation4 + $0x40] sm:$0xff] }
 0x5aa   : > { %v6278_v60 = vpop.permute.xlu0 %6277  ;;  %4815 = vmatpush.bf16.msra.mxu1 %v6037_v57 }
 0x5ab   : > { %v6280_v30 = vunpack.i.h.bf16 %v6278_v60  ;;  %v6279_v35 = vunpack.i.l.bf16 %v6278_v60  ;;  %v9523_v0 = vpop.permute.xlu2 %6317 }
 0x5ac   : > { %v6298_v14 = vpop.permute.xlu1 %6297  ;;  %v6320_v52 = vunpack.i.h.bf16 %v9523_v0 }
 0x5ad   : > { %v4003_v55 = vsel %vm3959_vm13, %v3990_v9, %v6279_v35  ;;  %v4004_v56 = vsel %vm3959_vm13, %v3991_v17, %v6280_v30  ;;  %v6300_v30 = vunpack.i.h.bf16 %v6298_v14  ;;  %v6299_v35 = vunpack.i.l.bf16 %v6298_v14  ;;  %v10766_v9 = vld [vmem:[#allocation22_spill] sm:$0xff]  ;;  %v10767_v17 = vld [vmem:[#allocation93_spill] sm:$0xff]  ;;  %v6023_v14 = vld [vmem:[%s10415_s7 + $0x90] sm:$0xff] }
 0x5ae   : > { %v4019_v2 = vpack.c.bf16 %v4004_v56, %v4003_v55  ;;  %v2902_v28 = vmul.f32 %v10767_v17, %v10766_v9  ;;  %v6029_v55 = vld [vmem:[%s10415_s7 + $0xc0] sm:$0xff]  ;;  %v6179_v56 = vunpack.i.l.bf16 %v9262_v37  ;;  %4727 = vmatpush.bf16.msra.mxu3 %v6023_v14  ;;  %v6319_v14 = vunpack.i.l.bf16 %v9523_v0 }
 0x5af   : > { %v3980_v4 = vsel %vm3932_vm5, %v2903_v29, %v6300_v30  ;;  %4772 = vmatpush.bf16.msra.mxu0 %v6029_v55 }
 0x5b0   : > { %4331 = vmatmul.bf16.gmra.mxu3 %v4019_v2  ;;  %v9542_v39 = vpop.f32.mrf.mxu0  ;;  %v3979_v22 = vsel %vm3932_vm5, %v2902_v28, %v6299_v35  ;;  %v6014_v28 = vld [vmem:[%s10415_s7 + $0x48] sm:$0xff] }
 0x5b1   : > { %4685 = vmatpush.bf16.msra.mxu2 %v6014_v28  ;;  %v2478_v28 = vld [vmem:[#allocation4 + $0x58] sm:$0xff] }
 0x5b2   : > { %v6293_v62 = vpop.permute.xlu0 %6292  ;;  %4669 = vmatmul.bf16.gmra.mxu1 %v3610_v33  ;;  %v10769_v33 = vld [vmem:[#allocation43_spill] sm:$0xff] }
 0x5b3   : > { %v6295_v12 = vunpack.i.h.bf16 %v6293_v62  ;;  %v6294_v19 = vunpack.i.l.bf16 %v6293_v62  ;;  %v9551_v10 = vpop.permute.xlu2 %6332  ;;  %v2466_v23 = vmul.f32 %v10769_v33, %v2388_v38 }
 0x5b4   : > { %v6313_v60 = vpop.permute.xlu1 %6312 }
 0x5b5   : > { %v3966_v36 = vsel %vm3959_vm13, %v3952_v1, %v6294_v19  ;;  %v3967_v45 = vsel %vm3959_vm13, %v3953_v11, %v6295_v12  ;;  %v3992_v12 = vsel %vm2362_vm12, %v3979_v22, %v6304_v51  ;;  %v3993_v19 = vsel %vm2362_vm12, %v3980_v4, %v6305_v6  ;;  %v2891_v4 = vld [vmem:[#allocation4 + $0x48] sm:$0xff] }
 0x5b6   : > { %v4021_v53 = vpack.c.bf16 %v3967_v45, %v3966_v36  ;;  %v3545_v1 = vsel %vm2362_vm12, %v2466_v23, %v6179_v56  ;;  %v6315_v11 = vunpack.i.h.bf16 %v6313_v60  ;;  %v6314_v30 = vunpack.i.l.bf16 %v6313_v60 }
 0x5b7   : > { %v2489_v45 = vmul.f32 %v2476_v40, %v10760_v50  ;;  %v3615_v17 = vpack.c.bf16 %v3545_v1, %v3545_v1 }
 0x5b8   : > { %4293 = vmatmul.bf16.gmra.mxu2 %v4021_v53  ;;  %v9571_v2 = vpop.f32.mrf.mxu0  ;;  %v2488_v53 = vmul.f32 %v2475_v58, %v10759_v18  ;;  %v10770_v58 = vld [vmem:[#allocation16_spill] sm:$0xff] }
 0x5b9   : > { %v3942_v29 = vsel %vm3932_vm5, %v2489_v45, %v6315_v11 }
 0x5ba   : > { %v6308_v57 = vpop.permute.xlu0 %6307  ;;  %v3941_v60 = vsel %vm3932_vm5, %v2488_v53, %v6314_v30  ;;  %v3955_v51 = vsel %vm2362_vm12, %v3942_v29, %v6320_v52  ;;  %v2477_v29 = vld [vmem:[#allocation4 + $0x50] sm:$0xff] }
 0x5bb   : > { %v6310_v31 = vunpack.i.h.bf16 %v6308_v57  ;;  %v6309_v5 = vunpack.i.l.bf16 %v6308_v57  ;;  %v9578_v37 = vpop.permute.xlu2 %6347  ;;  %v3954_v6 = vsel %vm2362_vm12, %v3941_v60, %v6319_v14  ;;  %v6022_v57 = vld [vmem:[%s10415_s7 + $0x88] sm:$0xff] }
 0x5bc   : > { %v6328_v62 = vpop.permute.xlu1 %6327  ;;  %4728 = vmatpush.bf16.msra.mxu3 %v6022_v57 }
 0x5bd   : > { %v4005_v41 = vsel %vm3959_vm13, %v3992_v12, %v6309_v5  ;;  %v4006_v35 = vsel %vm3959_vm13, %v3993_v19, %v6310_v31  ;;  %v6330_v23 = vunpack.i.h.bf16 %v6328_v62  ;;  %v6329_v31 = vunpack.i.l.bf16 %v6328_v62  ;;  %v10771_v19 = vld [vmem:[#allocation38_spill] sm:$0xff] }
 0x5be   : > { %v4022_v36 = vpack.c.bf16 %v4006_v35, %v4005_v41  ;;  %v2904_v12 = vmul.f32 %v2891_v4, %v10770_v58  ;;  %v2905_v1 = vmul.f32 %v9255_v54, %v10771_v19  ;;  %v6335_v62 = vunpack.i.h.bf16 %v9551_v10  ;;  %v10772_v54 = vld [vmem:[#allocation84_spill] sm:$0xff] }
 0x5bf   : > { %v6334_v35 = vunpack.i.l.bf16 %v9551_v10  ;;  %v3287_v60 = vmul.f32 %v10772_v54, %v9227_v8 }
 0x5c0   : > { %4336 = vmatmul.bf16.gmra.mxu3 %v4022_v36  ;;  %v9587_v38 = vpop.f32.mrf.mxu0  ;;  %v3982_v30 = vsel %vm3932_vm5, %v2905_v1, %v6330_v23  ;;  %v3981_v41 = vsel %vm3932_vm5, %v2904_v12, %v6329_v31  ;;  %v2491_v31 = vmul.f32 %v2478_v28, %v10765_v48  ;;  %v3013_v48 = vld [vmem:[#allocation6 + $0xe] sm:$0xff] }
 0x5c1   : > { %v3994_v14 = vsel %vm2362_vm12, %v3981_v41, %v6334_v35  ;;  %v6349_v41 = vunpack.i.l.bf16 %v9578_v37  ;;  %v10775_v35 = vld [vmem:[#allocation59_spill] sm:$0xff] }
 0x5c2   : > { %v6323_v55 = vpop.permute.xlu0 %6322  ;;  %4674 = vmatmul.bf16.gmra.mxu1 %v3615_v17 }
 0x5c3   : > { %v6325_v18 = vunpack.i.h.bf16 %v6323_v55  ;;  %v6324_v50 = vunpack.i.l.bf16 %v6323_v55  ;;  %v9596_v56 = vpop.permute.xlu2 %6362  ;;  %v3995_v55 = vsel %vm2362_vm12, %v3982_v30, %v6335_v62  ;;  %v3014_v30 = vld [vmem:[#allocation6 + $0x16] sm:$0xff] }
 0x5c4   : > { %v6343_v22 = vpop.permute.xlu1 %6342 }
 0x5c5   : > { %v3968_v0 = vsel %vm3959_vm13, %v3954_v6, %v6324_v50  ;;  %v3969_v5 = vsel %vm3959_vm13, %v3955_v51, %v6325_v18  ;;  %v6345_v18 = vunpack.i.h.bf16 %v6343_v22  ;;  %v6344_v50 = vunpack.i.l.bf16 %v6343_v22  ;;  %v10773_v6 = vld [vmem:[#allocation27_spill] sm:$0xff]  ;;  %v6013_v22 = vld [vmem:[%s10415_s7 + $0x40] sm:$0xff] }
 0x5c6   : > { %v4024_v40 = vpack.c.bf16 %v3969_v5, %v3968_v0  ;;  %v10774_v51 = vld [vmem:[#allocation83_spill] sm:$0xff]  ;;  %v2490_v0 = vmul.f32 %v2477_v29, %v10764_v46  ;;  %v6350_v46 = vunpack.i.h.bf16 %v9578_v37  ;;  %4686 = vmatpush.bf16.msra.mxu2 %v6013_v22 }
 0x5c7   : > { %v3286_v57 = vmul.f32 %v10774_v51, %v10773_v6  ;;  %v3944_v12 = vsel %vm3932_vm5, %v2491_v31, %v6345_v18  ;;  %v10777_v31 = vld [vmem:[#allocation31_spill] sm:$0xff] }
 0x5c8   : > { %4298 = vmatmul.bf16.gmra.mxu2 %v4024_v40  ;;  %v9608_v11 = vpop.f32.mrf.mxu0  ;;  %v6021_v40 = vld [vmem:[%s10415_s7 + $0x80] sm:$0xff]  ;;  %v3943_v1 = vsel %vm3932_vm5, %v2490_v0, %v6344_v50  ;;  %v3957_v50 = vsel %vm2362_vm12, %v3944_v12, %v6350_v46  ;;  %v2906_v0 = vmul.f32 %v9245_v61, %v10777_v31 }
 0x5c9   : > { %v3589_v8 = vpack.c.bf16 %v3287_v60, %v3286_v57  ;;  %4729 = vmatpush.bf16.msra.mxu3 %v6021_v40  ;;  %v3956_v18 = vsel %vm2362_vm12, %v3943_v1, %v6349_v41  ;;  %v2479_v61 = vld [vmem:[#allocation4 + $0x60] sm:$0xff] }
 0x5ca   : > { %v6338_v36 = vpop.permute.xlu0 %6337 }
 0x5cb   : > { %v6340_v45 = vunpack.i.h.bf16 %v6338_v36  ;;  %v6339_v53 = vunpack.i.l.bf16 %v6338_v36  ;;  %v9614_v17 = vpop.permute.xlu2 %6377  ;;  %v3079_v36 = vmul.f32 %v10775_v35, %v3014_v30  ;;  %v6365_v30 = vunpack.i.h.bf16 %v9596_v56  ;;  %v10779_v35 = vld [vmem:[#allocation88_spill] sm:$0xff] }
 0x5cc   : > { %v6358_v52 = vpop.permute.xlu1 %6357 }
 0x5cd   : > { %v4007_v4 = vsel %vm3959_vm13, %v3994_v14, %v6339_v53  ;;  %v4008_v10 = vsel %vm3959_vm13, %v3995_v55, %v6340_v45  ;;  %v10776_v45 = vld [vmem:[#allocation65_spill] sm:$0xff]  ;;  %v6360_v37 = vunpack.i.h.bf16 %v6358_v52 }
 0x5ce   : > { %v4025_v23 = vpack.c.bf16 %v4008_v10, %v4007_v4  ;;  %v3078_v53 = vmul.f32 %v10776_v45, %v3013_v48  ;;  %v6359_v4 = vunpack.i.l.bf16 %v6358_v52  ;;  %v6364_v48 = vunpack.i.l.bf16 %v9596_v56  ;;  %v10780_v56 = vld [vmem:[#allocation85_spill] sm:$0xff] }
 0x5d0   : > { %4341 = vmatmul.bf16.gmra.mxu3 %v4025_v23  ;;  %v9626_v5 = vpop.f32.mrf.mxu0  ;;  %v3983_v1 = vsel %vm3932_vm5, %v2906_v0, %v6359_v4 }
 0x5d1   : > { %v3996_v45 = vsel %vm2362_vm12, %v3983_v1, %v6364_v48 }
 0x5d2   : > { %v6353_v62 = vpop.permute.xlu0 %6352  ;;  %5976 = vmatmul.msk.bf16.vlgmr.msra.gmra.mxu1 %vm2362_vm12, %v3589_v8  ;;  %v10778_v8 = vld [vmem:[#allocation46_spill] sm:$0xff] }
 0x5d3   : > { %v6355_v28 = vunpack.i.h.bf16 %v6353_v62  ;;  %v6354_v29 = vunpack.i.l.bf16 %v6353_v62  ;;  %v6393_v54 = vpop.permute.xlu2 %6392  ;;  %v2907_v22 = vmul.f32 %v9336_v42, %v10778_v8  ;;  %v3288_v42 = vmul.f32 %v10779_v35, %v9312_v47 }
 0x5d4   : > { %v6395_v60 = vunpack.i.h.bf16 %v6393_v54  ;;  %v6394_v14 = vunpack.i.l.bf16 %v6393_v54  ;;  %v6373_v55 = vpop.permute.xlu1 %6372 }
 0x5d5   : > { %v3970_v10 = vsel %vm3959_vm13, %v3956_v18, %v6354_v29  ;;  %v3971_v6 = vsel %vm3959_vm13, %v3957_v50, %v6355_v28  ;;  %v3984_v52 = vsel %vm3932_vm5, %v2907_v22, %v6360_v37  ;;  %v6374_v28 = vunpack.i.l.bf16 %v6373_v55 }
 0x5d6   : > { %v3573_v51 = vsel %vm2362_vm12, %v3079_v36, %v6395_v60  ;;  %v3572_v57 = vsel %vm2362_vm12, %v3078_v53, %v6394_v14  ;;  %v4027_v23 = vpack.c.bf16 %v3971_v6, %v3970_v10  ;;  %v3997_v53 = vsel %vm2362_vm12, %v3984_v52, %v6365_v30  ;;  %v10783_v30 = vld [vmem:[#allocation70_spill] sm:$0xff] }
 0x5d7   : > { %v3588_v40 = vpack.c.bf16 %v3573_v51, %v3572_v57  ;;  %v3289_v60 = vmul.f32 %v10780_v56, %v9310_v44  ;;  %v2492_v18 = vmul.f32 %v2479_v61, %v10769_v33  ;;  %v6379_v10 = vunpack.i.l.bf16 %v9614_v17  ;;  %v3016_v51 = vld [vmem:[#allocation6 + $0x26] sm:$0xff]  ;;  %v10781_v44 = vld [vmem:[#allocation41_spill] sm:$0xff] }
 0x5d8   : > { %4303 = vmatmul.bf16.gmra.mxu2 %v4027_v23  ;;  %v9651_v12 = vpop.f32.mrf.mxu0  ;;  %v6375_v57 = vunpack.i.h.bf16 %v6373_v55  ;;  %v2908_v0 = vmul.f32 %v9347_v3, %v10781_v44  ;;  %v10782_v33 = vld [vmem:[#allocation69_spill] sm:$0xff] }
 0x5d9   : > { %4773 = vmatmul.bf16.vlgmr.msra.gmra.mxu0 %v3588_v40  ;;  %v3594_v47 = vpack.c.bf16 %v3289_v60, %v3288_v42  ;;  %v3945_v4 = vsel %vm3932_vm5, %v2492_v18, %v6374_v28  ;;  %v3081_v22 = vmul.f32 %v10782_v33, %v3016_v51  ;;  %v3015_v40 = vld [vmem:[#allocation6 + $0x1e] sm:$0xff]  ;;  %v10786_v33 = vld [vmem:[#allocation64_spill] sm:$0xff] }
 0x5da   : > { %v6368_v46 = vpop.permute.xlu0 %6367  ;;  %v3958_v1 = vsel %vm2362_vm12, %v3945_v4, %v6379_v10  ;;  %v3080_v48 = vmul.f32 %v10783_v30, %v3015_v40  ;;  %v3018_v40 = vld [vmem:[#allocation6 + $0x36] sm:$0xff] }
 0x5db   : > { %v6370_v41 = vunpack.i.h.bf16 %v6368_v46  ;;  %v6369_v62 = vunpack.i.l.bf16 %v6368_v46 }
 0x5dc   : > { %v9659_v36 = vpop.permute.xlu1 %6387 }
 0x5dd   : > { %v4009_v29 = vsel %vm3959_vm13, %v3996_v45, %v6369_v62  ;;  %v4010_v54 = vsel %vm3959_vm13, %v3997_v53, %v6370_v41  ;;  %v3985_v45 = vsel %vm3932_vm5, %v2908_v0, %v6375_v57  ;;  %v6380_v53 = vunpack.i.h.bf16 %v9614_v17 }
 0x5de   : > { %v4028_v14 = vpack.c.bf16 %v4010_v54, %v4009_v29 }
 0x5df   : > { %v9668_v50 = vpop.f32.mrf.mxu1  ;;  %v3998_v56 = vsel %vm2362_vm12, %v3985_v45, %v6380_v53 }
 0x5e0   : > { %4346 = vmatmul.bf16.gmra.mxu3 %v4028_v14  ;;  %v9670_v37 = vpop.f32.mrf.mxu0  ;;  %v10784_v14 = vld [vmem:[#allocation90_spill] sm:$0xff] }
 0x5e1   : > { %v3290_v18 = vmul.f32 %v10784_v14, %v9366_v63  ;;  %v10789_v14 = vld [vmem:[#allocation86_spill] sm:$0xff] }
 0x5e2   : > { %v6383_v6 = vpop.permute.xlu0 %6382  ;;  %5977 = vmatmul.msk.bf16.gmra.mxu1 %vm2362_vm12, %v3594_v47  ;;  %v10785_v47 = vld [vmem:[#allocation87_spill] sm:$0xff] }
 0x5e3   : > { %v6384_v23 = vunpack.i.l.bf16 %v6383_v6  ;;  %v6385_v35 = vunpack.i.h.bf16 %v6383_v6  ;;  %v3291_v4 = vmul.f32 %v10785_v47, %v9371_v32 }
 0x5e4   : > { %v6403_v52 = vpop.permute.xlu1 %6402 }
 0x5e5   : > { %v6405_v46 = vunpack.i.h.bf16 %v6403_v52  ;;  %v6404_v41 = vunpack.i.l.bf16 %v6403_v52  ;;  %v3972_v62 = vsel %vm3959_vm13, %v3958_v1, %v6384_v23  ;;  %v4011_v60 = vsel %vm3959_vm13, %v3998_v56, %v6385_v35  ;;  %v3017_v23 = vld [vmem:[#allocation6 + $0x2e] sm:$0xff]  ;;  %v10787_v52 = vld [vmem:[#allocation73_spill] sm:$0xff] }
 0x5e6   : > { %v4030_v61 = vpack.c.bf16 %v3972_v62, %v3972_v62  ;;  %v4031_v10 = vpack.c.bf16 %v4011_v60, %v4011_v60  ;;  %v3599_v17 = vpack.c.bf16 %v3291_v4, %v3290_v18  ;;  %v3083_v1 = vmul.f32 %v10787_v52, %v3018_v40  ;;  %v10788_v56 = vld [vmem:[#allocation92_spill] sm:$0xff]  ;;  %v2808_v40 = vld [vmem:[#allocation6 + $0x20] sm:$0xff] }
 0x5e7   : > { %v9681_v42 = vpop.f32.mrf.mxu1  ;;  %v3574_v55 = vsel %vm2362_vm12, %v3080_v48, %v6404_v41  ;;  %v3575_v3 = vsel %vm2362_vm12, %v3081_v22, %v6405_v46  ;;  %v3082_v22 = vmul.f32 %v10786_v33, %v3017_v23  ;;  %v2806_v48 = vld [vmem:[#allocation6 + $0x10] sm:$0xff]  ;;  %v6390_v46 = vunpack.i.h.bf16 %v9659_v36  ;;  %v3020_v23 = vld [vmem:[#allocation6 + $0x46] sm:$0xff] }
 0x5e8   : > { %4308 = vmatmul.bf16.gmra.mxu2 %v4030_v61  ;;  %v9687_v28 = vpop.f32.mrf.mxu0  ;;  %v3593_v29 = vpack.c.bf16 %v3575_v3, %v3574_v55  ;;  %v6389_v41 = vunpack.i.l.bf16 %v9659_v36  ;;  %v6760_v3 = vld [vmem:[#allocation6 + $0x8] sm:$0xff]  ;;  %v2871_v53 = vmul.f32 %v10748_v26, %v2806_v48  ;;  %v3293_v60 = vmul.f32 %v10788_v56, %v9450_v59 }
 0x5e9   : > { %v2870_v45 = vmul.f32 %v6760_v3, %v10747_v34  ;;  %v3292_v18 = vmul.f32 %v10789_v14, %v9448_v15  ;;  %v10790_v59 = vld [vmem:[#allocation67_spill] sm:$0xff]  ;;  %v10791_v33 = vld [vmem:[#allocation74_spill] sm:$0xff]  ;;  %v6408_v14 = vpop.permute.xlu2 %6407 }
 0x5ea   : > { %4778 = vmatmul.bf16.gmra.mxu0 %v3593_v29  ;;  %v9689_v54 = vpop.permute.xlu0 %6397  ;;  %v3560_v29 = vsel %vm2362_vm12, %v2871_v53, %v6390_v46 }
 0x5eb   : > { %v3559_v36 = vsel %vm2362_vm12, %v2870_v45, %v6389_v41  ;;  %v6400_v52 = vunpack.i.h.bf16 %v9689_v54  ;;  %v10792_v41 = vld [vmem:[#allocation66_spill] sm:$0xff] }
 0x5ec   : > { %v9699_v51 = vpop.permute.xlu1 %6417  ;;  %v3587_v47 = vpack.c.bf16 %v3560_v29, %v3559_v36  ;;  %v2873_v29 = vmul.f32 %v10757_v21, %v2808_v40  ;;  %v9755_v36 = vld [vmem:[#allocation6 + $0x50] sm:$0xff] }
 0x5ed   : > { %v6419_v63 = vunpack.i.l.bf16 %v9699_v51  ;;  %v2602_v21 = vld [vmem:[#allocation6 + $0x2a] sm:$0xff] }
 0x5ee   : > { %v3562_v56 = vsel %vm2362_vm12, %v2873_v29, %v6400_v52  ;;  %v3021_v52 = vld [vmem:[#allocation6 + $0x4e] sm:$0xff] }
 0x5ef   : > { %v9697_v6 = vpop.f32.mrf.mxu1  ;;  %v3577_v61 = vsel %vm2362_vm12, %v3083_v1, %v6419_v63  ;;  %v6399_v1 = vunpack.i.l.bf16 %v9689_v54 }
 0x5f0   : > { %4351 = vmatmul.bf16.gmra.mxu3 %v4031_v10  ;;  %v9701_v57 = vpop.f32.mrf.mxu0  ;;  %v3019_v10 = vld [vmem:[#allocation6 + $0x3e] sm:$0xff] }
 0x5f2   : > { %v9703_v0 = vpop.permute.xlu0 %6412  ;;  %5978 = vmatmul.msk.bf16.gmra.mxu1 %vm2362_vm12, %v3599_v17  ;;  %v3084_v17 = vmul.f32 %v10790_v59, %v3019_v10  ;;  %v6409_v10 = vunpack.i.l.bf16 %v6408_v14 }
 0x5f3   : > { %v6415_v32 = vunpack.i.h.bf16 %v9703_v0 }
 0x5f4   : > { %v9733_v34 = vpop.permute.xlu1 %6432 }
 0x5f5   : > { %v3576_v30 = vsel %vm2362_vm12, %v3082_v22, %v6415_v32  ;;  %v6434_v15 = vunpack.i.l.bf16 %v9733_v34  ;;  %v3085_v22 = vmul.f32 %v10791_v33, %v3020_v23  ;;  %v2807_v32 = vld [vmem:[#allocation6 + $0x18] sm:$0xff] }
 0x5f6   : > { %v3598_v55 = vpack.c.bf16 %v3577_v61, %v3576_v30  ;;  %v10793_v61 = vld [vmem:[#allocation39_spill] sm:$0xff]  ;;  %v2872_v53 = vmul.f32 %v10756_v27, %v2807_v32  ;;  %v10796_v33 = vld [vmem:[#allocation13_spill] sm:$0xff] }
 0x5f7   : > { %v9713_v62 = vpop.f32.mrf.mxu1  ;;  %v3579_v48 = vsel %vm2362_vm12, %v3085_v22, %v6434_v15  ;;  %v6190_v22 = vunpack.i.h.bf16 %v10796_v33  ;;  %v10797_v32 = vld [vmem:[#allocation57_spill] sm:$0xff]  ;;  %v2810_v33 = vld [vmem:[#allocation6 + $0x30] sm:$0xff] }
 0x5f8   : > { %v9716_v35 = vpop.f32.mrf.mxu0  ;;  %4687 = vmatmul.bf16.vlgmr.msra.gmra.mxu2 %v3586_v24  ;;  %v3604_v24 = vpack.c.bf16 %v3293_v60, %v3292_v18  ;;  %v3561_v54 = vsel %vm2362_vm12, %v2872_v53, %v6399_v1  ;;  %v3294_v60 = vmul.f32 %v9093_v20, %v9755_v36  ;;  %v9761_v18 = vld [vmem:[#allocation6 + $0x58] sm:$0xff]  ;;  %v2601_v20 = vld [vmem:[#allocation6 + $0x22] sm:$0xff]  ;;  %v2667_v40 = vmul.f32 %v10797_v32, %v2602_v21 }
 0x5f9   : > { %v3592_v27 = vpack.c.bf16 %v3562_v56, %v3561_v54  ;;  %v10798_v1 = vld [vmem:[#allocation78_spill] sm:$0xff]  ;;  %v3022_v54 = vld [vmem:[#allocation6 + $0x56] sm:$0xff] }
 0x5fa   : > { %4783 = vmatmul.bf16.gmra.mxu0 %v3598_v55  ;;  %v9729_v16 = vpop.permute.xlu0 %6427  ;;  %v10794_v55 = vpack.c.bf16 %v10792_v41, %v10793_v61  ;;  %v3551_v29 = vsel %vm2362_vm12, %v2667_v40, %v6409_v10  ;;  %v5128_v32 = vld [vmem:[#allocation5] sm:$0xff]  ;;  %v2809_v40 = vld [vmem:[#allocation6 + $0x28] sm:$0xff] }
 0x5fb   : > { %v6430_v4 = vunpack.i.h.bf16 %v9729_v16  ;;  %5154 = vrot.lane.b32.xlu1 %v5128_v32, %s6858_s27  ;;  %v3024_v32 = vld [vmem:[#allocation6 + $0x66] sm:$0xff] }
 0x5fc   : > { %v9769_v15 = vpop.permute.xlu1 %6447 }
 0x5fd   : > { %v3578_v63 = vsel %vm2362_vm12, %v3084_v17, %v6430_v4  ;;  %v6449_v41 = vunpack.i.l.bf16 %v9769_v15 }
 0x5fe   : > { %v3603_v3 = vpack.c.bf16 %v3579_v48, %v3578_v63  ;;  %v3086_v48 = vmul.f32 %v10798_v1, %v3021_v52  ;;  %v6414_v52 = vunpack.i.l.bf16 %v9703_v0  ;;  %v2874_v0 = vmul.f32 %v10761_v13, %v2809_v40 }
 0x5ff   : > { %v9731_v43 = vpop.f32.mrf.mxu1  ;;  %v4279_v45 = vpop.f32.mrf.mxu2 }
 0x600   : > { %v9735_v26 = vpop.f32.mrf.mxu0  ;;  %4730 = vmatmul.bf16.vlgmr.msra.gmra.mxu3 %v3587_v47  ;;  %v10795_v47 = vld [vmem:[#allocation89_spill] sm:$0xff] }
 0x602   : > { %5979 = vmatmul.msk.bf16.gmra.mxu1 %vm2362_vm12, %v3604_v24  ;;  %v3295_v24 = vmul.f32 %v10795_v47, %v9761_v18  ;;  %v9765_v4 = vpop.permute.xlu0 %6442 }
 0x603   : > { %v6445_v63 = vunpack.i.h.bf16 %v9765_v4 }
 0x604   : > { %v3609_v17 = vpack.c.bf16 %v3295_v24, %v3294_v60  ;;  %v10800_v60 = vld [vmem:[#allocation72_spill] sm:$0xff] }
 0x605   : > { %v3087_v47 = vmul.f32 %v10800_v60, %v3022_v54  ;;  %v6458_v54 = vpop.permute.xlu1 %6457 }
 0x607   : > { %v9745_v30 = vpop.f32.mrf.mxu1  ;;  %v4281_v61 = vpop.f32.mrf.mxu2 }
 0x608   : > { %v9748_v46 = vpop.f32.mrf.mxu0  ;;  %4692 = vmatmul.bf16.gmra.mxu2 %v10794_v55 }
 0x60a   : > { %4788 = vmatmul.bf16.gmra.mxu0 %v3603_v3  ;;  %v10799_v3 = vld [vmem:[#allocation15_spill] sm:$0xff] }
 0x60b   : > { %v2666_v53 = vmul.f32 %v10799_v3, %v2601_v20  ;;  %v3581_v20 = vsel %vm2362_vm12, %v3087_v47, %v6449_v41 }
 0x60d   : > { %v3550_v24 = vsel %vm2362_vm12, %v2666_v53, %v6190_v22 }
 0x60f   : > { %v9767_v59 = vpop.f32.mrf.mxu1 }
 0x610   : > { %v9771_v23 = vpop.f32.mrf.mxu0  ;;  %4735 = vmatmul.bf16.gmra.mxu3 %v3592_v27  ;;  %v3580_v27 = vsel %vm2362_vm12, %v3086_v48, %v6445_v63  ;;  %v6410_v63 = vunpack.i.h.bf16 %v6408_v14  ;;  %v6420_v14 = vunpack.i.h.bf16 %v9699_v51  ;;  %v10805_v51 = vld [vmem:[#allocation79_spill] sm:$0xff] }
 0x611   : > { %v3608_v10 = vpack.c.bf16 %v3581_v20, %v3580_v27  ;;  %v6460_v27 = vunpack.i.h.bf16 %v6458_v54 }
 0x612   : > { %5980 = vmatmul.msk.bf16.gmra.mxu1 %vm2362_vm12, %v3609_v17  ;;  %v3596_v17 = vpack.c.bf16 %v3551_v29, %v3550_v24  ;;  %v3563_v53 = vsel %vm2362_vm12, %v2874_v0, %v6410_v63  ;;  %v6423_v29 = vpop.permute.xlu2 %6422 }
 0x613   : > { %v4322_v55 = vpop.f32.mrf.mxu3  ;;  %v6424_v13 = vunpack.i.l.bf16 %v6423_v29 }
 0x614   : > { %v4323_v56 = vadd.f32 %v4322_v55, %v4279_v45 }
 0x616   : > { %v4366_v21 = vadd.f32 %v9542_v39, %v4323_v56  ;;  %v2875_v39 = vmul.f32 %v10762_v49, %v2810_v33  ;;  %v2604_v49 = vld [vmem:[#allocation6 + $0x3a] sm:$0xff] }
 0x617   : > { %v9786_v1 = vpop.f32.mrf.mxu1  ;;  %v3023_v33 = vld [vmem:[#allocation6 + $0x5e] sm:$0xff] }
 0x618   : > { %v4397_v45 = vpop.f32.mrf.mxu0  ;;  %4697 = vmatmul.bf16.gmra.mxu2 %v3596_v17  ;;  %v9791_v22 = vadd.f32 %v9668_v50, %v4366_v21  ;;  %v3564_v3 = vsel %vm2362_vm12, %v2875_v39, %v6414_v52  ;;  %v2603_v50 = vld [vmem:[#allocation6 + $0x32] sm:$0xff]  ;;  %v10801_v21 = vld [vmem:[#allocation29_spill] sm:$0xff]  ;;  %v10802_v52 = vld [vmem:[#allocation94_spill] sm:$0xff] }
 0x619   : > { %v3597_v60 = vpack.c.bf16 %v3564_v3, %v3563_v53  ;;  %v2668_v17 = vmul.f32 %v10801_v21, %v2603_v50  ;;  %v3088_v45 = vmul.f32 %v10805_v51, %v3023_v33  ;;  %v2812_v50 = vld [vmem:[#allocation6 + $0x40] sm:$0xff]  ;;  %v5130_v21 = vld [vmem:[#allocation5 + $0x10] sm:$0xff]  ;;  %v6429_v33 = vunpack.i.l.bf16 %v9729_v16 }
 0x61a   : > { %4793 = vmatmul.bf16.gmra.mxu0 %v3608_v10  ;;  %v10806_v10 = vld [vmem:[#allocation80_spill] sm:$0xff]  ;;  %5158 = vrot.lane.b32.xlu0 %v5130_v21, %s6858_s27 }
 0x61b   : > { %v4284_v48 = vpop.f32.mrf.mxu2  ;;  %v4324_v55 = vpop.f32.mrf.mxu3  ;;  %v3089_v40 = vmul.f32 %v10806_v10, %v3024_v32  ;;  %v3552_v0 = vsel %vm2362_vm12, %v2668_v17, %v6420_v14  ;;  %v2811_v14 = vld [vmem:[#allocation6 + $0x38] sm:$0xff] }
 0x61c   : > { %v4325_v41 = vadd.f32 %v4324_v55, %v4281_v61  ;;  %v6459_v61 = vunpack.i.l.bf16 %v6458_v54  ;;  %v2876_v16 = vmul.f32 %v10766_v9, %v2811_v14  ;;  %v6438_v10 = vpop.permute.xlu2 %6437 }
 0x61d   : > { %v3583_v54 = vsel %vm2362_vm12, %v3089_v40, %v6460_v27  ;;  %v3233_v27 = vld [vmem:[#allocation6 + $0x70] sm:$0xff] }
 0x61e   : > { %v4368_v56 = vadd.f32 %v9571_v2, %v4325_v41  ;;  %v10803_v2 = vld [vmem:[#allocation95_spill] sm:$0xff]  ;;  %v3582_v53 = vsel %vm2362_vm12, %v3088_v45, %v6459_v61  ;;  %v6425_v61 = vunpack.i.h.bf16 %v6423_v29 }
 0x61f   : > { %v9799_v47 = vpop.f32.mrf.mxu1  ;;  %v10804_v20 = vpack.c.bf16 %v10802_v52, %v10803_v2  ;;  %v5131_v29 = vld [vmem:[#allocation5 + $0x18] sm:$0xff] }
 0x620   : > { %4740 = vmatmul.bf16.gmra.mxu3 %v3597_v60  ;;  %v9802_v24 = vadd.f32 %v9681_v42, %v4368_v56  ;;  %v10807_v42 = vld [vmem:[#allocation17_spill] sm:$0xff]  ;;  %v3565_v45 = vsel %vm2362_vm12, %v2876_v16, %v6425_v61  ;;  %5160 = vrot.lane.b32.xlu1 %v5131_v29, %s6858_s27 }
 0x621   : > { %v2669_v55 = vmul.f32 %v10807_v42, %v2604_v49  ;;  %v9821_v49 = vpop.permute.xlu0 %3464  ;;  %v5129_v61 = vld [vmem:[#allocation5 + $0x8] sm:$0xff] }
 0x622   : > { %5981 = vmatmul.msk.bf16.gmra.mxu1 %vm2362_vm12, %v10804_v20  ;;  %v3298_v20 = vmul.f32 %v10752_v7, %v3233_v27  ;;  %v6439_v7 = vunpack.i.l.bf16 %v6438_v10  ;;  %5156 = vrot.lane.b32.xlu2 %v5129_v61, %s6858_s27 }
 0x623   : > { %v4286_v63 = vpop.f32.mrf.mxu2  ;;  %v4327_v39 = vpop.f32.mrf.mxu3  ;;  %v3553_v41 = vsel %vm2362_vm12, %v2669_v55, %v6424_v13 }
 0x624   : > { %v4328_v3 = vadd.f32 %v4327_v39, %v4284_v48  ;;  %v3601_v60 = vpack.c.bf16 %v3553_v41, %v3552_v0  ;;  %v3613_v48 = vpack.c.bf16 %v3583_v54, %v3582_v53  ;;  %v2605_v39 = vld [vmem:[#allocation6 + $0x42] sm:$0xff]  ;;  %v3619_v9 = vpack.c.bf16 %v3298_v20, %v3298_v20  ;;  %v3025_v41 = vld [vmem:[#allocation6 + $0x6e] sm:$0xff]  ;;  %v6453_v29 = vpop.permute.xlu2 %6452 }
 0x625   : > { %v10809_v53 = vld [vmem:[#allocation34_spill] sm:$0xff]  ;;  %v6440_v20 = vunpack.i.h.bf16 %v6438_v10 }
 0x626   : > { %v4371_v56 = vadd.f32 %v9587_v38, %v4328_v3  ;;  %v2877_v38 = vmul.f32 %v10768_v25, %v2812_v50  ;;  %v6435_v25 = vunpack.i.h.bf16 %v9733_v34  ;;  %v2606_v3 = vld [vmem:[#allocation6 + $0x4a] sm:$0xff]  ;;  %v10810_v34 = vld [vmem:[#allocation77_spill] sm:$0xff] }
 0x627   : > { %v9818_v32 = vpop.f32.mrf.mxu1  ;;  %v2671_v54 = vmul.f32 %v10809_v53, %v2606_v3 }
 0x628   : > { %4702 = vmatmul.bf16.gmra.mxu2 %v3601_v60  ;;  %v9824_v13 = vadd.f32 %v9697_v6, %v4371_v56  ;;  %v3566_v2 = vsel %vm2362_vm12, %v2877_v38, %v6429_v33  ;;  %v3090_v56 = vmul.f32 %v10810_v34, %v3025_v41  ;;  %v6444_v38 = vunpack.i.l.bf16 %v9765_v4 }
 0x629   : > { %v3602_v40 = vpack.c.bf16 %v3566_v2, %v3565_v45 }
 0x62a   : > { %4798 = vmatmul.bf16.gmra.mxu0 %v3613_v48  ;;  %v3555_v48 = vsel %vm2362_vm12, %v2671_v54, %v6439_v7  ;;  %v5133_v7 = vld [vmem:[#allocation5 + $0x28] sm:$0xff] }
 0x62b   : > { %v4289_v17 = vpop.f32.mrf.mxu2  ;;  %v4329_v52 = vpop.f32.mrf.mxu3  ;;  %5164 = vrot.lane.b32.xlu0 %v5133_v7, %s6858_s27 }
 0x62c   : > { %v4330_v51 = vadd.f32 %v4329_v52, %v4286_v63  ;;  %v10808_v63 = vld [vmem:[#allocation14_spill] sm:$0xff] }
 0x62d   : > { %v2670_v0 = vmul.f32 %v10808_v63, %v2605_v39  ;;  %v6454_v63 = vunpack.i.l.bf16 %v6453_v29 }
 0x62e   : > { %v4373_v6 = vadd.f32 %v9608_v11, %v4330_v51  ;;  %v3519_v11 = vpop.permute.xlu0 %3518  ;;  %v2813_v51 = vld [vmem:[#allocation6 + $0x48] sm:$0xff] }
 0x62f   : > { %v9833_v42 = vpop.f32.mrf.mxu1  ;;  %v3554_v21 = vsel %vm2362_vm12, %v2670_v0, %v6435_v25  ;;  %v10811_v0 = vld [vmem:[#allocation28_spill] sm:$0xff] }
 0x630   : > { %4745 = vmatmul.bf16.gmra.mxu3 %v3602_v40  ;;  %v9837_v55 = vadd.f32 %v9713_v62, %v4373_v6  ;;  %v3584_v62 = vsel %vm2362_vm12, %v3090_v56, %v3519_v11  ;;  %v3606_v27 = vpack.c.bf16 %v3555_v48, %v3554_v21  ;;  %v6455_v48 = vunpack.i.h.bf16 %v6453_v29 }
 0x631   : > { %v3618_v16 = vpack.c.bf16 %v3584_v62, %v3584_v62 }
 0x632   : > { %5982 = vmatmul.msk.bf16.gmra.mxu1 %vm2362_vm12, %v3619_v9  ;;  %v2607_v9 = vld [vmem:[#allocation6 + $0x52] sm:$0xff] }
 0x633   : > { %v4291_v60 = vpop.f32.mrf.mxu2  ;;  %v4332_v50 = vpop.f32.mrf.mxu3  ;;  %v2672_v3 = vmul.f32 %v10811_v0, %v2607_v9  ;;  %v5136_v9 = vld [vmem:[#allocation5 + $0x40] sm:$0xff] }
 0x634   : > { %v4333_v33 = vadd.f32 %v4332_v50, %v4289_v17  ;;  %v2879_v17 = vmul.f32 %v10771_v19, %v9755_v36  ;;  %v6450_v19 = vunpack.i.h.bf16 %v9769_v15  ;;  %v5134_v50 = vld [vmem:[#allocation5 + $0x30] sm:$0xff]  ;;  %5170 = vrot.lane.b32.xlu0 %v5136_v9, %s6858_s27 }
 0x635   : > { %5166 = vrot.lane.b32.xlu1 %v5134_v50, %s6858_s27 }
 0x636   : > { %v4376_v14 = vadd.f32 %v9626_v5, %v4333_v33  ;;  %v2878_v5 = vmul.f32 %v10770_v58, %v2813_v51  ;;  %v3568_v4 = vsel %vm2362_vm12, %v2879_v17, %v6444_v38  ;;  %v2608_v58 = vld [vmem:[#allocation6 + $0x5a] sm:$0xff]  ;;  %v3556_v54 = vsel %vm2362_vm12, %v2672_v3, %v6450_v19  ;;  %v6463_v38 = vpop.permute.xlu2 %6462 }
 0x637   : > { %v9848_v52 = vpop.f32.mrf.mxu1  ;;  %v6761_v33 = vld [vmem:[#allocation6 + $0x60] sm:$0xff]  ;;  %v6465_v7 = vunpack.i.h.bf16 %v6463_v38 }
 0x638   : > { %4707 = vmatmul.bf16.gmra.mxu2 %v3606_v27  ;;  %v9852_v2 = vadd.f32 %v9731_v43, %v4376_v14  ;;  %v3567_v39 = vsel %vm2362_vm12, %v2878_v5, %v6440_v20  ;;  %v2881_v62 = vmul.f32 %v6761_v33, %v10778_v8  ;;  %v2880_v14 = vmul.f32 %v10777_v31, %v9761_v18  ;;  %v2609_v20 = vld [vmem:[#allocation6 + $0x62] sm:$0xff]  ;;  %v5132_v5 = vld [vmem:[#allocation5 + $0x20] sm:$0xff] }
 0x639   : > { %v3607_v43 = vpack.c.bf16 %v3568_v4, %v3567_v39  ;;  %5162 = vrot.lane.b32.xlu2 %v5132_v5, %s6858_s27  ;;  %v10813_v18 = vld [vmem:[#allocation42_spill] sm:$0xff]  ;;  %v5139_v5 = vld [vmem:[#allocation5 + $0x58] sm:$0xff] }
 0x63a   : > { %4803 = vmatmul.bf16.gmra.mxu0 %v3618_v16  ;;  %v3570_v27 = vsel %vm2362_vm12, %v2881_v62, %v9821_v49  ;;  %v3569_v17 = vsel %vm2362_vm12, %v2880_v14, %v6455_v48  ;;  %v2674_v49 = vmul.f32 %v10813_v18, %v2609_v20  ;;  %v5138_v20 = vld [vmem:[#allocation5 + $0x50] sm:$0xff] }
 0x63b   : > { %v4294_v45 = vpop.f32.mrf.mxu2  ;;  %v4334_v6 = vpop.f32.mrf.mxu3  ;;  %v3612_v51 = vpack.c.bf16 %v3570_v27, %v3569_v17 }
 0x63c   : > { %v4335_v40 = vadd.f32 %v4334_v6, %v4291_v60  ;;  %5176 = vrot.lane.b32.xlu0 %v5139_v5, %s6858_s27 }
 0x63e   : > { %v4378_v25 = vadd.f32 %v9651_v12, %v4335_v40  ;;  %v10812_v12 = vld [vmem:[#allocation26_spill] sm:$0xff] }
 0x63f   : > { %v9861_v36 = vpop.f32.mrf.mxu1  ;;  %v2673_v53 = vmul.f32 %v10812_v12, %v2608_v58 }
 0x640   : > { %4750 = vmatmul.bf16.gmra.mxu3 %v3607_v43  ;;  %v9865_v10 = vadd.f32 %v9745_v30, %v4378_v25  ;;  %v2817_v43 = vld [vmem:[#allocation6 + $0x68] sm:$0xff] }
 0x641   : > { %v3557_v15 = vsel %vm2362_vm12, %v2673_v53, %v6454_v63  ;;  %v2882_v58 = vmul.f32 %v10781_v44, %v2817_v43 }
 0x642   : > { %v3611_v60 = vpack.c.bf16 %v3557_v15, %v3556_v54 }
 0x643   : > { %v4296_v41 = vpop.f32.mrf.mxu2  ;;  %v4337_v11 = vpop.f32.mrf.mxu3  ;;  %v3571_v3 = vsel %vm2362_vm12, %v2882_v58, %v6465_v7 }
 0x644   : > { %v4338_v34 = vadd.f32 %v4337_v11, %v4294_v45  ;;  %v6464_v45 = vunpack.i.l.bf16 %v6463_v38  ;;  %v3617_v53 = vpack.c.bf16 %v3571_v3, %v3571_v3 }
 0x646   : > { %v4381_v56 = vadd.f32 %v9670_v37, %v4338_v34  ;;  %v3558_v40 = vsel %vm2362_vm12, %v2674_v49, %v6464_v45  ;;  %v5135_v34 = vld [vmem:[#allocation5 + $0x38] sm:$0xff] }
 0x647   : > { %v4677_v21 = vpop.f32.mrf.mxu1  ;;  %v3616_v25 = vpack.c.bf16 %v3558_v40, %v3558_v40  ;;  %5168 = vrot.lane.b32.xlu2 %v5135_v34, %s6858_s27 }
 0x648   : > { %4712 = vmatmul.bf16.gmra.mxu2 %v3611_v60  ;;  %v9874_v30 = vadd.f32 %v9767_v59, %v4381_v56 }
 0x64b   : > { %v4299_v37 = vpop.f32.mrf.mxu2  ;;  %v4339_v61 = vpop.f32.mrf.mxu3 }
 0x64c   : > { %v4340_v16 = vadd.f32 %v4339_v61, %v4296_v41  ;;  %v5137_v41 = vld [vmem:[#allocation5 + $0x48] sm:$0xff] }
 0x64d   : > { %5172 = vrot.lane.b32.xlu1 %v5137_v41, %s6858_s27 }
 0x64e   : > { %v4383_v59 = vadd.f32 %v9687_v28, %v4340_v16 }
 0x64f   : > { %v9883_v8 = vpop.f32.mrf.mxu1  ;;  %5174 = vrot.lane.b32.xlu2 %v5138_v20, %s6858_s27 }
 0x650   : > { %4755 = vmatmul.bf16.gmra.mxu3 %v3612_v51  ;;  %v9887_v31 = vadd.f32 %v9786_v1, %v4383_v59 }
 0x653   : > { %v4301_v6 = vpop.f32.mrf.mxu2  ;;  %v4342_v4 = vpop.f32.mrf.mxu3 }
 0x654   : > { %v4343_v39 = vadd.f32 %v4342_v4, %v4299_v37  ;;  %v5140_v4 = vld [vmem:[#allocation5 + $0x60] sm:$0xff] }
 0x655   : > { %5178 = vrot.lane.b32.xlu1 %v5140_v4, %s6858_s27 }
 0x656   : > { %v4386_v29 = vadd.f32 %v9701_v57, %v4343_v39  ;;  %v4774_v28 = vpop.f32.mrf.mxu0 }
 0x657   : > { %v9892_v19 = vpop.f32.mrf.mxu1 }
 0x658   : > { %4717 = vmatmul.bf16.gmra.mxu2 %v3616_v25  ;;  %v9896_v1 = vadd.f32 %v9799_v47, %v4386_v29 }
 0x65b   : > { %v4304_v63 = vpop.f32.mrf.mxu2  ;;  %v4344_v0 = vpop.f32.mrf.mxu3 }
 0x65c   : > { %v4345_v57 = vadd.f32 %v4344_v0, %v4301_v6 }
 0x65e   : > { %v4388_v11 = vadd.f32 %v9716_v35, %v4345_v57  ;;  %v4776_v12 = vpop.f32.mrf.mxu0 }
 0x65f   : > { %v9902_v54 = vpop.f32.mrf.mxu1 }
 0x660   : > { %4760 = vmatmul.bf16.gmra.mxu3 %v3617_v53  ;;  %v9906_v44 = vadd.f32 %v9818_v32, %v4388_v11 }
 0x663   : > { %v4306_v47 = vpop.f32.mrf.mxu2  ;;  %v4347_v15 = vpop.f32.mrf.mxu3 }
 0x664   : > { %v4348_v56 = vadd.f32 %v4347_v15, %v4304_v63 }
 0x666   : > { %v4391_v60 = vadd.f32 %v9735_v26, %v4348_v56 }
 0x667   : > { %v4779_v50 = vpop.f32.mrf.mxu0  ;;  %v9909_v21 = vpop.f32.mrf.mxu1 }
 0x668   : > { %v9912_v35 = vadd.f32 %v9833_v42, %v4391_v60 }
 0x66b   : > { %v4309_v33 = vpop.f32.mrf.mxu2  ;;  %v4349_v62 = vpop.f32.mrf.mxu3 }
 0x66c   : > { %v4350_v48 = vadd.f32 %v4349_v62, %v4306_v47 }
 0x66e   : > { %v4393_v14 = vadd.f32 %v9748_v46, %v4350_v48 }
 0x66f   : > { %v4781_v27 = vpop.f32.mrf.mxu0  ;;  %v9915_v37 = vpop.f32.mrf.mxu1 }
 0x670   : > { %v9918_v32 = vadd.f32 %v9848_v52, %v4393_v14 }
 0x673   : > { %v4311_v61 = vpop.f32.mrf.mxu2  ;;  %v4352_v38 = vpop.f32.mrf.mxu3 }
 0x674   : > { %v4353_v26 = vadd.f32 %v4352_v38, %v4309_v33 }
 0x676   : > { %v4396_v16 = vadd.f32 %v9771_v23, %v4353_v26 }
 0x677   : > { %v9921_v17 = vpop.f32.mrf.mxu0  ;;  %v9923_v42 = vpop.f32.mrf.mxu1 }
 0x678   : > { %v9927_v46 = vadd.f32 %v9861_v36, %v4396_v16  ;;  %v9939_v36 = vld [vmem:[%s10417_s9] ss:$0 sm:$0xff] }
 0x67b   : > { %v4354_v51 = vpop.f32.mrf.mxu3  ;;  %v4688_v59 = vpop.f32.mrf.mxu2 }
 0x67c   : > { %v4689_v23 = vadd.f32 %v4688_v59, %v9791_v22 }
 0x67f   : > { %v9930_v52 = vpop.f32.mrf.mxu0  ;;  %v9932_v45 = vpop.f32.mrf.mxu1 }
 0x683   : > { %v4690_v18 = vpop.f32.mrf.mxu2  ;;  %v4731_v49 = vpop.f32.mrf.mxu3 }
 0x684   : > { %v4732_v6 = vadd.f32 %v4731_v49, %v4689_v23  ;;  %v4691_v22 = vadd.f32 %v4690_v18, %v9802_v24 }
 0x686   : > { %v4775_v40 = vadd.f32 %v4774_v28, %v4732_v6 }
 0x687   : > { %v9941_v39 = vpop.f32.mrf.mxu0  ;;  %v9943_v29 = vpop.f32.mrf.mxu1 }
 0x688   : > { %v4818_v25 = vadd.f32 %v9883_v8, %v4775_v40 }
 0x68a   : > { %v9948_v43 = vadd.f32 %v9939_v36, %v4818_v25 }
 0x68b   : > { %v4693_v9 = vpop.f32.mrf.mxu2  ;;  %v4733_v7 = vpop.f32.mrf.mxu3 }
 0x68c   : > { %6624 = vtanh.f32 %v9948_v43  ;;  %v4734_v28 = vadd.f32 %v4733_v7, %v4691_v22  ;;  %v4694_v8 = vadd.f32 %v4693_v9, %v9824_v13 }
 0x68e   : > { %v4777_v58 = vadd.f32 %v4776_v12, %v4734_v28 }
 0x68f   : > { %v9951_v63 = vpop.f32.mrf.mxu0  ;;  %v9953_v0 = vpop.f32.mrf.mxu1 }
 0x690   : > { %v4820_v3 = vadd.f32 %v9892_v19, %v4777_v58 }
 0x692   : > { %v6625_v57 = vpop.eup %6624  ;;  %v9958_v24 = vadd.f32 %v9939_v36, %v4820_v3 }
 0x693   : > { %v4695_v41 = vpop.f32.mrf.mxu2  ;;  %v4736_v11 = vpop.f32.mrf.mxu3  ;;  %5219 = vrot.lane.b32.xlu2 %v6625_v57, %s6858_s27 }
 0x694   : > { %6626 = vtanh.f32 %v9958_v24  ;;  %v4737_v53 = vadd.f32 %v4736_v11, %v4694_v8  ;;  %v4696_v13 = vadd.f32 %v4695_v41, %v9837_v55 }
 0x696   : > { %v4780_v12 = vadd.f32 %v4779_v50, %v4737_v53 }
 0x697   : > { %v9962_v34 = vpop.f32.mrf.mxu0  ;;  %v9964_v47 = vpop.f32.mrf.mxu1 }
 0x698   : > { %v4823_v19 = vadd.f32 %v9902_v54, %v4780_v12  ;;  %v5983_v12 = vmul.f32 -1.442695, %v9948_v43  ;;  %v10028_v43 = vpop.permute.xlu2 %5156 }
 0x69a   : > { %v6627_v15 = vpop.eup %6626  ;;  %v9969_v56 = vadd.f32 %v9939_v36, %v4823_v19 }
 0x69b   : > { %v4698_v60 = vpop.f32.mrf.mxu2  ;;  %v4738_v33 = vpop.f32.mrf.mxu3  ;;  %5221 = vrot.lane.b32.xlu0 %v6627_v15, %s6858_s27 }
 0x69c   : > { %6628 = vtanh.f32 %v9969_v56  ;;  %v4739_v62 = vadd.f32 %v4738_v33, %v4696_v13  ;;  %v4699_v55 = vadd.f32 %v4698_v60, %v9852_v2 }
 0x69e   : > { %v4782_v50 = vadd.f32 %v4781_v27, %v4739_v62 }
 0x69f   : > { %v9973_v48 = vpop.f32.mrf.mxu0  ;;  %v9975_v14 = vpop.f32.mrf.mxu1 }
 0x6a0   : > { %v4825_v54 = vadd.f32 %v9909_v21, %v4782_v50 }
 0x6a2   : > { %v6629_v61 = vpop.eup %6628  ;;  %v9980_v38 = vadd.f32 %v9939_v36, %v4825_v54 }
 0x6a3   : > { %v4700_v26 = vpop.f32.mrf.mxu2  ;;  %v4741_v16 = vpop.f32.mrf.mxu3  ;;  %5223 = vrot.lane.b32.xlu1 %v6629_v61, %s6858_s27 }
 0x6a4   : > { %6630 = vtanh.f32 %v9980_v38  ;;  %v4742_v20 = vadd.f32 %v4741_v16, %v4699_v55  ;;  %v4701_v2 = vadd.f32 %v4700_v26, %v9865_v10 }
 0x6a6   : > { %v4785_v27 = vadd.f32 %v9921_v17, %v4742_v20 }
 0x6a7   : > { %v9985_v51 = vpop.f32.mrf.mxu0  ;;  %v9987_v59 = vpop.f32.mrf.mxu1 }
 0x6a8   : > { %v4828_v21 = vadd.f32 %v9915_v37, %v4785_v27  ;;  %v10040_v27 = vpop.permute.xlu2 %5162 }
 0x6aa   : > { %v6631_v5 = vpop.eup %6630  ;;  %v9992_v23 = vadd.f32 %v9939_v36, %v4828_v21 }
 0x6ab   : > { %v4703_v18 = vpop.f32.mrf.mxu2  ;;  %v4743_v49 = vpop.f32.mrf.mxu3  ;;  %5225 = vrot.lane.b32.xlu2 %v6631_v5, %s6858_s27 }
 0x6ac   : > { %6632 = vtanh.f32 %v9992_v23  ;;  %v4744_v6 = vadd.f32 %v4743_v49, %v4701_v2  ;;  %v4704_v10 = vadd.f32 %v4703_v18, %v9874_v30 }
 0x6ae   : > { %v4787_v17 = vadd.f32 %v9930_v52, %v4744_v6 }
 0x6af   : > { %v9997_v4 = vpop.f32.mrf.mxu0  ;;  %v9999_v40 = vpop.f32.mrf.mxu1 }
 0x6b0   : > { %v4830_v37 = vadd.f32 %v9923_v42, %v4787_v17 }
 0x6b2   : > { %v6633_v25 = vpop.eup %6632  ;;  %v10004_v22 = vadd.f32 %v9939_v36, %v4830_v37  ;;  %v10053_v37 = vpop.permute.xlu2 %5168 }
 0x6b3   : > { %v4705_v9 = vpop.f32.mrf.mxu2  ;;  %v4746_v7 = vpop.f32.mrf.mxu3  ;;  %5227 = vrot.lane.b32.xlu0 %v6633_v25, %s6858_s27 }
 0x6b4   : > { %6634 = vtanh.f32 %v10004_v22  ;;  %v4747_v28 = vadd.f32 %v4746_v7, %v4704_v10  ;;  %v4706_v30 = vadd.f32 %v4705_v9, %v9887_v31 }
 0x6b6   : > { %v4790_v52 = vadd.f32 %v9941_v39, %v4747_v28 }
 0x6b7   : > { %v10009_v58 = vpop.f32.mrf.mxu0  ;;  %v4849_v3 = vpop.f32.mrf.mxu1 }
 0x6b8   : > { %v4833_v42 = vadd.f32 %v9932_v45, %v4790_v52  ;;  %v5984_v52 = vmul.f32 -1.442695, %v9958_v24 }
 0x6ba   : > { %v6635_v57 = vpop.eup %6634  ;;  %v10014_v8 = vadd.f32 %v9939_v36, %v4833_v42 }
 0x6bb   : > { %v4708_v41 = vpop.f32.mrf.mxu2  ;;  %v4748_v11 = vpop.f32.mrf.mxu3  ;;  %5229 = vrot.lane.b32.xlu1 %v6635_v57, %s6858_s27 }
 0x6bc   : > { %6636 = vtanh.f32 %v10014_v8  ;;  %v4749_v53 = vadd.f32 %v4748_v11, %v4706_v30  ;;  %v4709_v31 = vadd.f32 %v4708_v41, %v9896_v1  ;;  %v10069_v11 = vpop.permute.xlu2 %5174 }
 0x6bd   : > { %6638 = vpow2.f32 %v5983_v12 }
 0x6be   : > { %v4792_v39 = vadd.f32 %v9951_v63, %v4749_v53 }
 0x6bf   : > { %v4806_v19 = vpop.f32.mrf.mxu0 }
 0x6c0   : > { %v4835_v45 = vadd.f32 %v9943_v29, %v4792_v39 }
 0x6c2   : > { %v6637_v15 = vpop.eup %6636  ;;  %v10023_v13 = vadd.f32 %v9939_v36, %v4835_v45 }
 0x6c3   : > { %v4710_v60 = vpop.f32.mrf.mxu2  ;;  %v4751_v33 = vpop.f32.mrf.mxu3  ;;  %5231 = vrot.lane.b32.xlu2 %v6637_v15, %s6858_s27 }
 0x6c4   : > { %6640 = vtanh.f32 %v10023_v13  ;;  %v4752_v62 = vadd.f32 %v4751_v33, %v4709_v31  ;;  %v6639_v50 = vpop.eup %6638  ;;  %v4711_v1 = vadd.f32 %v4710_v60, %v9906_v44 }
 0x6c5   : > { %v10037_v20 = vadd.f32 1.0, %v6639_v50  ;;  %v10093_v50 = vpop.permute.xlu0 %5158 }
 0x6c6   : > { %v4795_v63 = vadd.f32 %v9962_v34, %v4752_v62 }
 0x6c7   : > { %v4931_v19 = vand.u32 2147483648, %v10037_v20  ;;  %vm4925_vm15 = vweird.f32 %v10037_v20  ;;  %v4929_v45 = vand.u32 2147483647, %v10037_v20 }
 0x6c8   : > { %v4838_v29 = vadd.f32 %v9953_v0, %v4795_v63  ;;  %v10086_v63 = vpop.permute.xlu1 %5154 }
 0x6c9   : > { %vm4930_vm1 = vcmp.eq.f32.partialorder %v4929_v45, 8.507059e+37 }
 0x6ca   : > { %v6641_v54 = vpop.eup %6640  ;;  %v10033_v61 = vadd.f32 %v9939_v36, %v4838_v29 }
 0x6cb   : > { %v4713_v55 = vpop.f32.mrf.mxu2  ;;  %v4753_v26 = vpop.f32.mrf.mxu3  ;;  %5233 = vrot.lane.b32.xlu0 %v6641_v54, %s6858_s27 }
 0x6cc   : > { %6642 = vtanh.f32 %v10033_v61  ;;  %v4754_v16 = vadd.f32 %v4753_v26, %v4711_v1  ;;  %v4714_v21 = vadd.f32 %v4713_v55, %v9912_v35  ;;  %v5989_v55 = vmul.f32 -1.442695, %v10014_v8 }
 0x6cd   : > { %6644 = vrcp.f32 %v10037_v20  ;;  %v5987_v8 = vmul.f32 -1.442695, %v9992_v23 }
 0x6ce   : > { %v4797_v34 = vadd.f32 %v9973_v48, %v4754_v16 }
 0x6d0   : > { %v4840_v0 = vadd.f32 %v9964_v47, %v4797_v34  ;;  %v5986_v47 = vmul.f32 -1.442695, %v9980_v38  ;;  %v10101_v34 = vpop.permute.xlu1 %5160 }
 0x6d2   : > { %v6643_v44 = vpop.eup %6642  ;;  %v10046_v5 = vadd.f32 %v9939_v36, %v4840_v0 }
 0x6d3   : > { %v4715_v2 = vpop.f32.mrf.mxu2  ;;  %v4756_v18 = vpop.f32.mrf.mxu3  ;;  %5235 = vrot.lane.b32.xlu1 %v6643_v44, %s6858_s27 }
 0x6d4   : > { %6646 = vtanh.f32 %v10046_v5  ;;  %v4757_v49 = vadd.f32 %v4756_v18, %v4714_v21  ;;  %v6645_v6 = vpop.eup %6644  ;;  %v4716_v10 = vadd.f32 %v4715_v2, %v9918_v32  ;;  %v10105_v44 = vpop.permute.xlu0 %5164 }
 0x6d5   : > { %v4921_v25 = vmul.f32 %v6645_v6, %v10037_v20  ;;  %6648 = vpow2.f32 %v5986_v47  ;;  %vm4926_vm14 = vweird.f32 %v6645_v6 }
 0x6d6   : > { %v4800_v48 = vadd.f32 %v9985_v51, %v4757_v49  ;;  %vm4927_vm0 = vmor %vm4925_vm15, %vm4926_vm14 }
 0x6d7   : > { %v4922_v51 = vsub.f32 1.0, %v4921_v25 }
 0x6d8   : > { %v4843_v17 = vadd.f32 %v9975_v14, %v4800_v48 }
 0x6d9   : > { %v4923_v57 = vmul.f32 %v6645_v6, %v4922_v51 }
 0x6da   : > { %v6647_v35 = vpop.eup %6646  ;;  %v10058_v9 = vadd.f32 %v9939_v36, %v4843_v17 }
 0x6db   : > { %v4718_v7 = vpop.f32.mrf.mxu2  ;;  %v4758_v28 = vpop.f32.mrf.mxu3  ;;  %5237 = vrot.lane.b32.xlu2 %v6647_v35, %s6858_s27 }
 0x6dc   : > { %6650 = vtanh.f32 %v10058_v9  ;;  %v4759_v38 = vadd.f32 %v4758_v28, %v4716_v10  ;;  %v6649_v42 = vpop.eup %6648  ;;  %v4719_v30 = vadd.f32 %v4718_v7, %v9927_v46  ;;  %v5985_v46 = vmul.f32 -1.442695, %v9969_v56  ;;  %v10114_v17 = vpop.permute.xlu0 %5170 }
 0x6dd   : > { %6652 = vpow2.f32 %v5984_v52  ;;  %v5988_v7 = vmul.f32 -1.442695, %v10004_v22 }
 0x6de   : > { %v4802_v14 = vadd.f32 %v9997_v4, %v4759_v38  ;;  %v10073_v4 = vadd.f32 1.0, %v6649_v42 }
 0x6e0   : > { %v4845_v3 = vadd.f32 %v9987_v59, %v4802_v14  ;;  %v4924_v59 = vadd.f32 %v6645_v6, %v4923_v57  ;;  %v4976_v23 = vand.u32 2147483648, %v10073_v4  ;;  %vm4970_vm3 = vweird.f32 %v10073_v4 }
 0x6e1   : > { %v4974_v28 = vand.u32 2147483647, %v10073_v4 }
 0x6e2   : > { %v6651_v32 = vpop.eup %6650  ;;  %v10067_v41 = vadd.f32 %v9939_v36, %v4845_v3  ;;  %v4928_v33 = vsel %vm4927_vm0, %v6645_v6, %v4924_v59  ;;  %v10110_v6 = vpop.permute.xlu1 %5166  ;;  %v4977_v3 = vor.u32 1.1754944e-38, %v4976_v23 }
 0x6e3   : > { %v4720_v53 = vpop.f32.mrf.mxu2  ;;  %v4761_v39 = vpop.f32.mrf.mxu3  ;;  %5239 = vrot.lane.b32.xlu0 %v6651_v32, %s6858_s27  ;;  %vm4975_vm6 = vcmp.eq.f32.partialorder %v4974_v28, 8.507059e+37 }
 0x6e4   : > { %6654 = vtanh.f32 %v10067_v41  ;;  %v4762_v24 = vadd.f32 %v4761_v39, %v4719_v30  ;;  %v6653_v31 = vpop.eup %6652  ;;  %v10131_v57 = vpop.permute.xlu0 %5176 }
 0x6e5   : > { %6656 = vrcp.f32 %v10073_v4 }
 0x6e6   : > { %v4805_v12 = vadd.f32 %v10009_v58, %v4762_v24  ;;  %6658 = vpow2.f32 %v5985_v46  ;;  %v4932_v58 = vor.u32 1.1754944e-38, %v4931_v19  ;;  %v5992_v46 = vmul.f32 -1.442695, %v10046_v5 }
 0x6e8   : > { %v4848_v15 = vadd.f32 %v9999_v40, %v4805_v12  ;;  %v10089_v40 = vadd.f32 1.0, %v6653_v31  ;;  %v10091_v29 = vsel %vm4930_vm1, %v4932_v58, %v4928_v33 }
 0x6ea   : > { %v6655_v60 = vpop.eup %6654  ;;  %v10083_v62 = vadd.f32 %v9939_v36, %v4848_v15  ;;  %v10125_v42 = vpop.permute.xlu1 %5172  ;;  %v4946_v59 = vand.u32 2147483648, %v10089_v40  ;;  %vm4940_vm8 = vweird.f32 %v10089_v40  ;;  %v4944_v12 = vand.u32 2147483647, %v10089_v40 }
 0x6eb   : > { %v4763_v56 = vpop.f32.mrf.mxu3  ;;  %5241 = vrot.lane.b32.xlu1 %v6655_v60, %s6858_s27  ;;  %v6657_v1 = vpop.eup %6656 }
 0x6ec   : > { %6660 = vtanh.f32 %v10083_v62  ;;  %v6659_v26 = vpop.eup %6658  ;;  %v4966_v20 = vmul.f32 %v6657_v1, %v10073_v4  ;;  %vm4971_vm2 = vweird.f32 %v6657_v1  ;;  %v4947_v60 = vor.u32 1.1754944e-38, %v4946_v59 }
 0x6ed   : > { %v5220_v54 = vpop.permute.xlu2 %5219  ;;  %6662 = vrcp.f32 %v10089_v40  ;;  %v10103_v0 = vadd.f32 1.0, %v6659_v26  ;;  %vm4972_vm4 = vmor %vm4970_vm3, %vm4971_vm2  ;;  %vm4945_vm10 = vcmp.eq.f32.partialorder %v4944_v12, 8.507059e+37 }
 0x6ee   : > { %v5258_v36 = vmul.f32 %v5220_v54, %v10091_v29  ;;  %6664 = vpow2.f32 %v5989_v55  ;;  %v4967_v21 = vsub.f32 1.0, %v4966_v20 }
 0x6ef   : > { %6666 = vrcp.f32 %v10103_v0  ;;  %v4961_v55 = vand.u32 2147483648, %v10103_v0  ;;  %vm4955_vm12 = vweird.f32 %v10103_v0  ;;  %v4959_v26 = vand.u32 2147483647, %v10103_v0 }
 0x6f0   : > { %5284 = vrot.lane.b32.xlu0 %v5258_v36, %s6858_s27  ;;  %v4968_v48 = vmul.f32 %v6657_v1, %v4967_v21  ;;  %6668 = vpow2.f32 %v5987_v8 }
 0x6f1   : > { %vm4960_vm14 = vcmp.eq.f32.partialorder %v4959_v26, 8.507059e+37 }
 0x6f2   : > { %v6661_v16 = vpop.eup %6660  ;;  %v4969_v25 = vadd.f32 %v6657_v1, %v4968_v48  ;;  %v10149_v5 = vpop.permute.xlu1 %5178 }
 0x6f3   : > { %5243 = vrot.lane.b32.xlu2 %v6661_v16, %s6858_s27  ;;  %v6663_v2 = vpop.eup %6662  ;;  %v5990_v16 = vmul.f32 -1.442695, %v10023_v13 }
 0x6f4   : > { %v6665_v18 = vpop.eup %6664  ;;  %v4936_v49 = vmul.f32 %v6663_v2, %v10089_v40  ;;  %v4973_v52 = vsel %vm4972_vm4, %v6657_v1, %v4969_v25  ;;  %vm4941_vm7 = vweird.f32 %v6663_v2 }
 0x6f5   : > { %v10112_v47 = vadd.f32 1.0, %v6665_v18  ;;  %v10116_v10 = vpop.eup %6666  ;;  %v10129_v22 = vsel %vm4975_vm6, %v4977_v3, %v4973_v52  ;;  %vm4942_vm9 = vmor %vm4940_vm8, %vm4941_vm7  ;;  %v4962_v18 = vor.u32 1.1754944e-38, %v4961_v55 }
 0x6f6   : > { %v4937_v35 = vsub.f32 1.0, %v4936_v49  ;;  %v6669_v38 = vpop.eup %6668  ;;  %v4951_v14 = vmul.f32 %v10116_v10, %v10103_v0  ;;  %vm4956_vm11 = vweird.f32 %v10116_v10 }
 0x6f7   : > { %6670 = vrcp.f32 %v10112_v47  ;;  %v10127_v32 = vadd.f32 1.0, %v6669_v38  ;;  %vm4957_vm13 = vmor %vm4955_vm12, %vm4956_vm11  ;;  %v5021_v23 = vand.u32 2147483648, %v10112_v47  ;;  %vm5015_vm0 = vweird.f32 %v10112_v47 }
 0x6f8   : > { %v4938_v51 = vmul.f32 %v6663_v2, %v4937_v35  ;;  %6672 = vpow2.f32 %v5988_v7  ;;  %v4952_v39 = vsub.f32 1.0, %v4951_v14  ;;  %v5991_v7 = vmul.f32 -1.442695, %v10033_v61 }
 0x6f9   : > { %6674 = vrcp.f32 %v10127_v32  ;;  %v5019_v28 = vand.u32 2147483647, %v10112_v47  ;;  %v5022_v3 = vor.u32 1.1754944e-38, %v5021_v23  ;;  %v4991_v12 = vand.u32 2147483648, %v10127_v32 }
 0x6fa   : > { %v4939_v53 = vadd.f32 %v6663_v2, %v4938_v51  ;;  %v4953_v15 = vmul.f32 %v10116_v10, %v4952_v39  ;;  %6676 = vpow2.f32 %v5992_v46  ;;  %vm4985_vm4 = vweird.f32 %v10127_v32 }
 0x6fb   : > { %vm5020_vm2 = vcmp.eq.f32.partialorder %v5019_v28, 8.507059e+37  ;;  %v5995_v46 = vmul.f32 -1.442695, %v10083_v62 }
 0x6fc   : > { %v4943_v45 = vsel %vm4942_vm9, %v6663_v2, %v4939_v53  ;;  %v4954_v40 = vadd.f32 %v10116_v10, %v4953_v15 }
 0x6fd   : > { %v10134_v4 = vpop.eup %6670  ;;  %v10147_v58 = vsel %vm4945_vm10, %v4947_v60, %v4943_v45  ;;  %v4992_v60 = vor.u32 1.1754944e-38, %v4991_v12 }
 0x6fe   : > { %v6673_v19 = vpop.eup %6672  ;;  %v5011_v31 = vmul.f32 %v10134_v4, %v10112_v47  ;;  %v4958_v21 = vsel %vm4957_vm13, %v10116_v10, %v4954_v40  ;;  %vm5016_vm15 = vweird.f32 %v10134_v4 }
 0x6ff   : > { %v10145_v33 = vadd.f32 1.0, %v6673_v19  ;;  %v6675_v1 = vpop.eup %6674  ;;  %v10163_v49 = vsel %vm4960_vm14, %v4962_v18, %v4958_v21  ;;  %vm5017_vm1 = vmor %vm5015_vm0, %vm5016_vm15 }
 0x700   : > { %v5012_v54 = vsub.f32 1.0, %v5011_v31  ;;  %v6677_v20 = vpop.eup %6676  ;;  %v4981_v2 = vmul.f32 %v6675_v1, %v10127_v32  ;;  %vm4986_vm3 = vweird.f32 %v6675_v1 }
 0x701   : > { %6678 = vrcp.f32 %v10145_v33  ;;  %v10165_v0 = vadd.f32 1.0, %v6677_v20  ;;  %vm4987_vm6 = vmor %vm4985_vm4, %vm4986_vm3  ;;  %v5006_v26 = vand.u32 2147483648, %v10145_v33  ;;  %vm5000_vm9 = vweird.f32 %v10145_v33 }
 0x702   : > { %v5013_v8 = vmul.f32 %v10134_v4, %v5012_v54  ;;  %6680 = vpow2.f32 %v5990_v16  ;;  %v4982_v48 = vsub.f32 1.0, %v4981_v2  ;;  %v5993_v16 = vmul.f32 -1.442695, %v10058_v9 }
 0x703   : > { %6682 = vrcp.f32 %v10165_v0  ;;  %v5007_v18 = vor.u32 1.1754944e-38, %v5006_v26  ;;  %vm5060_vm13 = vweird.f32 %v10165_v0  ;;  %v5064_v28 = vand.u32 2147483647, %v10165_v0 }
 0x704   : > { %v5014_v35 = vadd.f32 %v10134_v4, %v5013_v8  ;;  %v4983_v51 = vmul.f32 %v6675_v1, %v4982_v48  ;;  %6684 = vpow2.f32 %v5991_v7  ;;  %v5066_v7 = vand.u32 2147483648, %v10165_v0 }
 0x705   : > { %v5226_v30 = vpop.permute.xlu2 %5225  ;;  %vm5065_vm15 = vcmp.eq.f32.partialorder %v5064_v28, 8.507059e+37 }
 0x706   : > { %v5261_v24 = vmul.f32 %v5226_v30, %v10129_v22  ;;  %v5018_v52 = vsel %vm5017_vm1, %v10134_v4, %v5014_v35  ;;  %v4984_v47 = vadd.f32 %v6675_v1, %v4983_v51  ;;  %v4989_v4 = vand.u32 2147483647, %v10127_v32 }
 0x707   : > { %v6679_v10 = vpop.eup %6678  ;;  %v10180_v61 = vsel %vm5020_vm2, %v5022_v3, %v5018_v52  ;;  %v5067_v3 = vor.u32 1.1754944e-38, %v5066_v7 }
 0x708   : > { %5290 = vrot.lane.b32.xlu0 %v5261_v24, %s6858_s27  ;;  %v6681_v38 = vpop.eup %6680  ;;  %v4996_v14 = vmul.f32 %v6679_v10, %v10145_v33  ;;  %v4988_v45 = vsel %vm4987_vm6, %v6675_v1, %v4984_v47  ;;  %vm4990_vm7 = vcmp.eq.f32.partialorder %v4989_v4, 8.507059e+37  ;;  %vm5001_vm8 = vweird.f32 %v6679_v10 }
 0x709   : > { %v10178_v30 = vadd.f32 1.0, %v6681_v38  ;;  %v6683_v59 = vpop.eup %6682  ;;  %v10192_v40 = vsel %vm4990_vm7, %v4992_v60, %v4988_v45  ;;  %v5004_v1 = vand.u32 2147483647, %v10145_v33  ;;  %vm5002_vm10 = vmor %vm5000_vm9, %vm5001_vm8 }
 0x70a   : > { %v4997_v39 = vsub.f32 1.0, %v4996_v14  ;;  %v6685_v19 = vpop.eup %6684  ;;  %v5056_v31 = vmul.f32 %v6683_v59, %v10165_v0  ;;  %vm5061_vm12 = vweird.f32 %v6683_v59 }
 0x70b   : > { %6686 = vrcp.f32 %v10178_v30  ;;  %vm5005_vm11 = vcmp.eq.f32.partialorder %v5004_v1, 8.507059e+37  ;;  %vm5062_vm14 = vmor %vm5060_vm13, %vm5061_vm12  ;;  %v5036_v4 = vand.u32 2147483648, %v10178_v30  ;;  %vm5030_vm1 = vweird.f32 %v10178_v30 }
 0x70c   : > { %v4998_v15 = vmul.f32 %v6679_v10, %v4997_v39  ;;  %6688 = vpow2.f32 %v5995_v46  ;;  %v5057_v62 = vsub.f32 1.0, %v5056_v31 }
 0x70d   : > { %v5222_v56 = vpop.permute.xlu0 %5221  ;;  %v5037_v31 = vor.u32 1.1754944e-38, %v5036_v4 }
 0x70e   : > { %v5259_v36 = vmul.f32 %v5222_v56, %v10147_v58  ;;  %v10190_v56 = vadd.f32 1.0, %v6685_v19  ;;  %v4999_v54 = vadd.f32 %v6679_v10, %v4998_v15  ;;  %v5058_v8 = vmul.f32 %v6683_v59, %v5057_v62 }
 0x710   : > { %5286 = vrot.lane.b32.xlu1 %v5259_v36, %s6858_s27  ;;  %6690 = vrcp.f32 %v10190_v56  ;;  %v5003_v21 = vsel %vm5002_vm10, %v6679_v10, %v4999_v54  ;;  %v5059_v9 = vadd.f32 %v6683_v59, %v5058_v8  ;;  %v5994_v10 = vmul.f32 -1.442695, %v10067_v41 }
 0x711   : > { %v6687_v55 = vpop.eup %6686  ;;  %6692 = vpow2.f32 %v5993_v16  ;;  %v5051_v1 = vand.u32 2147483648, %v10190_v56  ;;  %vm5045_vm6 = vweird.f32 %v10190_v56 }
 0x712   : > { %v6689_v20 = vpop.eup %6688  ;;  %v5026_v2 = vmul.f32 %v6687_v55, %v10178_v30  ;;  %v5063_v52 = vsel %vm5062_vm14, %v6683_v59, %v5059_v9  ;;  %vm5031_vm0 = vweird.f32 %v6687_v55  ;;  %v5034_v59 = vand.u32 2147483647, %v10178_v30 }
 0x713   : > { %v10204_v48 = vadd.f32 1.0, %v6689_v20  ;;  %v10216_v41 = vsel %vm5065_vm15, %v5067_v3, %v5063_v52  ;;  %vm5032_vm2 = vmor %vm5030_vm1, %vm5031_vm0 }
 0x714   : > { %v5027_v35 = vsub.f32 1.0, %v5026_v2  ;;  %vm5035_vm3 = vcmp.eq.f32.partialorder %v5034_v59, 8.507059e+37  ;;  %v5052_v2 = vor.u32 1.1754944e-38, %v5051_v1 }
 0x715   : > { %v5224_v13 = vpop.permute.xlu1 %5223  ;;  %6694 = vrcp.f32 %v10204_v48  ;;  %vm5105_vm10 = vweird.f32 %v10204_v48  ;;  %v5109_v7 = vand.u32 2147483647, %v10204_v48 }
 0x716   : > { %v5260_v25 = vmul.f32 %v5224_v13, %v10163_v49  ;;  %v10202_v13 = vsel %vm5005_vm11, %v5007_v18, %v5003_v21  ;;  %v6691_v23 = vpop.eup %6690  ;;  %v5028_v51 = vmul.f32 %v6687_v55, %v5027_v35  ;;  %6696 = vpow2.f32 %v5994_v10 }
 0x717   : > { %v6693_v38 = vpop.eup %6692  ;;  %v5041_v14 = vmul.f32 %v6691_v23, %v10190_v56  ;;  %vm5046_vm4 = vweird.f32 %v6691_v23  ;;  %vm5110_vm12 = vcmp.eq.f32.partialorder %v5109_v7, 8.507059e+37 }
 0x718   : > { %5288 = vrot.lane.b32.xlu2 %v5260_v25, %s6858_s27  ;;  %v5029_v39 = vadd.f32 %v6687_v55, %v5028_v51  ;;  %vm5047_vm7 = vmor %vm5045_vm6, %vm5046_vm4 }
 0x719   : > { %v5042_v0 = vsub.f32 1.0, %v5041_v14 }
 0x71a   : > { %v5033_v19 = vsel %vm5032_vm2, %v6687_v55, %v5029_v39  ;;  %v5049_v55 = vand.u32 2147483647, %v10190_v56 }
 0x71b   : > { %v6695_v12 = vpop.eup %6694  ;;  %v5043_v45 = vmul.f32 %v6691_v23, %v5042_v0 }
 0x71c   : > { %v6697_v46 = vpop.eup %6696  ;;  %v5101_v15 = vmul.f32 %v6695_v12, %v10204_v48  ;;  %vm5050_vm8 = vcmp.eq.f32.partialorder %v5049_v55, 8.507059e+37  ;;  %vm5106_vm9 = vweird.f32 %v6695_v12  ;;  %v5195_v55 = vmul.f32 %v10093_v50, %v10163_v49 }
 0x71d   : > { %v5232_v53 = vpop.permute.xlu2 %5231  ;;  %v10225_v60 = vadd.f32 1.0, %v6697_v46  ;;  %v5044_v62 = vadd.f32 %v6691_v23, %v5043_v45  ;;  %vm5107_vm11 = vmor %vm5105_vm10, %vm5106_vm9  ;;  %v5198_v50 = vmul.f32 %v10105_v44, %v10202_v13  ;;  %v5197_v44 = vmul.f32 %v10040_v27, %v10192_v40 }
 0x71e   : > { %v5264_v24 = vmul.f32 %v5232_v53, %v10180_v61  ;;  %v10214_v53 = vadd.f32 1.0, %v6693_v38  ;;  %v5102_v30 = vsub.f32 1.0, %v5101_v15 }
 0x71f   : > { %v5048_v20 = vsel %vm5047_vm7, %v6691_v23, %v5044_v62  ;;  %v5096_v45 = vand.u32 2147483648, %v10225_v60  ;;  %vm5090_vm2 = vweird.f32 %v10225_v60 }
 0x720   : > { %5296 = vrot.lane.b32.xlu0 %v5264_v24, %s6858_s27  ;;  %6698 = vrcp.f32 %v10214_v53  ;;  %v5103_v21 = vmul.f32 %v6695_v12, %v5102_v30  ;;  %v10236_v8 = vsel %vm5050_vm8, %v5052_v2, %v5048_v20  ;;  %v5081_v39 = vand.u32 2147483648, %v10214_v53 }
 0x721   : > { %6700 = vrcp.f32 %v10225_v60  ;;  %vm5075_vm14 = vweird.f32 %v10214_v53 }
 0x722   : > { %v5104_v35 = vadd.f32 %v6695_v12, %v5103_v21  ;;  %v5196_v21 = vmul.f32 %v10101_v34, %v10129_v22 }
 0x724   : > { %v5108_v28 = vsel %vm5107_vm11, %v6695_v12, %v5104_v35  ;;  %v5082_v12 = vor.u32 1.1754944e-38, %v5081_v39 }
 0x725   : > { %v5228_v32 = vpop.permute.xlu0 %5227 }
 0x726   : > { %v5262_v36 = vmul.f32 %v5228_v32, %v10192_v40  ;;  %v10227_v32 = vsel %vm5035_vm3, %v5037_v31, %v5033_v19  ;;  %v6699_v26 = vpop.eup %6698  ;;  %v5097_v31 = vor.u32 1.1754944e-38, %v5096_v45 }
 0x727   : > { %v5071_v16 = vmul.f32 %v6699_v26, %v10214_v53  ;;  %v6701_v56 = vpop.eup %6700  ;;  %vm5076_vm13 = vweird.f32 %v6699_v26 }
 0x728   : > { %5292 = vrot.lane.b32.xlu1 %v5262_v36, %s6858_s27  ;;  %v5086_v10 = vmul.f32 %v6701_v56, %v10225_v60  ;;  %vm5077_vm15 = vmor %vm5075_vm14, %vm5076_vm13  ;;  %vm5091_vm1 = vweird.f32 %v6701_v56 }
 0x729   : > { %vm5092_vm3 = vmor %vm5090_vm2, %vm5091_vm1 }
 0x72a   : > { %v5087_v3 = vsub.f32 1.0, %v5086_v10 }
 0x72d   : > { %v5230_v33 = vpop.permute.xlu1 %5229 }
 0x72e   : > { %v5263_v25 = vmul.f32 %v5230_v33, %v10202_v13  ;;  %v5072_v33 = vsub.f32 1.0, %v5071_v16 }
 0x730   : > { %5294 = vrot.lane.b32.xlu2 %v5263_v25, %s6858_s27  ;;  %v5111_v25 = vand.u32 2147483648, %v10204_v48  ;;  %v5073_v23 = vmul.f32 %v6699_v26, %v5072_v33  ;;  %v5079_v48 = vand.u32 2147483647, %v10214_v53  ;;  %v5094_v53 = vand.u32 2147483647, %v10225_v60 }
 0x732   : > { %v5112_v38 = vor.u32 1.1754944e-38, %v5111_v25  ;;  %v5074_v52 = vadd.f32 %v6699_v26, %v5073_v23  ;;  %vm5080_vm0 = vcmp.eq.f32.partialorder %v5079_v48, 8.507059e+37  ;;  %vm5095_vm4 = vcmp.eq.f32.partialorder %v5094_v53, 8.507059e+37 }
 0x733   : > { %v5201_v48 = vmul.f32 %v10114_v17, %v10236_v8 }
 0x734   : > { %v10244_v51 = vsel %vm5110_vm12, %v5112_v38, %v5108_v28  ;;  %v5078_v0 = vsel %vm5077_vm15, %v6699_v26, %v5074_v52 }
 0x735   : > { %v5238_v47 = vpop.permute.xlu2 %5237  ;;  %v10251_v4 = vsel %vm5080_vm0, %v5082_v12, %v5078_v0  ;;  %v5200_v0 = vmul.f32 %v10053_v37, %v10227_v32  ;;  %v5205_v37 = vmul.f32 %v10149_v5, %v10244_v51 }
 0x736   : > { %v5267_v24 = vmul.f32 %v5238_v47, %v10216_v41 }
 0x738   : > { %5302 = vrot.lane.b32.xlu0 %v5267_v24, %s6858_s27  ;;  %v5088_v24 = vmul.f32 %v6701_v56, %v5087_v3 }
 0x73a   : > { %v5089_v46 = vadd.f32 %v6701_v56, %v5088_v24 }
 0x73c   : > { %v5093_v15 = vsel %vm5092_vm3, %v6701_v56, %v5089_v46 }
 0x73d   : > { %v5234_v54 = vpop.permute.xlu0 %5233 }
 0x73e   : > { %v5265_v36 = vmul.f32 %v5234_v54, %v10227_v32  ;;  %v10258_v54 = vsel %vm5095_vm4, %v5097_v31, %v5093_v15 }
 0x740   : > { %5298 = vrot.lane.b32.xlu1 %v5265_v36, %s6858_s27  ;;  %v5193_v36 = vmul.f32 %v10086_v63, %v10091_v29 }
 0x745   : > { %v5236_v18 = vpop.permute.xlu1 %5235 }
 0x746   : > { %v5266_v9 = vmul.f32 %v5236_v18, %v10236_v8  ;;  %v5194_v18 = vmul.f32 %v10028_v43, %v10147_v58  ;;  %v5199_v43 = vmul.f32 %v10110_v6, %v10180_v61  ;;  %v5202_v6 = vmul.f32 %v10125_v42, %v10216_v41 }
 0x747   : > { %v5204_v42 = vmul.f32 %v10131_v57, %v10258_v54  ;;  %v5203_v57 = vmul.f32 %v10069_v11, %v10251_v4 }
 0x748   : > { %5300 = vrot.lane.b32.xlu2 %v5266_v9, %s6858_s27 }
 0x74d   : > { %v5244_v14 = vpop.permute.xlu2 %5243 }
 0x74e   : > { %v5270_v47 = vmul.f32 %v5244_v14, %v10244_v51 }
 0x750   : > { %5308 = vrot.lane.b32.xlu0 %v5270_v47, %s6858_s27 }
 0x755   : > { %v5240_v59 = vpop.permute.xlu0 %5239 }
 0x756   : > { %v5268_v19 = vmul.f32 %v5240_v59, %v10251_v4 }
 0x758   : > { %5304 = vrot.lane.b32.xlu1 %v5268_v19, %s6858_s27 }
 0x75d   : > { %v5242_v62 = vpop.permute.xlu1 %5241 }
 0x75e   : > { %v5269_v30 = vmul.f32 %v5242_v62, %v10258_v54 }
 0x760   : > { %5306 = vrot.lane.b32.xlu2 %v5269_v30, %s6858_s27 }
 0x762   : > { %v5285_v26 = vpop.permute.xlu0 %5284 }
 0x763   : > { %v5323_v1 = vadd.f32 %v5285_v26, %v5193_v36 }
 0x765   : > { %6702 = vtanh.f32 %v5323_v1 }
 0x768   : > { %5427 = vrot.lane.b32.xlu2 %v5323_v1, %s6857_s24 }
 0x76b   : > { %v6703_v60 = vpop.eup %6702 }
 0x76c   : > { %5362 = vrot.lane.b32.xlu1 %v6703_v60, %s6858_s27 }
 0x772   : > { %v5289_v16 = vpop.permute.xlu2 %5288 }
 0x773   : > { %v5325_v20 = vadd.f32 %v5289_v16, %v5195_v55 }
 0x775   : > { %5431 = vrot.lane.b32.xlu1 %v5325_v20, %s6857_s24 }
 0x77a   : > { %v5291_v2 = vpop.permute.xlu0 %5290 }
 0x77b   : > { %v5326_v63 = vadd.f32 %v5291_v2, %v5196_v21 }
 0x77d   : > { %6704 = vtanh.f32 %v5326_v63 }
 0x782   : > { %v5287_v33 = vpop.permute.xlu1 %5286 }
 0x783   : > { %v6705_v35 = vpop.eup %6704  ;;  %v5324_v9 = vadd.f32 %v5287_v33, %v5194_v18 }
 0x784   : > { %5368 = vrot.lane.b32.xlu1 %v6705_v35, %s6858_s27 }
 0x785   : > { %6706 = vtanh.f32 %v5324_v9  ;;  %5429 = vrot.lane.b32.xlu0 %v5324_v9, %s6857_s24 }
 0x786   : > { %6708 = vtanh.f32 %v5325_v20 }
 0x78a   : > { %v5295_v56 = vpop.permute.xlu2 %5294 }
 0x78b   : > { %v6707_v34 = vpop.eup %6706  ;;  %v5328_v25 = vadd.f32 %v5295_v56, %v5198_v50 }
 0x78c   : > { %v6709_v7 = vpop.eup %6708  ;;  %5364 = vrot.lane.b32.xlu2 %v6707_v34, %s6858_s27 }
 0x78d   : > { %5366 = vrot.lane.b32.xlu0 %v6709_v7, %s6858_s27  ;;  %5437 = vrot.lane.b32.xlu1 %v5328_v25, %s6857_s24 }
 0x792   : > { %v5297_v23 = vpop.permute.xlu0 %5296 }
 0x793   : > { %v5329_v10 = vadd.f32 %v5297_v23, %v5199_v43 }
 0x794   : > { %5433 = vrot.lane.b32.xlu2 %v5326_v63, %s6857_s24 }
 0x795   : > { %6710 = vtanh.f32 %v5329_v10 }
 0x79a   : > { %v5293_v28 = vpop.permute.xlu1 %5292 }
 0x79b   : > { %v6711_v38 = vpop.eup %6710  ;;  %v5327_v14 = vadd.f32 %v5293_v28, %v5197_v44 }
 0x79c   : > { %5374 = vrot.lane.b32.xlu1 %v6711_v38, %s6858_s27 }
 0x79d   : > { %6712 = vtanh.f32 %v5327_v14  ;;  %5435 = vrot.lane.b32.xlu0 %v5327_v14, %s6857_s24 }
 0x79e   : > { %6714 = vtanh.f32 %v5328_v25 }
 0x7a2   : > { %v5301_v39 = vpop.permute.xlu2 %5300 }
 0x7a3   : > { %v6713_v52 = vpop.eup %6712  ;;  %v5331_v24 = vadd.f32 %v5301_v39, %v5201_v48 }
 0x7a4   : > { %v6715_v3 = vpop.eup %6714  ;;  %5370 = vrot.lane.b32.xlu2 %v6713_v52, %s6858_s27 }
 0x7a5   : > { %5372 = vrot.lane.b32.xlu0 %v6715_v3, %s6858_s27 }
 0x7aa   : > { %v5303_v47 = vpop.permute.xlu0 %5302 }
 0x7ab   : > { %v5332_v27 = vadd.f32 %v5303_v47, %v5202_v6 }
 0x7ac   : > { %5439 = vrot.lane.b32.xlu2 %v5329_v10, %s6857_s24 }
 0x7ad   : > { %6716 = vtanh.f32 %v5332_v27 }
 0x7b2   : > { %v5299_v12 = vpop.permute.xlu1 %5298 }
 0x7b3   : > { %v6717_v59 = vpop.eup %6716  ;;  %v5330_v46 = vadd.f32 %v5299_v12, %v5200_v0 }
 0x7b4   : > { %5380 = vrot.lane.b32.xlu1 %v6717_v59, %s6858_s27 }
 0x7b5   : > { %6718 = vtanh.f32 %v5330_v46  ;;  %5441 = vrot.lane.b32.xlu0 %v5330_v46, %s6857_s24 }
 0x7b6   : > { %6720 = vtanh.f32 %v5331_v24 }
 0x7ba   : > { %v5307_v19 = vpop.permute.xlu2 %5306 }
 0x7bb   : > { %v6719_v45 = vpop.eup %6718  ;;  %v5334_v53 = vadd.f32 %v5307_v19, %v5204_v42 }
 0x7bc   : > { %v6721_v17 = vpop.eup %6720  ;;  %5376 = vrot.lane.b32.xlu2 %v6719_v45, %s6858_s27 }
 0x7bd   : > { %6722 = vtanh.f32 %v5334_v53  ;;  %5378 = vrot.lane.b32.xlu0 %v6721_v17, %s6858_s27 }
 0x7c2   : > { %v5428_v15 = vpop.permute.xlu2 %5427  ;;  %v5309_v31 = vpop.permute.xlu0 %5308 }
 0x7c3   : > { %v6723_v62 = vpop.eup %6722  ;;  %5466 = vst.msk [vmem:[#allocation5] sm:$0xff] %vm3932_vm5, %v5428_v15  ;;  %v5335_v30 = vadd.f32 %v5309_v31, %v5205_v37 }
 0x7c5   : > { %6724 = vtanh.f32 %v5335_v30  ;;  %5384 = vrot.lane.b32.xlu0 %v6723_v62, %s6858_s27 }
 0x7ca   : > { %v5305_v36 = vpop.permute.xlu1 %5304 }
 0x7cb   : > { %v6725_v26 = vpop.eup %6724  ;;  %v5333_v1 = vadd.f32 %v5305_v36, %v5203_v57 }
 0x7cc   : > { %5386 = vrot.lane.b32.xlu1 %v6725_v26, %s6858_s27 }
 0x7cd   : > { %6726 = vtanh.f32 %v5333_v1  ;;  %5447 = vrot.lane.b32.xlu0 %v5333_v1, %s6857_s24 }
 0x7d3   : > { %v6727_v5 = vpop.eup %6726 }
 0x7d4   : > { %5443 = vrot.lane.b32.xlu1 %v5331_v24, %s6857_s24  ;;  %5382 = vrot.lane.b32.xlu2 %v6727_v5, %s6858_s27 }
 0x7dc   : > { %5449 = vrot.lane.b32.xlu1 %v5334_v53, %s6857_s24  ;;  %5445 = vrot.lane.b32.xlu2 %v5332_v27, %s6857_s24 }
 0x7de   : > { %v5363_v60 = vpop.permute.xlu1 %5362 }
 0x7df   : > { %v5401_v11 = vmul.f32 %v5363_v60, %v10091_v29 }
 0x7e1   : > { %5492 = vrot.lane.b32.xlu0 %v5401_v11, %s6856_s18 }
 0x7e4   : > { %5451 = vrot.lane.b32.xlu2 %v5335_v30, %s6857_s24 }
 0x7e6   : > { %v5365_v55 = vpop.permute.xlu2 %5364 }
 0x7e7   : > { %v5402_v16 = vmul.f32 %v5365_v55, %v10147_v58  ;;  %v5432_v20 = vpop.permute.xlu1 %5431 }
 0x7e8   : > { %5468 = vst.msk [vmem:[#allocation5 + $0x10] sm:$0xff] %vm3932_vm5, %v5432_v20 }
 0x7e9   : > { %5494 = vrot.lane.b32.xlu1 %v5402_v16, %s6856_s18 }
 0x7ee   : > { %v5434_v21 = vpop.permute.xlu2 %5433 }
 0x7ef   : > { %5469 = vst.msk [vmem:[#allocation5 + $0x18] sm:$0xff] %vm3932_vm5, %v5434_v21 }
 0x7f6   : > { %v5369_v2 = vpop.permute.xlu1 %5368 }
 0x7f7   : > { %v5404_v63 = vmul.f32 %v5369_v2, %v10129_v22  ;;  %v5430_v18 = vpop.permute.xlu0 %5429 }
 0x7f8   : > { %5467 = vst.msk [vmem:[#allocation5 + $0x8] sm:$0xff] %vm3932_vm5, %v5430_v18 }
 0x7f9   : > { %5498 = vrot.lane.b32.xlu0 %v5404_v63, %s6856_s18 }
 0x7fe   : > { %v5371_v29 = vpop.permute.xlu2 %5370 }
 0x7ff   : > { %v5405_v33 = vmul.f32 %v5371_v29, %v10192_v40  ;;  %v5367_v58 = vpop.permute.xlu0 %5366  ;;  %v5438_v35 = vpop.permute.xlu1 %5437 }
 0x800   : > { %v5403_v9 = vmul.f32 %v5367_v58, %v10163_v49  ;;  %5471 = vst.msk [vmem:[#allocation5 + $0x28] sm:$0xff] %vm3932_vm5, %v5438_v35 }
 0x801   : > { %5500 = vrot.lane.b32.xlu1 %v5405_v33, %s6856_s18 }
 0x802   : > { %5496 = vrot.lane.b32.xlu2 %v5403_v9, %s6856_s18 }
 0x806   : > { %v5440_v50 = vpop.permute.xlu2 %5439 }
 0x807   : > { %5472 = vst.msk [vmem:[#allocation5 + $0x30] sm:$0xff] %vm3932_vm5, %v5440_v50 }
 0x80e   : > { %v5375_v22 = vpop.permute.xlu1 %5374 }
 0x80f   : > { %v5407_v56 = vmul.f32 %v5375_v22, %v10180_v61  ;;  %v5436_v34 = vpop.permute.xlu0 %5435 }
 0x810   : > { %5470 = vst.msk [vmem:[#allocation5 + $0x20] sm:$0xff] %vm3932_vm5, %v5436_v34 }
 0x811   : > { %5504 = vrot.lane.b32.xlu0 %v5407_v56, %s6856_s18 }
 0x816   : > { %v5377_v40 = vpop.permute.xlu2 %5376 }
 0x817   : > { %v5408_v49 = vmul.f32 %v5377_v40, %v10227_v32  ;;  %v5373_v25 = vpop.permute.xlu0 %5372 }
 0x818   : > { %v5406_v7 = vmul.f32 %v5373_v25, %v10202_v13 }
 0x819   : > { %5506 = vrot.lane.b32.xlu1 %v5408_v49, %s6856_s18 }
 0x81a   : > { %5502 = vrot.lane.b32.xlu2 %v5406_v7, %s6856_s18 }
 0x826   : > { %v5381_v43 = vpop.permute.xlu1 %5380 }
 0x827   : > { %v5410_v23 = vmul.f32 %v5381_v43, %v10216_v41  ;;  %v5442_v10 = vpop.permute.xlu0 %5441 }
 0x828   : > { %5473 = vst.msk [vmem:[#allocation5 + $0x38] sm:$0xff] %vm3932_vm5, %v5442_v10 }
 0x829   : > { %5510 = vrot.lane.b32.xlu0 %v5410_v23, %s6856_s18 }
 0x82e   : > { %v5383_v61 = vpop.permute.xlu2 %5382 }
 0x82f   : > { %v5411_v44 = vmul.f32 %v5383_v61, %v10251_v4  ;;  %v5379_v28 = vpop.permute.xlu0 %5378 }
 0x830   : > { %v5409_v32 = vmul.f32 %v5379_v28, %v10236_v8 }
 0x831   : > { %5512 = vrot.lane.b32.xlu1 %v5411_v44, %s6856_s18 }
 0x832   : > { %5508 = vrot.lane.b32.xlu2 %v5409_v32, %s6856_s18 }
 0x836   : > { %v5446_v13 = vpop.permute.xlu2 %5445 }
 0x837   : > { %5475 = vst.msk [vmem:[#allocation5 + $0x48] sm:$0xff] %vm3932_vm5, %v5446_v13  ;;  %v5385_v38 = vpop.permute.xlu0 %5384 }
 0x838   : > { %v5412_v41 = vmul.f32 %v5385_v38, %v10258_v54 }
 0x83a   : > { %5514 = vrot.lane.b32.xlu2 %v5412_v41, %s6856_s18 }
 0x83e   : > { %v5387_v14 = vpop.permute.xlu1 %5386  ;;  %v5452_v52 = vpop.permute.xlu2 %5451 }
 0x83f   : > { %v5413_v3 = vmul.f32 %v5387_v14, %v10244_v51  ;;  %5478 = vst.msk [vmem:[#allocation5 + $0x60] sm:$0xff] %vm3932_vm5, %v5452_v52  ;;  %v5448_v4 = vpop.permute.xlu0 %5447 }
 0x840   : > { %5476 = vst.msk [vmem:[#allocation5 + $0x50] sm:$0xff] %vm3932_vm5, %v5448_v4 }
 0x841   : > { %5516 = vrot.lane.b32.xlu0 %v5413_v3, %s6856_s18 }
 0x846   : > { %v5444_v8 = vpop.permute.xlu1 %5443 }
 0x847   : > { %5474 = vst.msk [vmem:[#allocation5 + $0x40] sm:$0xff] %vm3932_vm5, %v5444_v8 }
 0x84e   : > { %v5450_v6 = vpop.permute.xlu1 %5449 }
 0x84f   : > { %5477 = vst.msk [vmem:[#allocation5 + $0x58] sm:$0xff] %vm3932_vm5, %v5450_v6 }
 0x853   : > { %v5493_v54 = vpop.permute.xlu0 %5492 }
 0x854   : > { %5531 = vst.msk [vmem:[#allocation4 + $0x8] sm:$0xff] %vm3932_vm5, %v5493_v54 }
 0x85b   : > { %v5495_v47 = vpop.permute.xlu1 %5494 }
 0x85c   : > { %5532 = vst.msk [vmem:[#allocation4 + $0x10] sm:$0xff] %vm3932_vm5, %v5495_v47  ;;  %v5497_v51 = vpop.permute.xlu2 %5496 }
 0x85d   : > { %5533 = vst.msk [vmem:[#allocation4 + $0x18] sm:$0xff] %vm3932_vm5, %v5497_v51 }
 0x86b   : > { %v5499_v27 = vpop.permute.xlu0 %5498 }
 0x86c   : > { %5534 = vst.msk [vmem:[#allocation4 + $0x20] sm:$0xff] %vm3932_vm5, %v5499_v27 }
 0x873   : > { %v5501_v39 = vpop.permute.xlu1 %5500 }
 0x874   : > { %5535 = vst.msk [vmem:[#allocation4 + $0x28] sm:$0xff] %vm3932_vm5, %v5501_v39  ;;  %v5503_v48 = vpop.permute.xlu2 %5502 }
 0x875   : > { %5536 = vst.msk [vmem:[#allocation4 + $0x30] sm:$0xff] %vm3932_vm5, %v5503_v48 }
 0x883   : > { %v5505_v0 = vpop.permute.xlu0 %5504 }
 0x884   : > { %5537 = vst.msk [vmem:[#allocation4 + $0x38] sm:$0xff] %vm3932_vm5, %v5505_v0 }
 0x88b   : > { %v5507_v24 = vpop.permute.xlu1 %5506 }
 0x88c   : > { %5538 = vst.msk [vmem:[#allocation4 + $0x40] sm:$0xff] %vm3932_vm5, %v5507_v24  ;;  %v5509_v12 = vpop.permute.xlu2 %5508 }
 0x88d   : > { %5539 = vst.msk [vmem:[#allocation4 + $0x48] sm:$0xff] %vm3932_vm5, %v5509_v12 }
 0x894   : > { %v5515_v59 = vpop.permute.xlu2 %5514 }
 0x895   : > { %5542 = vst.msk [vmem:[#allocation4 + $0x60] sm:$0xff] %vm3932_vm5, %v5515_v59 }
 0x89b   : > { %v5511_v46 = vpop.permute.xlu0 %5510 }
 0x89c   : > { %5540 = vst.msk [vmem:[#allocation4 + $0x50] sm:$0xff] %vm3932_vm5, %v5511_v46 }
 0x8a3   : > { %v5513_v42 = vpop.permute.xlu1 %5512 }
 0x8a4   : > { %5541 = vst.msk [vmem:[#allocation4 + $0x58] sm:$0xff] %vm3932_vm5, %v5513_v42 }
 0x8b0   : > { %5547 = sbr.rel (%p5996_p5) target bundleno = 2509 (0x9cd), region = 76 }
 0x8b3   : > { %v5517_v19 = vpop.permute.xlu0 %5516 }
 0x8b4   : > { %5543 = vst.msk [vmem:[#allocation4 + $0x68] sm:$0xff] %vm3932_vm5, %v5517_v19 }
 0x8b5   : > { %5556 = vmatpush.msra.mxu0 %v5517_v19  ;;  %v5578_v45 = vld [vmem:[%s10418_s10 + $0x18] sm:$0xff]  ;;  %v5577_v53 = vld [vmem:[%s10418_s10 + $0x10] sm:$0xff]  ;;  %v5576_v17 = vld [vmem:[%s10418_s10 + $0x8] sm:$0xff]  ;;  %vm5549_vm6 = vcmask 850944   ;;  %vm5573_vm7 = vcmask 254976   ;;  %vm5606_vm8 = vcmask 58368  }
 0x8b6   : > { %5598 = vmatpush.msra.mxu1 %v5578_v45  ;;  %v5548_v37 = vld [vmem:[%s10411_s3] sm:$0x3] }
 0x8b7   : > { %5557 = vmatpush.msra.mxu0 %v5515_v59  ;;  %v5575_v15 = vld [vmem:[%s10418_s10] sm:$0xff] }
 0x8b8   : > { %5599 = vmatpush.msra.mxu1 %v5577_v53  ;;  %v6762_v62 = vld [vmem:[%s10419_s11] ss:$0 sm:$0xff] }
 0x8b9   : > { %5558 = vmatpush.msra.mxu0 %v5513_v42 }
 0x8ba   : > { %5600 = vmatpush.msra.mxu1 %v5576_v17 }
 0x8bb   : > { %5559 = vmatpush.msra.mxu0 %v5511_v46 }
 0x8bc   : > { %5601 = vmatpush.msra.mxu1 %v5575_v15 }
 0x8bd   : > { %5560 = vmatpush.msra.mxu0 %v5509_v12 }
 0x8bf   : > { %5561 = vmatpush.msra.mxu0 %v5507_v24 }
 0x8c1   : > { %5562 = vmatpush.msra.mxu0 %v5505_v0 }
 0x8c3   : > { %5563 = vmatpush.msra.mxu0 %v5503_v48 }
 0x8c5   : > { %5564 = vmatpush.msra.mxu0 %v5501_v39 }
 0x8c7   : > { %5565 = vmatpush.msra.mxu0 %v5499_v27 }
 0x8c9   : > { %5566 = vmatpush.msra.mxu0 %v5497_v51 }
 0x8cb   : > { %5567 = vmatpush.msra.mxu0 %v5495_v47 }
 0x8cd   : > { %5568 = vmatpush.msra.mxu0 %v5493_v54 }
 0x8ce   : > { %5997 = vmatmul.msk.f32.vlgmr.msra.gmra.mxu0 %vm5549_vm6, %v5548_v37 }
 0x94b   : > { %v5570_v31 = vpop.f32.mrf.mxu0 }
 0x94c   : > { %5574 = vst.msk [vmem:[#allocation9] sm:$0x3] %vm5573_vm7, %v5570_v31  ;;  %5998 = vmatmul.msk.f32.vlgmr.msra.gmra.mxu1 %vm3932_vm5, %v5570_v31 }
 0x9c9   : > { %v5603_v30 = vpop.f32.mrf.mxu1 }
 0x9ca   : > { %v5604_v57 = vadd.f32 %v6762_v62, %v5603_v30 }
 0x9cc   : > { %5607 = vst.msk [vmem:[#allocation7] sm:$0x3] %vm5606_vm8, %v5604_v57 }
 0x9cd PF: > { %p6071_p6 = scmp.eq.s32.totalorder %s6937_s26, 2  ;;  %s6859_s23 = smov [#allocation7]  }
 0x9ce   : > { %s5614_s28 = sshll.u32 %s6859_s23, 4  ;;  %s5616_s24 = sshll.u32 %s10420_s12, 4  ;;  %s5615_s28 = int_to_ptr.vmem [resolvable:$true] %s5614_s28  ;;  %s5617_s24 = int_to_ptr.hbm [resolvable:$true] %s5616_s24 }
 0x9cf   : > { %6064 = dma.vmem_to_hbm [thread:$0]  (%p6071_p6), %s5615_s28, 32, %s5617_s24, [#allocation8]  }
 0x9d0   : > { %s5628_s15 = sshll.u32 %s10421_s13, 4  ;;  %s6860_s16 = smov [#allocation9]   ;;  %s5629_s15 = int_to_ptr.hbm [resolvable:$true] %s5628_s15 }
 0x9d1   : > { %s5626_s19 = sshll.u32 %s6860_s16, 4  ;;  %s5627_s19 = int_to_ptr.vmem [resolvable:$true] %s5626_s19 }
 0x9d2   : > { %6066 = dma.vmem_to_hbm [thread:$0]  (%p6071_p6), %s5627_s19, 32, %s5629_s15, [#allocation10]  }
 0x9d3   : > { %6824 = dma.done.wait (%p6071_p6), [#allocation8], 32  }
 0x9d4   : > { %6826 = vsyncadd (%p6071_p6), [#allocation8], 4294967264 }
 0x9d5   : > { %6828 = dma.done.wait (%p6071_p6), [#allocation10], 32  }
 0x9d6   : > { %6830 = vsyncadd (%p6071_p6), [#allocation10], 4294967264 }
 0x9d7 PF: > { %s26_s25 = sadd.s32 1, %s6833_s25  }
 0x9d8   : > { %p23_p7 = scmp.ge.s32.totalorder %s26_s25, 5  }
 0x9da   :  { %25 = sbr.rel (!%p23_p7) target bundleno = 2 (0x2), region = 114 }
 0x9df   :  { %5647 = vsyncpa [#allocation8], 1 }
 0x9e0   :  { %5649 = vsyncpa [#allocation8 + $0x1], 1 }
 0x9e1   :  { %5650 = vsyncpa [#allocation10], 1 }

</bundles_post_ra>
